<compile_context>
chip_gen: v7x
topology: tpu7x:2x2x1
jax: 0.10.0
libtpu: 0.0.40
codegen_flags: <defaults>
</compile_context>

<pallas_src>
import math

import jax
import jax.numpy as jnp
from jax.experimental import pallas as pl
from jax.experimental.pallas import tpu as pltpu

# --------------------------- small synthetic config -------------------------
B = 2                      # batch
C_IN = 3                   # image channels
IMG = 16                   # image height / width
PATCH = 8                  # patch size -> 2x2 = 4 patches
N_PATCH = (IMG // PATCH) ** 2
S_V = N_PATCH + 1          # ViT sequence length (CLS + patches)
CP2 = C_IN * PATCH * PATCH # flattened patch size (192)

D_VIT, H_VIT, L_VIT, MLP_VIT = 64, 4, 2, 128
D_GPT, H_GPT, L_GPT, MLP_GPT = 64, 4, 2, 128
VOCAB = 96
V_PAD = 128                # lane-padded vocab for lane-dense logits / CE
MAX_POS = 32
T_TXT = 7                  # text tokens
S_G = T_TXT + 1            # GPT sequence after prepending the visual token

NEG_INF = -1e9

LAYER_KEYS = ("ln1_g", "ln1_b", "wqkv", "bqkv", "wo", "bo",
              "ln2_g", "ln2_b", "w1", "b1", "w2", "b2")
MATMUL_KEYS = ("wqkv", "wo", "w1", "w2")   # passed as bf16


# ------------------------------ in-kernel helpers ----------------------------
def _mm(a, b):
    """bf16 MXU matmul with f32 accumulation: a @ b."""
    return jnp.dot(a.astype(jnp.bfloat16), b.astype(jnp.bfloat16),
                   preferred_element_type=jnp.float32)


def _mm_nt(a, b):
    """a @ b.T without materializing the transpose (contract last dims)."""
    return jax.lax.dot_general(
        a.astype(jnp.bfloat16), b.astype(jnp.bfloat16),
        dimension_numbers=(((1,), (1,)), ((), ())),
        preferred_element_type=jnp.float32)


def _ln(x, g, b, eps):
    """Row-wise LayerNorm in f32 (v5e-friendly elementwise)."""
    xv = x.astype(jnp.float32)
    mu = jnp.mean(xv, axis=-1, keepdims=True)
    xc = xv - mu
    var = jnp.mean(xc * xc, axis=-1, keepdims=True)
    return xc * jax.lax.rsqrt(var + eps) * g + b


def _attention(h, wqkv, bqkv, wo, bo, n_heads, n_batch, seq, bias_list):
    """MHA over a (n_batch*seq, D) row-batched activation; heads stay in vregs."""
    D = wo.shape[-1]
    Dh = D // n_heads
    scale = 1.0 / math.sqrt(Dh)
    qkv = _mm(h, wqkv) + bqkv                                    # (B*S, 3D) fused
    per_batch = []
    for b in range(n_batch):
        r0 = b * seq
        q = qkv[r0:r0 + seq, 0:D]
        k = qkv[r0:r0 + seq, D:2 * D]
        v = qkv[r0:r0 + seq, 2 * D:3 * D]
        heads = []
        for hh in range(n_heads):                                # static lane slices
            lo = hh * Dh
            s = _mm_nt(q[:, lo:lo + Dh], k[:, lo:lo + Dh]) * scale   # (S, S)
            if bias_list is not None:
                s = s + bias_list[b]
            m = jnp.max(s, axis=-1, keepdims=True)
            p = jnp.exp(s - m)
            p = p * pl.reciprocal(jnp.sum(p, axis=-1, keepdims=True), approx=True)
            heads.append(_mm(p, v[:, lo:lo + Dh]))               # (S, Dh), register-resident
        per_batch.append(jnp.concatenate(heads, axis=-1))        # (S, D) lane concat
    ctx = jnp.concatenate(per_batch, axis=0)                     # (B*S, D)
    return _mm(ctx, wo) + bo


def _block(x, lw, l, n_heads, eps, n_batch, seq, bias_list):
    """Pre-LN transformer block (HF ViT / GPT-2 structure), fully in VMEM."""
    h = _ln(x, lw["ln1_g"][l], lw["ln1_b"][l], eps)
    x = x + _attention(h, lw["wqkv"][l], lw["bqkv"][l], lw["wo"][l], lw["bo"][l],
                       n_heads, n_batch, seq, bias_list)
    h2 = _ln(x, lw["ln2_g"][l], lw["ln2_b"][l], eps)
    # TODO(synk): HF ViT uses exact (erf) GELU; tanh approximation used for both
    # stacks for robust TPU lowering (GPT-2's gelu_new is the tanh form anyway).
    h2 = jax.nn.gelu(_mm(h2, lw["w1"][l]) + lw["b1"][l], approximate=True)
    return x + _mm(h2, lw["w2"][l]) + lw["b2"][l]


# --------------------------------- fused kernel ------------------------------
def _caption_kernel(
        patches_ref, patch_w_ref, rowbias_ref,
        v_ln1_g, v_ln1_b, v_wqkv, v_bqkv, v_wo, v_bo,
        v_ln2_g, v_ln2_b, v_w1, v_b1, v_w2, v_b2,
        v_lnf_g, v_lnf_b, proj_w_ref, proj_b_ref,
        tok_ref, wpe_ref, mask_ref, lab1h_ref,
        g_ln1_g, g_ln1_b, g_wqkv, g_bqkv, g_wo, g_bo,
        g_ln2_g, g_ln2_b, g_w1, g_b1, g_w2, g_b2,
        g_lnf_g, g_lnf_b, wte_ref,
        logits_ref, loss_ref):
    vit_lw = dict(zip(LAYER_KEYS, (v_ln1_g, v_ln1_b, v_wqkv, v_bqkv, v_wo, v_bo,
                                   v_ln2_g, v_ln2_b, v_w1, v_b1, v_w2, v_b2)))
    gpt_lw = dict(zip(LAYER_KEYS, (g_ln1_g, g_ln1_b, g_wqkv, g_bqkv, g_wo, g_bo,
                                   g_ln2_g, g_ln2_b, g_w1, g_b1, g_w2, g_b2)))

    # ------------------ ViT encoder (batch folded into rows) -----------------
    # CLS slot arrives as an all-zero "patch"; rowbias carries (cls / conv bias)
    # + positional embedding per row -> single lane-dense matmul.
    xv = _mm(patches_ref[...], patch_w_ref[...]) + rowbias_ref[...]   # (B*S_V, D_VIT)
    # TODO(synk): at real depth/width stream one layer at a time (layer grid axis
    # with Buffered specs, vocab-tiled LM head) instead of all-weights-resident.
    for l in range(L_VIT):
        xv = _block(xv, vit_lw, l, H_VIT, 1e-12, B, S_V, None)        # no attn bias
    xv = _ln(xv, v_lnf_g[...], v_lnf_b[...], 1e-12)
    cls_rows = jnp.concatenate([xv[b * S_V:b * S_V + 1, :] for b in range(B)],
                               axis=0)                                # (B, D_VIT)
    vis = _mm(cls_rows, proj_w_ref[...]) + proj_b_ref[...]            # (B, D_GPT)

    # --------- GPT-2 input assembly in VMEM (no HBM round trip for vis) ------
    tok = tok_ref[...]                                                # (B*T, D)
    wpe = wpe_ref[...]                                                # (S_G, D)
    rows = []
    for b in range(B):
        xb = jnp.concatenate(
            [vis[b:b + 1, :], tok[b * T_TXT:(b + 1) * T_TXT, :]], axis=0) + wpe
        rows.append(xb)
    xg = jnp.concatenate(rows, axis=0)                                # (B*S_G, D)

    # causal + key-padding additive bias, built once, shared over layers/heads
    row_i = jax.lax.broadcasted_iota(jnp.int32, (S_G, S_G), 0)
    col_i = jax.lax.broadcasted_iota(jnp.int32, (S_G, S_G), 1)
    causal = row_i >= col_i
    bias_list = []
    for b in range(B):
        keep = jnp.logical_and(causal, mask_ref[b] > 0.0)             # (S,S)&(1,S)
        bias_list.append(jnp.where(keep, 0.0, NEG_INF).astype(jnp.float32))

    for l in range(L_GPT):
        xg = _block(xg, gpt_lw, l, H_GPT, 1e-5, B, S_G, bias_list)
    xg = _ln(xg, g_lnf_g[...], g_lnf_b[...], 1e-5)

    # tied LM head against lane-padded wte -> lane-dense (B*S, 128) store
    logits = _mm_nt(xg, wte_ref[...])                                 # (B*S_G, V_PAD)
    logits_ref[...] = logits.astype(logits_ref.dtype)

    # fused shifted cross-entropy; ignore_index/-100 & shift folded into lab1h
    col_v = jax.lax.broadcasted_iota(jnp.int32, logits.shape, 1)
    lse_in = jnp.where(col_v < VOCAB, logits, NEG_INF)                # drop pad vocab
    m = jnp.max(lse_in, axis=-1, keepdims=True)
    lse = jnp.log(jnp.sum(jnp.exp(lse_in - m), axis=-1, keepdims=True)) + m
    lab1h = lab1h_ref[...]                                            # (B*S_G, V_PAD)
    tgt = jnp.sum(logits * lab1h, axis=-1, keepdims=True)             # target logit
    valid = jnp.sum(lab1h, axis=-1, keepdims=True)                    # 1.0 / 0.0
    loss_rows = (lse - tgt) * valid
    loss_sum = jnp.sum(loss_rows)
    n_valid = jnp.sum(valid)
    lane = jax.lax.broadcasted_iota(jnp.int32, (1, 128), 1)
    loss_ref[...] = jnp.where(lane == 0, loss_sum,
                              jnp.where(lane == 1, n_valid, 0.0)
                              ).astype(loss_ref.dtype)


# -------------------------------- pallas wrapper -----------------------------
def _layer_args(layers):
    """Stacked per-layer weights in kernel order; matmul weights as bf16."""
    return [layers[k].astype(jnp.bfloat16) if k in MATMUL_KEYS else layers[k]
            for k in LAYER_KEYS]


def model_forward(params, images, input_ids, attention_mask=None, labels=None):
    Bb = images.shape[0]
    T = input_ids.shape[1]
    S = T + 1
    assert Bb == B and T == T_TXT and S == S_G
    vp, gp = params["vit"], params["gpt"]
    bf16 = lambda a: a.astype(jnp.bfloat16)

    # --- patchify NCHW (XLA glue) ---
    x = images.reshape(Bb, C_IN, IMG // PATCH, PATCH, IMG // PATCH, PATCH)
    patches = x.transpose(0, 2, 4, 1, 3, 5).reshape(Bb, N_PATCH, CP2)
    patches_ext = jnp.concatenate(
        [jnp.zeros((Bb, 1, CP2), patches.dtype), patches], axis=1)     # CLS slot
    patches_flat = patches_ext.reshape(Bb * S_V, CP2)
    rowbias = jnp.concatenate(
        [vp["cls"] + vp["pos"][0:1], vp["patch_b"] + vp["pos"][1:]], axis=0)
    rowbias_t = jnp.tile(rowbias, (Bb, 1))                             # (B*S_V, D_VIT)

    # --- token embeddings (XLA gather) ---
    # TODO(synk): at real vocab/hidden sizes DMA-gather wte rows in-kernel via
    # scalar-prefetch driven copies instead of an XLA gather + HBM activation.
    tok = params["wte"][input_ids].reshape(Bb * T, D_GPT)

    # --- mask / labels ---
    if attention_mask is None:
        mask_full = jnp.ones((Bb, S), jnp.float32)
    else:
        mask_full = jnp.concatenate(
            [jnp.ones((Bb, 1), attention_mask.dtype), attention_mask],
            axis=1).astype(jnp.float32)
    have_labels = labels is not None
    if have_labels:
        labels_full = jnp.concatenate(
            [jnp.full((Bb, 1), -100, jnp.int32), labels.astype(jnp.int32)], axis=1)
    else:
        labels_full = jnp.full((Bb, S), -100, jnp.int32)
    # pre-shift labels (per batch) so the kernel CE is a flat row-wise reduction;
    # out-of-range / -100 labels become an all-zero one-hot row (excluded).
    lab_shift = jnp.concatenate(
        [labels_full[:, 1:], jnp.full((Bb, 1), -100, jnp.int32)], axis=1
    ).reshape(Bb * S)
    valid = jnp.logical_and(lab_shift >= 0, lab_shift < VOCAB)
    lab1h = (jax.nn.one_hot(jnp.where(valid, lab_shift, 0), V_PAD, dtype=jnp.float32)
             * valid[:, None].astype(jnp.float32))                    # (B*S, V_PAD)

    wte_pad = jnp.pad(params["wte"], ((0, V_PAD - VOCAB), (0, 0)))     # lane-pad vocab

    args = (
        patches_flat, bf16(vp["patch_w"]), rowbias_t,
        *_layer_args(vp["layers"]),
        vp["lnf_g"], vp["lnf_b"], bf16(vp["proj_w"]), vp["proj_b"],
        tok, params["wpe"][:S], mask_full.reshape(Bb, 1, S), lab1h,
        *_layer_args(gp["layers"]),
        gp["lnf_g"], gp["lnf_b"], bf16(wte_pad),
    )

    # Single launch, no grid: every operand is a full-array VMEM block
    # (total residency well under the 32 MiB scoped limit at these shapes).
    logits_pad, loss_stats = pl.pallas_call(
        _caption_kernel,
        out_shape=(jax.ShapeDtypeStruct((Bb * S, V_PAD), jnp.float32),
                   jax.ShapeDtypeStruct((1, 128), jnp.float32)),
        compiler_params=pltpu.CompilerParams(vmem_limit_bytes=32 * 1024 * 1024),
    )(*args)

    logits = logits_pad.reshape(Bb, S, V_PAD)[:, :, :VOCAB]
    loss = None
    if have_labels:
        loss = loss_stats[0, 0] / jnp.maximum(loss_stats[0, 1], 1.0)
    return loss, logits


# --------------------------------- parameter init ----------------------------
def init_params(key):
    keys = iter(jax.random.split(key, 64))

    def nrm(shape, scale=0.02):
        return scale * jax.random.normal(next(keys), shape, dtype=jnp.float32)

    def stack(n_layers, d, mlp):
        return {
            "ln1_g": jnp.ones((n_layers, 1, d), jnp.float32),
            "ln1_b": jnp.zeros((n_layers, 1, d), jnp.float32),
            "wqkv": nrm((n_layers, d, 3 * d)),              # fused q|k|v
            "bqkv": jnp.zeros((n_layers, 1, 3 * d), jnp.float32),
            "wo": nrm((n_layers, d, d)),
            "bo": jnp.zeros((n_layers, 1, d), jnp.float32),
            "ln2_g": jnp.ones((n_layers, 1, d), jnp.float32),
            "ln2_b": jnp.zeros((n_layers, 1, d), jnp.float32),
            "w1": nrm((n_layers, d, mlp)),
            "b1": jnp.zeros((n_layers, 1, mlp), jnp.float32),
            "w2": nrm((n_layers, mlp, d)),
            "b2": jnp.zeros((n_layers, 1, d), jnp.float32),
        }

    return {
        "vit": {
            "patch_w": nrm((CP2, D_VIT)),
            "patch_b": jnp.zeros((1, D_VIT), jnp.float32),
            "cls": nrm((1, D_VIT)),
            "pos": nrm((S_V, D_VIT)),
            "layers": stack(L_VIT, D_VIT, MLP_VIT),
            "lnf_g": jnp.ones((1, D_VIT), jnp.float32),
            "lnf_b": jnp.zeros((1, D_VIT), jnp.float32),
            "proj_w": nrm((D_VIT, D_GPT)),
            "proj_b": jnp.zeros((1, D_GPT), jnp.float32),
        },
        "gpt": {
            "layers": stack(L_GPT, D_GPT, MLP_GPT),
            "lnf_g": jnp.ones((1, D_GPT), jnp.float32),
            "lnf_b": jnp.zeros((1, D_GPT), jnp.float32),
        },
        "wte": nrm((VOCAB, D_GPT)),
        "wpe": nrm((MAX_POS, D_GPT)),
    }


# -------------------------------------- main ----------------------------------
if __name__ == "__main__":
    key = jax.random.PRNGKey(0)
    pk, ik, tk = jax.random.split(key, 3)
    params = init_params(pk)

    images = jax.random.normal(ik, (B, C_IN, IMG, IMG), dtype=jnp.float32)  # NCHW
    input_ids = jax.random.randint(tk, (B, T_TXT), 0, VOCAB, dtype=jnp.int32)
    attention_mask = jnp.ones((B, T_TXT), jnp.float32).at[1, -2:].set(0.0)  # padding
    labels = jnp.where(attention_mask > 0, input_ids, -100).astype(jnp.int32)

    fwd = jax.jit(model_forward)
    loss, logits = fwd(params, images, input_ids, attention_mask, labels)
    jax.block_until_ready((loss, logits))
    assert logits.shape == (B, S_G, VOCAB)
    assert jnp.isfinite(loss)
    print("KERNEL_OK")
</pallas_src>

<mosaic_0001>
module attributes {stable_mosaic.version = 11 : i64} {
  func.func @_caption_kernel(%arg0: memref<10x192xf32, #tpu.memory_space<vmem>>, %arg1: memref<192x64xbf16, #tpu.memory_space<vmem>>, %arg2: memref<10x64xf32, #tpu.memory_space<vmem>>, %arg3: memref<2x1x64xf32, #tpu.memory_space<vmem>>, %arg4: memref<2x1x64xf32, #tpu.memory_space<vmem>>, %arg5: memref<2x64x192xbf16, #tpu.memory_space<vmem>>, %arg6: memref<2x1x192xf32, #tpu.memory_space<vmem>>, %arg7: memref<2x64x64xbf16, #tpu.memory_space<vmem>>, %arg8: memref<2x1x64xf32, #tpu.memory_space<vmem>>, %arg9: memref<2x1x64xf32, #tpu.memory_space<vmem>>, %arg10: memref<2x1x64xf32, #tpu.memory_space<vmem>>, %arg11: memref<2x64x128xbf16, #tpu.memory_space<vmem>>, %arg12: memref<2x1x128xf32, #tpu.memory_space<vmem>>, %arg13: memref<2x128x64xbf16, #tpu.memory_space<vmem>>, %arg14: memref<2x1x64xf32, #tpu.memory_space<vmem>>, %arg15: memref<1x64xf32, #tpu.memory_space<vmem>>, %arg16: memref<1x64xf32, #tpu.memory_space<vmem>>, %arg17: memref<64x64xbf16, #tpu.memory_space<vmem>>, %arg18: memref<1x64xf32, #tpu.memory_space<vmem>>, %arg19: memref<14x64xf32, #tpu.memory_space<vmem>>, %arg20: memref<8x64xf32, #tpu.memory_space<vmem>>, %arg21: memref<2x1x8xf32, #tpu.memory_space<vmem>>, %arg22: memref<16x128xf32, #tpu.memory_space<vmem>>, %arg23: memref<2x1x64xf32, #tpu.memory_space<vmem>>, %arg24: memref<2x1x64xf32, #tpu.memory_space<vmem>>, %arg25: memref<2x64x192xbf16, #tpu.memory_space<vmem>>, %arg26: memref<2x1x192xf32, #tpu.memory_space<vmem>>, %arg27: memref<2x64x64xbf16, #tpu.memory_space<vmem>>, %arg28: memref<2x1x64xf32, #tpu.memory_space<vmem>>, %arg29: memref<2x1x64xf32, #tpu.memory_space<vmem>>, %arg30: memref<2x1x64xf32, #tpu.memory_space<vmem>>, %arg31: memref<2x64x128xbf16, #tpu.memory_space<vmem>>, %arg32: memref<2x1x128xf32, #tpu.memory_space<vmem>>, %arg33: memref<2x128x64xbf16, #tpu.memory_space<vmem>>, %arg34: memref<2x1x64xf32, #tpu.memory_space<vmem>>, %arg35: memref<1x64xf32, #tpu.memory_space<vmem>>, %arg36: memref<1x64xf32, #tpu.memory_space<vmem>>, %arg37: memref<128x64xbf16, #tpu.memory_space<vmem>>, %arg38: memref<16x128xf32, #tpu.memory_space<vmem>>, %arg39: memref<1x128xf32, #tpu.memory_space<vmem>>) attributes {dimension_semantics = [], scalar_prefetch = 0 : i64, scratch_operands = 0 : i64, tpu.core_type = #tpu.core_type<tc>} {
    %c0 = arith.constant 0 : index
    %c0_0 = arith.constant 0 : index
    %0 = vector.load %arg0[%c0, %c0_0] : memref<10x192xf32, #tpu.memory_space<vmem>>, vector<10x192xf32>
    %c0_1 = arith.constant 0 : index
    %c0_2 = arith.constant 0 : index
    %1 = vector.load %arg1[%c0_1, %c0_2] : memref<192x64xbf16, #tpu.memory_space<vmem>>, vector<192x64xbf16>
    %2 = arith.truncf %0 : vector<10x192xf32> to vector<10x192xbf16>
    %cst = arith.constant dense<0.000000e+00> : vector<10x64xf32>
    %3 = tpu.matmul %2, %1, %cst {dimension_numbers = #tpu.dot_dimension_numbers<[1], [0], [0], [1], [0, 0, 1, 1], [], []>} : vector<10x192xbf16>, vector<192x64xbf16>, vector<10x64xf32> -> vector<10x64xf32>
    %c0_3 = arith.constant 0 : index
    %c0_4 = arith.constant 0 : index
    %4 = vector.load %arg2[%c0_3, %c0_4] : memref<10x64xf32, #tpu.memory_space<vmem>>, vector<10x64xf32>
    %5 = arith.addf %3, %4 : vector<10x64xf32>
    %c0_5 = arith.constant 0 : index
    %c0_6 = arith.constant 0 : index
    %c0_7 = arith.constant 0 : index
    %6 = vector.load %arg3[%c0_5, %c0_6, %c0_7] : memref<2x1x64xf32, #tpu.memory_space<vmem>>, vector<1x1x64xf32>
    %7 = vector.shape_cast %6 : vector<1x1x64xf32> to vector<1x64xf32>
    %c0_8 = arith.constant 0 : index
    %c0_9 = arith.constant 0 : index
    %c0_10 = arith.constant 0 : index
    %8 = vector.load %arg4[%c0_8, %c0_9, %c0_10] : memref<2x1x64xf32, #tpu.memory_space<vmem>>, vector<1x1x64xf32>
    %9 = vector.shape_cast %8 : vector<1x1x64xf32> to vector<1x64xf32>
    %cst_11 = arith.constant dense<0.000000e+00> : vector<10xf32>
    %10 = vector.multi_reduction <add>, %5, %cst_11 [1] : vector<10x64xf32> to vector<10xf32>
    %11 = vector.shape_cast %10 : vector<10xf32> to vector<10x1xf32>
    %cst_12 = arith.constant 6.400000e+01 : f32
    %12 = vector.broadcast %cst_12 : f32 to vector<10x1xf32>
    %13 = arith.divf %11, %12 : vector<10x1xf32>
    %14 = vector.broadcast %13 : vector<10x1xf32> to vector<10x64xf32>
    %15 = arith.subf %5, %14 : vector<10x64xf32>
    %16 = arith.mulf %15, %15 : vector<10x64xf32>
    %cst_13 = arith.constant dense<0.000000e+00> : vector<10xf32>
    %17 = vector.multi_reduction <add>, %16, %cst_13 [1] : vector<10x64xf32> to vector<10xf32>
    %18 = vector.shape_cast %17 : vector<10xf32> to vector<10x1xf32>
    %cst_14 = arith.constant 6.400000e+01 : f32
    %19 = vector.broadcast %cst_14 : f32 to vector<10x1xf32>
    %20 = arith.divf %18, %19 : vector<10x1xf32>
    %cst_15 = arith.constant 9.99999996E-13 : f32
    %21 = vector.broadcast %cst_15 : f32 to vector<10x1xf32>
    %22 = arith.addf %20, %21 : vector<10x1xf32>
    %23 = math.rsqrt %22 : vector<10x1xf32>
    %24 = vector.broadcast %23 : vector<10x1xf32> to vector<10x64xf32>
    %25 = arith.mulf %15, %24 : vector<10x64xf32>
    %26 = vector.broadcast %7 : vector<1x64xf32> to vector<10x64xf32>
    %27 = arith.mulf %25, %26 : vector<10x64xf32>
    %28 = vector.broadcast %9 : vector<1x64xf32> to vector<10x64xf32>
    %29 = arith.addf %27, %28 : vector<10x64xf32>
    %c0_16 = arith.constant 0 : index
    %c0_17 = arith.constant 0 : index
    %c0_18 = arith.constant 0 : index
    %30 = vector.load %arg5[%c0_16, %c0_17, %c0_18] : memref<2x64x192xbf16, #tpu.memory_space<vmem>>, vector<1x64x192xbf16>
    %31 = vector.shape_cast %30 : vector<1x64x192xbf16> to vector<64x192xbf16>
    %c0_19 = arith.constant 0 : index
    %c0_20 = arith.constant 0 : index
    %c0_21 = arith.constant 0 : index
    %32 = vector.load %arg6[%c0_19, %c0_20, %c0_21] : memref<2x1x192xf32, #tpu.memory_space<vmem>>, vector<1x1x192xf32>
    %33 = vector.shape_cast %32 : vector<1x1x192xf32> to vector<1x192xf32>
    %c0_22 = arith.constant 0 : index
    %c0_23 = arith.constant 0 : index
    %c0_24 = arith.constant 0 : index
    %34 = vector.load %arg7[%c0_22, %c0_23, %c0_24] : memref<2x64x64xbf16, #tpu.memory_space<vmem>>, vector<1x64x64xbf16>
    %35 = vector.shape_cast %34 : vector<1x64x64xbf16> to vector<64x64xbf16>
    %c0_25 = arith.constant 0 : index
    %c0_26 = arith.constant 0 : index
    %c0_27 = arith.constant 0 : index
    %36 = vector.load %arg8[%c0_25, %c0_26, %c0_27] : memref<2x1x64xf32, #tpu.memory_space<vmem>>, vector<1x1x64xf32>
    %37 = vector.shape_cast %36 : vector<1x1x64xf32> to vector<1x64xf32>
    %38 = arith.truncf %29 : vector<10x64xf32> to vector<10x64xbf16>
    %cst_28 = arith.constant dense<0.000000e+00> : vector<10x192xf32>
    %39 = tpu.matmul %38, %31, %cst_28 {dimension_numbers = #tpu.dot_dimension_numbers<[1], [0], [0], [1], [0, 0, 1, 1], [], []>} : vector<10x64xbf16>, vector<64x192xbf16>, vector<10x192xf32> -> vector<10x192xf32>
    %40 = vector.broadcast %33 : vector<1x192xf32> to vector<10x192xf32>
    %41 = arith.addf %39, %40 : vector<10x192xf32>
    %42 = vector.extract_strided_slice %41 {offsets = [0, 0], sizes = [5, 64], strides = [1, 1]} : vector<10x192xf32> to vector<5x64xf32>
    %43 = vector.extract_strided_slice %41 {offsets = [0, 64], sizes = [5, 64], strides = [1, 1]} : vector<10x192xf32> to vector<5x64xf32>
    %44 = vector.extract_strided_slice %41 {offsets = [0, 128], sizes = [5, 64], strides = [1, 1]} : vector<10x192xf32> to vector<5x64xf32>
    %45 = vector.extract_strided_slice %42 {offsets = [0, 0], sizes = [5, 16], strides = [1, 1]} : vector<5x64xf32> to vector<5x16xf32>
    %46 = vector.extract_strided_slice %43 {offsets = [0, 0], sizes = [5, 16], strides = [1, 1]} : vector<5x64xf32> to vector<5x16xf32>
    %47 = arith.truncf %45 : vector<5x16xf32> to vector<5x16xbf16>
    %48 = arith.truncf %46 : vector<5x16xf32> to vector<5x16xbf16>
    %cst_29 = arith.constant dense<0.000000e+00> : vector<5x5xf32>
    %49 = tpu.matmul %47, %48, %cst_29 {dimension_numbers = #tpu.dot_dimension_numbers<[1], [1], [0], [0], [0, 0, 1, 0], [], []>} : vector<5x16xbf16>, vector<5x16xbf16>, vector<5x5xf32> -> vector<5x5xf32>
    %cst_30 = arith.constant 2.500000e-01 : f32
    %50 = vector.broadcast %cst_30 : f32 to vector<5x5xf32>
    %51 = arith.mulf %49, %50 : vector<5x5xf32>
    %cst_31 = arith.constant dense<0xFF800000> : vector<5xf32>
    %52 = vector.multi_reduction <maximumf>, %51, %cst_31 [1] : vector<5x5xf32> to vector<5xf32>
    %53 = vector.shape_cast %52 : vector<5xf32> to vector<5x1xf32>
    %54 = vector.broadcast %53 : vector<5x1xf32> to vector<5x5xf32>
    %55 = arith.subf %51, %54 : vector<5x5xf32>
    %56 = math.exp %55 : vector<5x5xf32>
    %cst_32 = arith.constant dense<0.000000e+00> : vector<5xf32>
    %57 = vector.multi_reduction <add>, %56, %cst_32 [1] : vector<5x5xf32> to vector<5xf32>
    %58 = vector.shape_cast %57 : vector<5xf32> to vector<5x1xf32>
    %59 = tpu.reciprocal %58 {approx = true} : vector<5x1xf32> -> vector<5x1xf32>
    %60 = vector.broadcast %59 : vector<5x1xf32> to vector<5x5xf32>
    %61 = arith.mulf %56, %60 : vector<5x5xf32>
    %62 = vector.extract_strided_slice %44 {offsets = [0, 0], sizes = [5, 16], strides = [1, 1]} : vector<5x64xf32> to vector<5x16xf32>
    %63 = arith.truncf %61 : vector<5x5xf32> to vector<5x5xbf16>
    %64 = arith.truncf %62 : vector<5x16xf32> to vector<5x16xbf16>
    %cst_33 = arith.constant dense<0.000000e+00> : vector<5x16xf32>
    %65 = tpu.matmul %63, %64, %cst_33 {dimension_numbers = #tpu.dot_dimension_numbers<[1], [0], [0], [1], [0, 0, 1, 1], [], []>} : vector<5x5xbf16>, vector<5x16xbf16>, vector<5x16xf32> -> vector<5x16xf32>
    %66 = vector.extract_strided_slice %42 {offsets = [0, 16], sizes = [5, 16], strides = [1, 1]} : vector<5x64xf32> to vector<5x16xf32>
    %67 = vector.extract_strided_slice %43 {offsets = [0, 16], sizes = [5, 16], strides = [1, 1]} : vector<5x64xf32> to vector<5x16xf32>
    %68 = arith.truncf %66 : vector<5x16xf32> to vector<5x16xbf16>
    %69 = arith.truncf %67 : vector<5x16xf32> to vector<5x16xbf16>
    %cst_34 = arith.constant dense<0.000000e+00> : vector<5x5xf32>
    %70 = tpu.matmul %68, %69, %cst_34 {dimension_numbers = #tpu.dot_dimension_numbers<[1], [1], [0], [0], [0, 0, 1, 0], [], []>} : vector<5x16xbf16>, vector<5x16xbf16>, vector<5x5xf32> -> vector<5x5xf32>
    %cst_35 = arith.constant 2.500000e-01 : f32
    %71 = vector.broadcast %cst_35 : f32 to vector<5x5xf32>
    %72 = arith.mulf %70, %71 : vector<5x5xf32>
    %cst_36 = arith.constant dense<0xFF800000> : vector<5xf32>
    %73 = vector.multi_reduction <maximumf>, %72, %cst_36 [1] : vector<5x5xf32> to vector<5xf32>
    %74 = vector.shape_cast %73 : vector<5xf32> to vector<5x1xf32>
    %75 = vector.broadcast %74 : vector<5x1xf32> to vector<5x5xf32>
    %76 = arith.subf %72, %75 : vector<5x5xf32>
    %77 = math.exp %76 : vector<5x5xf32>
    %cst_37 = arith.constant dense<0.000000e+00> : vector<5xf32>
    %78 = vector.multi_reduction <add>, %77, %cst_37 [1] : vector<5x5xf32> to vector<5xf32>
    %79 = vector.shape_cast %78 : vector<5xf32> to vector<5x1xf32>
    %80 = tpu.reciprocal %79 {approx = true} : vector<5x1xf32> -> vector<5x1xf32>
    %81 = vector.broadcast %80 : vector<5x1xf32> to vector<5x5xf32>
    %82 = arith.mulf %77, %81 : vector<5x5xf32>
    %83 = vector.extract_strided_slice %44 {offsets = [0, 16], sizes = [5, 16], strides = [1, 1]} : vector<5x64xf32> to vector<5x16xf32>
    %84 = arith.truncf %82 : vector<5x5xf32> to vector<5x5xbf16>
    %85 = arith.truncf %83 : vector<5x16xf32> to vector<5x16xbf16>
    %cst_38 = arith.constant dense<0.000000e+00> : vector<5x16xf32>
    %86 = tpu.matmul %84, %85, %cst_38 {dimension_numbers = #tpu.dot_dimension_numbers<[1], [0], [0], [1], [0, 0, 1, 1], [], []>} : vector<5x5xbf16>, vector<5x16xbf16>, vector<5x16xf32> -> vector<5x16xf32>
    %87 = vector.extract_strided_slice %42 {offsets = [0, 32], sizes = [5, 16], strides = [1, 1]} : vector<5x64xf32> to vector<5x16xf32>
    %88 = vector.extract_strided_slice %43 {offsets = [0, 32], sizes = [5, 16], strides = [1, 1]} : vector<5x64xf32> to vector<5x16xf32>
    %89 = arith.truncf %87 : vector<5x16xf32> to vector<5x16xbf16>
    %90 = arith.truncf %88 : vector<5x16xf32> to vector<5x16xbf16>
    %cst_39 = arith.constant dense<0.000000e+00> : vector<5x5xf32>
    %91 = tpu.matmul %89, %90, %cst_39 {dimension_numbers = #tpu.dot_dimension_numbers<[1], [1], [0], [0], [0, 0, 1, 0], [], []>} : vector<5x16xbf16>, vector<5x16xbf16>, vector<5x5xf32> -> vector<5x5xf32>
    %cst_40 = arith.constant 2.500000e-01 : f32
    %92 = vector.broadcast %cst_40 : f32 to vector<5x5xf32>
    %93 = arith.mulf %91, %92 : vector<5x5xf32>
    %cst_41 = arith.constant dense<0xFF800000> : vector<5xf32>
    %94 = vector.multi_reduction <maximumf>, %93, %cst_41 [1] : vector<5x5xf32> to vector<5xf32>
    %95 = vector.shape_cast %94 : vector<5xf32> to vector<5x1xf32>
    %96 = vector.broadcast %95 : vector<5x1xf32> to vector<5x5xf32>
    %97 = arith.subf %93, %96 : vector<5x5xf32>
    %98 = math.exp %97 : vector<5x5xf32>
    %cst_42 = arith.constant dense<0.000000e+00> : vector<5xf32>
    %99 = vector.multi_reduction <add>, %98, %cst_42 [1] : vector<5x5xf32> to vector<5xf32>
    %100 = vector.shape_cast %99 : vector<5xf32> to vector<5x1xf32>
    %101 = tpu.reciprocal %100 {approx = true} : vector<5x1xf32> -> vector<5x1xf32>
    %102 = vector.broadcast %101 : vector<5x1xf32> to vector<5x5xf32>
    %103 = arith.mulf %98, %102 : vector<5x5xf32>
    %104 = vector.extract_strided_slice %44 {offsets = [0, 32], sizes = [5, 16], strides = [1, 1]} : vector<5x64xf32> to vector<5x16xf32>
    %105 = arith.truncf %103 : vector<5x5xf32> to vector<5x5xbf16>
    %106 = arith.truncf %104 : vector<5x16xf32> to vector<5x16xbf16>
    %cst_43 = arith.constant dense<0.000000e+00> : vector<5x16xf32>
    %107 = tpu.matmul %105, %106, %cst_43 {dimension_numbers = #tpu.dot_dimension_numbers<[1], [0], [0], [1], [0, 0, 1, 1], [], []>} : vector<5x5xbf16>, vector<5x16xbf16>, vector<5x16xf32> -> vector<5x16xf32>
    %108 = vector.extract_strided_slice %42 {offsets = [0, 48], sizes = [5, 16], strides = [1, 1]} : vector<5x64xf32> to vector<5x16xf32>
    %109 = vector.extract_strided_slice %43 {offsets = [0, 48], sizes = [5, 16], strides = [1, 1]} : vector<5x64xf32> to vector<5x16xf32>
    %110 = arith.truncf %108 : vector<5x16xf32> to vector<5x16xbf16>
    %111 = arith.truncf %109 : vector<5x16xf32> to vector<5x16xbf16>
    %cst_44 = arith.constant dense<0.000000e+00> : vector<5x5xf32>
    %112 = tpu.matmul %110, %111, %cst_44 {dimension_numbers = #tpu.dot_dimension_numbers<[1], [1], [0], [0], [0, 0, 1, 0], [], []>} : vector<5x16xbf16>, vector<5x16xbf16>, vector<5x5xf32> -> vector<5x5xf32>
    %cst_45 = arith.constant 2.500000e-01 : f32
    %113 = vector.broadcast %cst_45 : f32 to vector<5x5xf32>
    %114 = arith.mulf %112, %113 : vector<5x5xf32>
    %cst_46 = arith.constant dense<0xFF800000> : vector<5xf32>
    %115 = vector.multi_reduction <maximumf>, %114, %cst_46 [1] : vector<5x5xf32> to vector<5xf32>
    %116 = vector.shape_cast %115 : vector<5xf32> to vector<5x1xf32>
    %117 = vector.broadcast %116 : vector<5x1xf32> to vector<5x5xf32>
    %118 = arith.subf %114, %117 : vector<5x5xf32>
    %119 = math.exp %118 : vector<5x5xf32>
    %cst_47 = arith.constant dense<0.000000e+00> : vector<5xf32>
    %120 = vector.multi_reduction <add>, %119, %cst_47 [1] : vector<5x5xf32> to vector<5xf32>
    %121 = vector.shape_cast %120 : vector<5xf32> to vector<5x1xf32>
    %122 = tpu.reciprocal %121 {approx = true} : vector<5x1xf32> -> vector<5x1xf32>
    %123 = vector.broadcast %122 : vector<5x1xf32> to vector<5x5xf32>
    %124 = arith.mulf %119, %123 : vector<5x5xf32>
    %125 = vector.extract_strided_slice %44 {offsets = [0, 48], sizes = [5, 16], strides = [1, 1]} : vector<5x64xf32> to vector<5x16xf32>
    %126 = arith.truncf %124 : vector<5x5xf32> to vector<5x5xbf16>
    %127 = arith.truncf %125 : vector<5x16xf32> to vector<5x16xbf16>
    %cst_48 = arith.constant dense<0.000000e+00> : vector<5x16xf32>
    %128 = tpu.matmul %126, %127, %cst_48 {dimension_numbers = #tpu.dot_dimension_numbers<[1], [0], [0], [1], [0, 0, 1, 1], [], []>} : vector<5x5xbf16>, vector<5x16xbf16>, vector<5x16xf32> -> vector<5x16xf32>
    %129 = tpu.concatenate %65, %86, %107, %128 in 1 : vector<5x16xf32>, vector<5x16xf32>, vector<5x16xf32>, vector<5x16xf32> -> vector<5x64xf32>
    %130 = vector.extract_strided_slice %41 {offsets = [5, 0], sizes = [5, 64], strides = [1, 1]} : vector<10x192xf32> to vector<5x64xf32>
    %131 = vector.extract_strided_slice %41 {offsets = [5, 64], sizes = [5, 64], strides = [1, 1]} : vector<10x192xf32> to vector<5x64xf32>
    %132 = vector.extract_strided_slice %41 {offsets = [5, 128], sizes = [5, 64], strides = [1, 1]} : vector<10x192xf32> to vector<5x64xf32>
    %133 = vector.extract_strided_slice %130 {offsets = [0, 0], sizes = [5, 16], strides = [1, 1]} : vector<5x64xf32> to vector<5x16xf32>
    %134 = vector.extract_strided_slice %131 {offsets = [0, 0], sizes = [5, 16], strides = [1, 1]} : vector<5x64xf32> to vector<5x16xf32>
    %135 = arith.truncf %133 : vector<5x16xf32> to vector<5x16xbf16>
    %136 = arith.truncf %134 : vector<5x16xf32> to vector<5x16xbf16>
    %cst_49 = arith.constant dense<0.000000e+00> : vector<5x5xf32>
    %137 = tpu.matmul %135, %136, %cst_49 {dimension_numbers = #tpu.dot_dimension_numbers<[1], [1], [0], [0], [0, 0, 1, 0], [], []>} : vector<5x16xbf16>, vector<5x16xbf16>, vector<5x5xf32> -> vector<5x5xf32>
    %cst_50 = arith.constant 2.500000e-01 : f32
    %138 = vector.broadcast %cst_50 : f32 to vector<5x5xf32>
    %139 = arith.mulf %137, %138 : vector<5x5xf32>
    %cst_51 = arith.constant dense<0xFF800000> : vector<5xf32>
    %140 = vector.multi_reduction <maximumf>, %139, %cst_51 [1] : vector<5x5xf32> to vector<5xf32>
    %141 = vector.shape_cast %140 : vector<5xf32> to vector<5x1xf32>
    %142 = vector.broadcast %141 : vector<5x1xf32> to vector<5x5xf32>
    %143 = arith.subf %139, %142 : vector<5x5xf32>
    %144 = math.exp %143 : vector<5x5xf32>
    %cst_52 = arith.constant dense<0.000000e+00> : vector<5xf32>
    %145 = vector.multi_reduction <add>, %144, %cst_52 [1] : vector<5x5xf32> to vector<5xf32>
    %146 = vector.shape_cast %145 : vector<5xf32> to vector<5x1xf32>
    %147 = tpu.reciprocal %146 {approx = true} : vector<5x1xf32> -> vector<5x1xf32>
    %148 = vector.broadcast %147 : vector<5x1xf32> to vector<5x5xf32>
    %149 = arith.mulf %144, %148 : vector<5x5xf32>
    %150 = vector.extract_strided_slice %132 {offsets = [0, 0], sizes = [5, 16], strides = [1, 1]} : vector<5x64xf32> to vector<5x16xf32>
    %151 = arith.truncf %149 : vector<5x5xf32> to vector<5x5xbf16>
    %152 = arith.truncf %150 : vector<5x16xf32> to vector<5x16xbf16>
    %cst_53 = arith.constant dense<0.000000e+00> : vector<5x16xf32>
    %153 = tpu.matmul %151, %152, %cst_53 {dimension_numbers = #tpu.dot_dimension_numbers<[1], [0], [0], [1], [0, 0, 1, 1], [], []>} : vector<5x5xbf16>, vector<5x16xbf16>, vector<5x16xf32> -> vector<5x16xf32>
    %154 = vector.extract_strided_slice %130 {offsets = [0, 16], sizes = [5, 16], strides = [1, 1]} : vector<5x64xf32> to vector<5x16xf32>
    %155 = vector.extract_strided_slice %131 {offsets = [0, 16], sizes = [5, 16], strides = [1, 1]} : vector<5x64xf32> to vector<5x16xf32>
    %156 = arith.truncf %154 : vector<5x16xf32> to vector<5x16xbf16>
    %157 = arith.truncf %155 : vector<5x16xf32> to vector<5x16xbf16>
    %cst_54 = arith.constant dense<0.000000e+00> : vector<5x5xf32>
    %158 = tpu.matmul %156, %157, %cst_54 {dimension_numbers = #tpu.dot_dimension_numbers<[1], [1], [0], [0], [0, 0, 1, 0], [], []>} : vector<5x16xbf16>, vector<5x16xbf16>, vector<5x5xf32> -> vector<5x5xf32>
    %cst_55 = arith.constant 2.500000e-01 : f32
    %159 = vector.broadcast %cst_55 : f32 to vector<5x5xf32>
    %160 = arith.mulf %158, %159 : vector<5x5xf32>
    %cst_56 = arith.constant dense<0xFF800000> : vector<5xf32>
    %161 = vector.multi_reduction <maximumf>, %160, %cst_56 [1] : vector<5x5xf32> to vector<5xf32>
    %162 = vector.shape_cast %161 : vector<5xf32> to vector<5x1xf32>
    %163 = vector.broadcast %162 : vector<5x1xf32> to vector<5x5xf32>
    %164 = arith.subf %160, %163 : vector<5x5xf32>
    %165 = math.exp %164 : vector<5x5xf32>
    %cst_57 = arith.constant dense<0.000000e+00> : vector<5xf32>
    %166 = vector.multi_reduction <add>, %165, %cst_57 [1] : vector<5x5xf32> to vector<5xf32>
    %167 = vector.shape_cast %166 : vector<5xf32> to vector<5x1xf32>
    %168 = tpu.reciprocal %167 {approx = true} : vector<5x1xf32> -> vector<5x1xf32>
    %169 = vector.broadcast %168 : vector<5x1xf32> to vector<5x5xf32>
    %170 = arith.mulf %165, %169 : vector<5x5xf32>
    %171 = vector.extract_strided_slice %132 {offsets = [0, 16], sizes = [5, 16], strides = [1, 1]} : vector<5x64xf32> to vector<5x16xf32>
    %172 = arith.truncf %170 : vector<5x5xf32> to vector<5x5xbf16>
    %173 = arith.truncf %171 : vector<5x16xf32> to vector<5x16xbf16>
    %cst_58 = arith.constant dense<0.000000e+00> : vector<5x16xf32>
    %174 = tpu.matmul %172, %173, %cst_58 {dimension_numbers = #tpu.dot_dimension_numbers<[1], [0], [0], [1], [0, 0, 1, 1], [], []>} : vector<5x5xbf16>, vector<5x16xbf16>, vector<5x16xf32> -> vector<5x16xf32>
    %175 = vector.extract_strided_slice %130 {offsets = [0, 32], sizes = [5, 16], strides = [1, 1]} : vector<5x64xf32> to vector<5x16xf32>
    %176 = vector.extract_strided_slice %131 {offsets = [0, 32], sizes = [5, 16], strides = [1, 1]} : vector<5x64xf32> to vector<5x16xf32>
    %177 = arith.truncf %175 : vector<5x16xf32> to vector<5x16xbf16>
    %178 = arith.truncf %176 : vector<5x16xf32> to vector<5x16xbf16>
    %cst_59 = arith.constant dense<0.000000e+00> : vector<5x5xf32>
    %179 = tpu.matmul %177, %178, %cst_59 {dimension_numbers = #tpu.dot_dimension_numbers<[1], [1], [0], [0], [0, 0, 1, 0], [], []>} : vector<5x16xbf16>, vector<5x16xbf16>, vector<5x5xf32> -> vector<5x5xf32>
    %cst_60 = arith.constant 2.500000e-01 : f32
    %180 = vector.broadcast %cst_60 : f32 to vector<5x5xf32>
    %181 = arith.mulf %179, %180 : vector<5x5xf32>
    %cst_61 = arith.constant dense<0xFF800000> : vector<5xf32>
    %182 = vector.multi_reduction <maximumf>, %181, %cst_61 [1] : vector<5x5xf32> to vector<5xf32>
    %183 = vector.shape_cast %182 : vector<5xf32> to vector<5x1xf32>
    %184 = vector.broadcast %183 : vector<5x1xf32> to vector<5x5xf32>
    %185 = arith.subf %181, %184 : vector<5x5xf32>
    %186 = math.exp %185 : vector<5x5xf32>
    %cst_62 = arith.constant dense<0.000000e+00> : vector<5xf32>
    %187 = vector.multi_reduction <add>, %186, %cst_62 [1] : vector<5x5xf32> to vector<5xf32>
    %188 = vector.shape_cast %187 : vector<5xf32> to vector<5x1xf32>
    %189 = tpu.reciprocal %188 {approx = true} : vector<5x1xf32> -> vector<5x1xf32>
    %190 = vector.broadcast %189 : vector<5x1xf32> to vector<5x5xf32>
    %191 = arith.mulf %186, %190 : vector<5x5xf32>
    %192 = vector.extract_strided_slice %132 {offsets = [0, 32], sizes = [5, 16], strides = [1, 1]} : vector<5x64xf32> to vector<5x16xf32>
    %193 = arith.truncf %191 : vector<5x5xf32> to vector<5x5xbf16>
    %194 = arith.truncf %192 : vector<5x16xf32> to vector<5x16xbf16>
    %cst_63 = arith.constant dense<0.000000e+00> : vector<5x16xf32>
    %195 = tpu.matmul %193, %194, %cst_63 {dimension_numbers = #tpu.dot_dimension_numbers<[1], [0], [0], [1], [0, 0, 1, 1], [], []>} : vector<5x5xbf16>, vector<5x16xbf16>, vector<5x16xf32> -> vector<5x16xf32>
    %196 = vector.extract_strided_slice %130 {offsets = [0, 48], sizes = [5, 16], strides = [1, 1]} : vector<5x64xf32> to vector<5x16xf32>
    %197 = vector.extract_strided_slice %131 {offsets = [0, 48], sizes = [5, 16], strides = [1, 1]} : vector<5x64xf32> to vector<5x16xf32>
    %198 = arith.truncf %196 : vector<5x16xf32> to vector<5x16xbf16>
    %199 = arith.truncf %197 : vector<5x16xf32> to vector<5x16xbf16>
    %cst_64 = arith.constant dense<0.000000e+00> : vector<5x5xf32>
    %200 = tpu.matmul %198, %199, %cst_64 {dimension_numbers = #tpu.dot_dimension_numbers<[1], [1], [0], [0], [0, 0, 1, 0], [], []>} : vector<5x16xbf16>, vector<5x16xbf16>, vector<5x5xf32> -> vector<5x5xf32>
    %cst_65 = arith.constant 2.500000e-01 : f32
    %201 = vector.broadcast %cst_65 : f32 to vector<5x5xf32>
    %202 = arith.mulf %200, %201 : vector<5x5xf32>
    %cst_66 = arith.constant dense<0xFF800000> : vector<5xf32>
    %203 = vector.multi_reduction <maximumf>, %202, %cst_66 [1] : vector<5x5xf32> to vector<5xf32>
    %204 = vector.shape_cast %203 : vector<5xf32> to vector<5x1xf32>
    %205 = vector.broadcast %204 : vector<5x1xf32> to vector<5x5xf32>
    %206 = arith.subf %202, %205 : vector<5x5xf32>
    %207 = math.exp %206 : vector<5x5xf32>
    %cst_67 = arith.constant dense<0.000000e+00> : vector<5xf32>
    %208 = vector.multi_reduction <add>, %207, %cst_67 [1] : vector<5x5xf32> to vector<5xf32>
    %209 = vector.shape_cast %208 : vector<5xf32> to vector<5x1xf32>
    %210 = tpu.reciprocal %209 {approx = true} : vector<5x1xf32> -> vector<5x1xf32>
    %211 = vector.broadcast %210 : vector<5x1xf32> to vector<5x5xf32>
    %212 = arith.mulf %207, %211 : vector<5x5xf32>
    %213 = vector.extract_strided_slice %132 {offsets = [0, 48], sizes = [5, 16], strides = [1, 1]} : vector<5x64xf32> to vector<5x16xf32>
    %214 = arith.truncf %212 : vector<5x5xf32> to vector<5x5xbf16>
    %215 = arith.truncf %213 : vector<5x16xf32> to vector<5x16xbf16>
    %cst_68 = arith.constant dense<0.000000e+00> : vector<5x16xf32>
    %216 = tpu.matmul %214, %215, %cst_68 {dimension_numbers = #tpu.dot_dimension_numbers<[1], [0], [0], [1], [0, 0, 1, 1], [], []>} : vector<5x5xbf16>, vector<5x16xbf16>, vector<5x16xf32> -> vector<5x16xf32>
    %217 = tpu.concatenate %153, %174, %195, %216 in 1 : vector<5x16xf32>, vector<5x16xf32>, vector<5x16xf32>, vector<5x16xf32> -> vector<5x64xf32>
    %218 = tpu.concatenate %129, %217 in 0 : vector<5x64xf32>, vector<5x64xf32> -> vector<10x64xf32>
    %219 = arith.truncf %218 : vector<10x64xf32> to vector<10x64xbf16>
    %cst_69 = arith.constant dense<0.000000e+00> : vector<10x64xf32>
    %220 = tpu.matmul %219, %35, %cst_69 {dimension_numbers = #tpu.dot_dimension_numbers<[1], [0], [0], [1], [0, 0, 1, 1], [], []>} : vector<10x64xbf16>, vector<64x64xbf16>, vector<10x64xf32> -> vector<10x64xf32>
    %221 = vector.broadcast %37 : vector<1x64xf32> to vector<10x64xf32>
    %222 = arith.addf %220, %221 : vector<10x64xf32>
    %223 = arith.addf %5, %222 : vector<10x64xf32>
    %c0_70 = arith.constant 0 : index
    %c0_71 = arith.constant 0 : index
    %c0_72 = arith.constant 0 : index
    %224 = vector.load %arg9[%c0_70, %c0_71, %c0_72] : memref<2x1x64xf32, #tpu.memory_space<vmem>>, vector<1x1x64xf32>
    %225 = vector.shape_cast %224 : vector<1x1x64xf32> to vector<1x64xf32>
    %c0_73 = arith.constant 0 : index
    %c0_74 = arith.constant 0 : index
    %c0_75 = arith.constant 0 : index
    %226 = vector.load %arg10[%c0_73, %c0_74, %c0_75] : memref<2x1x64xf32, #tpu.memory_space<vmem>>, vector<1x1x64xf32>
    %227 = vector.shape_cast %226 : vector<1x1x64xf32> to vector<1x64xf32>
    %cst_76 = arith.constant dense<0.000000e+00> : vector<10xf32>
    %228 = vector.multi_reduction <add>, %223, %cst_76 [1] : vector<10x64xf32> to vector<10xf32>
    %229 = vector.shape_cast %228 : vector<10xf32> to vector<10x1xf32>
    %cst_77 = arith.constant 6.400000e+01 : f32
    %230 = vector.broadcast %cst_77 : f32 to vector<10x1xf32>
    %231 = arith.divf %229, %230 : vector<10x1xf32>
    %232 = vector.broadcast %231 : vector<10x1xf32> to vector<10x64xf32>
    %233 = arith.subf %223, %232 : vector<10x64xf32>
    %234 = arith.mulf %233, %233 : vector<10x64xf32>
    %cst_78 = arith.constant dense<0.000000e+00> : vector<10xf32>
    %235 = vector.multi_reduction <add>, %234, %cst_78 [1] : vector<10x64xf32> to vector<10xf32>
    %236 = vector.shape_cast %235 : vector<10xf32> to vector<10x1xf32>
    %cst_79 = arith.constant 6.400000e+01 : f32
    %237 = vector.broadcast %cst_79 : f32 to vector<10x1xf32>
    %238 = arith.divf %236, %237 : vector<10x1xf32>
    %cst_80 = arith.constant 9.99999996E-13 : f32
    %239 = vector.broadcast %cst_80 : f32 to vector<10x1xf32>
    %240 = arith.addf %238, %239 : vector<10x1xf32>
    %241 = math.rsqrt %240 : vector<10x1xf32>
    %242 = vector.broadcast %241 : vector<10x1xf32> to vector<10x64xf32>
    %243 = arith.mulf %233, %242 : vector<10x64xf32>
    %244 = vector.broadcast %225 : vector<1x64xf32> to vector<10x64xf32>
    %245 = arith.mulf %243, %244 : vector<10x64xf32>
    %246 = vector.broadcast %227 : vector<1x64xf32> to vector<10x64xf32>
    %247 = arith.addf %245, %246 : vector<10x64xf32>
    %c0_81 = arith.constant 0 : index
    %c0_82 = arith.constant 0 : index
    %c0_83 = arith.constant 0 : index
    %248 = vector.load %arg11[%c0_81, %c0_82, %c0_83] : memref<2x64x128xbf16, #tpu.memory_space<vmem>>, vector<1x64x128xbf16>
    %249 = vector.shape_cast %248 : vector<1x64x128xbf16> to vector<64x128xbf16>
    %250 = arith.truncf %247 : vector<10x64xf32> to vector<10x64xbf16>
    %cst_84 = arith.constant dense<0.000000e+00> : vector<10x128xf32>
    %251 = tpu.matmul %250, %249, %cst_84 {dimension_numbers = #tpu.dot_dimension_numbers<[1], [0], [0], [1], [0, 0, 1, 1], [], []>} : vector<10x64xbf16>, vector<64x128xbf16>, vector<10x128xf32> -> vector<10x128xf32>
    %c0_85 = arith.constant 0 : index
    %c0_86 = arith.constant 0 : index
    %c0_87 = arith.constant 0 : index
    %252 = vector.load %arg12[%c0_85, %c0_86, %c0_87] : memref<2x1x128xf32, #tpu.memory_space<vmem>>, vector<1x1x128xf32>
    %253 = vector.shape_cast %252 : vector<1x1x128xf32> to vector<1x128xf32>
    %254 = vector.broadcast %253 : vector<1x128xf32> to vector<10x128xf32>
    %255 = arith.addf %251, %254 : vector<10x128xf32>
    %256 = arith.mulf %255, %255 : vector<10x128xf32>
    %257 = arith.mulf %255, %256 : vector<10x128xf32>
    %cst_88 = arith.constant 4.471500e-02 : f32
    %258 = vector.broadcast %cst_88 : f32 to vector<10x128xf32>
    %259 = arith.mulf %258, %257 : vector<10x128xf32>
    %260 = arith.addf %255, %259 : vector<10x128xf32>
    %cst_89 = arith.constant 0.797884583 : f32
    %261 = vector.broadcast %cst_89 : f32 to vector<10x128xf32>
    %262 = arith.mulf %261, %260 : vector<10x128xf32>
    %263 = math.tanh %262 : vector<10x128xf32>
    %cst_90 = arith.constant 1.000000e+00 : f32
    %264 = vector.broadcast %cst_90 : f32 to vector<10x128xf32>
    %265 = arith.addf %264, %263 : vector<10x128xf32>
    %cst_91 = arith.constant 5.000000e-01 : f32
    %266 = vector.broadcast %cst_91 : f32 to vector<10x128xf32>
    %267 = arith.mulf %266, %265 : vector<10x128xf32>
    %268 = arith.mulf %255, %267 : vector<10x128xf32>
    %c0_92 = arith.constant 0 : index
    %c0_93 = arith.constant 0 : index
    %c0_94 = arith.constant 0 : index
    %269 = vector.load %arg13[%c0_92, %c0_93, %c0_94] : memref<2x128x64xbf16, #tpu.memory_space<vmem>>, vector<1x128x64xbf16>
    %270 = vector.shape_cast %269 : vector<1x128x64xbf16> to vector<128x64xbf16>
    %271 = arith.truncf %268 : vector<10x128xf32> to vector<10x128xbf16>
    %cst_95 = arith.constant dense<0.000000e+00> : vector<10x64xf32>
    %272 = tpu.matmul %271, %270, %cst_95 {dimension_numbers = #tpu.dot_dimension_numbers<[1], [0], [0], [1], [0, 0, 1, 1], [], []>} : vector<10x128xbf16>, vector<128x64xbf16>, vector<10x64xf32> -> vector<10x64xf32>
    %273 = arith.addf %223, %272 : vector<10x64xf32>
    %c0_96 = arith.constant 0 : index
    %c0_97 = arith.constant 0 : index
    %c0_98 = arith.constant 0 : index
    %274 = vector.load %arg14[%c0_96, %c0_97, %c0_98] : memref<2x1x64xf32, #tpu.memory_space<vmem>>, vector<1x1x64xf32>
    %275 = vector.shape_cast %274 : vector<1x1x64xf32> to vector<1x64xf32>
    %276 = vector.broadcast %275 : vector<1x64xf32> to vector<10x64xf32>
    %277 = arith.addf %273, %276 : vector<10x64xf32>
    %c1 = arith.constant 1 : index
    %c0_99 = arith.constant 0 : index
    %c0_100 = arith.constant 0 : index
    %278 = vector.load %arg3[%c1, %c0_99, %c0_100] : memref<2x1x64xf32, #tpu.memory_space<vmem>>, vector<1x1x64xf32>
    %279 = vector.shape_cast %278 : vector<1x1x64xf32> to vector<1x64xf32>
    %c1_101 = arith.constant 1 : index
    %c0_102 = arith.constant 0 : index
    %c0_103 = arith.constant 0 : index
    %280 = vector.load %arg4[%c1_101, %c0_102, %c0_103] : memref<2x1x64xf32, #tpu.memory_space<vmem>>, vector<1x1x64xf32>
    %281 = vector.shape_cast %280 : vector<1x1x64xf32> to vector<1x64xf32>
    %cst_104 = arith.constant dense<0.000000e+00> : vector<10xf32>
    %282 = vector.multi_reduction <add>, %277, %cst_104 [1] : vector<10x64xf32> to vector<10xf32>
    %283 = vector.shape_cast %282 : vector<10xf32> to vector<10x1xf32>
    %cst_105 = arith.constant 6.400000e+01 : f32
    %284 = vector.broadcast %cst_105 : f32 to vector<10x1xf32>
    %285 = arith.divf %283, %284 : vector<10x1xf32>
    %286 = vector.broadcast %285 : vector<10x1xf32> to vector<10x64xf32>
    %287 = arith.subf %277, %286 : vector<10x64xf32>
    %288 = arith.mulf %287, %287 : vector<10x64xf32>
    %cst_106 = arith.constant dense<0.000000e+00> : vector<10xf32>
    %289 = vector.multi_reduction <add>, %288, %cst_106 [1] : vector<10x64xf32> to vector<10xf32>
    %290 = vector.shape_cast %289 : vector<10xf32> to vector<10x1xf32>
    %cst_107 = arith.constant 6.400000e+01 : f32
    %291 = vector.broadcast %cst_107 : f32 to vector<10x1xf32>
    %292 = arith.divf %290, %291 : vector<10x1xf32>
    %cst_108 = arith.constant 9.99999996E-13 : f32
    %293 = vector.broadcast %cst_108 : f32 to vector<10x1xf32>
    %294 = arith.addf %292, %293 : vector<10x1xf32>
    %295 = math.rsqrt %294 : vector<10x1xf32>
    %296 = vector.broadcast %295 : vector<10x1xf32> to vector<10x64xf32>
    %297 = arith.mulf %287, %296 : vector<10x64xf32>
    %298 = vector.broadcast %279 : vector<1x64xf32> to vector<10x64xf32>
    %299 = arith.mulf %297, %298 : vector<10x64xf32>
    %300 = vector.broadcast %281 : vector<1x64xf32> to vector<10x64xf32>
    %301 = arith.addf %299, %300 : vector<10x64xf32>
    %c1_109 = arith.constant 1 : index
    %c0_110 = arith.constant 0 : index
    %c0_111 = arith.constant 0 : index
    %302 = vector.load %arg5[%c1_109, %c0_110, %c0_111] : memref<2x64x192xbf16, #tpu.memory_space<vmem>>, vector<1x64x192xbf16>
    %303 = vector.shape_cast %302 : vector<1x64x192xbf16> to vector<64x192xbf16>
    %c1_112 = arith.constant 1 : index
    %c0_113 = arith.constant 0 : index
    %c0_114 = arith.constant 0 : index
    %304 = vector.load %arg6[%c1_112, %c0_113, %c0_114] : memref<2x1x192xf32, #tpu.memory_space<vmem>>, vector<1x1x192xf32>
    %305 = vector.shape_cast %304 : vector<1x1x192xf32> to vector<1x192xf32>
    %c1_115 = arith.constant 1 : index
    %c0_116 = arith.constant 0 : index
    %c0_117 = arith.constant 0 : index
    %306 = vector.load %arg7[%c1_115, %c0_116, %c0_117] : memref<2x64x64xbf16, #tpu.memory_space<vmem>>, vector<1x64x64xbf16>
    %307 = vector.shape_cast %306 : vector<1x64x64xbf16> to vector<64x64xbf16>
    %c1_118 = arith.constant 1 : index
    %c0_119 = arith.constant 0 : index
    %c0_120 = arith.constant 0 : index
    %308 = vector.load %arg8[%c1_118, %c0_119, %c0_120] : memref<2x1x64xf32, #tpu.memory_space<vmem>>, vector<1x1x64xf32>
    %309 = vector.shape_cast %308 : vector<1x1x64xf32> to vector<1x64xf32>
    %310 = arith.truncf %301 : vector<10x64xf32> to vector<10x64xbf16>
    %cst_121 = arith.constant dense<0.000000e+00> : vector<10x192xf32>
    %311 = tpu.matmul %310, %303, %cst_121 {dimension_numbers = #tpu.dot_dimension_numbers<[1], [0], [0], [1], [0, 0, 1, 1], [], []>} : vector<10x64xbf16>, vector<64x192xbf16>, vector<10x192xf32> -> vector<10x192xf32>
    %312 = vector.broadcast %305 : vector<1x192xf32> to vector<10x192xf32>
    %313 = arith.addf %311, %312 : vector<10x192xf32>
    %314 = vector.extract_strided_slice %313 {offsets = [0, 0], sizes = [5, 64], strides = [1, 1]} : vector<10x192xf32> to vector<5x64xf32>
    %315 = vector.extract_strided_slice %313 {offsets = [0, 64], sizes = [5, 64], strides = [1, 1]} : vector<10x192xf32> to vector<5x64xf32>
    %316 = vector.extract_strided_slice %313 {offsets = [0, 128], sizes = [5, 64], strides = [1, 1]} : vector<10x192xf32> to vector<5x64xf32>
    %317 = vector.extract_strided_slice %314 {offsets = [0, 0], sizes = [5, 16], strides = [1, 1]} : vector<5x64xf32> to vector<5x16xf32>
    %318 = vector.extract_strided_slice %315 {offsets = [0, 0], sizes = [5, 16], strides = [1, 1]} : vector<5x64xf32> to vector<5x16xf32>
    %319 = arith.truncf %317 : vector<5x16xf32> to vector<5x16xbf16>
    %320 = arith.truncf %318 : vector<5x16xf32> to vector<5x16xbf16>
    %cst_122 = arith.constant dense<0.000000e+00> : vector<5x5xf32>
    %321 = tpu.matmul %319, %320, %cst_122 {dimension_numbers = #tpu.dot_dimension_numbers<[1], [1], [0], [0], [0, 0, 1, 0], [], []>} : vector<5x16xbf16>, vector<5x16xbf16>, vector<5x5xf32> -> vector<5x5xf32>
    %cst_123 = arith.constant 2.500000e-01 : f32
    %322 = vector.broadcast %cst_123 : f32 to vector<5x5xf32>
    %323 = arith.mulf %321, %322 : vector<5x5xf32>
    %cst_124 = arith.constant dense<0xFF800000> : vector<5xf32>
    %324 = vector.multi_reduction <maximumf>, %323, %cst_124 [1] : vector<5x5xf32> to vector<5xf32>
    %325 = vector.shape_cast %324 : vector<5xf32> to vector<5x1xf32>
    %326 = vector.broadcast %325 : vector<5x1xf32> to vector<5x5xf32>
    %327 = arith.subf %323, %326 : vector<5x5xf32>
    %328 = math.exp %327 : vector<5x5xf32>
    %cst_125 = arith.constant dense<0.000000e+00> : vector<5xf32>
    %329 = vector.multi_reduction <add>, %328, %cst_125 [1] : vector<5x5xf32> to vector<5xf32>
    %330 = vector.shape_cast %329 : vector<5xf32> to vector<5x1xf32>
    %331 = tpu.reciprocal %330 {approx = true} : vector<5x1xf32> -> vector<5x1xf32>
    %332 = vector.broadcast %331 : vector<5x1xf32> to vector<5x5xf32>
    %333 = arith.mulf %328, %332 : vector<5x5xf32>
    %334 = vector.extract_strided_slice %316 {offsets = [0, 0], sizes = [5, 16], strides = [1, 1]} : vector<5x64xf32> to vector<5x16xf32>
    %335 = arith.truncf %333 : vector<5x5xf32> to vector<5x5xbf16>
    %336 = arith.truncf %334 : vector<5x16xf32> to vector<5x16xbf16>
    %cst_126 = arith.constant dense<0.000000e+00> : vector<5x16xf32>
    %337 = tpu.matmul %335, %336, %cst_126 {dimension_numbers = #tpu.dot_dimension_numbers<[1], [0], [0], [1], [0, 0, 1, 1], [], []>} : vector<5x5xbf16>, vector<5x16xbf16>, vector<5x16xf32> -> vector<5x16xf32>
    %338 = vector.extract_strided_slice %314 {offsets = [0, 16], sizes = [5, 16], strides = [1, 1]} : vector<5x64xf32> to vector<5x16xf32>
    %339 = vector.extract_strided_slice %315 {offsets = [0, 16], sizes = [5, 16], strides = [1, 1]} : vector<5x64xf32> to vector<5x16xf32>
    %340 = arith.truncf %338 : vector<5x16xf32> to vector<5x16xbf16>
    %341 = arith.truncf %339 : vector<5x16xf32> to vector<5x16xbf16>
    %cst_127 = arith.constant dense<0.000000e+00> : vector<5x5xf32>
    %342 = tpu.matmul %340, %341, %cst_127 {dimension_numbers = #tpu.dot_dimension_numbers<[1], [1], [0], [0], [0, 0, 1, 0], [], []>} : vector<5x16xbf16>, vector<5x16xbf16>, vector<5x5xf32> -> vector<5x5xf32>
    %cst_128 = arith.constant 2.500000e-01 : f32
    %343 = vector.broadcast %cst_128 : f32 to vector<5x5xf32>
    %344 = arith.mulf %342, %343 : vector<5x5xf32>
    %cst_129 = arith.constant dense<0xFF800000> : vector<5xf32>
    %345 = vector.multi_reduction <maximumf>, %344, %cst_129 [1] : vector<5x5xf32> to vector<5xf32>
    %346 = vector.shape_cast %345 : vector<5xf32> to vector<5x1xf32>
    %347 = vector.broadcast %346 : vector<5x1xf32> to vector<5x5xf32>
    %348 = arith.subf %344, %347 : vector<5x5xf32>
    %349 = math.exp %348 : vector<5x5xf32>
    %cst_130 = arith.constant dense<0.000000e+00> : vector<5xf32>
    %350 = vector.multi_reduction <add>, %349, %cst_130 [1] : vector<5x5xf32> to vector<5xf32>
    %351 = vector.shape_cast %350 : vector<5xf32> to vector<5x1xf32>
    %352 = tpu.reciprocal %351 {approx = true} : vector<5x1xf32> -> vector<5x1xf32>
    %353 = vector.broadcast %352 : vector<5x1xf32> to vector<5x5xf32>
    %354 = arith.mulf %349, %353 : vector<5x5xf32>
    %355 = vector.extract_strided_slice %316 {offsets = [0, 16], sizes = [5, 16], strides = [1, 1]} : vector<5x64xf32> to vector<5x16xf32>
    %356 = arith.truncf %354 : vector<5x5xf32> to vector<5x5xbf16>
    %357 = arith.truncf %355 : vector<5x16xf32> to vector<5x16xbf16>
    %cst_131 = arith.constant dense<0.000000e+00> : vector<5x16xf32>
    %358 = tpu.matmul %356, %357, %cst_131 {dimension_numbers = #tpu.dot_dimension_numbers<[1], [0], [0], [1], [0, 0, 1, 1], [], []>} : vector<5x5xbf16>, vector<5x16xbf16>, vector<5x16xf32> -> vector<5x16xf32>
    %359 = vector.extract_strided_slice %314 {offsets = [0, 32], sizes = [5, 16], strides = [1, 1]} : vector<5x64xf32> to vector<5x16xf32>
    %360 = vector.extract_strided_slice %315 {offsets = [0, 32], sizes = [5, 16], strides = [1, 1]} : vector<5x64xf32> to vector<5x16xf32>
    %361 = arith.truncf %359 : vector<5x16xf32> to vector<5x16xbf16>
    %362 = arith.truncf %360 : vector<5x16xf32> to vector<5x16xbf16>
    %cst_132 = arith.constant dense<0.000000e+00> : vector<5x5xf32>
    %363 = tpu.matmul %361, %362, %cst_132 {dimension_numbers = #tpu.dot_dimension_numbers<[1], [1], [0], [0], [0, 0, 1, 0], [], []>} : vector<5x16xbf16>, vector<5x16xbf16>, vector<5x5xf32> -> vector<5x5xf32>
    %cst_133 = arith.constant 2.500000e-01 : f32
    %364 = vector.broadcast %cst_133 : f32 to vector<5x5xf32>
    %365 = arith.mulf %363, %364 : vector<5x5xf32>
    %cst_134 = arith.constant dense<0xFF800000> : vector<5xf32>
    %366 = vector.multi_reduction <maximumf>, %365, %cst_134 [1] : vector<5x5xf32> to vector<5xf32>
    %367 = vector.shape_cast %366 : vector<5xf32> to vector<5x1xf32>
    %368 = vector.broadcast %367 : vector<5x1xf32> to vector<5x5xf32>
    %369 = arith.subf %365, %368 : vector<5x5xf32>
    %370 = math.exp %369 : vector<5x5xf32>
    %cst_135 = arith.constant dense<0.000000e+00> : vector<5xf32>
    %371 = vector.multi_reduction <add>, %370, %cst_135 [1] : vector<5x5xf32> to vector<5xf32>
    %372 = vector.shape_cast %371 : vector<5xf32> to vector<5x1xf32>
    %373 = tpu.reciprocal %372 {approx = true} : vector<5x1xf32> -> vector<5x1xf32>
    %374 = vector.broadcast %373 : vector<5x1xf32> to vector<5x5xf32>
    %375 = arith.mulf %370, %374 : vector<5x5xf32>
    %376 = vector.extract_strided_slice %316 {offsets = [0, 32], sizes = [5, 16], strides = [1, 1]} : vector<5x64xf32> to vector<5x16xf32>
    %377 = arith.truncf %375 : vector<5x5xf32> to vector<5x5xbf16>
    %378 = arith.truncf %376 : vector<5x16xf32> to vector<5x16xbf16>
    %cst_136 = arith.constant dense<0.000000e+00> : vector<5x16xf32>
    %379 = tpu.matmul %377, %378, %cst_136 {dimension_numbers = #tpu.dot_dimension_numbers<[1], [0], [0], [1], [0, 0, 1, 1], [], []>} : vector<5x5xbf16>, vector<5x16xbf16>, vector<5x16xf32> -> vector<5x16xf32>
    %380 = vector.extract_strided_slice %314 {offsets = [0, 48], sizes = [5, 16], strides = [1, 1]} : vector<5x64xf32> to vector<5x16xf32>
    %381 = vector.extract_strided_slice %315 {offsets = [0, 48], sizes = [5, 16], strides = [1, 1]} : vector<5x64xf32> to vector<5x16xf32>
    %382 = arith.truncf %380 : vector<5x16xf32> to vector<5x16xbf16>
    %383 = arith.truncf %381 : vector<5x16xf32> to vector<5x16xbf16>
    %cst_137 = arith.constant dense<0.000000e+00> : vector<5x5xf32>
    %384 = tpu.matmul %382, %383, %cst_137 {dimension_numbers = #tpu.dot_dimension_numbers<[1], [1], [0], [0], [0, 0, 1, 0], [], []>} : vector<5x16xbf16>, vector<5x16xbf16>, vector<5x5xf32> -> vector<5x5xf32>
    %cst_138 = arith.constant 2.500000e-01 : f32
    %385 = vector.broadcast %cst_138 : f32 to vector<5x5xf32>
    %386 = arith.mulf %384, %385 : vector<5x5xf32>
    %cst_139 = arith.constant dense<0xFF800000> : vector<5xf32>
    %387 = vector.multi_reduction <maximumf>, %386, %cst_139 [1] : vector<5x5xf32> to vector<5xf32>
    %388 = vector.shape_cast %387 : vector<5xf32> to vector<5x1xf32>
    %389 = vector.broadcast %388 : vector<5x1xf32> to vector<5x5xf32>
    %390 = arith.subf %386, %389 : vector<5x5xf32>
    %391 = math.exp %390 : vector<5x5xf32>
    %cst_140 = arith.constant dense<0.000000e+00> : vector<5xf32>
    %392 = vector.multi_reduction <add>, %391, %cst_140 [1] : vector<5x5xf32> to vector<5xf32>
    %393 = vector.shape_cast %392 : vector<5xf32> to vector<5x1xf32>
    %394 = tpu.reciprocal %393 {approx = true} : vector<5x1xf32> -> vector<5x1xf32>
    %395 = vector.broadcast %394 : vector<5x1xf32> to vector<5x5xf32>
    %396 = arith.mulf %391, %395 : vector<5x5xf32>
    %397 = vector.extract_strided_slice %316 {offsets = [0, 48], sizes = [5, 16], strides = [1, 1]} : vector<5x64xf32> to vector<5x16xf32>
    %398 = arith.truncf %396 : vector<5x5xf32> to vector<5x5xbf16>
    %399 = arith.truncf %397 : vector<5x16xf32> to vector<5x16xbf16>
    %cst_141 = arith.constant dense<0.000000e+00> : vector<5x16xf32>
    %400 = tpu.matmul %398, %399, %cst_141 {dimension_numbers = #tpu.dot_dimension_numbers<[1], [0], [0], [1], [0, 0, 1, 1], [], []>} : vector<5x5xbf16>, vector<5x16xbf16>, vector<5x16xf32> -> vector<5x16xf32>
    %401 = tpu.concatenate %337, %358, %379, %400 in 1 : vector<5x16xf32>, vector<5x16xf32>, vector<5x16xf32>, vector<5x16xf32> -> vector<5x64xf32>
    %402 = vector.extract_strided_slice %313 {offsets = [5, 0], sizes = [5, 64], strides = [1, 1]} : vector<10x192xf32> to vector<5x64xf32>
    %403 = vector.extract_strided_slice %313 {offsets = [5, 64], sizes = [5, 64], strides = [1, 1]} : vector<10x192xf32> to vector<5x64xf32>
    %404 = vector.extract_strided_slice %313 {offsets = [5, 128], sizes = [5, 64], strides = [1, 1]} : vector<10x192xf32> to vector<5x64xf32>
    %405 = vector.extract_strided_slice %402 {offsets = [0, 0], sizes = [5, 16], strides = [1, 1]} : vector<5x64xf32> to vector<5x16xf32>
    %406 = vector.extract_strided_slice %403 {offsets = [0, 0], sizes = [5, 16], strides = [1, 1]} : vector<5x64xf32> to vector<5x16xf32>
    %407 = arith.truncf %405 : vector<5x16xf32> to vector<5x16xbf16>
    %408 = arith.truncf %406 : vector<5x16xf32> to vector<5x16xbf16>
    %cst_142 = arith.constant dense<0.000000e+00> : vector<5x5xf32>
    %409 = tpu.matmul %407, %408, %cst_142 {dimension_numbers = #tpu.dot_dimension_numbers<[1], [1], [0], [0], [0, 0, 1, 0], [], []>} : vector<5x16xbf16>, vector<5x16xbf16>, vector<5x5xf32> -> vector<5x5xf32>
    %cst_143 = arith.constant 2.500000e-01 : f32
    %410 = vector.broadcast %cst_143 : f32 to vector<5x5xf32>
    %411 = arith.mulf %409, %410 : vector<5x5xf32>
    %cst_144 = arith.constant dense<0xFF800000> : vector<5xf32>
    %412 = vector.multi_reduction <maximumf>, %411, %cst_144 [1] : vector<5x5xf32> to vector<5xf32>
    %413 = vector.shape_cast %412 : vector<5xf32> to vector<5x1xf32>
    %414 = vector.broadcast %413 : vector<5x1xf32> to vector<5x5xf32>
    %415 = arith.subf %411, %414 : vector<5x5xf32>
    %416 = math.exp %415 : vector<5x5xf32>
    %cst_145 = arith.constant dense<0.000000e+00> : vector<5xf32>
    %417 = vector.multi_reduction <add>, %416, %cst_145 [1] : vector<5x5xf32> to vector<5xf32>
    %418 = vector.shape_cast %417 : vector<5xf32> to vector<5x1xf32>
    %419 = tpu.reciprocal %418 {approx = true} : vector<5x1xf32> -> vector<5x1xf32>
    %420 = vector.broadcast %419 : vector<5x1xf32> to vector<5x5xf32>
    %421 = arith.mulf %416, %420 : vector<5x5xf32>
    %422 = vector.extract_strided_slice %404 {offsets = [0, 0], sizes = [5, 16], strides = [1, 1]} : vector<5x64xf32> to vector<5x16xf32>
    %423 = arith.truncf %421 : vector<5x5xf32> to vector<5x5xbf16>
    %424 = arith.truncf %422 : vector<5x16xf32> to vector<5x16xbf16>
    %cst_146 = arith.constant dense<0.000000e+00> : vector<5x16xf32>
    %425 = tpu.matmul %423, %424, %cst_146 {dimension_numbers = #tpu.dot_dimension_numbers<[1], [0], [0], [1], [0, 0, 1, 1], [], []>} : vector<5x5xbf16>, vector<5x16xbf16>, vector<5x16xf32> -> vector<5x16xf32>
    %426 = vector.extract_strided_slice %402 {offsets = [0, 16], sizes = [5, 16], strides = [1, 1]} : vector<5x64xf32> to vector<5x16xf32>
    %427 = vector.extract_strided_slice %403 {offsets = [0, 16], sizes = [5, 16], strides = [1, 1]} : vector<5x64xf32> to vector<5x16xf32>
    %428 = arith.truncf %426 : vector<5x16xf32> to vector<5x16xbf16>
    %429 = arith.truncf %427 : vector<5x16xf32> to vector<5x16xbf16>
    %cst_147 = arith.constant dense<0.000000e+00> : vector<5x5xf32>
    %430 = tpu.matmul %428, %429, %cst_147 {dimension_numbers = #tpu.dot_dimension_numbers<[1], [1], [0], [0], [0, 0, 1, 0], [], []>} : vector<5x16xbf16>, vector<5x16xbf16>, vector<5x5xf32> -> vector<5x5xf32>
    %cst_148 = arith.constant 2.500000e-01 : f32
    %431 = vector.broadcast %cst_148 : f32 to vector<5x5xf32>
    %432 = arith.mulf %430, %431 : vector<5x5xf32>
    %cst_149 = arith.constant dense<0xFF800000> : vector<5xf32>
    %433 = vector.multi_reduction <maximumf>, %432, %cst_149 [1] : vector<5x5xf32> to vector<5xf32>
    %434 = vector.shape_cast %433 : vector<5xf32> to vector<5x1xf32>
    %435 = vector.broadcast %434 : vector<5x1xf32> to vector<5x5xf32>
    %436 = arith.subf %432, %435 : vector<5x5xf32>
    %437 = math.exp %436 : vector<5x5xf32>
    %cst_150 = arith.constant dense<0.000000e+00> : vector<5xf32>
    %438 = vector.multi_reduction <add>, %437, %cst_150 [1] : vector<5x5xf32> to vector<5xf32>
    %439 = vector.shape_cast %438 : vector<5xf32> to vector<5x1xf32>
    %440 = tpu.reciprocal %439 {approx = true} : vector<5x1xf32> -> vector<5x1xf32>
    %441 = vector.broadcast %440 : vector<5x1xf32> to vector<5x5xf32>
    %442 = arith.mulf %437, %441 : vector<5x5xf32>
    %443 = vector.extract_strided_slice %404 {offsets = [0, 16], sizes = [5, 16], strides = [1, 1]} : vector<5x64xf32> to vector<5x16xf32>
    %444 = arith.truncf %442 : vector<5x5xf32> to vector<5x5xbf16>
    %445 = arith.truncf %443 : vector<5x16xf32> to vector<5x16xbf16>
    %cst_151 = arith.constant dense<0.000000e+00> : vector<5x16xf32>
    %446 = tpu.matmul %444, %445, %cst_151 {dimension_numbers = #tpu.dot_dimension_numbers<[1], [0], [0], [1], [0, 0, 1, 1], [], []>} : vector<5x5xbf16>, vector<5x16xbf16>, vector<5x16xf32> -> vector<5x16xf32>
    %447 = vector.extract_strided_slice %402 {offsets = [0, 32], sizes = [5, 16], strides = [1, 1]} : vector<5x64xf32> to vector<5x16xf32>
    %448 = vector.extract_strided_slice %403 {offsets = [0, 32], sizes = [5, 16], strides = [1, 1]} : vector<5x64xf32> to vector<5x16xf32>
    %449 = arith.truncf %447 : vector<5x16xf32> to vector<5x16xbf16>
    %450 = arith.truncf %448 : vector<5x16xf32> to vector<5x16xbf16>
    %cst_152 = arith.constant dense<0.000000e+00> : vector<5x5xf32>
    %451 = tpu.matmul %449, %450, %cst_152 {dimension_numbers = #tpu.dot_dimension_numbers<[1], [1], [0], [0], [0, 0, 1, 0], [], []>} : vector<5x16xbf16>, vector<5x16xbf16>, vector<5x5xf32> -> vector<5x5xf32>
    %cst_153 = arith.constant 2.500000e-01 : f32
    %452 = vector.broadcast %cst_153 : f32 to vector<5x5xf32>
    %453 = arith.mulf %451, %452 : vector<5x5xf32>
    %cst_154 = arith.constant dense<0xFF800000> : vector<5xf32>
    %454 = vector.multi_reduction <maximumf>, %453, %cst_154 [1] : vector<5x5xf32> to vector<5xf32>
    %455 = vector.shape_cast %454 : vector<5xf32> to vector<5x1xf32>
    %456 = vector.broadcast %455 : vector<5x1xf32> to vector<5x5xf32>
    %457 = arith.subf %453, %456 : vector<5x5xf32>
    %458 = math.exp %457 : vector<5x5xf32>
    %cst_155 = arith.constant dense<0.000000e+00> : vector<5xf32>
    %459 = vector.multi_reduction <add>, %458, %cst_155 [1] : vector<5x5xf32> to vector<5xf32>
    %460 = vector.shape_cast %459 : vector<5xf32> to vector<5x1xf32>
    %461 = tpu.reciprocal %460 {approx = true} : vector<5x1xf32> -> vector<5x1xf32>
    %462 = vector.broadcast %461 : vector<5x1xf32> to vector<5x5xf32>
    %463 = arith.mulf %458, %462 : vector<5x5xf32>
    %464 = vector.extract_strided_slice %404 {offsets = [0, 32], sizes = [5, 16], strides = [1, 1]} : vector<5x64xf32> to vector<5x16xf32>
    %465 = arith.truncf %463 : vector<5x5xf32> to vector<5x5xbf16>
    %466 = arith.truncf %464 : vector<5x16xf32> to vector<5x16xbf16>
    %cst_156 = arith.constant dense<0.000000e+00> : vector<5x16xf32>
    %467 = tpu.matmul %465, %466, %cst_156 {dimension_numbers = #tpu.dot_dimension_numbers<[1], [0], [0], [1], [0, 0, 1, 1], [], []>} : vector<5x5xbf16>, vector<5x16xbf16>, vector<5x16xf32> -> vector<5x16xf32>
    %468 = vector.extract_strided_slice %402 {offsets = [0, 48], sizes = [5, 16], strides = [1, 1]} : vector<5x64xf32> to vector<5x16xf32>
    %469 = vector.extract_strided_slice %403 {offsets = [0, 48], sizes = [5, 16], strides = [1, 1]} : vector<5x64xf32> to vector<5x16xf32>
    %470 = arith.truncf %468 : vector<5x16xf32> to vector<5x16xbf16>
    %471 = arith.truncf %469 : vector<5x16xf32> to vector<5x16xbf16>
    %cst_157 = arith.constant dense<0.000000e+00> : vector<5x5xf32>
    %472 = tpu.matmul %470, %471, %cst_157 {dimension_numbers = #tpu.dot_dimension_numbers<[1], [1], [0], [0], [0, 0, 1, 0], [], []>} : vector<5x16xbf16>, vector<5x16xbf16>, vector<5x5xf32> -> vector<5x5xf32>
    %cst_158 = arith.constant 2.500000e-01 : f32
    %473 = vector.broadcast %cst_158 : f32 to vector<5x5xf32>
    %474 = arith.mulf %472, %473 : vector<5x5xf32>
    %cst_159 = arith.constant dense<0xFF800000> : vector<5xf32>
    %475 = vector.multi_reduction <maximumf>, %474, %cst_159 [1] : vector<5x5xf32> to vector<5xf32>
    %476 = vector.shape_cast %475 : vector<5xf32> to vector<5x1xf32>
    %477 = vector.broadcast %476 : vector<5x1xf32> to vector<5x5xf32>
    %478 = arith.subf %474, %477 : vector<5x5xf32>
    %479 = math.exp %478 : vector<5x5xf32>
    %cst_160 = arith.constant dense<0.000000e+00> : vector<5xf32>
    %480 = vector.multi_reduction <add>, %479, %cst_160 [1] : vector<5x5xf32> to vector<5xf32>
    %481 = vector.shape_cast %480 : vector<5xf32> to vector<5x1xf32>
    %482 = tpu.reciprocal %481 {approx = true} : vector<5x1xf32> -> vector<5x1xf32>
    %483 = vector.broadcast %482 : vector<5x1xf32> to vector<5x5xf32>
    %484 = arith.mulf %479, %483 : vector<5x5xf32>
    %485 = vector.extract_strided_slice %404 {offsets = [0, 48], sizes = [5, 16], strides = [1, 1]} : vector<5x64xf32> to vector<5x16xf32>
    %486 = arith.truncf %484 : vector<5x5xf32> to vector<5x5xbf16>
    %487 = arith.truncf %485 : vector<5x16xf32> to vector<5x16xbf16>
    %cst_161 = arith.constant dense<0.000000e+00> : vector<5x16xf32>
    %488 = tpu.matmul %486, %487, %cst_161 {dimension_numbers = #tpu.dot_dimension_numbers<[1], [0], [0], [1], [0, 0, 1, 1], [], []>} : vector<5x5xbf16>, vector<5x16xbf16>, vector<5x16xf32> -> vector<5x16xf32>
    %489 = tpu.concatenate %425, %446, %467, %488 in 1 : vector<5x16xf32>, vector<5x16xf32>, vector<5x16xf32>, vector<5x16xf32> -> vector<5x64xf32>
    %490 = tpu.concatenate %401, %489 in 0 : vector<5x64xf32>, vector<5x64xf32> -> vector<10x64xf32>
    %491 = arith.truncf %490 : vector<10x64xf32> to vector<10x64xbf16>
    %cst_162 = arith.constant dense<0.000000e+00> : vector<10x64xf32>
    %492 = tpu.matmul %491, %307, %cst_162 {dimension_numbers = #tpu.dot_dimension_numbers<[1], [0], [0], [1], [0, 0, 1, 1], [], []>} : vector<10x64xbf16>, vector<64x64xbf16>, vector<10x64xf32> -> vector<10x64xf32>
    %493 = vector.broadcast %309 : vector<1x64xf32> to vector<10x64xf32>
    %494 = arith.addf %492, %493 : vector<10x64xf32>
    %495 = arith.addf %277, %494 : vector<10x64xf32>
    %c1_163 = arith.constant 1 : index
    %c0_164 = arith.constant 0 : index
    %c0_165 = arith.constant 0 : index
    %496 = vector.load %arg9[%c1_163, %c0_164, %c0_165] : memref<2x1x64xf32, #tpu.memory_space<vmem>>, vector<1x1x64xf32>
    %497 = vector.shape_cast %496 : vector<1x1x64xf32> to vector<1x64xf32>
    %c1_166 = arith.constant 1 : index
    %c0_167 = arith.constant 0 : index
    %c0_168 = arith.constant 0 : index
    %498 = vector.load %arg10[%c1_166, %c0_167, %c0_168] : memref<2x1x64xf32, #tpu.memory_space<vmem>>, vector<1x1x64xf32>
    %499 = vector.shape_cast %498 : vector<1x1x64xf32> to vector<1x64xf32>
    %cst_169 = arith.constant dense<0.000000e+00> : vector<10xf32>
    %500 = vector.multi_reduction <add>, %495, %cst_169 [1] : vector<10x64xf32> to vector<10xf32>
    %501 = vector.shape_cast %500 : vector<10xf32> to vector<10x1xf32>
    %cst_170 = arith.constant 6.400000e+01 : f32
    %502 = vector.broadcast %cst_170 : f32 to vector<10x1xf32>
    %503 = arith.divf %501, %502 : vector<10x1xf32>
    %504 = vector.broadcast %503 : vector<10x1xf32> to vector<10x64xf32>
    %505 = arith.subf %495, %504 : vector<10x64xf32>
    %506 = arith.mulf %505, %505 : vector<10x64xf32>
    %cst_171 = arith.constant dense<0.000000e+00> : vector<10xf32>
    %507 = vector.multi_reduction <add>, %506, %cst_171 [1] : vector<10x64xf32> to vector<10xf32>
    %508 = vector.shape_cast %507 : vector<10xf32> to vector<10x1xf32>
    %cst_172 = arith.constant 6.400000e+01 : f32
    %509 = vector.broadcast %cst_172 : f32 to vector<10x1xf32>
    %510 = arith.divf %508, %509 : vector<10x1xf32>
    %cst_173 = arith.constant 9.99999996E-13 : f32
    %511 = vector.broadcast %cst_173 : f32 to vector<10x1xf32>
    %512 = arith.addf %510, %511 : vector<10x1xf32>
    %513 = math.rsqrt %512 : vector<10x1xf32>
    %514 = vector.broadcast %513 : vector<10x1xf32> to vector<10x64xf32>
    %515 = arith.mulf %505, %514 : vector<10x64xf32>
    %516 = vector.broadcast %497 : vector<1x64xf32> to vector<10x64xf32>
    %517 = arith.mulf %515, %516 : vector<10x64xf32>
    %518 = vector.broadcast %499 : vector<1x64xf32> to vector<10x64xf32>
    %519 = arith.addf %517, %518 : vector<10x64xf32>
    %c1_174 = arith.constant 1 : index
    %c0_175 = arith.constant 0 : index
    %c0_176 = arith.constant 0 : index
    %520 = vector.load %arg11[%c1_174, %c0_175, %c0_176] : memref<2x64x128xbf16, #tpu.memory_space<vmem>>, vector<1x64x128xbf16>
    %521 = vector.shape_cast %520 : vector<1x64x128xbf16> to vector<64x128xbf16>
    %522 = arith.truncf %519 : vector<10x64xf32> to vector<10x64xbf16>
    %cst_177 = arith.constant dense<0.000000e+00> : vector<10x128xf32>
    %523 = tpu.matmul %522, %521, %cst_177 {dimension_numbers = #tpu.dot_dimension_numbers<[1], [0], [0], [1], [0, 0, 1, 1], [], []>} : vector<10x64xbf16>, vector<64x128xbf16>, vector<10x128xf32> -> vector<10x128xf32>
    %c1_178 = arith.constant 1 : index
    %c0_179 = arith.constant 0 : index
    %c0_180 = arith.constant 0 : index
    %524 = vector.load %arg12[%c1_178, %c0_179, %c0_180] : memref<2x1x128xf32, #tpu.memory_space<vmem>>, vector<1x1x128xf32>
    %525 = vector.shape_cast %524 : vector<1x1x128xf32> to vector<1x128xf32>
    %526 = vector.broadcast %525 : vector<1x128xf32> to vector<10x128xf32>
    %527 = arith.addf %523, %526 : vector<10x128xf32>
    %528 = arith.mulf %527, %527 : vector<10x128xf32>
    %529 = arith.mulf %527, %528 : vector<10x128xf32>
    %cst_181 = arith.constant 4.471500e-02 : f32
    %530 = vector.broadcast %cst_181 : f32 to vector<10x128xf32>
    %531 = arith.mulf %530, %529 : vector<10x128xf32>
    %532 = arith.addf %527, %531 : vector<10x128xf32>
    %cst_182 = arith.constant 0.797884583 : f32
    %533 = vector.broadcast %cst_182 : f32 to vector<10x128xf32>
    %534 = arith.mulf %533, %532 : vector<10x128xf32>
    %535 = math.tanh %534 : vector<10x128xf32>
    %cst_183 = arith.constant 1.000000e+00 : f32
    %536 = vector.broadcast %cst_183 : f32 to vector<10x128xf32>
    %537 = arith.addf %536, %535 : vector<10x128xf32>
    %cst_184 = arith.constant 5.000000e-01 : f32
    %538 = vector.broadcast %cst_184 : f32 to vector<10x128xf32>
    %539 = arith.mulf %538, %537 : vector<10x128xf32>
    %540 = arith.mulf %527, %539 : vector<10x128xf32>
    %c1_185 = arith.constant 1 : index
    %c0_186 = arith.constant 0 : index
    %c0_187 = arith.constant 0 : index
    %541 = vector.load %arg13[%c1_185, %c0_186, %c0_187] : memref<2x128x64xbf16, #tpu.memory_space<vmem>>, vector<1x128x64xbf16>
    %542 = vector.shape_cast %541 : vector<1x128x64xbf16> to vector<128x64xbf16>
    %543 = arith.truncf %540 : vector<10x128xf32> to vector<10x128xbf16>
    %cst_188 = arith.constant dense<0.000000e+00> : vector<10x64xf32>
    %544 = tpu.matmul %543, %542, %cst_188 {dimension_numbers = #tpu.dot_dimension_numbers<[1], [0], [0], [1], [0, 0, 1, 1], [], []>} : vector<10x128xbf16>, vector<128x64xbf16>, vector<10x64xf32> -> vector<10x64xf32>
    %545 = arith.addf %495, %544 : vector<10x64xf32>
    %c1_189 = arith.constant 1 : index
    %c0_190 = arith.constant 0 : index
    %c0_191 = arith.constant 0 : index
    %546 = vector.load %arg14[%c1_189, %c0_190, %c0_191] : memref<2x1x64xf32, #tpu.memory_space<vmem>>, vector<1x1x64xf32>
    %547 = vector.shape_cast %546 : vector<1x1x64xf32> to vector<1x64xf32>
    %548 = vector.broadcast %547 : vector<1x64xf32> to vector<10x64xf32>
    %549 = arith.addf %545, %548 : vector<10x64xf32>
    %c0_192 = arith.constant 0 : index
    %c0_193 = arith.constant 0 : index
    %550 = vector.load %arg15[%c0_192, %c0_193] : memref<1x64xf32, #tpu.memory_space<vmem>>, vector<1x64xf32>
    %c0_194 = arith.constant 0 : index
    %c0_195 = arith.constant 0 : index
    %551 = vector.load %arg16[%c0_194, %c0_195] : memref<1x64xf32, #tpu.memory_space<vmem>>, vector<1x64xf32>
    %cst_196 = arith.constant dense<0.000000e+00> : vector<10xf32>
    %552 = vector.multi_reduction <add>, %549, %cst_196 [1] : vector<10x64xf32> to vector<10xf32>
    %553 = vector.shape_cast %552 : vector<10xf32> to vector<10x1xf32>
    %cst_197 = arith.constant 6.400000e+01 : f32
    %554 = vector.broadcast %cst_197 : f32 to vector<10x1xf32>
    %555 = arith.divf %553, %554 : vector<10x1xf32>
    %556 = vector.broadcast %555 : vector<10x1xf32> to vector<10x64xf32>
    %557 = arith.subf %549, %556 : vector<10x64xf32>
    %558 = arith.mulf %557, %557 : vector<10x64xf32>
    %cst_198 = arith.constant dense<0.000000e+00> : vector<10xf32>
    %559 = vector.multi_reduction <add>, %558, %cst_198 [1] : vector<10x64xf32> to vector<10xf32>
    %560 = vector.shape_cast %559 : vector<10xf32> to vector<10x1xf32>
    %cst_199 = arith.constant 6.400000e+01 : f32
    %561 = vector.broadcast %cst_199 : f32 to vector<10x1xf32>
    %562 = arith.divf %560, %561 : vector<10x1xf32>
    %cst_200 = arith.constant 9.99999996E-13 : f32
    %563 = vector.broadcast %cst_200 : f32 to vector<10x1xf32>
    %564 = arith.addf %562, %563 : vector<10x1xf32>
    %565 = math.rsqrt %564 : vector<10x1xf32>
    %566 = vector.broadcast %565 : vector<10x1xf32> to vector<10x64xf32>
    %567 = arith.mulf %557, %566 : vector<10x64xf32>
    %568 = vector.broadcast %550 : vector<1x64xf32> to vector<10x64xf32>
    %569 = arith.mulf %567, %568 : vector<10x64xf32>
    %570 = vector.broadcast %551 : vector<1x64xf32> to vector<10x64xf32>
    %571 = arith.addf %569, %570 : vector<10x64xf32>
    %572 = vector.extract_strided_slice %571 {offsets = [0, 0], sizes = [1, 64], strides = [1, 1]} : vector<10x64xf32> to vector<1x64xf32>
    %573 = vector.extract_strided_slice %571 {offsets = [5, 0], sizes = [1, 64], strides = [1, 1]} : vector<10x64xf32> to vector<1x64xf32>
    %574 = tpu.concatenate %572, %573 in 0 : vector<1x64xf32>, vector<1x64xf32> -> vector<2x64xf32>
    %c0_201 = arith.constant 0 : index
    %c0_202 = arith.constant 0 : index
    %575 = vector.load %arg17[%c0_201, %c0_202] : memref<64x64xbf16, #tpu.memory_space<vmem>>, vector<64x64xbf16>
    %576 = arith.truncf %574 : vector<2x64xf32> to vector<2x64xbf16>
    %cst_203 = arith.constant dense<0.000000e+00> : vector<2x64xf32>
    %577 = tpu.matmul %576, %575, %cst_203 {dimension_numbers = #tpu.dot_dimension_numbers<[1], [0], [0], [1], [0, 0, 1, 1], [], []>} : vector<2x64xbf16>, vector<64x64xbf16>, vector<2x64xf32> -> vector<2x64xf32>
    %c0_204 = arith.constant 0 : index
    %c0_205 = arith.constant 0 : index
    %578 = vector.load %arg18[%c0_204, %c0_205] : memref<1x64xf32, #tpu.memory_space<vmem>>, vector<1x64xf32>
    %579 = vector.broadcast %578 : vector<1x64xf32> to vector<2x64xf32>
    %580 = arith.addf %577, %579 : vector<2x64xf32>
    %c0_206 = arith.constant 0 : index
    %c0_207 = arith.constant 0 : index
    %581 = vector.load %arg19[%c0_206, %c0_207] : memref<14x64xf32, #tpu.memory_space<vmem>>, vector<14x64xf32>
    %c0_208 = arith.constant 0 : index
    %c0_209 = arith.constant 0 : index
    %582 = vector.load %arg20[%c0_208, %c0_209] : memref<8x64xf32, #tpu.memory_space<vmem>>, vector<8x64xf32>
    %583 = vector.extract_strided_slice %580 {offsets = [0, 0], sizes = [1, 64], strides = [1, 1]} : vector<2x64xf32> to vector<1x64xf32>
    %584 = vector.extract_strided_slice %581 {offsets = [0, 0], sizes = [7, 64], strides = [1, 1]} : vector<14x64xf32> to vector<7x64xf32>
    %585 = tpu.concatenate %583, %584 in 0 : vector<1x64xf32>, vector<7x64xf32> -> vector<8x64xf32>
    %586 = arith.addf %585, %582 : vector<8x64xf32>
    %587 = vector.extract_strided_slice %580 {offsets = [1, 0], sizes = [1, 64], strides = [1, 1]} : vector<2x64xf32> to vector<1x64xf32>
    %588 = vector.extract_strided_slice %581 {offsets = [7, 0], sizes = [7, 64], strides = [1, 1]} : vector<14x64xf32> to vector<7x64xf32>
    %589 = tpu.concatenate %587, %588 in 0 : vector<1x64xf32>, vector<7x64xf32> -> vector<8x64xf32>
    %590 = arith.addf %589, %582 : vector<8x64xf32>
    %591 = tpu.concatenate %586, %590 in 0 : vector<8x64xf32>, vector<8x64xf32> -> vector<16x64xf32>
    %592 = tpu.iota {dimensions = array<i32: 0>} : vector<8x8xi32>
    %593 = tpu.iota {dimensions = array<i32: 1>} : vector<8x8xi32>
    %594 = arith.cmpi sge, %592, %593 : vector<8x8xi32>
    %c0_210 = arith.constant 0 : index
    %c0_211 = arith.constant 0 : index
    %c0_212 = arith.constant 0 : index
    %595 = vector.load %arg21[%c0_210, %c0_211, %c0_212] : memref<2x1x8xf32, #tpu.memory_space<vmem>>, vector<1x1x8xf32>
    %596 = vector.shape_cast %595 : vector<1x1x8xf32> to vector<1x8xf32>
    %cst_213 = arith.constant 0.000000e+00 : f32
    %597 = vector.broadcast %cst_213 : f32 to vector<1x8xf32>
    %598 = arith.cmpf ogt, %596, %597 : vector<1x8xf32>
    %599 = vector.broadcast %598 : vector<1x8xi1> to vector<8x8xi1>
    %600 = arith.andi %594, %599 : vector<8x8xi1>
    %cst_214 = arith.constant 0.000000e+00 : f32
    %cst_215 = arith.constant -1.000000e+09 : f32
    %601 = vector.broadcast %cst_214 : f32 to vector<8x8xf32>
    %602 = vector.broadcast %cst_215 : f32 to vector<8x8xf32>
    %603 = arith.select %600, %601, %602 : vector<8x8xi1>, vector<8x8xf32>
    %c1_216 = arith.constant 1 : index
    %c0_217 = arith.constant 0 : index
    %c0_218 = arith.constant 0 : index
    %604 = vector.load %arg21[%c1_216, %c0_217, %c0_218] : memref<2x1x8xf32, #tpu.memory_space<vmem>>, vector<1x1x8xf32>
    %605 = vector.shape_cast %604 : vector<1x1x8xf32> to vector<1x8xf32>
    %cst_219 = arith.constant 0.000000e+00 : f32
    %606 = vector.broadcast %cst_219 : f32 to vector<1x8xf32>
    %607 = arith.cmpf ogt, %605, %606 : vector<1x8xf32>
    %608 = vector.broadcast %607 : vector<1x8xi1> to vector<8x8xi1>
    %609 = arith.andi %594, %608 : vector<8x8xi1>
    %cst_220 = arith.constant 0.000000e+00 : f32
    %cst_221 = arith.constant -1.000000e+09 : f32
    %610 = vector.broadcast %cst_220 : f32 to vector<8x8xf32>
    %611 = vector.broadcast %cst_221 : f32 to vector<8x8xf32>
    %612 = arith.select %609, %610, %611 : vector<8x8xi1>, vector<8x8xf32>
    %c0_222 = arith.constant 0 : index
    %c0_223 = arith.constant 0 : index
    %c0_224 = arith.constant 0 : index
    %613 = vector.load %arg23[%c0_222, %c0_223, %c0_224] : memref<2x1x64xf32, #tpu.memory_space<vmem>>, vector<1x1x64xf32>
    %614 = vector.shape_cast %613 : vector<1x1x64xf32> to vector<1x64xf32>
    %c0_225 = arith.constant 0 : index
    %c0_226 = arith.constant 0 : index
    %c0_227 = arith.constant 0 : index
    %615 = vector.load %arg24[%c0_225, %c0_226, %c0_227] : memref<2x1x64xf32, #tpu.memory_space<vmem>>, vector<1x1x64xf32>
    %616 = vector.shape_cast %615 : vector<1x1x64xf32> to vector<1x64xf32>
    %cst_228 = arith.constant dense<0.000000e+00> : vector<16xf32>
    %617 = vector.multi_reduction <add>, %591, %cst_228 [1] : vector<16x64xf32> to vector<16xf32>
    %618 = vector.shape_cast %617 : vector<16xf32> to vector<16x1xf32>
    %cst_229 = arith.constant 6.400000e+01 : f32
    %619 = vector.broadcast %cst_229 : f32 to vector<16x1xf32>
    %620 = arith.divf %618, %619 : vector<16x1xf32>
    %621 = vector.broadcast %620 : vector<16x1xf32> to vector<16x64xf32>
    %622 = arith.subf %591, %621 : vector<16x64xf32>
    %623 = arith.mulf %622, %622 : vector<16x64xf32>
    %cst_230 = arith.constant dense<0.000000e+00> : vector<16xf32>
    %624 = vector.multi_reduction <add>, %623, %cst_230 [1] : vector<16x64xf32> to vector<16xf32>
    %625 = vector.shape_cast %624 : vector<16xf32> to vector<16x1xf32>
    %cst_231 = arith.constant 6.400000e+01 : f32
    %626 = vector.broadcast %cst_231 : f32 to vector<16x1xf32>
    %627 = arith.divf %625, %626 : vector<16x1xf32>
    %cst_232 = arith.constant 9.99999974E-6 : f32
    %628 = vector.broadcast %cst_232 : f32 to vector<16x1xf32>
    %629 = arith.addf %627, %628 : vector<16x1xf32>
    %630 = math.rsqrt %629 : vector<16x1xf32>
    %631 = vector.broadcast %630 : vector<16x1xf32> to vector<16x64xf32>
    %632 = arith.mulf %622, %631 : vector<16x64xf32>
    %633 = vector.broadcast %614 : vector<1x64xf32> to vector<16x64xf32>
    %634 = arith.mulf %632, %633 : vector<16x64xf32>
    %635 = vector.broadcast %616 : vector<1x64xf32> to vector<16x64xf32>
    %636 = arith.addf %634, %635 : vector<16x64xf32>
    %c0_233 = arith.constant 0 : index
    %c0_234 = arith.constant 0 : index
    %c0_235 = arith.constant 0 : index
    %637 = vector.load %arg25[%c0_233, %c0_234, %c0_235] : memref<2x64x192xbf16, #tpu.memory_space<vmem>>, vector<1x64x192xbf16>
    %638 = vector.shape_cast %637 : vector<1x64x192xbf16> to vector<64x192xbf16>
    %c0_236 = arith.constant 0 : index
    %c0_237 = arith.constant 0 : index
    %c0_238 = arith.constant 0 : index
    %639 = vector.load %arg26[%c0_236, %c0_237, %c0_238] : memref<2x1x192xf32, #tpu.memory_space<vmem>>, vector<1x1x192xf32>
    %640 = vector.shape_cast %639 : vector<1x1x192xf32> to vector<1x192xf32>
    %c0_239 = arith.constant 0 : index
    %c0_240 = arith.constant 0 : index
    %c0_241 = arith.constant 0 : index
    %641 = vector.load %arg27[%c0_239, %c0_240, %c0_241] : memref<2x64x64xbf16, #tpu.memory_space<vmem>>, vector<1x64x64xbf16>
    %642 = vector.shape_cast %641 : vector<1x64x64xbf16> to vector<64x64xbf16>
    %c0_242 = arith.constant 0 : index
    %c0_243 = arith.constant 0 : index
    %c0_244 = arith.constant 0 : index
    %643 = vector.load %arg28[%c0_242, %c0_243, %c0_244] : memref<2x1x64xf32, #tpu.memory_space<vmem>>, vector<1x1x64xf32>
    %644 = vector.shape_cast %643 : vector<1x1x64xf32> to vector<1x64xf32>
    %645 = arith.truncf %636 : vector<16x64xf32> to vector<16x64xbf16>
    %cst_245 = arith.constant dense<0.000000e+00> : vector<16x192xf32>
    %646 = tpu.matmul %645, %638, %cst_245 {dimension_numbers = #tpu.dot_dimension_numbers<[1], [0], [0], [1], [0, 0, 1, 1], [], []>} : vector<16x64xbf16>, vector<64x192xbf16>, vector<16x192xf32> -> vector<16x192xf32>
    %647 = vector.broadcast %640 : vector<1x192xf32> to vector<16x192xf32>
    %648 = arith.addf %646, %647 : vector<16x192xf32>
    %649 = vector.extract_strided_slice %648 {offsets = [0, 0], sizes = [8, 64], strides = [1, 1]} : vector<16x192xf32> to vector<8x64xf32>
    %650 = vector.extract_strided_slice %648 {offsets = [0, 64], sizes = [8, 64], strides = [1, 1]} : vector<16x192xf32> to vector<8x64xf32>
    %651 = vector.extract_strided_slice %648 {offsets = [0, 128], sizes = [8, 64], strides = [1, 1]} : vector<16x192xf32> to vector<8x64xf32>
    %652 = vector.extract_strided_slice %649 {offsets = [0, 0], sizes = [8, 16], strides = [1, 1]} : vector<8x64xf32> to vector<8x16xf32>
    %653 = vector.extract_strided_slice %650 {offsets = [0, 0], sizes = [8, 16], strides = [1, 1]} : vector<8x64xf32> to vector<8x16xf32>
    %654 = arith.truncf %652 : vector<8x16xf32> to vector<8x16xbf16>
    %655 = arith.truncf %653 : vector<8x16xf32> to vector<8x16xbf16>
    %cst_246 = arith.constant dense<0.000000e+00> : vector<8x8xf32>
    %656 = tpu.matmul %654, %655, %cst_246 {dimension_numbers = #tpu.dot_dimension_numbers<[1], [1], [0], [0], [0, 0, 1, 0], [], []>} : vector<8x16xbf16>, vector<8x16xbf16>, vector<8x8xf32> -> vector<8x8xf32>
    %cst_247 = arith.constant 2.500000e-01 : f32
    %657 = vector.broadcast %cst_247 : f32 to vector<8x8xf32>
    %658 = arith.mulf %656, %657 : vector<8x8xf32>
    %659 = arith.addf %658, %603 : vector<8x8xf32>
    %cst_248 = arith.constant dense<0xFF800000> : vector<8xf32>
    %660 = vector.multi_reduction <maximumf>, %659, %cst_248 [1] : vector<8x8xf32> to vector<8xf32>
    %661 = vector.shape_cast %660 : vector<8xf32> to vector<8x1xf32>
    %662 = vector.broadcast %661 : vector<8x1xf32> to vector<8x8xf32>
    %663 = arith.subf %659, %662 : vector<8x8xf32>
    %664 = math.exp %663 : vector<8x8xf32>
    %cst_249 = arith.constant dense<0.000000e+00> : vector<8xf32>
    %665 = vector.multi_reduction <add>, %664, %cst_249 [1] : vector<8x8xf32> to vector<8xf32>
    %666 = vector.shape_cast %665 : vector<8xf32> to vector<8x1xf32>
    %667 = tpu.reciprocal %666 {approx = true} : vector<8x1xf32> -> vector<8x1xf32>
    %668 = vector.broadcast %667 : vector<8x1xf32> to vector<8x8xf32>
    %669 = arith.mulf %664, %668 : vector<8x8xf32>
    %670 = vector.extract_strided_slice %651 {offsets = [0, 0], sizes = [8, 16], strides = [1, 1]} : vector<8x64xf32> to vector<8x16xf32>
    %671 = arith.truncf %669 : vector<8x8xf32> to vector<8x8xbf16>
    %672 = arith.truncf %670 : vector<8x16xf32> to vector<8x16xbf16>
    %cst_250 = arith.constant dense<0.000000e+00> : vector<8x16xf32>
    %673 = tpu.matmul %671, %672, %cst_250 {dimension_numbers = #tpu.dot_dimension_numbers<[1], [0], [0], [1], [0, 0, 1, 1], [], []>} : vector<8x8xbf16>, vector<8x16xbf16>, vector<8x16xf32> -> vector<8x16xf32>
    %674 = vector.extract_strided_slice %649 {offsets = [0, 16], sizes = [8, 16], strides = [1, 1]} : vector<8x64xf32> to vector<8x16xf32>
    %675 = vector.extract_strided_slice %650 {offsets = [0, 16], sizes = [8, 16], strides = [1, 1]} : vector<8x64xf32> to vector<8x16xf32>
    %676 = arith.truncf %674 : vector<8x16xf32> to vector<8x16xbf16>
    %677 = arith.truncf %675 : vector<8x16xf32> to vector<8x16xbf16>
    %cst_251 = arith.constant dense<0.000000e+00> : vector<8x8xf32>
    %678 = tpu.matmul %676, %677, %cst_251 {dimension_numbers = #tpu.dot_dimension_numbers<[1], [1], [0], [0], [0, 0, 1, 0], [], []>} : vector<8x16xbf16>, vector<8x16xbf16>, vector<8x8xf32> -> vector<8x8xf32>
    %cst_252 = arith.constant 2.500000e-01 : f32
    %679 = vector.broadcast %cst_252 : f32 to vector<8x8xf32>
    %680 = arith.mulf %678, %679 : vector<8x8xf32>
    %681 = arith.addf %680, %603 : vector<8x8xf32>
    %cst_253 = arith.constant dense<0xFF800000> : vector<8xf32>
    %682 = vector.multi_reduction <maximumf>, %681, %cst_253 [1] : vector<8x8xf32> to vector<8xf32>
    %683 = vector.shape_cast %682 : vector<8xf32> to vector<8x1xf32>
    %684 = vector.broadcast %683 : vector<8x1xf32> to vector<8x8xf32>
    %685 = arith.subf %681, %684 : vector<8x8xf32>
    %686 = math.exp %685 : vector<8x8xf32>
    %cst_254 = arith.constant dense<0.000000e+00> : vector<8xf32>
    %687 = vector.multi_reduction <add>, %686, %cst_254 [1] : vector<8x8xf32> to vector<8xf32>
    %688 = vector.shape_cast %687 : vector<8xf32> to vector<8x1xf32>
    %689 = tpu.reciprocal %688 {approx = true} : vector<8x1xf32> -> vector<8x1xf32>
    %690 = vector.broadcast %689 : vector<8x1xf32> to vector<8x8xf32>
    %691 = arith.mulf %686, %690 : vector<8x8xf32>
    %692 = vector.extract_strided_slice %651 {offsets = [0, 16], sizes = [8, 16], strides = [1, 1]} : vector<8x64xf32> to vector<8x16xf32>
    %693 = arith.truncf %691 : vector<8x8xf32> to vector<8x8xbf16>
    %694 = arith.truncf %692 : vector<8x16xf32> to vector<8x16xbf16>
    %cst_255 = arith.constant dense<0.000000e+00> : vector<8x16xf32>
    %695 = tpu.matmul %693, %694, %cst_255 {dimension_numbers = #tpu.dot_dimension_numbers<[1], [0], [0], [1], [0, 0, 1, 1], [], []>} : vector<8x8xbf16>, vector<8x16xbf16>, vector<8x16xf32> -> vector<8x16xf32>
    %696 = vector.extract_strided_slice %649 {offsets = [0, 32], sizes = [8, 16], strides = [1, 1]} : vector<8x64xf32> to vector<8x16xf32>
    %697 = vector.extract_strided_slice %650 {offsets = [0, 32], sizes = [8, 16], strides = [1, 1]} : vector<8x64xf32> to vector<8x16xf32>
    %698 = arith.truncf %696 : vector<8x16xf32> to vector<8x16xbf16>
    %699 = arith.truncf %697 : vector<8x16xf32> to vector<8x16xbf16>
    %cst_256 = arith.constant dense<0.000000e+00> : vector<8x8xf32>
    %700 = tpu.matmul %698, %699, %cst_256 {dimension_numbers = #tpu.dot_dimension_numbers<[1], [1], [0], [0], [0, 0, 1, 0], [], []>} : vector<8x16xbf16>, vector<8x16xbf16>, vector<8x8xf32> -> vector<8x8xf32>
    %cst_257 = arith.constant 2.500000e-01 : f32
    %701 = vector.broadcast %cst_257 : f32 to vector<8x8xf32>
    %702 = arith.mulf %700, %701 : vector<8x8xf32>
    %703 = arith.addf %702, %603 : vector<8x8xf32>
    %cst_258 = arith.constant dense<0xFF800000> : vector<8xf32>
    %704 = vector.multi_reduction <maximumf>, %703, %cst_258 [1] : vector<8x8xf32> to vector<8xf32>
    %705 = vector.shape_cast %704 : vector<8xf32> to vector<8x1xf32>
    %706 = vector.broadcast %705 : vector<8x1xf32> to vector<8x8xf32>
    %707 = arith.subf %703, %706 : vector<8x8xf32>
    %708 = math.exp %707 : vector<8x8xf32>
    %cst_259 = arith.constant dense<0.000000e+00> : vector<8xf32>
    %709 = vector.multi_reduction <add>, %708, %cst_259 [1] : vector<8x8xf32> to vector<8xf32>
    %710 = vector.shape_cast %709 : vector<8xf32> to vector<8x1xf32>
    %711 = tpu.reciprocal %710 {approx = true} : vector<8x1xf32> -> vector<8x1xf32>
    %712 = vector.broadcast %711 : vector<8x1xf32> to vector<8x8xf32>
    %713 = arith.mulf %708, %712 : vector<8x8xf32>
    %714 = vector.extract_strided_slice %651 {offsets = [0, 32], sizes = [8, 16], strides = [1, 1]} : vector<8x64xf32> to vector<8x16xf32>
    %715 = arith.truncf %713 : vector<8x8xf32> to vector<8x8xbf16>
    %716 = arith.truncf %714 : vector<8x16xf32> to vector<8x16xbf16>
    %cst_260 = arith.constant dense<0.000000e+00> : vector<8x16xf32>
    %717 = tpu.matmul %715, %716, %cst_260 {dimension_numbers = #tpu.dot_dimension_numbers<[1], [0], [0], [1], [0, 0, 1, 1], [], []>} : vector<8x8xbf16>, vector<8x16xbf16>, vector<8x16xf32> -> vector<8x16xf32>
    %718 = vector.extract_strided_slice %649 {offsets = [0, 48], sizes = [8, 16], strides = [1, 1]} : vector<8x64xf32> to vector<8x16xf32>
    %719 = vector.extract_strided_slice %650 {offsets = [0, 48], sizes = [8, 16], strides = [1, 1]} : vector<8x64xf32> to vector<8x16xf32>
    %720 = arith.truncf %718 : vector<8x16xf32> to vector<8x16xbf16>
    %721 = arith.truncf %719 : vector<8x16xf32> to vector<8x16xbf16>
    %cst_261 = arith.constant dense<0.000000e+00> : vector<8x8xf32>
    %722 = tpu.matmul %720, %721, %cst_261 {dimension_numbers = #tpu.dot_dimension_numbers<[1], [1], [0], [0], [0, 0, 1, 0], [], []>} : vector<8x16xbf16>, vector<8x16xbf16>, vector<8x8xf32> -> vector<8x8xf32>
    %cst_262 = arith.constant 2.500000e-01 : f32
    %723 = vector.broadcast %cst_262 : f32 to vector<8x8xf32>
    %724 = arith.mulf %722, %723 : vector<8x8xf32>
    %725 = arith.addf %724, %603 : vector<8x8xf32>
    %cst_263 = arith.constant dense<0xFF800000> : vector<8xf32>
    %726 = vector.multi_reduction <maximumf>, %725, %cst_263 [1] : vector<8x8xf32> to vector<8xf32>
    %727 = vector.shape_cast %726 : vector<8xf32> to vector<8x1xf32>
    %728 = vector.broadcast %727 : vector<8x1xf32> to vector<8x8xf32>
    %729 = arith.subf %725, %728 : vector<8x8xf32>
    %730 = math.exp %729 : vector<8x8xf32>
    %cst_264 = arith.constant dense<0.000000e+00> : vector<8xf32>
    %731 = vector.multi_reduction <add>, %730, %cst_264 [1] : vector<8x8xf32> to vector<8xf32>
    %732 = vector.shape_cast %731 : vector<8xf32> to vector<8x1xf32>
    %733 = tpu.reciprocal %732 {approx = true} : vector<8x1xf32> -> vector<8x1xf32>
    %734 = vector.broadcast %733 : vector<8x1xf32> to vector<8x8xf32>
    %735 = arith.mulf %730, %734 : vector<8x8xf32>
    %736 = vector.extract_strided_slice %651 {offsets = [0, 48], sizes = [8, 16], strides = [1, 1]} : vector<8x64xf32> to vector<8x16xf32>
    %737 = arith.truncf %735 : vector<8x8xf32> to vector<8x8xbf16>
    %738 = arith.truncf %736 : vector<8x16xf32> to vector<8x16xbf16>
    %cst_265 = arith.constant dense<0.000000e+00> : vector<8x16xf32>
    %739 = tpu.matmul %737, %738, %cst_265 {dimension_numbers = #tpu.dot_dimension_numbers<[1], [0], [0], [1], [0, 0, 1, 1], [], []>} : vector<8x8xbf16>, vector<8x16xbf16>, vector<8x16xf32> -> vector<8x16xf32>
    %740 = tpu.concatenate %673, %695, %717, %739 in 1 : vector<8x16xf32>, vector<8x16xf32>, vector<8x16xf32>, vector<8x16xf32> -> vector<8x64xf32>
    %741 = vector.extract_strided_slice %648 {offsets = [8, 0], sizes = [8, 64], strides = [1, 1]} : vector<16x192xf32> to vector<8x64xf32>
    %742 = vector.extract_strided_slice %648 {offsets = [8, 64], sizes = [8, 64], strides = [1, 1]} : vector<16x192xf32> to vector<8x64xf32>
    %743 = vector.extract_strided_slice %648 {offsets = [8, 128], sizes = [8, 64], strides = [1, 1]} : vector<16x192xf32> to vector<8x64xf32>
    %744 = vector.extract_strided_slice %741 {offsets = [0, 0], sizes = [8, 16], strides = [1, 1]} : vector<8x64xf32> to vector<8x16xf32>
    %745 = vector.extract_strided_slice %742 {offsets = [0, 0], sizes = [8, 16], strides = [1, 1]} : vector<8x64xf32> to vector<8x16xf32>
    %746 = arith.truncf %744 : vector<8x16xf32> to vector<8x16xbf16>
    %747 = arith.truncf %745 : vector<8x16xf32> to vector<8x16xbf16>
    %cst_266 = arith.constant dense<0.000000e+00> : vector<8x8xf32>
    %748 = tpu.matmul %746, %747, %cst_266 {dimension_numbers = #tpu.dot_dimension_numbers<[1], [1], [0], [0], [0, 0, 1, 0], [], []>} : vector<8x16xbf16>, vector<8x16xbf16>, vector<8x8xf32> -> vector<8x8xf32>
    %cst_267 = arith.constant 2.500000e-01 : f32
    %749 = vector.broadcast %cst_267 : f32 to vector<8x8xf32>
    %750 = arith.mulf %748, %749 : vector<8x8xf32>
    %751 = arith.addf %750, %612 : vector<8x8xf32>
    %cst_268 = arith.constant dense<0xFF800000> : vector<8xf32>
    %752 = vector.multi_reduction <maximumf>, %751, %cst_268 [1] : vector<8x8xf32> to vector<8xf32>
    %753 = vector.shape_cast %752 : vector<8xf32> to vector<8x1xf32>
    %754 = vector.broadcast %753 : vector<8x1xf32> to vector<8x8xf32>
    %755 = arith.subf %751, %754 : vector<8x8xf32>
    %756 = math.exp %755 : vector<8x8xf32>
    %cst_269 = arith.constant dense<0.000000e+00> : vector<8xf32>
    %757 = vector.multi_reduction <add>, %756, %cst_269 [1] : vector<8x8xf32> to vector<8xf32>
    %758 = vector.shape_cast %757 : vector<8xf32> to vector<8x1xf32>
    %759 = tpu.reciprocal %758 {approx = true} : vector<8x1xf32> -> vector<8x1xf32>
    %760 = vector.broadcast %759 : vector<8x1xf32> to vector<8x8xf32>
    %761 = arith.mulf %756, %760 : vector<8x8xf32>
    %762 = vector.extract_strided_slice %743 {offsets = [0, 0], sizes = [8, 16], strides = [1, 1]} : vector<8x64xf32> to vector<8x16xf32>
    %763 = arith.truncf %761 : vector<8x8xf32> to vector<8x8xbf16>
    %764 = arith.truncf %762 : vector<8x16xf32> to vector<8x16xbf16>
    %cst_270 = arith.constant dense<0.000000e+00> : vector<8x16xf32>
    %765 = tpu.matmul %763, %764, %cst_270 {dimension_numbers = #tpu.dot_dimension_numbers<[1], [0], [0], [1], [0, 0, 1, 1], [], []>} : vector<8x8xbf16>, vector<8x16xbf16>, vector<8x16xf32> -> vector<8x16xf32>
    %766 = vector.extract_strided_slice %741 {offsets = [0, 16], sizes = [8, 16], strides = [1, 1]} : vector<8x64xf32> to vector<8x16xf32>
    %767 = vector.extract_strided_slice %742 {offsets = [0, 16], sizes = [8, 16], strides = [1, 1]} : vector<8x64xf32> to vector<8x16xf32>
    %768 = arith.truncf %766 : vector<8x16xf32> to vector<8x16xbf16>
    %769 = arith.truncf %767 : vector<8x16xf32> to vector<8x16xbf16>
    %cst_271 = arith.constant dense<0.000000e+00> : vector<8x8xf32>
    %770 = tpu.matmul %768, %769, %cst_271 {dimension_numbers = #tpu.dot_dimension_numbers<[1], [1], [0], [0], [0, 0, 1, 0], [], []>} : vector<8x16xbf16>, vector<8x16xbf16>, vector<8x8xf32> -> vector<8x8xf32>
    %cst_272 = arith.constant 2.500000e-01 : f32
    %771 = vector.broadcast %cst_272 : f32 to vector<8x8xf32>
    %772 = arith.mulf %770, %771 : vector<8x8xf32>
    %773 = arith.addf %772, %612 : vector<8x8xf32>
    %cst_273 = arith.constant dense<0xFF800000> : vector<8xf32>
    %774 = vector.multi_reduction <maximumf>, %773, %cst_273 [1] : vector<8x8xf32> to vector<8xf32>
    %775 = vector.shape_cast %774 : vector<8xf32> to vector<8x1xf32>
    %776 = vector.broadcast %775 : vector<8x1xf32> to vector<8x8xf32>
    %777 = arith.subf %773, %776 : vector<8x8xf32>
    %778 = math.exp %777 : vector<8x8xf32>
    %cst_274 = arith.constant dense<0.000000e+00> : vector<8xf32>
    %779 = vector.multi_reduction <add>, %778, %cst_274 [1] : vector<8x8xf32> to vector<8xf32>
    %780 = vector.shape_cast %779 : vector<8xf32> to vector<8x1xf32>
    %781 = tpu.reciprocal %780 {approx = true} : vector<8x1xf32> -> vector<8x1xf32>
    %782 = vector.broadcast %781 : vector<8x1xf32> to vector<8x8xf32>
    %783 = arith.mulf %778, %782 : vector<8x8xf32>
    %784 = vector.extract_strided_slice %743 {offsets = [0, 16], sizes = [8, 16], strides = [1, 1]} : vector<8x64xf32> to vector<8x16xf32>
    %785 = arith.truncf %783 : vector<8x8xf32> to vector<8x8xbf16>
    %786 = arith.truncf %784 : vector<8x16xf32> to vector<8x16xbf16>
    %cst_275 = arith.constant dense<0.000000e+00> : vector<8x16xf32>
    %787 = tpu.matmul %785, %786, %cst_275 {dimension_numbers = #tpu.dot_dimension_numbers<[1], [0], [0], [1], [0, 0, 1, 1], [], []>} : vector<8x8xbf16>, vector<8x16xbf16>, vector<8x16xf32> -> vector<8x16xf32>
    %788 = vector.extract_strided_slice %741 {offsets = [0, 32], sizes = [8, 16], strides = [1, 1]} : vector<8x64xf32> to vector<8x16xf32>
    %789 = vector.extract_strided_slice %742 {offsets = [0, 32], sizes = [8, 16], strides = [1, 1]} : vector<8x64xf32> to vector<8x16xf32>
    %790 = arith.truncf %788 : vector<8x16xf32> to vector<8x16xbf16>
    %791 = arith.truncf %789 : vector<8x16xf32> to vector<8x16xbf16>
    %cst_276 = arith.constant dense<0.000000e+00> : vector<8x8xf32>
    %792 = tpu.matmul %790, %791, %cst_276 {dimension_numbers = #tpu.dot_dimension_numbers<[1], [1], [0], [0], [0, 0, 1, 0], [], []>} : vector<8x16xbf16>, vector<8x16xbf16>, vector<8x8xf32> -> vector<8x8xf32>
    %cst_277 = arith.constant 2.500000e-01 : f32
    %793 = vector.broadcast %cst_277 : f32 to vector<8x8xf32>
    %794 = arith.mulf %792, %793 : vector<8x8xf32>
    %795 = arith.addf %794, %612 : vector<8x8xf32>
    %cst_278 = arith.constant dense<0xFF800000> : vector<8xf32>
    %796 = vector.multi_reduction <maximumf>, %795, %cst_278 [1] : vector<8x8xf32> to vector<8xf32>
    %797 = vector.shape_cast %796 : vector<8xf32> to vector<8x1xf32>
    %798 = vector.broadcast %797 : vector<8x1xf32> to vector<8x8xf32>
    %799 = arith.subf %795, %798 : vector<8x8xf32>
    %800 = math.exp %799 : vector<8x8xf32>
    %cst_279 = arith.constant dense<0.000000e+00> : vector<8xf32>
    %801 = vector.multi_reduction <add>, %800, %cst_279 [1] : vector<8x8xf32> to vector<8xf32>
    %802 = vector.shape_cast %801 : vector<8xf32> to vector<8x1xf32>
    %803 = tpu.reciprocal %802 {approx = true} : vector<8x1xf32> -> vector<8x1xf32>
    %804 = vector.broadcast %803 : vector<8x1xf32> to vector<8x8xf32>
    %805 = arith.mulf %800, %804 : vector<8x8xf32>
    %806 = vector.extract_strided_slice %743 {offsets = [0, 32], sizes = [8, 16], strides = [1, 1]} : vector<8x64xf32> to vector<8x16xf32>
    %807 = arith.truncf %805 : vector<8x8xf32> to vector<8x8xbf16>
    %808 = arith.truncf %806 : vector<8x16xf32> to vector<8x16xbf16>
    %cst_280 = arith.constant dense<0.000000e+00> : vector<8x16xf32>
    %809 = tpu.matmul %807, %808, %cst_280 {dimension_numbers = #tpu.dot_dimension_numbers<[1], [0], [0], [1], [0, 0, 1, 1], [], []>} : vector<8x8xbf16>, vector<8x16xbf16>, vector<8x16xf32> -> vector<8x16xf32>
    %810 = vector.extract_strided_slice %741 {offsets = [0, 48], sizes = [8, 16], strides = [1, 1]} : vector<8x64xf32> to vector<8x16xf32>
    %811 = vector.extract_strided_slice %742 {offsets = [0, 48], sizes = [8, 16], strides = [1, 1]} : vector<8x64xf32> to vector<8x16xf32>
    %812 = arith.truncf %810 : vector<8x16xf32> to vector<8x16xbf16>
    %813 = arith.truncf %811 : vector<8x16xf32> to vector<8x16xbf16>
    %cst_281 = arith.constant dense<0.000000e+00> : vector<8x8xf32>
    %814 = tpu.matmul %812, %813, %cst_281 {dimension_numbers = #tpu.dot_dimension_numbers<[1], [1], [0], [0], [0, 0, 1, 0], [], []>} : vector<8x16xbf16>, vector<8x16xbf16>, vector<8x8xf32> -> vector<8x8xf32>
    %cst_282 = arith.constant 2.500000e-01 : f32
    %815 = vector.broadcast %cst_282 : f32 to vector<8x8xf32>
    %816 = arith.mulf %814, %815 : vector<8x8xf32>
    %817 = arith.addf %816, %612 : vector<8x8xf32>
    %cst_283 = arith.constant dense<0xFF800000> : vector<8xf32>
    %818 = vector.multi_reduction <maximumf>, %817, %cst_283 [1] : vector<8x8xf32> to vector<8xf32>
    %819 = vector.shape_cast %818 : vector<8xf32> to vector<8x1xf32>
    %820 = vector.broadcast %819 : vector<8x1xf32> to vector<8x8xf32>
    %821 = arith.subf %817, %820 : vector<8x8xf32>
    %822 = math.exp %821 : vector<8x8xf32>
    %cst_284 = arith.constant dense<0.000000e+00> : vector<8xf32>
    %823 = vector.multi_reduction <add>, %822, %cst_284 [1] : vector<8x8xf32> to vector<8xf32>
    %824 = vector.shape_cast %823 : vector<8xf32> to vector<8x1xf32>
    %825 = tpu.reciprocal %824 {approx = true} : vector<8x1xf32> -> vector<8x1xf32>
    %826 = vector.broadcast %825 : vector<8x1xf32> to vector<8x8xf32>
    %827 = arith.mulf %822, %826 : vector<8x8xf32>
    %828 = vector.extract_strided_slice %743 {offsets = [0, 48], sizes = [8, 16], strides = [1, 1]} : vector<8x64xf32> to vector<8x16xf32>
    %829 = arith.truncf %827 : vector<8x8xf32> to vector<8x8xbf16>
    %830 = arith.truncf %828 : vector<8x16xf32> to vector<8x16xbf16>
    %cst_285 = arith.constant dense<0.000000e+00> : vector<8x16xf32>
    %831 = tpu.matmul %829, %830, %cst_285 {dimension_numbers = #tpu.dot_dimension_numbers<[1], [0], [0], [1], [0, 0, 1, 1], [], []>} : vector<8x8xbf16>, vector<8x16xbf16>, vector<8x16xf32> -> vector<8x16xf32>
    %832 = tpu.concatenate %765, %787, %809, %831 in 1 : vector<8x16xf32>, vector<8x16xf32>, vector<8x16xf32>, vector<8x16xf32> -> vector<8x64xf32>
    %833 = tpu.concatenate %740, %832 in 0 : vector<8x64xf32>, vector<8x64xf32> -> vector<16x64xf32>
    %834 = arith.truncf %833 : vector<16x64xf32> to vector<16x64xbf16>
    %cst_286 = arith.constant dense<0.000000e+00> : vector<16x64xf32>
    %835 = tpu.matmul %834, %642, %cst_286 {dimension_numbers = #tpu.dot_dimension_numbers<[1], [0], [0], [1], [0, 0, 1, 1], [], []>} : vector<16x64xbf16>, vector<64x64xbf16>, vector<16x64xf32> -> vector<16x64xf32>
    %836 = vector.broadcast %644 : vector<1x64xf32> to vector<16x64xf32>
    %837 = arith.addf %835, %836 : vector<16x64xf32>
    %838 = arith.addf %591, %837 : vector<16x64xf32>
    %c0_287 = arith.constant 0 : index
    %c0_288 = arith.constant 0 : index
    %c0_289 = arith.constant 0 : index
    %839 = vector.load %arg29[%c0_287, %c0_288, %c0_289] : memref<2x1x64xf32, #tpu.memory_space<vmem>>, vector<1x1x64xf32>
    %840 = vector.shape_cast %839 : vector<1x1x64xf32> to vector<1x64xf32>
    %c0_290 = arith.constant 0 : index
    %c0_291 = arith.constant 0 : index
    %c0_292 = arith.constant 0 : index
    %841 = vector.load %arg30[%c0_290, %c0_291, %c0_292] : memref<2x1x64xf32, #tpu.memory_space<vmem>>, vector<1x1x64xf32>
    %842 = vector.shape_cast %841 : vector<1x1x64xf32> to vector<1x64xf32>
    %cst_293 = arith.constant dense<0.000000e+00> : vector<16xf32>
    %843 = vector.multi_reduction <add>, %838, %cst_293 [1] : vector<16x64xf32> to vector<16xf32>
    %844 = vector.shape_cast %843 : vector<16xf32> to vector<16x1xf32>
    %cst_294 = arith.constant 6.400000e+01 : f32
    %845 = vector.broadcast %cst_294 : f32 to vector<16x1xf32>
    %846 = arith.divf %844, %845 : vector<16x1xf32>
    %847 = vector.broadcast %846 : vector<16x1xf32> to vector<16x64xf32>
    %848 = arith.subf %838, %847 : vector<16x64xf32>
    %849 = arith.mulf %848, %848 : vector<16x64xf32>
    %cst_295 = arith.constant dense<0.000000e+00> : vector<16xf32>
    %850 = vector.multi_reduction <add>, %849, %cst_295 [1] : vector<16x64xf32> to vector<16xf32>
    %851 = vector.shape_cast %850 : vector<16xf32> to vector<16x1xf32>
    %cst_296 = arith.constant 6.400000e+01 : f32
    %852 = vector.broadcast %cst_296 : f32 to vector<16x1xf32>
    %853 = arith.divf %851, %852 : vector<16x1xf32>
    %cst_297 = arith.constant 9.99999974E-6 : f32
    %854 = vector.broadcast %cst_297 : f32 to vector<16x1xf32>
    %855 = arith.addf %853, %854 : vector<16x1xf32>
    %856 = math.rsqrt %855 : vector<16x1xf32>
    %857 = vector.broadcast %856 : vector<16x1xf32> to vector<16x64xf32>
    %858 = arith.mulf %848, %857 : vector<16x64xf32>
    %859 = vector.broadcast %840 : vector<1x64xf32> to vector<16x64xf32>
    %860 = arith.mulf %858, %859 : vector<16x64xf32>
    %861 = vector.broadcast %842 : vector<1x64xf32> to vector<16x64xf32>
    %862 = arith.addf %860, %861 : vector<16x64xf32>
    %c0_298 = arith.constant 0 : index
    %c0_299 = arith.constant 0 : index
    %c0_300 = arith.constant 0 : index
    %863 = vector.load %arg31[%c0_298, %c0_299, %c0_300] : memref<2x64x128xbf16, #tpu.memory_space<vmem>>, vector<1x64x128xbf16>
    %864 = vector.shape_cast %863 : vector<1x64x128xbf16> to vector<64x128xbf16>
    %865 = arith.truncf %862 : vector<16x64xf32> to vector<16x64xbf16>
    %cst_301 = arith.constant dense<0.000000e+00> : vector<16x128xf32>
    %866 = tpu.matmul %865, %864, %cst_301 {dimension_numbers = #tpu.dot_dimension_numbers<[1], [0], [0], [1], [0, 0, 1, 1], [], []>} : vector<16x64xbf16>, vector<64x128xbf16>, vector<16x128xf32> -> vector<16x128xf32>
    %c0_302 = arith.constant 0 : index
    %c0_303 = arith.constant 0 : index
    %c0_304 = arith.constant 0 : index
    %867 = vector.load %arg32[%c0_302, %c0_303, %c0_304] : memref<2x1x128xf32, #tpu.memory_space<vmem>>, vector<1x1x128xf32>
    %868 = vector.shape_cast %867 : vector<1x1x128xf32> to vector<1x128xf32>
    %869 = vector.broadcast %868 : vector<1x128xf32> to vector<16x128xf32>
    %870 = arith.addf %866, %869 : vector<16x128xf32>
    %871 = arith.mulf %870, %870 : vector<16x128xf32>
    %872 = arith.mulf %870, %871 : vector<16x128xf32>
    %cst_305 = arith.constant 4.471500e-02 : f32
    %873 = vector.broadcast %cst_305 : f32 to vector<16x128xf32>
    %874 = arith.mulf %873, %872 : vector<16x128xf32>
    %875 = arith.addf %870, %874 : vector<16x128xf32>
    %cst_306 = arith.constant 0.797884583 : f32
    %876 = vector.broadcast %cst_306 : f32 to vector<16x128xf32>
    %877 = arith.mulf %876, %875 : vector<16x128xf32>
    %878 = math.tanh %877 : vector<16x128xf32>
    %cst_307 = arith.constant 1.000000e+00 : f32
    %879 = vector.broadcast %cst_307 : f32 to vector<16x128xf32>
    %880 = arith.addf %879, %878 : vector<16x128xf32>
    %cst_308 = arith.constant 5.000000e-01 : f32
    %881 = vector.broadcast %cst_308 : f32 to vector<16x128xf32>
    %882 = arith.mulf %881, %880 : vector<16x128xf32>
    %883 = arith.mulf %870, %882 : vector<16x128xf32>
    %c0_309 = arith.constant 0 : index
    %c0_310 = arith.constant 0 : index
    %c0_311 = arith.constant 0 : index
    %884 = vector.load %arg33[%c0_309, %c0_310, %c0_311] : memref<2x128x64xbf16, #tpu.memory_space<vmem>>, vector<1x128x64xbf16>
    %885 = vector.shape_cast %884 : vector<1x128x64xbf16> to vector<128x64xbf16>
    %886 = arith.truncf %883 : vector<16x128xf32> to vector<16x128xbf16>
    %cst_312 = arith.constant dense<0.000000e+00> : vector<16x64xf32>
    %887 = tpu.matmul %886, %885, %cst_312 {dimension_numbers = #tpu.dot_dimension_numbers<[1], [0], [0], [1], [0, 0, 1, 1], [], []>} : vector<16x128xbf16>, vector<128x64xbf16>, vector<16x64xf32> -> vector<16x64xf32>
    %888 = arith.addf %838, %887 : vector<16x64xf32>
    %c0_313 = arith.constant 0 : index
    %c0_314 = arith.constant 0 : index
    %c0_315 = arith.constant 0 : index
    %889 = vector.load %arg34[%c0_313, %c0_314, %c0_315] : memref<2x1x64xf32, #tpu.memory_space<vmem>>, vector<1x1x64xf32>
    %890 = vector.shape_cast %889 : vector<1x1x64xf32> to vector<1x64xf32>
    %891 = vector.broadcast %890 : vector<1x64xf32> to vector<16x64xf32>
    %892 = arith.addf %888, %891 : vector<16x64xf32>
    %c1_316 = arith.constant 1 : index
    %c0_317 = arith.constant 0 : index
    %c0_318 = arith.constant 0 : index
    %893 = vector.load %arg23[%c1_316, %c0_317, %c0_318] : memref<2x1x64xf32, #tpu.memory_space<vmem>>, vector<1x1x64xf32>
    %894 = vector.shape_cast %893 : vector<1x1x64xf32> to vector<1x64xf32>
    %c1_319 = arith.constant 1 : index
    %c0_320 = arith.constant 0 : index
    %c0_321 = arith.constant 0 : index
    %895 = vector.load %arg24[%c1_319, %c0_320, %c0_321] : memref<2x1x64xf32, #tpu.memory_space<vmem>>, vector<1x1x64xf32>
    %896 = vector.shape_cast %895 : vector<1x1x64xf32> to vector<1x64xf32>
    %cst_322 = arith.constant dense<0.000000e+00> : vector<16xf32>
    %897 = vector.multi_reduction <add>, %892, %cst_322 [1] : vector<16x64xf32> to vector<16xf32>
    %898 = vector.shape_cast %897 : vector<16xf32> to vector<16x1xf32>
    %cst_323 = arith.constant 6.400000e+01 : f32
    %899 = vector.broadcast %cst_323 : f32 to vector<16x1xf32>
    %900 = arith.divf %898, %899 : vector<16x1xf32>
    %901 = vector.broadcast %900 : vector<16x1xf32> to vector<16x64xf32>
    %902 = arith.subf %892, %901 : vector<16x64xf32>
    %903 = arith.mulf %902, %902 : vector<16x64xf32>
    %cst_324 = arith.constant dense<0.000000e+00> : vector<16xf32>
    %904 = vector.multi_reduction <add>, %903, %cst_324 [1] : vector<16x64xf32> to vector<16xf32>
    %905 = vector.shape_cast %904 : vector<16xf32> to vector<16x1xf32>
    %cst_325 = arith.constant 6.400000e+01 : f32
    %906 = vector.broadcast %cst_325 : f32 to vector<16x1xf32>
    %907 = arith.divf %905, %906 : vector<16x1xf32>
    %cst_326 = arith.constant 9.99999974E-6 : f32
    %908 = vector.broadcast %cst_326 : f32 to vector<16x1xf32>
    %909 = arith.addf %907, %908 : vector<16x1xf32>
    %910 = math.rsqrt %909 : vector<16x1xf32>
    %911 = vector.broadcast %910 : vector<16x1xf32> to vector<16x64xf32>
    %912 = arith.mulf %902, %911 : vector<16x64xf32>
    %913 = vector.broadcast %894 : vector<1x64xf32> to vector<16x64xf32>
    %914 = arith.mulf %912, %913 : vector<16x64xf32>
    %915 = vector.broadcast %896 : vector<1x64xf32> to vector<16x64xf32>
    %916 = arith.addf %914, %915 : vector<16x64xf32>
    %c1_327 = arith.constant 1 : index
    %c0_328 = arith.constant 0 : index
    %c0_329 = arith.constant 0 : index
    %917 = vector.load %arg25[%c1_327, %c0_328, %c0_329] : memref<2x64x192xbf16, #tpu.memory_space<vmem>>, vector<1x64x192xbf16>
    %918 = vector.shape_cast %917 : vector<1x64x192xbf16> to vector<64x192xbf16>
    %c1_330 = arith.constant 1 : index
    %c0_331 = arith.constant 0 : index
    %c0_332 = arith.constant 0 : index
    %919 = vector.load %arg26[%c1_330, %c0_331, %c0_332] : memref<2x1x192xf32, #tpu.memory_space<vmem>>, vector<1x1x192xf32>
    %920 = vector.shape_cast %919 : vector<1x1x192xf32> to vector<1x192xf32>
    %c1_333 = arith.constant 1 : index
    %c0_334 = arith.constant 0 : index
    %c0_335 = arith.constant 0 : index
    %921 = vector.load %arg27[%c1_333, %c0_334, %c0_335] : memref<2x64x64xbf16, #tpu.memory_space<vmem>>, vector<1x64x64xbf16>
    %922 = vector.shape_cast %921 : vector<1x64x64xbf16> to vector<64x64xbf16>
    %c1_336 = arith.constant 1 : index
    %c0_337 = arith.constant 0 : index
    %c0_338 = arith.constant 0 : index
    %923 = vector.load %arg28[%c1_336, %c0_337, %c0_338] : memref<2x1x64xf32, #tpu.memory_space<vmem>>, vector<1x1x64xf32>
    %924 = vector.shape_cast %923 : vector<1x1x64xf32> to vector<1x64xf32>
    %925 = arith.truncf %916 : vector<16x64xf32> to vector<16x64xbf16>
    %cst_339 = arith.constant dense<0.000000e+00> : vector<16x192xf32>
    %926 = tpu.matmul %925, %918, %cst_339 {dimension_numbers = #tpu.dot_dimension_numbers<[1], [0], [0], [1], [0, 0, 1, 1], [], []>} : vector<16x64xbf16>, vector<64x192xbf16>, vector<16x192xf32> -> vector<16x192xf32>
    %927 = vector.broadcast %920 : vector<1x192xf32> to vector<16x192xf32>
    %928 = arith.addf %926, %927 : vector<16x192xf32>
    %929 = vector.extract_strided_slice %928 {offsets = [0, 0], sizes = [8, 64], strides = [1, 1]} : vector<16x192xf32> to vector<8x64xf32>
    %930 = vector.extract_strided_slice %928 {offsets = [0, 64], sizes = [8, 64], strides = [1, 1]} : vector<16x192xf32> to vector<8x64xf32>
    %931 = vector.extract_strided_slice %928 {offsets = [0, 128], sizes = [8, 64], strides = [1, 1]} : vector<16x192xf32> to vector<8x64xf32>
    %932 = vector.extract_strided_slice %929 {offsets = [0, 0], sizes = [8, 16], strides = [1, 1]} : vector<8x64xf32> to vector<8x16xf32>
    %933 = vector.extract_strided_slice %930 {offsets = [0, 0], sizes = [8, 16], strides = [1, 1]} : vector<8x64xf32> to vector<8x16xf32>
    %934 = arith.truncf %932 : vector<8x16xf32> to vector<8x16xbf16>
    %935 = arith.truncf %933 : vector<8x16xf32> to vector<8x16xbf16>
    %cst_340 = arith.constant dense<0.000000e+00> : vector<8x8xf32>
    %936 = tpu.matmul %934, %935, %cst_340 {dimension_numbers = #tpu.dot_dimension_numbers<[1], [1], [0], [0], [0, 0, 1, 0], [], []>} : vector<8x16xbf16>, vector<8x16xbf16>, vector<8x8xf32> -> vector<8x8xf32>
    %cst_341 = arith.constant 2.500000e-01 : f32
    %937 = vector.broadcast %cst_341 : f32 to vector<8x8xf32>
    %938 = arith.mulf %936, %937 : vector<8x8xf32>
    %939 = arith.addf %938, %603 : vector<8x8xf32>
    %cst_342 = arith.constant dense<0xFF800000> : vector<8xf32>
    %940 = vector.multi_reduction <maximumf>, %939, %cst_342 [1] : vector<8x8xf32> to vector<8xf32>
    %941 = vector.shape_cast %940 : vector<8xf32> to vector<8x1xf32>
    %942 = vector.broadcast %941 : vector<8x1xf32> to vector<8x8xf32>
    %943 = arith.subf %939, %942 : vector<8x8xf32>
    %944 = math.exp %943 : vector<8x8xf32>
    %cst_343 = arith.constant dense<0.000000e+00> : vector<8xf32>
    %945 = vector.multi_reduction <add>, %944, %cst_343 [1] : vector<8x8xf32> to vector<8xf32>
    %946 = vector.shape_cast %945 : vector<8xf32> to vector<8x1xf32>
    %947 = tpu.reciprocal %946 {approx = true} : vector<8x1xf32> -> vector<8x1xf32>
    %948 = vector.broadcast %947 : vector<8x1xf32> to vector<8x8xf32>
    %949 = arith.mulf %944, %948 : vector<8x8xf32>
    %950 = vector.extract_strided_slice %931 {offsets = [0, 0], sizes = [8, 16], strides = [1, 1]} : vector<8x64xf32> to vector<8x16xf32>
    %951 = arith.truncf %949 : vector<8x8xf32> to vector<8x8xbf16>
    %952 = arith.truncf %950 : vector<8x16xf32> to vector<8x16xbf16>
    %cst_344 = arith.constant dense<0.000000e+00> : vector<8x16xf32>
    %953 = tpu.matmul %951, %952, %cst_344 {dimension_numbers = #tpu.dot_dimension_numbers<[1], [0], [0], [1], [0, 0, 1, 1], [], []>} : vector<8x8xbf16>, vector<8x16xbf16>, vector<8x16xf32> -> vector<8x16xf32>
    %954 = vector.extract_strided_slice %929 {offsets = [0, 16], sizes = [8, 16], strides = [1, 1]} : vector<8x64xf32> to vector<8x16xf32>
    %955 = vector.extract_strided_slice %930 {offsets = [0, 16], sizes = [8, 16], strides = [1, 1]} : vector<8x64xf32> to vector<8x16xf32>
    %956 = arith.truncf %954 : vector<8x16xf32> to vector<8x16xbf16>
    %957 = arith.truncf %955 : vector<8x16xf32> to vector<8x16xbf16>
    %cst_345 = arith.constant dense<0.000000e+00> : vector<8x8xf32>
    %958 = tpu.matmul %956, %957, %cst_345 {dimension_numbers = #tpu.dot_dimension_numbers<[1], [1], [0], [0], [0, 0, 1, 0], [], []>} : vector<8x16xbf16>, vector<8x16xbf16>, vector<8x8xf32> -> vector<8x8xf32>
    %cst_346 = arith.constant 2.500000e-01 : f32
    %959 = vector.broadcast %cst_346 : f32 to vector<8x8xf32>
    %960 = arith.mulf %958, %959 : vector<8x8xf32>
    %961 = arith.addf %960, %603 : vector<8x8xf32>
    %cst_347 = arith.constant dense<0xFF800000> : vector<8xf32>
    %962 = vector.multi_reduction <maximumf>, %961, %cst_347 [1] : vector<8x8xf32> to vector<8xf32>
    %963 = vector.shape_cast %962 : vector<8xf32> to vector<8x1xf32>
    %964 = vector.broadcast %963 : vector<8x1xf32> to vector<8x8xf32>
    %965 = arith.subf %961, %964 : vector<8x8xf32>
    %966 = math.exp %965 : vector<8x8xf32>
    %cst_348 = arith.constant dense<0.000000e+00> : vector<8xf32>
    %967 = vector.multi_reduction <add>, %966, %cst_348 [1] : vector<8x8xf32> to vector<8xf32>
    %968 = vector.shape_cast %967 : vector<8xf32> to vector<8x1xf32>
    %969 = tpu.reciprocal %968 {approx = true} : vector<8x1xf32> -> vector<8x1xf32>
    %970 = vector.broadcast %969 : vector<8x1xf32> to vector<8x8xf32>
    %971 = arith.mulf %966, %970 : vector<8x8xf32>
    %972 = vector.extract_strided_slice %931 {offsets = [0, 16], sizes = [8, 16], strides = [1, 1]} : vector<8x64xf32> to vector<8x16xf32>
    %973 = arith.truncf %971 : vector<8x8xf32> to vector<8x8xbf16>
    %974 = arith.truncf %972 : vector<8x16xf32> to vector<8x16xbf16>
    %cst_349 = arith.constant dense<0.000000e+00> : vector<8x16xf32>
    %975 = tpu.matmul %973, %974, %cst_349 {dimension_numbers = #tpu.dot_dimension_numbers<[1], [0], [0], [1], [0, 0, 1, 1], [], []>} : vector<8x8xbf16>, vector<8x16xbf16>, vector<8x16xf32> -> vector<8x16xf32>
    %976 = vector.extract_strided_slice %929 {offsets = [0, 32], sizes = [8, 16], strides = [1, 1]} : vector<8x64xf32> to vector<8x16xf32>
    %977 = vector.extract_strided_slice %930 {offsets = [0, 32], sizes = [8, 16], strides = [1, 1]} : vector<8x64xf32> to vector<8x16xf32>
    %978 = arith.truncf %976 : vector<8x16xf32> to vector<8x16xbf16>
    %979 = arith.truncf %977 : vector<8x16xf32> to vector<8x16xbf16>
    %cst_350 = arith.constant dense<0.000000e+00> : vector<8x8xf32>
    %980 = tpu.matmul %978, %979, %cst_350 {dimension_numbers = #tpu.dot_dimension_numbers<[1], [1], [0], [0], [0, 0, 1, 0], [], []>} : vector<8x16xbf16>, vector<8x16xbf16>, vector<8x8xf32> -> vector<8x8xf32>
    %cst_351 = arith.constant 2.500000e-01 : f32
    %981 = vector.broadcast %cst_351 : f32 to vector<8x8xf32>
    %982 = arith.mulf %980, %981 : vector<8x8xf32>
    %983 = arith.addf %982, %603 : vector<8x8xf32>
    %cst_352 = arith.constant dense<0xFF800000> : vector<8xf32>
    %984 = vector.multi_reduction <maximumf>, %983, %cst_352 [1] : vector<8x8xf32> to vector<8xf32>
    %985 = vector.shape_cast %984 : vector<8xf32> to vector<8x1xf32>
    %986 = vector.broadcast %985 : vector<8x1xf32> to vector<8x8xf32>
    %987 = arith.subf %983, %986 : vector<8x8xf32>
    %988 = math.exp %987 : vector<8x8xf32>
    %cst_353 = arith.constant dense<0.000000e+00> : vector<8xf32>
    %989 = vector.multi_reduction <add>, %988, %cst_353 [1] : vector<8x8xf32> to vector<8xf32>
    %990 = vector.shape_cast %989 : vector<8xf32> to vector<8x1xf32>
    %991 = tpu.reciprocal %990 {approx = true} : vector<8x1xf32> -> vector<8x1xf32>
    %992 = vector.broadcast %991 : vector<8x1xf32> to vector<8x8xf32>
    %993 = arith.mulf %988, %992 : vector<8x8xf32>
    %994 = vector.extract_strided_slice %931 {offsets = [0, 32], sizes = [8, 16], strides = [1, 1]} : vector<8x64xf32> to vector<8x16xf32>
    %995 = arith.truncf %993 : vector<8x8xf32> to vector<8x8xbf16>
    %996 = arith.truncf %994 : vector<8x16xf32> to vector<8x16xbf16>
    %cst_354 = arith.constant dense<0.000000e+00> : vector<8x16xf32>
    %997 = tpu.matmul %995, %996, %cst_354 {dimension_numbers = #tpu.dot_dimension_numbers<[1], [0], [0], [1], [0, 0, 1, 1], [], []>} : vector<8x8xbf16>, vector<8x16xbf16>, vector<8x16xf32> -> vector<8x16xf32>
    %998 = vector.extract_strided_slice %929 {offsets = [0, 48], sizes = [8, 16], strides = [1, 1]} : vector<8x64xf32> to vector<8x16xf32>
    %999 = vector.extract_strided_slice %930 {offsets = [0, 48], sizes = [8, 16], strides = [1, 1]} : vector<8x64xf32> to vector<8x16xf32>
    %1000 = arith.truncf %998 : vector<8x16xf32> to vector<8x16xbf16>
    %1001 = arith.truncf %999 : vector<8x16xf32> to vector<8x16xbf16>
    %cst_355 = arith.constant dense<0.000000e+00> : vector<8x8xf32>
    %1002 = tpu.matmul %1000, %1001, %cst_355 {dimension_numbers = #tpu.dot_dimension_numbers<[1], [1], [0], [0], [0, 0, 1, 0], [], []>} : vector<8x16xbf16>, vector<8x16xbf16>, vector<8x8xf32> -> vector<8x8xf32>
    %cst_356 = arith.constant 2.500000e-01 : f32
    %1003 = vector.broadcast %cst_356 : f32 to vector<8x8xf32>
    %1004 = arith.mulf %1002, %1003 : vector<8x8xf32>
    %1005 = arith.addf %1004, %603 : vector<8x8xf32>
    %cst_357 = arith.constant dense<0xFF800000> : vector<8xf32>
    %1006 = vector.multi_reduction <maximumf>, %1005, %cst_357 [1] : vector<8x8xf32> to vector<8xf32>
    %1007 = vector.shape_cast %1006 : vector<8xf32> to vector<8x1xf32>
    %1008 = vector.broadcast %1007 : vector<8x1xf32> to vector<8x8xf32>
    %1009 = arith.subf %1005, %1008 : vector<8x8xf32>
    %1010 = math.exp %1009 : vector<8x8xf32>
    %cst_358 = arith.constant dense<0.000000e+00> : vector<8xf32>
    %1011 = vector.multi_reduction <add>, %1010, %cst_358 [1] : vector<8x8xf32> to vector<8xf32>
    %1012 = vector.shape_cast %1011 : vector<8xf32> to vector<8x1xf32>
    %1013 = tpu.reciprocal %1012 {approx = true} : vector<8x1xf32> -> vector<8x1xf32>
    %1014 = vector.broadcast %1013 : vector<8x1xf32> to vector<8x8xf32>
    %1015 = arith.mulf %1010, %1014 : vector<8x8xf32>
    %1016 = vector.extract_strided_slice %931 {offsets = [0, 48], sizes = [8, 16], strides = [1, 1]} : vector<8x64xf32> to vector<8x16xf32>
    %1017 = arith.truncf %1015 : vector<8x8xf32> to vector<8x8xbf16>
    %1018 = arith.truncf %1016 : vector<8x16xf32> to vector<8x16xbf16>
    %cst_359 = arith.constant dense<0.000000e+00> : vector<8x16xf32>
    %1019 = tpu.matmul %1017, %1018, %cst_359 {dimension_numbers = #tpu.dot_dimension_numbers<[1], [0], [0], [1], [0, 0, 1, 1], [], []>} : vector<8x8xbf16>, vector<8x16xbf16>, vector<8x16xf32> -> vector<8x16xf32>
    %1020 = tpu.concatenate %953, %975, %997, %1019 in 1 : vector<8x16xf32>, vector<8x16xf32>, vector<8x16xf32>, vector<8x16xf32> -> vector<8x64xf32>
    %1021 = vector.extract_strided_slice %928 {offsets = [8, 0], sizes = [8, 64], strides = [1, 1]} : vector<16x192xf32> to vector<8x64xf32>
    %1022 = vector.extract_strided_slice %928 {offsets = [8, 64], sizes = [8, 64], strides = [1, 1]} : vector<16x192xf32> to vector<8x64xf32>
    %1023 = vector.extract_strided_slice %928 {offsets = [8, 128], sizes = [8, 64], strides = [1, 1]} : vector<16x192xf32> to vector<8x64xf32>
    %1024 = vector.extract_strided_slice %1021 {offsets = [0, 0], sizes = [8, 16], strides = [1, 1]} : vector<8x64xf32> to vector<8x16xf32>
    %1025 = vector.extract_strided_slice %1022 {offsets = [0, 0], sizes = [8, 16], strides = [1, 1]} : vector<8x64xf32> to vector<8x16xf32>
    %1026 = arith.truncf %1024 : vector<8x16xf32> to vector<8x16xbf16>
    %1027 = arith.truncf %1025 : vector<8x16xf32> to vector<8x16xbf16>
    %cst_360 = arith.constant dense<0.000000e+00> : vector<8x8xf32>
    %1028 = tpu.matmul %1026, %1027, %cst_360 {dimension_numbers = #tpu.dot_dimension_numbers<[1], [1], [0], [0], [0, 0, 1, 0], [], []>} : vector<8x16xbf16>, vector<8x16xbf16>, vector<8x8xf32> -> vector<8x8xf32>
    %cst_361 = arith.constant 2.500000e-01 : f32
    %1029 = vector.broadcast %cst_361 : f32 to vector<8x8xf32>
    %1030 = arith.mulf %1028, %1029 : vector<8x8xf32>
    %1031 = arith.addf %1030, %612 : vector<8x8xf32>
    %cst_362 = arith.constant dense<0xFF800000> : vector<8xf32>
    %1032 = vector.multi_reduction <maximumf>, %1031, %cst_362 [1] : vector<8x8xf32> to vector<8xf32>
    %1033 = vector.shape_cast %1032 : vector<8xf32> to vector<8x1xf32>
    %1034 = vector.broadcast %1033 : vector<8x1xf32> to vector<8x8xf32>
    %1035 = arith.subf %1031, %1034 : vector<8x8xf32>
    %1036 = math.exp %1035 : vector<8x8xf32>
    %cst_363 = arith.constant dense<0.000000e+00> : vector<8xf32>
    %1037 = vector.multi_reduction <add>, %1036, %cst_363 [1] : vector<8x8xf32> to vector<8xf32>
    %1038 = vector.shape_cast %1037 : vector<8xf32> to vector<8x1xf32>
    %1039 = tpu.reciprocal %1038 {approx = true} : vector<8x1xf32> -> vector<8x1xf32>
    %1040 = vector.broadcast %1039 : vector<8x1xf32> to vector<8x8xf32>
    %1041 = arith.mulf %1036, %1040 : vector<8x8xf32>
    %1042 = vector.extract_strided_slice %1023 {offsets = [0, 0], sizes = [8, 16], strides = [1, 1]} : vector<8x64xf32> to vector<8x16xf32>
    %1043 = arith.truncf %1041 : vector<8x8xf32> to vector<8x8xbf16>
    %1044 = arith.truncf %1042 : vector<8x16xf32> to vector<8x16xbf16>
    %cst_364 = arith.constant dense<0.000000e+00> : vector<8x16xf32>
    %1045 = tpu.matmul %1043, %1044, %cst_364 {dimension_numbers = #tpu.dot_dimension_numbers<[1], [0], [0], [1], [0, 0, 1, 1], [], []>} : vector<8x8xbf16>, vector<8x16xbf16>, vector<8x16xf32> -> vector<8x16xf32>
    %1046 = vector.extract_strided_slice %1021 {offsets = [0, 16], sizes = [8, 16], strides = [1, 1]} : vector<8x64xf32> to vector<8x16xf32>
    %1047 = vector.extract_strided_slice %1022 {offsets = [0, 16], sizes = [8, 16], strides = [1, 1]} : vector<8x64xf32> to vector<8x16xf32>
    %1048 = arith.truncf %1046 : vector<8x16xf32> to vector<8x16xbf16>
    %1049 = arith.truncf %1047 : vector<8x16xf32> to vector<8x16xbf16>
    %cst_365 = arith.constant dense<0.000000e+00> : vector<8x8xf32>
    %1050 = tpu.matmul %1048, %1049, %cst_365 {dimension_numbers = #tpu.dot_dimension_numbers<[1], [1], [0], [0], [0, 0, 1, 0], [], []>} : vector<8x16xbf16>, vector<8x16xbf16>, vector<8x8xf32> -> vector<8x8xf32>
    %cst_366 = arith.constant 2.500000e-01 : f32
    %1051 = vector.broadcast %cst_366 : f32 to vector<8x8xf32>
    %1052 = arith.mulf %1050, %1051 : vector<8x8xf32>
    %1053 = arith.addf %1052, %612 : vector<8x8xf32>
    %cst_367 = arith.constant dense<0xFF800000> : vector<8xf32>
    %1054 = vector.multi_reduction <maximumf>, %1053, %cst_367 [1] : vector<8x8xf32> to vector<8xf32>
    %1055 = vector.shape_cast %1054 : vector<8xf32> to vector<8x1xf32>
    %1056 = vector.broadcast %1055 : vector<8x1xf32> to vector<8x8xf32>
    %1057 = arith.subf %1053, %1056 : vector<8x8xf32>
    %1058 = math.exp %1057 : vector<8x8xf32>
    %cst_368 = arith.constant dense<0.000000e+00> : vector<8xf32>
    %1059 = vector.multi_reduction <add>, %1058, %cst_368 [1] : vector<8x8xf32> to vector<8xf32>
    %1060 = vector.shape_cast %1059 : vector<8xf32> to vector<8x1xf32>
    %1061 = tpu.reciprocal %1060 {approx = true} : vector<8x1xf32> -> vector<8x1xf32>
    %1062 = vector.broadcast %1061 : vector<8x1xf32> to vector<8x8xf32>
    %1063 = arith.mulf %1058, %1062 : vector<8x8xf32>
    %1064 = vector.extract_strided_slice %1023 {offsets = [0, 16], sizes = [8, 16], strides = [1, 1]} : vector<8x64xf32> to vector<8x16xf32>
    %1065 = arith.truncf %1063 : vector<8x8xf32> to vector<8x8xbf16>
    %1066 = arith.truncf %1064 : vector<8x16xf32> to vector<8x16xbf16>
    %cst_369 = arith.constant dense<0.000000e+00> : vector<8x16xf32>
    %1067 = tpu.matmul %1065, %1066, %cst_369 {dimension_numbers = #tpu.dot_dimension_numbers<[1], [0], [0], [1], [0, 0, 1, 1], [], []>} : vector<8x8xbf16>, vector<8x16xbf16>, vector<8x16xf32> -> vector<8x16xf32>
    %1068 = vector.extract_strided_slice %1021 {offsets = [0, 32], sizes = [8, 16], strides = [1, 1]} : vector<8x64xf32> to vector<8x16xf32>
    %1069 = vector.extract_strided_slice %1022 {offsets = [0, 32], sizes = [8, 16], strides = [1, 1]} : vector<8x64xf32> to vector<8x16xf32>
    %1070 = arith.truncf %1068 : vector<8x16xf32> to vector<8x16xbf16>
    %1071 = arith.truncf %1069 : vector<8x16xf32> to vector<8x16xbf16>
    %cst_370 = arith.constant dense<0.000000e+00> : vector<8x8xf32>
    %1072 = tpu.matmul %1070, %1071, %cst_370 {dimension_numbers = #tpu.dot_dimension_numbers<[1], [1], [0], [0], [0, 0, 1, 0], [], []>} : vector<8x16xbf16>, vector<8x16xbf16>, vector<8x8xf32> -> vector<8x8xf32>
    %cst_371 = arith.constant 2.500000e-01 : f32
    %1073 = vector.broadcast %cst_371 : f32 to vector<8x8xf32>
    %1074 = arith.mulf %1072, %1073 : vector<8x8xf32>
    %1075 = arith.addf %1074, %612 : vector<8x8xf32>
    %cst_372 = arith.constant dense<0xFF800000> : vector<8xf32>
    %1076 = vector.multi_reduction <maximumf>, %1075, %cst_372 [1] : vector<8x8xf32> to vector<8xf32>
    %1077 = vector.shape_cast %1076 : vector<8xf32> to vector<8x1xf32>
    %1078 = vector.broadcast %1077 : vector<8x1xf32> to vector<8x8xf32>
    %1079 = arith.subf %1075, %1078 : vector<8x8xf32>
    %1080 = math.exp %1079 : vector<8x8xf32>
    %cst_373 = arith.constant dense<0.000000e+00> : vector<8xf32>
    %1081 = vector.multi_reduction <add>, %1080, %cst_373 [1] : vector<8x8xf32> to vector<8xf32>
    %1082 = vector.shape_cast %1081 : vector<8xf32> to vector<8x1xf32>
    %1083 = tpu.reciprocal %1082 {approx = true} : vector<8x1xf32> -> vector<8x1xf32>
    %1084 = vector.broadcast %1083 : vector<8x1xf32> to vector<8x8xf32>
    %1085 = arith.mulf %1080, %1084 : vector<8x8xf32>
    %1086 = vector.extract_strided_slice %1023 {offsets = [0, 32], sizes = [8, 16], strides = [1, 1]} : vector<8x64xf32> to vector<8x16xf32>
    %1087 = arith.truncf %1085 : vector<8x8xf32> to vector<8x8xbf16>
    %1088 = arith.truncf %1086 : vector<8x16xf32> to vector<8x16xbf16>
    %cst_374 = arith.constant dense<0.000000e+00> : vector<8x16xf32>
    %1089 = tpu.matmul %1087, %1088, %cst_374 {dimension_numbers = #tpu.dot_dimension_numbers<[1], [0], [0], [1], [0, 0, 1, 1], [], []>} : vector<8x8xbf16>, vector<8x16xbf16>, vector<8x16xf32> -> vector<8x16xf32>
    %1090 = vector.extract_strided_slice %1021 {offsets = [0, 48], sizes = [8, 16], strides = [1, 1]} : vector<8x64xf32> to vector<8x16xf32>
    %1091 = vector.extract_strided_slice %1022 {offsets = [0, 48], sizes = [8, 16], strides = [1, 1]} : vector<8x64xf32> to vector<8x16xf32>
    %1092 = arith.truncf %1090 : vector<8x16xf32> to vector<8x16xbf16>
    %1093 = arith.truncf %1091 : vector<8x16xf32> to vector<8x16xbf16>
    %cst_375 = arith.constant dense<0.000000e+00> : vector<8x8xf32>
    %1094 = tpu.matmul %1092, %1093, %cst_375 {dimension_numbers = #tpu.dot_dimension_numbers<[1], [1], [0], [0], [0, 0, 1, 0], [], []>} : vector<8x16xbf16>, vector<8x16xbf16>, vector<8x8xf32> -> vector<8x8xf32>
    %cst_376 = arith.constant 2.500000e-01 : f32
    %1095 = vector.broadcast %cst_376 : f32 to vector<8x8xf32>
    %1096 = arith.mulf %1094, %1095 : vector<8x8xf32>
    %1097 = arith.addf %1096, %612 : vector<8x8xf32>
    %cst_377 = arith.constant dense<0xFF800000> : vector<8xf32>
    %1098 = vector.multi_reduction <maximumf>, %1097, %cst_377 [1] : vector<8x8xf32> to vector<8xf32>
    %1099 = vector.shape_cast %1098 : vector<8xf32> to vector<8x1xf32>
    %1100 = vector.broadcast %1099 : vector<8x1xf32> to vector<8x8xf32>
    %1101 = arith.subf %1097, %1100 : vector<8x8xf32>
    %1102 = math.exp %1101 : vector<8x8xf32>
    %cst_378 = arith.constant dense<0.000000e+00> : vector<8xf32>
    %1103 = vector.multi_reduction <add>, %1102, %cst_378 [1] : vector<8x8xf32> to vector<8xf32>
    %1104 = vector.shape_cast %1103 : vector<8xf32> to vector<8x1xf32>
    %1105 = tpu.reciprocal %1104 {approx = true} : vector<8x1xf32> -> vector<8x1xf32>
    %1106 = vector.broadcast %1105 : vector<8x1xf32> to vector<8x8xf32>
    %1107 = arith.mulf %1102, %1106 : vector<8x8xf32>
    %1108 = vector.extract_strided_slice %1023 {offsets = [0, 48], sizes = [8, 16], strides = [1, 1]} : vector<8x64xf32> to vector<8x16xf32>
    %1109 = arith.truncf %1107 : vector<8x8xf32> to vector<8x8xbf16>
    %1110 = arith.truncf %1108 : vector<8x16xf32> to vector<8x16xbf16>
    %cst_379 = arith.constant dense<0.000000e+00> : vector<8x16xf32>
    %1111 = tpu.matmul %1109, %1110, %cst_379 {dimension_numbers = #tpu.dot_dimension_numbers<[1], [0], [0], [1], [0, 0, 1, 1], [], []>} : vector<8x8xbf16>, vector<8x16xbf16>, vector<8x16xf32> -> vector<8x16xf32>
    %1112 = tpu.concatenate %1045, %1067, %1089, %1111 in 1 : vector<8x16xf32>, vector<8x16xf32>, vector<8x16xf32>, vector<8x16xf32> -> vector<8x64xf32>
    %1113 = tpu.concatenate %1020, %1112 in 0 : vector<8x64xf32>, vector<8x64xf32> -> vector<16x64xf32>
    %1114 = arith.truncf %1113 : vector<16x64xf32> to vector<16x64xbf16>
    %cst_380 = arith.constant dense<0.000000e+00> : vector<16x64xf32>
    %1115 = tpu.matmul %1114, %922, %cst_380 {dimension_numbers = #tpu.dot_dimension_numbers<[1], [0], [0], [1], [0, 0, 1, 1], [], []>} : vector<16x64xbf16>, vector<64x64xbf16>, vector<16x64xf32> -> vector<16x64xf32>
    %1116 = vector.broadcast %924 : vector<1x64xf32> to vector<16x64xf32>
    %1117 = arith.addf %1115, %1116 : vector<16x64xf32>
    %1118 = arith.addf %892, %1117 : vector<16x64xf32>
    %c1_381 = arith.constant 1 : index
    %c0_382 = arith.constant 0 : index
    %c0_383 = arith.constant 0 : index
    %1119 = vector.load %arg29[%c1_381, %c0_382, %c0_383] : memref<2x1x64xf32, #tpu.memory_space<vmem>>, vector<1x1x64xf32>
    %1120 = vector.shape_cast %1119 : vector<1x1x64xf32> to vector<1x64xf32>
    %c1_384 = arith.constant 1 : index
    %c0_385 = arith.constant 0 : index
    %c0_386 = arith.constant 0 : index
    %1121 = vector.load %arg30[%c1_384, %c0_385, %c0_386] : memref<2x1x64xf32, #tpu.memory_space<vmem>>, vector<1x1x64xf32>
    %1122 = vector.shape_cast %1121 : vector<1x1x64xf32> to vector<1x64xf32>
    %cst_387 = arith.constant dense<0.000000e+00> : vector<16xf32>
    %1123 = vector.multi_reduction <add>, %1118, %cst_387 [1] : vector<16x64xf32> to vector<16xf32>
    %1124 = vector.shape_cast %1123 : vector<16xf32> to vector<16x1xf32>
    %cst_388 = arith.constant 6.400000e+01 : f32
    %1125 = vector.broadcast %cst_388 : f32 to vector<16x1xf32>
    %1126 = arith.divf %1124, %1125 : vector<16x1xf32>
    %1127 = vector.broadcast %1126 : vector<16x1xf32> to vector<16x64xf32>
    %1128 = arith.subf %1118, %1127 : vector<16x64xf32>
    %1129 = arith.mulf %1128, %1128 : vector<16x64xf32>
    %cst_389 = arith.constant dense<0.000000e+00> : vector<16xf32>
    %1130 = vector.multi_reduction <add>, %1129, %cst_389 [1] : vector<16x64xf32> to vector<16xf32>
    %1131 = vector.shape_cast %1130 : vector<16xf32> to vector<16x1xf32>
    %cst_390 = arith.constant 6.400000e+01 : f32
    %1132 = vector.broadcast %cst_390 : f32 to vector<16x1xf32>
    %1133 = arith.divf %1131, %1132 : vector<16x1xf32>
    %cst_391 = arith.constant 9.99999974E-6 : f32
    %1134 = vector.broadcast %cst_391 : f32 to vector<16x1xf32>
    %1135 = arith.addf %1133, %1134 : vector<16x1xf32>
    %1136 = math.rsqrt %1135 : vector<16x1xf32>
    %1137 = vector.broadcast %1136 : vector<16x1xf32> to vector<16x64xf32>
    %1138 = arith.mulf %1128, %1137 : vector<16x64xf32>
    %1139 = vector.broadcast %1120 : vector<1x64xf32> to vector<16x64xf32>
    %1140 = arith.mulf %1138, %1139 : vector<16x64xf32>
    %1141 = vector.broadcast %1122 : vector<1x64xf32> to vector<16x64xf32>
    %1142 = arith.addf %1140, %1141 : vector<16x64xf32>
    %c1_392 = arith.constant 1 : index
    %c0_393 = arith.constant 0 : index
    %c0_394 = arith.constant 0 : index
    %1143 = vector.load %arg31[%c1_392, %c0_393, %c0_394] : memref<2x64x128xbf16, #tpu.memory_space<vmem>>, vector<1x64x128xbf16>
    %1144 = vector.shape_cast %1143 : vector<1x64x128xbf16> to vector<64x128xbf16>
    %1145 = arith.truncf %1142 : vector<16x64xf32> to vector<16x64xbf16>
    %cst_395 = arith.constant dense<0.000000e+00> : vector<16x128xf32>
    %1146 = tpu.matmul %1145, %1144, %cst_395 {dimension_numbers = #tpu.dot_dimension_numbers<[1], [0], [0], [1], [0, 0, 1, 1], [], []>} : vector<16x64xbf16>, vector<64x128xbf16>, vector<16x128xf32> -> vector<16x128xf32>
    %c1_396 = arith.constant 1 : index
    %c0_397 = arith.constant 0 : index
    %c0_398 = arith.constant 0 : index
    %1147 = vector.load %arg32[%c1_396, %c0_397, %c0_398] : memref<2x1x128xf32, #tpu.memory_space<vmem>>, vector<1x1x128xf32>
    %1148 = vector.shape_cast %1147 : vector<1x1x128xf32> to vector<1x128xf32>
    %1149 = vector.broadcast %1148 : vector<1x128xf32> to vector<16x128xf32>
    %1150 = arith.addf %1146, %1149 : vector<16x128xf32>
    %1151 = arith.mulf %1150, %1150 : vector<16x128xf32>
    %1152 = arith.mulf %1150, %1151 : vector<16x128xf32>
    %cst_399 = arith.constant 4.471500e-02 : f32
    %1153 = vector.broadcast %cst_399 : f32 to vector<16x128xf32>
    %1154 = arith.mulf %1153, %1152 : vector<16x128xf32>
    %1155 = arith.addf %1150, %1154 : vector<16x128xf32>
    %cst_400 = arith.constant 0.797884583 : f32
    %1156 = vector.broadcast %cst_400 : f32 to vector<16x128xf32>
    %1157 = arith.mulf %1156, %1155 : vector<16x128xf32>
    %1158 = math.tanh %1157 : vector<16x128xf32>
    %cst_401 = arith.constant 1.000000e+00 : f32
    %1159 = vector.broadcast %cst_401 : f32 to vector<16x128xf32>
    %1160 = arith.addf %1159, %1158 : vector<16x128xf32>
    %cst_402 = arith.constant 5.000000e-01 : f32
    %1161 = vector.broadcast %cst_402 : f32 to vector<16x128xf32>
    %1162 = arith.mulf %1161, %1160 : vector<16x128xf32>
    %1163 = arith.mulf %1150, %1162 : vector<16x128xf32>
    %c1_403 = arith.constant 1 : index
    %c0_404 = arith.constant 0 : index
    %c0_405 = arith.constant 0 : index
    %1164 = vector.load %arg33[%c1_403, %c0_404, %c0_405] : memref<2x128x64xbf16, #tpu.memory_space<vmem>>, vector<1x128x64xbf16>
    %1165 = vector.shape_cast %1164 : vector<1x128x64xbf16> to vector<128x64xbf16>
    %1166 = arith.truncf %1163 : vector<16x128xf32> to vector<16x128xbf16>
    %cst_406 = arith.constant dense<0.000000e+00> : vector<16x64xf32>
    %1167 = tpu.matmul %1166, %1165, %cst_406 {dimension_numbers = #tpu.dot_dimension_numbers<[1], [0], [0], [1], [0, 0, 1, 1], [], []>} : vector<16x128xbf16>, vector<128x64xbf16>, vector<16x64xf32> -> vector<16x64xf32>
    %1168 = arith.addf %1118, %1167 : vector<16x64xf32>
    %c1_407 = arith.constant 1 : index
    %c0_408 = arith.constant 0 : index
    %c0_409 = arith.constant 0 : index
    %1169 = vector.load %arg34[%c1_407, %c0_408, %c0_409] : memref<2x1x64xf32, #tpu.memory_space<vmem>>, vector<1x1x64xf32>
    %1170 = vector.shape_cast %1169 : vector<1x1x64xf32> to vector<1x64xf32>
    %1171 = vector.broadcast %1170 : vector<1x64xf32> to vector<16x64xf32>
    %1172 = arith.addf %1168, %1171 : vector<16x64xf32>
    %c0_410 = arith.constant 0 : index
    %c0_411 = arith.constant 0 : index
    %1173 = vector.load %arg35[%c0_410, %c0_411] : memref<1x64xf32, #tpu.memory_space<vmem>>, vector<1x64xf32>
    %c0_412 = arith.constant 0 : index
    %c0_413 = arith.constant 0 : index
    %1174 = vector.load %arg36[%c0_412, %c0_413] : memref<1x64xf32, #tpu.memory_space<vmem>>, vector<1x64xf32>
    %cst_414 = arith.constant dense<0.000000e+00> : vector<16xf32>
    %1175 = vector.multi_reduction <add>, %1172, %cst_414 [1] : vector<16x64xf32> to vector<16xf32>
    %1176 = vector.shape_cast %1175 : vector<16xf32> to vector<16x1xf32>
    %cst_415 = arith.constant 6.400000e+01 : f32
    %1177 = vector.broadcast %cst_415 : f32 to vector<16x1xf32>
    %1178 = arith.divf %1176, %1177 : vector<16x1xf32>
    %1179 = vector.broadcast %1178 : vector<16x1xf32> to vector<16x64xf32>
    %1180 = arith.subf %1172, %1179 : vector<16x64xf32>
    %1181 = arith.mulf %1180, %1180 : vector<16x64xf32>
    %cst_416 = arith.constant dense<0.000000e+00> : vector<16xf32>
    %1182 = vector.multi_reduction <add>, %1181, %cst_416 [1] : vector<16x64xf32> to vector<16xf32>
    %1183 = vector.shape_cast %1182 : vector<16xf32> to vector<16x1xf32>
    %cst_417 = arith.constant 6.400000e+01 : f32
    %1184 = vector.broadcast %cst_417 : f32 to vector<16x1xf32>
    %1185 = arith.divf %1183, %1184 : vector<16x1xf32>
    %cst_418 = arith.constant 9.99999974E-6 : f32
    %1186 = vector.broadcast %cst_418 : f32 to vector<16x1xf32>
    %1187 = arith.addf %1185, %1186 : vector<16x1xf32>
    %1188 = math.rsqrt %1187 : vector<16x1xf32>
    %1189 = vector.broadcast %1188 : vector<16x1xf32> to vector<16x64xf32>
    %1190 = arith.mulf %1180, %1189 : vector<16x64xf32>
    %1191 = vector.broadcast %1173 : vector<1x64xf32> to vector<16x64xf32>
    %1192 = arith.mulf %1190, %1191 : vector<16x64xf32>
    %1193 = vector.broadcast %1174 : vector<1x64xf32> to vector<16x64xf32>
    %1194 = arith.addf %1192, %1193 : vector<16x64xf32>
    %c0_419 = arith.constant 0 : index
    %c0_420 = arith.constant 0 : index
    %1195 = vector.load %arg37[%c0_419, %c0_420] : memref<128x64xbf16, #tpu.memory_space<vmem>>, vector<128x64xbf16>
    %1196 = arith.truncf %1194 : vector<16x64xf32> to vector<16x64xbf16>
    %cst_421 = arith.constant dense<0.000000e+00> : vector<16x128xf32>
    %1197 = tpu.matmul %1196, %1195, %cst_421 {dimension_numbers = #tpu.dot_dimension_numbers<[1], [1], [0], [0], [0, 0, 1, 0], [], []>} : vector<16x64xbf16>, vector<128x64xbf16>, vector<16x128xf32> -> vector<16x128xf32>
    %c0_422 = arith.constant 0 : index
    %c0_423 = arith.constant 0 : index
    %1198 = vector.load %arg38[%c0_422, %c0_423] : memref<16x128xf32, #tpu.memory_space<vmem>>, vector<16x128xf32>
    tpu.vector_store %arg38[%c0_422, %c0_423], %1197 {strides = array<i32>} : memref<16x128xf32, #tpu.memory_space<vmem>>, vector<16x128xf32>,
    %1199 = tpu.iota {dimensions = array<i32: 1>} : vector<16x128xi32>
    %c96_i32 = arith.constant 96 : i32
    %1200 = vector.broadcast %c96_i32 : i32 to vector<16x128xi32>
    %1201 = arith.cmpi slt, %1199, %1200 : vector<16x128xi32>
    %cst_424 = arith.constant -1.000000e+09 : f32
    %1202 = vector.broadcast %cst_424 : f32 to vector<16x128xf32>
    %1203 = arith.select %1201, %1197, %1202 : vector<16x128xi1>, vector<16x128xf32>
    %cst_425 = arith.constant dense<0xFF800000> : vector<16xf32>
    %1204 = vector.multi_reduction <maximumf>, %1203, %cst_425 [1] : vector<16x128xf32> to vector<16xf32>
    %1205 = vector.shape_cast %1204 : vector<16xf32> to vector<16x1xf32>
    %1206 = vector.broadcast %1205 : vector<16x1xf32> to vector<16x128xf32>
    %1207 = arith.subf %1203, %1206 : vector<16x128xf32>
    %1208 = math.exp %1207 : vector<16x128xf32>
    %cst_426 = arith.constant dense<0.000000e+00> : vector<16xf32>
    %1209 = vector.multi_reduction <add>, %1208, %cst_426 [1] : vector<16x128xf32> to vector<16xf32>
    %1210 = vector.shape_cast %1209 : vector<16xf32> to vector<16x1xf32>
    %1211 = math.log %1210 : vector<16x1xf32>
    %1212 = arith.addf %1211, %1205 : vector<16x1xf32>
    %c0_427 = arith.constant 0 : index
    %c0_428 = arith.constant 0 : index
    %1213 = vector.load %arg22[%c0_427, %c0_428] : memref<16x128xf32, #tpu.memory_space<vmem>>, vector<16x128xf32>
    %1214 = arith.mulf %1197, %1213 : vector<16x128xf32>
    %cst_429 = arith.constant dense<0.000000e+00> : vector<16xf32>
    %1215 = vector.multi_reduction <add>, %1214, %cst_429 [1] : vector<16x128xf32> to vector<16xf32>
    %1216 = vector.shape_cast %1215 : vector<16xf32> to vector<16x1xf32>
    %cst_430 = arith.constant dense<0.000000e+00> : vector<16xf32>
    %1217 = vector.multi_reduction <add>, %1213, %cst_430 [1] : vector<16x128xf32> to vector<16xf32>
    %1218 = vector.shape_cast %1217 : vector<16xf32> to vector<16x1xf32>
    %1219 = arith.subf %1212, %1216 : vector<16x1xf32>
    %1220 = arith.mulf %1219, %1218 : vector<16x1xf32>
    %1221 = vector.shape_cast %1220 : vector<16x1xf32> to vector<1x16x1xf32>
    %cst_431 = arith.constant dense<0.000000e+00> : vector<1xf32>
    %1222 = vector.multi_reduction <add>, %1221, %cst_431 [1, 2] : vector<1x16x1xf32> to vector<1xf32>
    %1223 = vector.shape_cast %1222 : vector<1xf32> to vector<1x1x1xf32>
    %1224 = vector.extract %1223[0, 0, 0] : f32 from vector<1x1x1xf32>
    %1225 = vector.shape_cast %1218 : vector<16x1xf32> to vector<1x16x1xf32>
    %cst_432 = arith.constant dense<0.000000e+00> : vector<1xf32>
    %1226 = vector.multi_reduction <add>, %1225, %cst_432 [1, 2] : vector<1x16x1xf32> to vector<1xf32>
    %1227 = vector.shape_cast %1226 : vector<1xf32> to vector<1x1x1xf32>
    %1228 = vector.extract %1227[0, 0, 0] : f32 from vector<1x1x1xf32>
    %1229 = tpu.iota {dimensions = array<i32: 1>} : vector<1x128xi32>
    %c0_i32 = arith.constant 0 : i32
    %1230 = vector.broadcast %c0_i32 : i32 to vector<1x128xi32>
    %1231 = arith.cmpi eq, %1229, %1230 : vector<1x128xi32>
    %c1_i32 = arith.constant 1 : i32
    %1232 = vector.broadcast %c1_i32 : i32 to vector<1x128xi32>
    %1233 = arith.cmpi eq, %1229, %1232 : vector<1x128xi32>
    %cst_433 = arith.constant 0.000000e+00 : f32
    %1234 = vector.broadcast %1228 : f32 to vector<1x128xf32>
    %1235 = vector.broadcast %cst_433 : f32 to vector<1x128xf32>
    %1236 = arith.select %1233, %1234, %1235 : vector<1x128xi1>, vector<1x128xf32>
    %1237 = vector.broadcast %1224 : f32 to vector<1x128xf32>
    %1238 = arith.select %1231, %1237, %1236 : vector<1x128xi1>, vector<1x128xf32>
    %c0_434 = arith.constant 0 : index
    %c0_435 = arith.constant 0 : index
    %1239 = vector.load %arg39[%c0_434, %c0_435] : memref<1x128xf32, #tpu.memory_space<vmem>>, vector<1x128xf32>
    tpu.vector_store %arg39[%c0_434, %c0_435], %1238 {strides = array<i32>} : memref<1x128xf32, #tpu.memory_space<vmem>>, vector<1x128xf32>,
    return
  }
}

</mosaic_0001>

<bundles_post_ra>
// kernel: tile.9
= control target key start
LH: loop header
LB: loop body
LE: loop exit
PB: predicated region body
PF: predicated region fallthrough
CT: control target
= control target key end

     0   :  { %vm3_vm0 = vcmask 523264   ;;  %s34_s0 = inlined_call_operand.vmem [shape: f32[2,5,64], index: 0, kind: input, shape index: {}]   ;;  %s35_s1 = inlined_call_operand.vmem [shape: f32[10,64], index: 1, kind: output, shape index: {}]  }
   0x1   :  { %v2_v0 = vld [vmem:[%s34_s0] sm:$0x1f]   ;;  %v10_v1 = vld [vmem:[%s34_s0 + $0x8] sm:$0x1f]  }
   0x2   :  { %4 = vst.msk [vmem:[%s35_s1] sm:$0x1f] %vm3_vm0, %v2_v0   ;;  %11 = vst.msk [vmem:[%s35_s1 + $0x5] sm:$0x1f] %vm3_vm0, %v10_v1  }

// kernel: model_forward.1
= control target key start
LH: loop header
LB: loop body
LE: loop exit
PB: predicated region body
PF: predicated region fallthrough
CT: control target
= control target key end

     0   :  { %s8130_s6 = smov 1   ;;  %s8131_s10 = smov 2   ;;  %s9573_s0 = inlined_call_operand.smem [shape: u32[40], index: -1, kind: input, shape index: {}] }
   0x1   :  { %s8192_s5 = sld [smem:[%s9573_s0]]   ;;  %s8132_s14 = smov 3  }
   0x2   :  { %s8197_s9 = sld [smem:[%s9573_s0 + %s8130_s6]]   ;;  %s8133_s18 = smov 4  }
   0x3   :  { %s8202_s13 = sld [smem:[%s9573_s0 + %s8131_s10]]   ;;  %s8134_s22 = smov 5  }
   0x4   :  { %s8207_s17 = sld [smem:[%s9573_s0 + %s8132_s14]]   ;;  %s8135_s26 = smov 6  }
   0x5   :  { %s8212_s21 = sld [smem:[%s9573_s0 + %s8133_s18]]   ;;  %s8136_s30 = smov 7  }
   0x6   :  { %s8217_s25 = sld [smem:[%s9573_s0 + %s8134_s22]]   ;;  %s8137_s4 = smov 8  }
   0x7   :  { %s8222_s29 = sld [smem:[%s9573_s0 + %s8135_s26]]   ;;  %s8138_s10 = smov 9  }
   0x8   :  { %s8227_s3 = sld [smem:[%s9573_s0 + %s8136_s30]]   ;;  %s8139_s15 = smov 10  }
   0x9   :  { %s8232_s8 = sld [smem:[%s9573_s0 + %s8137_s4]]   ;;  %s8140_s20 = smov 11  }
   0xa   :  { %s8237_s14 = sld [smem:[%s9573_s0 + %s8138_s10]]   ;;  %s8141_s26 = smov 12  }
   0xb   :  { %s8242_s19 = sld [smem:[%s9573_s0 + %s8139_s15]]   ;;  %s8142_s1 = smov 13  }
   0xc   :  { %s8247_s24 = sld [smem:[%s9573_s0 + %s8140_s20]]   ;;  %s8143_s7 = smov 14  }
   0xd   :  { %s8252_s30 = sld [smem:[%s9573_s0 + %s8141_s26]]   ;;  %s8144_s15 = smov 15  }
   0xe   :  { %s8257_s6 = sld [smem:[%s9573_s0 + %s8142_s1]]   ;;  %s8145_s22 = smov 16  }
   0xf   :  { %s8262_s12 = sld [smem:[%s9573_s0 + %s8143_s7]]   ;;  %s8146_s28 = smov 17  }
  0x10   :  { %s8267_s20 = sld [smem:[%s9573_s0 + %s8144_s15]]   ;;  %s8147_s7 = smov 18  }
  0x11   :  { %s8272_s27 = sld [smem:[%s9573_s0 + %s8145_s22]]   ;;  %s8148_s15 = smov 19  }
  0x12   :  { %s8277_s4 = sld [smem:[%s9573_s0 + %s8146_s28]]   ;;  %s8149_s22 = smov 20  }
  0x13   :  { %s8150_s28 = smov 21  }
  0x15   :  { %9591 = sst [smem:[#allocation5_spill]] %s8262_s12 }
  0x16   :  { %9592 = sst [smem:[#allocation6_spill]] %s8267_s20 }
  0x17   :  { %9593 = sst [smem:[#allocation7_spill]] %s8272_s27 }
  0x18   :  { %9594 = sst [smem:[#allocation8_spill]] %s8277_s4 }
  0x19   :  { %s8282_s12 = sld [smem:[%s9573_s0 + %s8147_s7]]   ;;  %s8151_s7 = smov 22  }
  0x1a   :  { %s8287_s20 = sld [smem:[%s9573_s0 + %s8148_s15]]   ;;  %s8152_s15 = smov 23  }
  0x1b   :  { %s8292_s27 = sld [smem:[%s9573_s0 + %s8149_s22]]   ;;  %s8153_s22 = smov 24  }
  0x1c   :  { %s8297_s4 = sld [smem:[%s9573_s0 + %s8150_s28]]   ;;  %s8154_s28 = smov 25  }
  0x1f   :  { %9595 = sst [smem:[#allocation9_spill]] %s8282_s12 }
  0x20   :  { %9596 = sst [smem:[#allocation10_spill]] %s8287_s20 }
  0x21   :  { %9597 = sst [smem:[#allocation11_spill]] %s8292_s27 }
  0x22   :  { %9598 = sst [smem:[#allocation12_spill]] %s8297_s4 }
  0x23   :  { %s8302_s12 = sld [smem:[%s9573_s0 + %s8151_s7]]   ;;  %s8155_s7 = smov 26  }
  0x24   :  { %s8307_s20 = sld [smem:[%s9573_s0 + %s8152_s15]]   ;;  %s8156_s15 = smov 27  }
  0x25   :  { %s8312_s27 = sld [smem:[%s9573_s0 + %s8153_s22]]   ;;  %s8157_s22 = smov 28  }
  0x26   :  { %s8317_s4 = sld [smem:[%s9573_s0 + %s8154_s28]]   ;;  %s8158_s28 = smov 29  }
  0x29   :  { %9599 = sst [smem:[#allocation13_spill]] %s8302_s12 }
  0x2a   :  { %9600 = sst [smem:[#allocation14_spill]] %s8307_s20 }
  0x2b   :  { %9601 = sst [smem:[#allocation15_spill]] %s8312_s27 }
  0x2c   :  { %9602 = sst [smem:[#allocation16_spill]] %s8317_s4 }
  0x2d   :  { %s8322_s12 = sld [smem:[%s9573_s0 + %s8155_s7]]   ;;  %s8159_s7 = smov 30  }
  0x2e   :  { %s8327_s20 = sld [smem:[%s9573_s0 + %s8156_s15]]   ;;  %s8160_s15 = smov 31  }
  0x2f   :  { %s8332_s27 = sld [smem:[%s9573_s0 + %s8157_s22]]   ;;  %s8161_s22 = smov 32  }
  0x30   :  { %s8337_s4 = sld [smem:[%s9573_s0 + %s8158_s28]]   ;;  %s8162_s28 = smov 33  }
  0x33   :  { %9603 = sst [smem:[#allocation17_spill]] %s8322_s12 }
  0x34   :  { %9604 = sst [smem:[#allocation18_spill]] %s8327_s20 }
  0x35   :  { %9605 = sst [smem:[#allocation19_spill]] %s8332_s27 }
  0x36   :  { %9606 = sst [smem:[#allocation20_spill]] %s8337_s4 }
  0x37   :  { %s8342_s12 = sld [smem:[%s9573_s0 + %s8159_s7]]   ;;  %s8163_s7 = smov 34  }
  0x38   :  { %s8347_s20 = sld [smem:[%s9573_s0 + %s8160_s15]]   ;;  %s8164_s15 = smov 35  }
  0x39   :  { %s8352_s27 = sld [smem:[%s9573_s0 + %s8161_s22]]   ;;  %s8165_s22 = smov 36  }
  0x3a   :  { %s8357_s4 = sld [smem:[%s9573_s0 + %s8162_s28]]   ;;  %s8166_s28 = smov 37  }
  0x3d   :  { %9607 = sst [smem:[#allocation21_spill]] %s8342_s12 }
  0x3e   :  { %9608 = sst [smem:[#allocation22_spill]] %s8347_s20 }
  0x3f   :  { %9609 = sst [smem:[#allocation23_spill]] %s8352_s27 }
  0x40   :  { %9610 = sst [smem:[#allocation24_spill]] %s8357_s4 }
  0x41   :  { %s8362_s12 = sld [smem:[%s9573_s0 + %s8163_s7]]   ;;  %s8167_s7 = smov 38  }
  0x42   :  { %s8367_s20 = sld [smem:[%s9573_s0 + %s8164_s15]]   ;;  %s8168_s15 = smov 39  }
  0x43   :  { %s8372_s27 = sld [smem:[%s9573_s0 + %s8165_s22]]  }
  0x44   :  { %s8377_s4 = sld [smem:[%s9573_s0 + %s8166_s28]]  }
  0x47   :  { %9611 = sst [smem:[#allocation25_spill]] %s8362_s12 }
  0x48   :  { %9612 = sst [smem:[#allocation26_spill]] %s8367_s20 }
  0x49   :  { %s8382_s12 = sld [smem:[%s9573_s0 + %s8167_s7]]  }
  0x4a   :  { %s8387_s20 = sld [smem:[%s9573_s0 + %s8168_s15]]  }
  0x4b   :  { %v7780_v0 = vld [vmem:[%s8197_s9] sm:$0xff]   ;;  %v8169_v1 = vmov 0   ;;  %v7781_v2 = vld [vmem:[%s8197_s9 + $0x8] sm:$0xff]   ;;  %v7782_v3 = vld [vmem:[%s8197_s9 + $0x10] sm:$0xff]   ;;  %vm267_vm0 = vcmask 523264  }
  0x4c   :  { %271 = vmatprep.subr.bf16.mxu0 %v8169_v1  ;;  %v7783_v4 = vld [vmem:[%s8197_s9 + $0x18] sm:$0xff]   ;;  %v164_v5 = vld [vmem:[%s8192_s5 + $0x8] sm:$0xff]  ;;  %v7784_v7 = vld [vmem:[%s8197_s9 + $0x20] sm:$0xff]  }
  0x4d   :  { %272 = vmatpush1.bf16.msra.mxu0 %v7780_v0  ;;  %v166_v6 = vld [vmem:[%s8192_s5 + $0x18] sm:$0x3]  ;;  %v7785_v9 = vld [vmem:[%s8197_s9 + $0x28] sm:$0xff]   ;;  %v7786_v10 = vld [vmem:[%s8197_s9 + $0x30] sm:$0xff]  }
  0x4e   :  { %273 = vmatprep.subr.bf16.mxu0 %v8169_v1  ;;  %v192_v8 = vpack.c.bf16 %v166_v6, %v164_v5  ;;  %v7787_v11 = vld [vmem:[%s8197_s9 + $0x38] sm:$0xff]   ;;  %v7788_v12 = vld [vmem:[%s8197_s9 + $0x40] sm:$0xff]   ;;  %v7789_v13 = vld [vmem:[%s8197_s9 + $0x48] sm:$0xff]  }
  0x4f   :  { %v7790_v14 = vld [vmem:[%s8197_s9 + $0x50] sm:$0xff]   ;;  %v7791_v15 = vld [vmem:[%s8197_s9 + $0x58] sm:$0xff]   ;;  %v163_v16 = vld [vmem:[%s8192_s5] sm:$0xff] }
  0x50   :  { %6545 = vmatprep.mubr.msk.bf16.mxu0 %vm267_vm0, %v192_v8  ;;  %v165_v17 = vld [vmem:[%s8192_s5 + $0x10] sm:$0x3] }
  0x51   :  { %274 = vmatpush1.bf16.msra.mxu0 %v7781_v2  ;;  %v191_v18 = vpack.c.bf16 %v165_v17, %v163_v16 }
  0x52   :  { %275 = vmatprep.subr.bf16.mxu0 %v8169_v1 }
  0x55   :  { %276 = vmatpush1.bf16.msra.mxu0 %v7782_v3 }
  0x56   :  { %277 = vmatprep.subr.bf16.mxu0 %v8169_v1 }
  0x59   :  { %278 = vmatpush1.bf16.msra.mxu0 %v7783_v4 }
  0x5a   :  { %279 = vmatprep.subr.bf16.mxu0 %v8169_v1 }
  0x5d   :  { %280 = vmatpush1.bf16.msra.mxu0 %v7784_v7 }
  0x5e   :  { %281 = vmatprep.subr.bf16.mxu0 %v8169_v1 }
  0x61   :  { %282 = vmatpush1.bf16.msra.mxu0 %v7785_v9 }
  0x62   :  { %283 = vmatprep.subr.bf16.mxu0 %v8169_v1 }
  0x65   :  { %284 = vmatpush1.bf16.msra.mxu0 %v7786_v10 }
  0x66   :  { %285 = vmatprep.subr.bf16.mxu0 %v8169_v1 }
  0x69   :  { %286 = vmatpush1.bf16.msra.mxu0 %v7787_v11 }
  0x6a   :  { %287 = vmatprep.subr.bf16.mxu0 %v8169_v1 }
  0x6d   :  { %288 = vmatpush1.bf16.msra.mxu0 %v7788_v12 }
  0x6e   :  { %289 = vmatprep.subr.bf16.mxu0 %v8169_v1 }
  0x71   :  { %290 = vmatpush1.bf16.msra.mxu0 %v7789_v13 }
  0x72   :  { %291 = vmatprep.subr.bf16.mxu0 %v8169_v1 }
  0x75   :  { %292 = vmatpush1.bf16.msra.mxu0 %v7790_v14 }
  0x76   :  { %293 = vmatprep.subr.bf16.mxu0 %v8169_v1 }
  0x79   :  { %294 = vmatpush1.bf16.msra.mxu0 %v7791_v15 }
  0x7c   :  { %304 = vmatmul.mubr.bf16.vlgmr.msra.gmra.mrb[0].mxu0 %v191_v18 }
  0x7d   :  { %463 = vmatprep.mubr.bf16.mxu0 %v8169_v1 }
  0x7e   :  { %85 = vsyncpa [#allocation3], 0  ;;  %v193_v19 = vld [vmem:[%s8202_s13] sm:$0xff]  ;;  %v194_v21 = vld [vmem:[%s8202_s13 + $0x8] sm:$0x3]  ;;  %vm317_vm1 = vcmask 517120   ;;  %v378_v0 = vlaneseq }
  0x7f   :  { %v7794_v39 = vld [vmem:[%s8217_s25 + $0x4] ss:$8 sps:$4 sm:$0xff]   ;;  %v7792_v40 = vld [vmem:[%s8217_s25] ss:$8 sps:$4 sm:$0xff]   ;;  %v7797_v41 = vld [vmem:[%s8217_s25 + $0x14] ss:$8 sps:$4 sm:$0xff]  }
  0x80   :  { %431 = vmatprep.subr.bf16.mxu0 %v7794_v39  ;;  %v7795_v42 = vld [vmem:[%s8217_s25 + $0x10] ss:$8 sps:$4 sm:$0xff]   ;;  %v7800_v43 = vld [vmem:[%s8217_s25 + $0x24] ss:$8 sps:$4 sm:$0xff]   ;;  %v7798_v44 = vld [vmem:[%s8217_s25 + $0x20] ss:$8 sps:$4 sm:$0xff]  }
  0x81   :  { %432 = vmatpush1.bf16.msra.mxu0 %v7792_v40  ;;  %v7801_v45 = vld [vmem:[%s8217_s25 + $0x30] ss:$8 sps:$4 sm:$0xff]   ;;  %v7803_v46 = vld [vmem:[%s8217_s25 + $0x34] ss:$8 sps:$4 sm:$0xff]   ;;  %v6546_v55 = vld [vmem:[%s8207_s17] ss:$0 sm:$0xff] }
  0x82   :  { %433 = vmatprep.subr.bf16.mxu0 %v7797_v41  ;;  %v6547_v59 = vld [vmem:[%s8212_s21] ss:$0 sm:$0xff]  ;;  %v8445_v2 = vshrl.u32 %v378_v0, 7  ;;  %v8170_v3 = vmov 0.0   ;;  %vm8171_vm2 = vmmov 0   ;;  %s8172_s0 = smov 64  }
  0x83   :  { %7080 = vmatprep.subr.bf16.mxu1 %v8170_v3  ;;  %v366_v5 = vld [vmem:[%s8222_s29] sm:$0x3]  ;;  %7082 = vmatprep.mubr.msk.bf16.mxu1 %vm8171_vm2, %v8170_v3  ;;  %s8173_s5 = smov 112   ;;  %s8174_s9 = smov 96   ;;  %vm478_vm3 = vcmask 130048   ;;  %vm544_vm4 = vcmask 1041408  }
  0x84   :  { %v8450_v4 = vsub.s32 0, %v8445_v2  ;;  %v8454_v6 = vsub.s32 1, %v8445_v2  ;;  %s8175_s13 = smov 80   ;;  %s8176_s22 = smov 48   ;;  %vm545_vm5 = vcmask 1042432   ;;  %vm526_vm6 = vcmask 36864  }
  0x85   :  { %434 = vmatpush1.bf16.msra.mxu0 %v7795_v42  ;;  %s8177_s23 = smov 32   ;;  %s8178_s26 = smov 16   ;;  %vm540_vm7 = vcmask 39936   ;;  %vm938_vm8 = vcmask 261120   ;;  %vm940_vm9 = vcmask 392192   ;;  %vm1418_vm10 = vcmask 1044480  }
  0x86   :  { %435 = vmatprep.subr.bf16.mxu0 %v7800_v43  ;;  %v381_v7 = vrot.slane %v366_v5, %v8450_v4  ;;  %v385_v9 = vrot.slane %v366_v5, %v8454_v6  ;;  %s9613_s28 = sld [smem:[#allocation5_spill]]  ;;  %vm3237_vm11 = vcmask 1040384   ;;  %vm3595_vm12 = vcmask 1043456   ;;  %s9625_s1 = sld [smem:[#allocation18_spill]] }
  0x87   :  { %s9626_s2 = sld [smem:[#allocation19_spill]]  ;;  %s9627_s7 = sld [smem:[#allocation22_spill]] }
  0x88   :  { %s9628_s10 = sld [smem:[#allocation20_spill]]  ;;  %s9629_s11 = sld [smem:[#allocation21_spill]] }
  0x89   :  { %436 = vmatpush1.bf16.msra.mxu0 %v7798_v44  ;;  %s9630_s15 = sld [smem:[#allocation24_spill]]  ;;  %s9631_s16 = sld [smem:[#allocation23_spill]] }
  0x8a   :  { %437 = vmatprep.subr.bf16.mxu0 %v7803_v46  ;;  %s9632_s18 = sld [smem:[#allocation25_spill]] }
  0x8d   :  { %438 = vmatpush1.bf16.msra.mxu0 %v7801_v45 }
  0x8e   :  { %7104 = vmatprep.subr.bf16.mxu0 %v8170_v3 }
 0x14f   :  { %v305_v20 = vpop.f32.mrb[0].mxu0 }
 0x150   :  { %v8421_v22 = vadd.f32 %v305_v20, %v193_v19  ;;  %v307_v23 = vpop.f32.mrb[1].mxu0 }
 0x151   :  { %v308_v24 = vpop.f32.mrb[2].mxu0 }
 0x152   :  { %v8423_v25 = vadd.f32 %v308_v24, %v194_v21  ;;  %v310_v26 = vpop.f32.mrb[3].mxu0  ;;  %v314_v27 = vsel %vm267_vm0, %v8421_v22, 0.0 }
 0x153   :  { %315 = vadd.xlane.f32.xlu0 %v314_v27 }
 0x154   :  { %v318_v28 = vsel %vm317_vm1, %v8423_v25, 0.0 }
 0x157   :  { %319 = vadd.xlane.f32.xlu0 %v318_v28 }
 0x1e0   :  { %v316_v29 = vpop.xlane.xlu0 %315 }
 0x1e1   :  { %v322_v30 = vmul.f32 0.015625, %v316_v29  ;;  %v8179_v29 = vmov 65535  }
 0x1e3   :  { %v324_v31 = vsub.f32 %v8421_v22, %v322_v30  ;;  %v546_v30 = vsel %vm544_vm4, 4294967295, %v8179_v29 }
 0x1e4   :  { %v320_v32 = vpop.xlane.xlu0 %319 }
 0x1e5   :  { %v323_v33 = vmul.f32 0.015625, %v320_v32  ;;  %v326_v34 = vmul.f32 %v324_v31, %v324_v31  ;;  %v8481_v32 = vsel %vm545_vm5, %v546_v30, 0 }
 0x1e7   :  { %v325_v35 = vsub.f32 %v8423_v25, %v323_v33  ;;  %v328_v36 = vsel %vm267_vm0, %v326_v34, 0.0 }
 0x1e8   :  { %329 = vadd.xlane.f32.xlu1 %v328_v36 }
 0x1e9   :  { %v327_v37 = vmul.f32 %v325_v35, %v325_v35 }
 0x1eb   :  { %v331_v38 = vsel %vm317_vm1, %v327_v37, 0.0 }
 0x1ec   :  { %332 = vadd.xlane.f32.xlu1 %v331_v38 }
 0x275   :  { %v330_v47 = vpop.xlane.xlu1 %329 }
 0x276   :  { %v334_v48 = vmul.f32 0.015625, %v330_v47 }
 0x278   :  { %v336_v49 = vadd.f32 1e-12, %v334_v48 }
 0x279   :  { %v333_v50 = vpop.xlane.xlu1 %332 }
 0x27a   :  { %7916 = vrsqrt.f32 %v336_v49  ;;  %v335_v51 = vmul.f32 0.015625, %v333_v50 }
 0x27c   :  { %v337_v52 = vadd.f32 1e-12, %v335_v51 }
 0x27e   :  { %7918 = vrsqrt.f32 %v337_v52 }
 0x284   :  { %v7917_v53 = vpop.eup %7916 }
 0x285   :  { %v340_v54 = vmul.f32 %v7917_v53, %v324_v31 }
 0x287   :  { %v348_v57 = vmul.f32 %v6546_v55, %v340_v54 }
 0x288   :  { %v7919_v56 = vpop.eup %7918 }
 0x289   :  { %v341_v58 = vmul.f32 %v7919_v56, %v325_v35  ;;  %v356_v61 = vadd.f32 %v6547_v59, %v348_v57 }
 0x28b   :  { %v349_v60 = vmul.f32 %v6546_v55, %v341_v58 }
 0x28d   :  { %v357_v62 = vadd.f32 %v6547_v59, %v349_v60 }
 0x28f   :  { %v376_v63 = vpack.c.bf16 %v357_v62, %v356_v61 }
 0x291   :  { %6556 = vmatmul.mubr.msk.bf16.vlgmr.msra.gmra.mrb[4].mxu0 %vm267_vm0, %v376_v63 }
 0x292   :  { %7106 = vmatprep.mubr.msk.bf16.mxu0 %vm8171_vm2, %v8170_v3 }
 0x364   :  { %v465_v8 = vpop.f32.mrb[4].mxu0 }
 0x365   :  { %v466_v10 = vadd.f32 %v465_v8, %v381_v7  ;;  %v467_v11 = vpop.f32.mrb[5].mxu0 }
 0x366   :  { %v469_v12 = vpop.f32.mrb[6].mxu0  ;;  %v468_v16 = vadd.f32 %v467_v11, %v385_v9 }
 0x367   :  { %v474_v13 = vpack.c.bf16 %v466_v10, %v466_v10  ;;  %v470_v14 = vadd.f32 %v469_v12, %v381_v7  ;;  %v471_v15 = vpop.f32.mrb[7].mxu0 }
 0x368   :  { %v472_v17 = vadd.f32 %v471_v15, %v385_v9  ;;  %v8479_v31 = vpack.c.bf16 %v468_v16, %v468_v16 }
 0x369   :  { %v942_v18 = vpack.c.bf16 %v470_v14, %v466_v10  ;;  %476 = vrot.lane.b32.xlu0 %v474_v13, %s8172_s0 }
 0x36a   :  { %v8463_v19 = vpack.c.bf16 %v472_v17, %v468_v16  ;;  %v549_v33 = vand.u32 %v8481_v32, %v8479_v31 }
 0x36b   :  { %v944_v20 = vshrl.u32 %v942_v18, 16  ;;  %v947_v21 = vshll.u32 %v942_v18, 16 }
 0x36d   :  { %591 = vrot.lane.b32.xlu0 %v474_v13, %s8173_s5  ;;  %v946_v23 = vrot.slane %v944_v20, 2  ;;  %v949_v24 = vrot.slane %v947_v21, 3 }
 0x36f   :  { %v8468_v26 = vor.u32 %v949_v24, %v946_v23 }
 0x371   :  { %703 = vrot.lane.b32.xlu0 %v474_v13, %s8174_s9 }
 0x375   :  { %814 = vrot.lane.b32.xlu0 %v474_v13, %s8175_s13 }
 0x379   :  { %1069 = vrot.lane.b32.xlu0 %v8468_v26, %s8176_s22 }
 0x37d   :  { %1180 = vrot.lane.b32.xlu0 %v8468_v26, %s8177_s23 }
 0x381   :  { %1291 = vrot.lane.b32.xlu0 %v8468_v26, %s8178_s26 }
 0x3db   :  { %v477_v27 = vpop.permute.xlu0 %476 }
 0x3dc   :  { %v483_v28 = vsel %vm478_vm3, %v477_v27, 0 }
 0x3dd   :  { %7081 = vmatpush3.bf16.xpose.msra.mxu1 %v483_v28 }
 0x3de   :  { %7086 = vmatprep.subr.bf16.mxu1 %v8170_v3 }
 0x3df   :  { %v592_v49 = vpop.permute.xlu0 %591 }
 0x3e3   :  { %v704_v54 = vpop.permute.xlu0 %703 }
 0x3e4   :  { %7083 = vmatmul.mubr.msk.bf16.vlgmr.msra.gmra.mrb[0].mxu1 %vm478_vm3, %v474_v13 }
 0x3e5   :  { %7087 = vmatpush3.bf16.msra.mxu1 %v549_v33  ;;  %7088 = vmatprep.mubr.msk.bf16.mxu1 %vm8171_vm2, %v8170_v3 }
 0x3e6   :  { %7092 = vmatprep.subr.bf16.mxu1 %v8170_v3 }
 0x3e7   :  { %v815_v58 = vpop.permute.xlu0 %814 }
 0x3eb   :  { %v1070_v60 = vpop.permute.xlu0 %1069 }
 0x3ec   :  { %v1075_v61 = vsel %vm478_vm3, %v1070_v60, 0 }
 0x3ef   :  { %v1181_v62 = vpop.permute.xlu0 %1180 }
 0x3f0   :  { %v1186_v5 = vsel %vm478_vm3, %v1181_v62, 0 }
 0x3f3   :  { %v1292_v7 = vpop.permute.xlu0 %1291 }
 0x3f4   :  { %v1297_v9 = vsel %vm478_vm3, %v1292_v7, 0 }
 0x4b7   :  { %v519_v34 = vpop.f32.mrb[0].mxu1 }
 0x4b8   :  { %v525_v35 = vmul.f32 0.25, %v519_v34  ;;  %v7084_v36 = vpop.f32.mrb[1].mxu1 }
 0x4b9   :  { %v522_v37 = vpop.f32.mrb[2].mxu1 }
 0x4ba   :  { %v7085_v38 = vpop.f32.mrb[3].mxu1  ;;  %v527_v39 = vsel %vm526_vm6, %v525_v35, -inf }
 0x4bb   :  { %528 = vmax.xlane.f32.xlu1 %v527_v39 }
 0x548   :  { %v529_v40 = vpop.xlane.xlu1 %528 }
 0x549   :  { %v530_v41 = vsub.f32 %v525_v35, %v529_v40 }
 0x54b   :  { %v531_v42 = vmul.f32 1.442695, %v530_v41 }
 0x54d   :  { %7920 = vpow2.f32 %v531_v42 }
 0x557   :  { %v7921_v43 = vpop.eup %7920 }
 0x558   :  { %v533_v44 = vsel %vm526_vm6, %v7921_v43, 0.0 }
 0x559   :  { %534 = vadd.xlane.f32.xlu1 %v533_v44 }
 0x56a   :  { %593 = vrot.lane.b32.xlu1 %v474_v13, %s8176_s22 }
 0x56e   :  { %705 = vrot.lane.b32.xlu1 %v474_v13, %s8177_s23 }
 0x572   :  { %816 = vrot.lane.b32.xlu1 %v474_v13, %s8178_s26 }
 0x576   :  { %951 = vrot.lane.b32.xlu1 %v8468_v26, %s8172_s0 }
 0x57a   :  { %1067 = vrot.lane.b32.xlu1 %v8468_v26, %s8173_s5 }
 0x57e   :  { %1178 = vrot.lane.b32.xlu1 %v8468_v26, %s8174_s9 }
 0x582   :  { %1289 = vrot.lane.b32.xlu1 %v8468_v26, %s8175_s13 }
 0x5e6   :  { %v535_v45 = vpop.xlane.xlu1 %534 }
 0x5e7   :  { %7922 = vrcp.f32 %v535_v45 }
 0x5ea   :  { %v594_v46 = vpop.permute.xlu1 %593 }
 0x5eb   :  { %v599_v55 = vsel %vm478_vm3, %v594_v46, 0 }
 0x5ee   :  { %v706_v47 = vpop.permute.xlu1 %705 }
 0x5ef   :  { %v711_v48 = vsel %vm478_vm3, %v706_v47, 0 }
 0x5f0   :  { %7105 = vmatpush3.bf16.xpose.msra.mxu0 %v711_v48 }
 0x5f1   :  { %v7923_v50 = vpop.eup %7922  ;;  %7116 = vmatprep.subr.bf16.mxu0 %v8170_v3 }
 0x5f2   :  { %v537_v51 = vmul.f32 %v7923_v50, %v7921_v43  ;;  %v817_v52 = vpop.permute.xlu1 %816 }
 0x5f3   :  { %v822_v56 = vsel %vm478_vm3, %v817_v52, 0 }
 0x5f4   :  { %v538_v53 = vpack.c.bf16 %v537_v51, %v537_v51 }
 0x5f6   :  { %7089 = vmatmul.mubr.msk.bf16.vlgmr.msra.gmra.mrb[4].mxu1 %vm540_vm7, %v538_v53  ;;  %v952_v57 = vpop.permute.xlu1 %951 }
 0x5f7   :  { %7093 = vmatpush3.bf16.xpose.msra.mxu1 %v599_v55  ;;  %7107 = vmatmul.mubr.msk.bf16.vlgmr.msra.gmra.mrb[8].mxu0 %vm478_vm3, %v704_v54  ;;  %v957_v59 = vsel %vm478_vm3, %v952_v57, 0 }
 0x5f8   :  { %7117 = vmatpush3.bf16.xpose.msra.mxu0 %v822_v56  ;;  %7094 = vmatprep.mubr.msk.bf16.mxu1 %vm8171_vm2, %v8170_v3 }
 0x5f9   :  { %7118 = vmatprep.mubr.msk.bf16.mxu0 %vm8171_vm2, %v8170_v3  ;;  %7128 = vmatprep.subr.bf16.mxu0 %v8170_v3 }
 0x5fa   :  { %7098 = vmatprep.subr.bf16.mxu1 %v8170_v3  ;;  %v1068_v63 = vpop.permute.xlu1 %1067 }
 0x5fe   :  { %7095 = vmatmul.mubr.msk.bf16.vlgmr.msra.gmra.mrb[8].mxu1 %vm478_vm3, %v592_v49  ;;  %v1179_v8 = vpop.permute.xlu1 %1178 }
 0x5ff   :  { %7119 = vmatmul.mubr.msk.bf16.vlgmr.msra.gmra.mrb[12].mxu0 %vm478_vm3, %v815_v58  ;;  %7100 = vmatprep.mubr.msk.bf16.mxu1 %vm8171_vm2, %v8170_v3 }
 0x600   :  { %7129 = vmatpush3.bf16.xpose.msra.mxu0 %v957_v59  ;;  %7130 = vmatprep.mubr.msk.bf16.mxu0 %vm8171_vm2, %v8170_v3 }
 0x601   :  { %7140 = vmatprep.subr.bf16.mxu0 %v8170_v3 }
 0x602   :  { %v1290_v10 = vpop.permute.xlu1 %1289 }
 0x607   :  { %7131 = vmatmul.mubr.msk.bf16.vlgmr.msra.gmra.mrb[16].mxu0 %vm478_vm3, %v8468_v26 }
 0x608   :  { %7141 = vmatpush3.bf16.xpose.msra.mxu0 %v1075_v61  ;;  %7142 = vmatprep.mubr.msk.bf16.mxu0 %vm8171_vm2, %v8170_v3 }
 0x609   :  { %7152 = vmatprep.subr.bf16.mxu0 %v8170_v3 }
 0x60f   :  { %7143 = vmatmul.mubr.msk.bf16.vlgmr.msra.gmra.mrb[20].mxu0 %vm478_vm3, %v1068_v63 }
 0x610   :  { %7153 = vmatpush3.bf16.xpose.msra.mxu0 %v1186_v5  ;;  %7154 = vmatprep.mubr.msk.bf16.mxu0 %vm8171_vm2, %v8170_v3 }
 0x611   :  { %7164 = vmatprep.subr.bf16.mxu0 %v8170_v3 }
 0x617   :  { %7155 = vmatmul.mubr.msk.bf16.vlgmr.msra.gmra.mrb[24].mxu0 %vm478_vm3, %v1179_v8 }
 0x618   :  { %7165 = vmatpush3.bf16.xpose.msra.mxu0 %v1297_v9  ;;  %7166 = vmatprep.mubr.msk.bf16.mxu0 %vm8171_vm2, %v8170_v3 }
 0x619   :  { %7176 = vmatprep.subr.bf16.mxu0 %v8170_v3 }
 0x61f   :  { %7167 = vmatmul.mubr.msk.bf16.vlgmr.msra.gmra.mrb[28].mxu0 %vm478_vm3, %v1290_v10 }
 0x620   :  { %7184 = vmatprep.mubr.msk.bf16.mxu0 %vm8171_vm2, %v8170_v3 }
 0x6c9   :  { %v8541_v11 = vpop.f32.mrb[4].mxu1 }
 0x6ca   :  { %v7090_v12 = vpop.f32.mrb[5].mxu1  ;;  %v747_v13 = vpop.f32.mrb[8].mxu0 }
 0x6cb   :  { %v753_v14 = vmul.f32 0.25, %v747_v13  ;;  %v588_v15 = vpop.f32.mrb[6].mxu1  ;;  %v7108_v16 = vpop.f32.mrb[9].mxu0 }
 0x6cc   :  { %v7091_v17 = vpop.f32.mrb[7].mxu1  ;;  %v750_v18 = vpop.f32.mrb[10].mxu0 }
 0x6cd   :  { %v7109_v20 = vpop.f32.mrb[11].mxu0  ;;  %v754_v21 = vsel %vm526_vm6, %v753_v14, -inf }
 0x6ce   :  { %755 = vmax.xlane.f32.xlu1 %v754_v21 }
 0x6d1   :  { %v635_v23 = vpop.f32.mrb[8].mxu1 }
 0x6d2   :  { %v641_v24 = vmul.f32 0.25, %v635_v23  ;;  %v7096_v26 = vpop.f32.mrb[9].mxu1  ;;  %v858_v27 = vpop.f32.mrb[12].mxu0 }
 0x6d3   :  { %v638_v28 = vpop.f32.mrb[10].mxu1  ;;  %v7120_v29 = vpop.f32.mrb[13].mxu0  ;;  %v864_v30 = vmul.f32 0.25, %v858_v27 }
 0x6d4   :  { %v7097_v33 = vpop.f32.mrb[11].mxu1  ;;  %v861_v34 = vpop.f32.mrb[14].mxu0  ;;  %v642_v35 = vsel %vm526_vm6, %v641_v24, -inf }
 0x6d5   :  { %643 = vmax.xlane.f32.xlu0 %v642_v35  ;;  %v7121_v36 = vpop.f32.mrb[15].mxu0  ;;  %v865_v37 = vsel %vm526_vm6, %v864_v30, -inf }
 0x6d9   :  { %866 = vmax.xlane.f32.xlu0 %v865_v37 }
 0x6da   :  { %v993_v38 = vpop.f32.mrb[16].mxu0 }
 0x6db   :  { %v999_v39 = vmul.f32 0.25, %v993_v38  ;;  %v7132_v40 = vpop.f32.mrb[17].mxu0 }
 0x6dc   :  { %v996_v41 = vpop.f32.mrb[18].mxu0 }
 0x6dd   :  { %v7133_v42 = vpop.f32.mrb[19].mxu0  ;;  %v1000_v43 = vsel %vm526_vm6, %v999_v39, -inf }
 0x6de   :  { %1001 = vmax.xlane.f32.xlu0 %v1000_v43 }
 0x6e2   :  { %v1111_v44 = vpop.f32.mrb[20].mxu0 }
 0x6e3   :  { %v1117_v45 = vmul.f32 0.25, %v1111_v44  ;;  %v7144_v46 = vpop.f32.mrb[21].mxu0  ;;  %v1014_v44 = vshrl.u32 %v8463_v19, 16 }
 0x6e4   :  { %v1114_v47 = vpop.f32.mrb[22].mxu0 }
 0x6e5   :  { %v7145_v48 = vpop.f32.mrb[23].mxu0  ;;  %v1118_v49 = vsel %vm526_vm6, %v1117_v45, -inf  ;;  %v1016_v46 = vrot.slane %v1014_v44, 2 }
 0x6e6   :  { %1119 = vmax.xlane.f32.xlu0 %v1118_v49 }
 0x6ea   :  { %v1222_v50 = vpop.f32.mrb[24].mxu0 }
 0x6eb   :  { %v1228_v51 = vmul.f32 0.25, %v1222_v50  ;;  %v7156_v52 = vpop.f32.mrb[25].mxu0 }
 0x6ec   :  { %v1225_v53 = vpop.f32.mrb[26].mxu0 }
 0x6ed   :  { %v7157_v54 = vpop.f32.mrb[27].mxu0  ;;  %v1229_v55 = vsel %vm526_vm6, %v1228_v51, -inf }
 0x6ee   :  { %1230 = vmax.xlane.f32.xlu1 %v1229_v55 }
 0x6f2   :  { %v1333_v56 = vpop.f32.mrb[28].mxu0 }
 0x6f3   :  { %v1339_v57 = vmul.f32 0.25, %v1333_v56  ;;  %v7168_v58 = vpop.f32.mrb[29].mxu0 }
 0x6f4   :  { %v1336_v59 = vpop.f32.mrb[30].mxu0 }
 0x6f5   :  { %v7169_v60 = vpop.f32.mrb[31].mxu0  ;;  %v1340_v61 = vsel %vm526_vm6, %v1339_v57, -inf }
 0x6f6   :  { %1341 = vmax.xlane.f32.xlu0 %v1340_v61 }
 0x75b   :  { %v756_v62 = vpop.xlane.xlu1 %755 }
 0x75c   :  { %v757_v63 = vsub.f32 %v753_v14, %v756_v62 }
 0x75e   :  { %v758_v5 = vmul.f32 1.442695, %v757_v63 }
 0x760   :  { %7924 = vpow2.f32 %v758_v5 }
 0x762   :  { %v644_v7 = vpop.xlane.xlu0 %643 }
 0x763   :  { %v645_v13 = vsub.f32 %v641_v24, %v644_v7 }
 0x765   :  { %v646_v18 = vmul.f32 1.442695, %v645_v13 }
 0x766   :  { %v867_v8 = vpop.xlane.xlu0 %866 }
 0x767   :  { %v868_v9 = vsub.f32 %v864_v30, %v867_v8 }
 0x769   :  { %v869_v10 = vmul.f32 1.442695, %v868_v9 }
 0x76a   :  { %v8550_v12 = vpop.eup %7924 }
 0x76b   :  { %7926 = vpow2.f32 %v869_v10  ;;  %v1002_v15 = vpop.xlane.xlu0 %1001  ;;  %v760_v16 = vsel %vm526_vm6, %v8550_v12, 0.0 }
 0x76c   :  { %v1003_v17 = vsub.f32 %v999_v39, %v1002_v15  ;;  %761 = vadd.xlane.f32.xlu0 %v760_v16 }
 0x76e   :  { %v1004_v20 = vmul.f32 1.442695, %v1003_v17 }
 0x770   :  { %7928 = vpow2.f32 %v1004_v20 }
 0x771   :  { %7930 = vpow2.f32 %v646_v18 }
 0x773   :  { %v1120_v28 = vpop.xlane.xlu0 %1119 }
 0x774   :  { %v1121_v37 = vsub.f32 %v1117_v45, %v1120_v28  ;;  %v1017_v45 = vshll.u32 %v8463_v19, 16 }
 0x775   :  { %v8554_v14 = vpop.eup %7926 }
 0x776   :  { %v871_v21 = vsel %vm526_vm6, %v8554_v14, 0.0  ;;  %v1122_v39 = vmul.f32 1.442695, %v1121_v37  ;;  %v1019_v47 = vrot.slane %v1017_v45, 3 }
 0x777   :  { %872 = vadd.xlane.f32.xlu1 %v871_v21 }
 0x778   :  { %v1020_v48 = vor.u32 %v1019_v47, %v1016_v46 }
 0x77a   :  { %v8558_v23 = vpop.eup %7928  ;;  %v1025_v10 = vand.u32 %v1020_v48, %v8481_v32 }
 0x77b   :  { %v1006_v24 = vsel %vm526_vm6, %v8558_v23, 0.0  ;;  %v7931_v26 = vpop.eup %7930  ;;  %v1231_v29 = vpop.xlane.xlu1 %1230 }
 0x77c   :  { %1007 = vadd.xlane.f32.xlu1 %v1006_v24  ;;  %v648_v27 = vsel %vm526_vm6, %v7931_v26, 0.0  ;;  %v1232_v30 = vsub.f32 %v1228_v51, %v1231_v29 }
 0x77e   :  { %v1233_v34 = vmul.f32 1.442695, %v1232_v30 }
 0x780   :  { %649 = vadd.xlane.f32.xlu1 %v648_v27  ;;  %7932 = vpow2.f32 %v1233_v34 }
 0x782   :  { %655 = vrot.lane.b32.xlu0 %v8479_v31, %s8173_s5 }
 0x783   :  { %v1342_v33 = vpop.xlane.xlu0 %1341 }
 0x784   :  { %v1343_v35 = vsub.f32 %v1339_v57, %v1342_v33 }
 0x786   :  { %877 = vrot.lane.b32.xlu0 %v8479_v31, %s8175_s13  ;;  %v1344_v36 = vmul.f32 1.442695, %v1343_v35 }
 0x788   :  { %7934 = vpow2.f32 %v1344_v36 }
 0x789   :  { %7936 = vpow2.f32 %v1122_v39 }
 0x78a   :  { %v8569_v38 = vpop.eup %7932 }
 0x78b   :  { %v1235_v40 = vsel %vm526_vm6, %v8569_v38, 0.0 }
 0x791   :  { %766 = vrot.lane.b32.xlu1 %v8479_v31, %s8174_s9 }
 0x792   :  { %v8573_v41 = vpop.eup %7934 }
 0x793   :  { %v1346_v42 = vsel %vm526_vm6, %v8573_v41, 0.0  ;;  %v8577_v31 = vpop.eup %7936 }
 0x794   :  { %v1124_v43 = vsel %vm526_vm6, %v8577_v31, 0.0 }
 0x7a5   :  { %1236 = vadd.xlane.f32.xlu0 %v1235_v40 }
 0x7a9   :  { %1347 = vadd.xlane.f32.xlu0 %v1346_v42 }
 0x7b5   :  { %1125 = vadd.xlane.f32.xlu1 %v1124_v43 }
 0x7bf   :  { %1241 = vrot.lane.b32.xlu0 %v1020_v48, %s8174_s9 }
 0x7c6   :  { %1130 = vrot.lane.b32.xlu1 %v1020_v48, %s8173_s5 }
 0x7ca   :  { %1352 = vrot.lane.b32.xlu1 %v1020_v48, %s8175_s13 }
 0x7f9   :  { %v762_v49 = vpop.xlane.xlu0 %761 }
 0x7fd   :  { %v656_v50 = vpop.permute.xlu0 %655 }
 0x7fe   :  { %v661_v51 = vand.u32 %v656_v50, %v8481_v32 }
 0x800   :  { %7099 = vmatpush3.bf16.msra.mxu1 %v661_v51 }
 0x801   :  { %7110 = vmatprep.subr.bf16.mxu1 %v8170_v3  ;;  %v878_v61 = vpop.permute.xlu0 %877 }
 0x802   :  { %v883_v5 = vand.u32 %v878_v61, %v8481_v32 }
 0x804   :  { %v873_v52 = vpop.xlane.xlu1 %872 }
 0x809   :  { %v1008_v53 = vpop.xlane.xlu1 %1007 }
 0x80d   :  { %v650_v19 = vpop.xlane.xlu1 %649 }
 0x80e   :  { %7938 = vrcp.f32 %v650_v19 }
 0x80f   :  { %7940 = vrcp.f32 %v762_v49 }
 0x810   :  { %7942 = vrcp.f32 %v873_v52  ;;  %v7804_v52 = vld [vmem:[%s8227_s3] sm:$0xff]  }
 0x811   :  { %v767_v55 = vpop.permute.xlu1 %766  ;;  %7944 = vrcp.f32 %v1008_v53  ;;  %7177 = vmatpush3.bf16.msra.mxu0 %v7804_v52  ;;  %v7805_v53 = vld [vmem:[%s8227_s3 + $0x8] sm:$0xff]  }
 0x812   :  { %v772_v59 = vand.u32 %v767_v55, %v8481_v32  ;;  %7178 = vmatprep.subr.bf16.mxu0 %v8170_v3  ;;  %v7809_v52 = vld [vmem:[%s8247_s24 + $0x8] sm:$0xff]  }
 0x815   :  { %7179 = vmatpush3.bf16.msra.mxu0 %v7805_v53  ;;  %v7810_v53 = vld [vmem:[%s8247_s24 + $0x10] sm:$0xff]  }
 0x816   :  { %7180 = vmatprep.subr.bf16.mxu0 %v8170_v3 }
 0x818   :  { %v7939_v54 = vpop.eup %7938 }
 0x819   :  { %v652_v56 = vmul.f32 %v7939_v54, %v7931_v26  ;;  %v7941_v58 = vpop.eup %7940 }
 0x81a   :  { %v764_v60 = vmul.f32 %v7941_v58, %v8550_v12  ;;  %v7943_v63 = vpop.eup %7942 }
 0x81b   :  { %v653_v57 = vpack.c.bf16 %v652_v56, %v652_v56  ;;  %v875_v7 = vmul.f32 %v7943_v63, %v8554_v14  ;;  %v7945_v9 = vpop.eup %7944 }
 0x81c   :  { %v765_v62 = vpack.c.bf16 %v764_v60, %v764_v60  ;;  %v1010_v12 = vmul.f32 %v7945_v9, %v8558_v23 }
 0x81d   :  { %7101 = vmatmul.mubr.msk.bf16.vlgmr.msra.gmra.mrb[12].mxu1 %vm540_vm7, %v653_v57  ;;  %v876_v8 = vpack.c.bf16 %v875_v7, %v875_v7  ;;  %v7806_v57 = vld [vmem:[%s8227_s3 + $0x10] sm:$0xff]  }
 0x81e   :  { %7111 = vmatpush3.bf16.msra.mxu1 %v772_v59  ;;  %7112 = vmatprep.mubr.msk.bf16.mxu1 %vm8171_vm2, %v8170_v3  ;;  %v1011_v13 = vpack.c.bf16 %v1010_v12, %v1010_v12  ;;  %v7807_v59 = vld [vmem:[%s8227_s3 + $0x18] sm:$0xff]  }
 0x81f   :  { %7122 = vmatprep.subr.bf16.mxu1 %v8170_v3  ;;  %7181 = vmatpush3.bf16.msra.mxu0 %v7806_v57 }
 0x820   :  { %7182 = vmatprep.subr.bf16.mxu0 %v8170_v3 }
 0x823   :  { %7183 = vmatpush3.bf16.msra.mxu0 %v7807_v59 }
 0x824   :  { %7200 = vmatprep.subr.bf16.mxu0 %v8170_v3 }
 0x825   :  { %7113 = vmatmul.mubr.msk.bf16.vlgmr.msra.gmra.mrb[16].mxu1 %vm540_vm7, %v765_v62 }
 0x826   :  { %7123 = vmatpush3.bf16.msra.mxu1 %v883_v5  ;;  %7124 = vmatprep.mubr.msk.bf16.mxu1 %vm8171_vm2, %v8170_v3 }
 0x827   :  { %7134 = vmatprep.subr.bf16.mxu1 %v8170_v3 }
 0x82d   :  { %7125 = vmatmul.mubr.msk.bf16.vlgmr.msra.gmra.mrb[20].mxu1 %vm540_vm7, %v876_v8 }
 0x82e   :  { %7135 = vmatpush3.bf16.msra.mxu1 %v1025_v10  ;;  %7136 = vmatprep.mubr.msk.bf16.mxu1 %vm8171_vm2, %v8170_v3 }
 0x82f   :  { %7146 = vmatprep.subr.bf16.mxu1 %v8170_v3 }
 0x832   :  { %v1237_v15 = vpop.xlane.xlu0 %1236 }
 0x835   :  { %7137 = vmatmul.mubr.msk.bf16.vlgmr.msra.gmra.mrb[24].mxu1 %vm540_vm7, %v1011_v13 }
 0x836   :  { %7148 = vmatprep.mubr.msk.bf16.mxu1 %vm8171_vm2, %v8170_v3  ;;  %v1348_v20 = vpop.xlane.xlu0 %1347 }
 0x83a   :  { %v1242_v21 = vpop.permute.xlu0 %1241 }
 0x83b   :  { %v1247_v27 = vand.u32 %v1242_v21, %v8481_v32 }
 0x842   :  { %v1126_v16 = vpop.xlane.xlu1 %1125 }
 0x843   :  { %7946 = vrcp.f32 %v1126_v16 }
 0x844   :  { %7948 = vrcp.f32 %v1237_v15 }
 0x845   :  { %7950 = vrcp.f32 %v1348_v20 }
 0x846   :  { %v1131_v17 = vpop.permute.xlu1 %1130 }
 0x847   :  { %v1136_v18 = vand.u32 %v1131_v17, %v8481_v32 }
 0x849   :  { %7147 = vmatpush3.bf16.msra.mxu1 %v1136_v18 }
 0x84a   :  { %7158 = vmatprep.subr.bf16.mxu1 %v8170_v3  ;;  %v1353_v29 = vpop.permute.xlu1 %1352 }
 0x84b   :  { %v1358_v34 = vand.u32 %v1353_v29, %v8481_v32 }
 0x84d   :  { %v7947_v14 = vpop.eup %7946 }
 0x84e   :  { %v1128_v23 = vmul.f32 %v7947_v14, %v8577_v31  ;;  %v7949_v26 = vpop.eup %7948 }
 0x84f   :  { %v1239_v28 = vmul.f32 %v7949_v26, %v8569_v38  ;;  %v7951_v33 = vpop.eup %7950 }
 0x850   :  { %v1129_v24 = vpack.c.bf16 %v1128_v23, %v1128_v23  ;;  %v1350_v35 = vmul.f32 %v7951_v33, %v8573_v41 }
 0x851   :  { %v1240_v30 = vpack.c.bf16 %v1239_v28, %v1239_v28 }
 0x852   :  { %7149 = vmatmul.mubr.msk.bf16.vlgmr.msra.gmra.mrb[28].mxu1 %vm540_vm7, %v1129_v24  ;;  %v1351_v36 = vpack.c.bf16 %v1350_v35, %v1350_v35 }
 0x853   :  { %7159 = vmatpush3.bf16.msra.mxu1 %v1247_v27  ;;  %7160 = vmatprep.mubr.msk.bf16.mxu1 %vm8171_vm2, %v8170_v3 }
 0x854   :  { %7170 = vmatprep.subr.bf16.mxu1 %v8170_v3 }
 0x85a   :  { %7161 = vmatmul.mubr.msk.bf16.vlgmr.msra.gmra.mrb[32].mxu1 %vm540_vm7, %v1240_v30 }
 0x85b   :  { %7171 = vmatpush3.bf16.msra.mxu1 %v1358_v34  ;;  %7172 = vmatprep.mubr.msk.bf16.mxu1 %vm8171_vm2, %v8170_v3 }
 0x85c   :  { %7188 = vmatprep.subr.bf16.mxu1 %v8170_v3 }
 0x862   :  { %7173 = vmatmul.mubr.msk.bf16.vlgmr.msra.gmra.mrb[36].mxu1 %vm540_vm7, %v1351_v36 }
 0x863   :  { %7196 = vmatprep.mubr.msk.bf16.mxu1 %vm8171_vm2, %v8170_v3 }
 0x8f0   :  { %v697_v37 = vpop.f32.mrb[12].mxu1 }
 0x8f1   :  { %v7102_v38 = vpop.f32.mrb[13].mxu1 }
 0x8f2   :  { %v700_v39 = vpop.f32.mrb[14].mxu1 }
 0x8f3   :  { %v7103_v40 = vpop.f32.mrb[15].mxu1 }
 0x8f8   :  { %v808_v42 = vpop.f32.mrb[16].mxu1 }
 0x8f9   :  { %v7114_v31 = vpop.f32.mrb[17].mxu1 }
 0x8fa   :  { %v811_v43 = vpop.f32.mrb[18].mxu1 }
 0x8fb   :  { %v7115_v44 = vpop.f32.mrb[19].mxu1 }
 0x900   :  { %v919_v45 = vpop.f32.mrb[20].mxu1 }
 0x901   :  { %v7126_v41 = vpop.f32.mrb[21].mxu1 }
 0x902   :  { %v922_v46 = vpop.f32.mrb[22].mxu1 }
 0x903   :  { %v7127_v47 = vpop.f32.mrb[23].mxu1 }
 0x908   :  { %v1061_v48 = vpop.f32.mrb[24].mxu1 }
 0x909   :  { %v7138_v49 = vpop.f32.mrb[25].mxu1 }
 0x90a   :  { %v1064_v50 = vpop.f32.mrb[26].mxu1 }
 0x90b   :  { %v7139_v51 = vpop.f32.mrb[27].mxu1 }
 0x90c   :  { %v7808_v51 = vld [vmem:[%s8247_s24] sm:$0xff]  }
 0x90d   :  { %7189 = vmatpush3.bf16.msra.mxu1 %v7808_v51 }
 0x90e   :  { %7190 = vmatprep.subr.bf16.mxu1 %v8170_v3 }
 0x911   :  { %7191 = vmatpush3.bf16.msra.mxu1 %v7809_v52  ;;  %v6595_v52 = vld [vmem:[%s9613_s28] ss:$0 sm:$0xff] }
 0x912   :  { %7192 = vmatprep.subr.bf16.mxu1 %v8170_v3 }
 0x915   :  { %7193 = vmatpush3.bf16.msra.mxu1 %v7810_v53 }
 0x916   :  { %7194 = vmatprep.subr.bf16.mxu1 %v8170_v3 }
 0x925   :  { %v1172_v19 = vpop.f32.mrb[28].mxu1 }
 0x926   :  { %v7730_v54 = vpack.i.bf16 %v697_v37, %v1172_v19  ;;  %v7150_v55 = vpop.f32.mrb[29].mxu1  ;;  %v7811_v19 = vld [vmem:[%s8247_s24 + $0x18] sm:$0xff]  }
 0x927   :  { %v1175_v56 = vpop.f32.mrb[30].mxu1  ;;  %7195 = vmatpush3.bf16.msra.mxu1 %v7811_v19 }
 0x928   :  { %7731 = vrot.lane.b32.xlu1 %v7730_v54, %s8178_s26  ;;  %v7151_v58 = vpop.f32.mrb[31].mxu1 }
 0x92d   :  { %v1283_v60 = vpop.f32.mrb[32].mxu1 }
 0x92e   :  { %v7735_v61 = vpack.i.bf16 %v808_v42, %v1283_v60  ;;  %v7162_v62 = vpop.f32.mrb[33].mxu1 }
 0x92f   :  { %v1286_v63 = vpop.f32.mrb[34].mxu1  ;;  %v6579_v62 = vld [vmem:[%s8237_s14] ss:$0 sm:$0xff] }
 0x930   :  { %7736 = vrot.lane.b32.xlu1 %v7735_v61, %s8177_s23  ;;  %v7163_v5 = vpop.f32.mrb[35].mxu1 }
 0x934   :  { %934 = vrot.lane.b32.xlu1 %v919_v45, %s8176_s22 }
 0x935   :  { %v1394_v7 = vpop.f32.mrb[36].mxu1 }
 0x936   :  { %1409 = vrot.lane.b32.xlu0 %v1394_v7, %s8176_s22  ;;  %v7174_v8 = vpop.f32.mrb[37].mxu1 }
 0x937   :  { %v1397_v9 = vpop.f32.mrb[38].mxu1  ;;  %v6580_v8 = vld [vmem:[%s8242_s19] ss:$0 sm:$0xff] }
 0x938   :  { %v7175_v10 = vpop.f32.mrb[39].mxu1 }
 0x99a   :  { %v7732_v12 = vpop.permute.xlu1 %7731 }
 0x99b   :  { %v7734_v15 = vunpack.i.h.bf16 %v7732_v12  ;;  %v7733_v16 = vunpack.i.l.bf16 %v7732_v12 }
 0x99d   :  { %v937_v20 = vsel %vm478_vm3, %v8541_v11, %v7734_v15  ;;  %v1412_v14 = vsel %vm478_vm3, %v1061_v48, %v7733_v16  ;;  %v6573_v11 = vld [vmem:[%s8232_s8] ss:$0 sm:$0xff]  ;;  %v7813_v16 = vld [vmem:[%s8257_s6 + $0x8] sm:$0xff]  }
 0x99e   :  { %v7812_v15 = vld [vmem:[%s8257_s6] sm:$0xff]  }
 0x9a2   :  { %v7737_v13 = vpop.permute.xlu1 %7736 }
 0x9a3   :  { %v7739_v17 = vunpack.i.h.bf16 %v7737_v13  ;;  %v7738_v18 = vunpack.i.l.bf16 %v7737_v13 }
 0x9a5   :  { %v939_v23 = vsel %vm938_vm8, %v937_v20, %v7739_v17  ;;  %v1413_v24 = vsel %vm938_vm8, %v1412_v14, %v7738_v18  ;;  %v7814_v17 = vld [vmem:[%s8257_s6 + $0x10] sm:$0xff]   ;;  %v7815_v18 = vld [vmem:[%s8257_s6 + $0x18] sm:$0xff]   ;;  %v7816_v20 = vld [vmem:[%s8257_s6 + $0x20] sm:$0xff]  }
 0x9a6   :  { %v935_v21 = vpop.permute.xlu1 %934  ;;  %v7817_v14 = vld [vmem:[%s8257_s6 + $0x28] sm:$0xff]  }
 0x9a7   :  { %v941_v29 = vsel %vm940_vm9, %v939_v23, %v935_v21  ;;  %v7818_v21 = vld [vmem:[%s8257_s6 + $0x30] sm:$0xff]   ;;  %v7819_v23 = vld [vmem:[%s8257_s6 + $0x38] sm:$0xff]  }
 0x9a8   :  { %v1410_v26 = vpop.permute.xlu0 %1409 }
 0x9a9   :  { %v1414_v27 = vsel %vm940_vm9, %v1413_v24, %v1410_v26  ;;  %v6581_v24 = vld [vmem:[%s8252_s30] ss:$0 sm:$0xff] }
 0x9aa   :  { %v1416_v28 = vrot.slane %v1414_v27, 3 }
 0x9ac   :  { %v1419_v30 = vsel %vm1418_vm10, %v941_v29, %v1416_v28 }
 0x9ad   :  { %v1420_v33 = vpack.c.bf16 %v1416_v28, %v1419_v30 }
 0x9af   :  { %7185 = vmatmul.mubr.msk.bf16.vlgmr.msra.gmra.mrb[32].mxu0 %vm267_vm0, %v1420_v33 }
 0x9b0   :  { %7216 = vmatprep.mubr.msk.bf16.mxu0 %vm8171_vm2, %v8170_v3  ;;  %7201 = vmatpush3.bf16.msra.mxu0 %v7812_v15  ;;  %v7825_v15 = vld [vmem:[%s8217_s25 + $0x54] ss:$8 sps:$4 sm:$0xff]  }
 0x9b1   :  { %7202 = vmatprep.subr.bf16.mxu0 %v8170_v3 }
 0x9b4   :  { %7203 = vmatpush3.bf16.msra.mxu0 %v7813_v16  ;;  %v7823_v16 = vld [vmem:[%s8217_s25 + $0x50] ss:$8 sps:$4 sm:$0xff]  }
 0x9b5   :  { %7204 = vmatprep.subr.bf16.mxu0 %v8170_v3 }
 0x9b8   :  { %7205 = vmatpush3.bf16.msra.mxu0 %v7814_v17  ;;  %v7828_v17 = vld [vmem:[%s8217_s25 + $0x64] ss:$8 sps:$4 sm:$0xff]  }
 0x9b9   :  { %7206 = vmatprep.subr.bf16.mxu0 %v8170_v3 }
 0x9bc   :  { %7207 = vmatpush3.bf16.msra.mxu0 %v7815_v18  ;;  %v7826_v18 = vld [vmem:[%s8217_s25 + $0x60] ss:$8 sps:$4 sm:$0xff]  }
 0x9bd   :  { %7208 = vmatprep.subr.bf16.mxu0 %v8170_v3 }
 0x9c0   :  { %7209 = vmatpush3.bf16.msra.mxu0 %v7816_v20  ;;  %v7829_v20 = vld [vmem:[%s8217_s25 + $0x70] ss:$8 sps:$4 sm:$0xff]  }
 0x9c1   :  { %7210 = vmatprep.subr.bf16.mxu0 %v8170_v3 }
 0x9c4   :  { %7211 = vmatpush3.bf16.msra.mxu0 %v7817_v14  ;;  %v7831_v14 = vld [vmem:[%s8217_s25 + $0x74] ss:$8 sps:$4 sm:$0xff]  }
 0x9c5   :  { %7212 = vmatprep.subr.bf16.mxu0 %v8170_v3 }
 0x9c8   :  { %7213 = vmatpush3.bf16.msra.mxu0 %v7818_v21 }
 0x9c9   :  { %7214 = vmatprep.subr.bf16.mxu0 %v8170_v3 }
 0x9cc   :  { %7215 = vmatpush3.bf16.msra.mxu0 %v7819_v23 }
 0x9cd   :  { %7232 = vmatprep.subr.bf16.mxu0 %v8170_v3 }
 0xa82   :  { %v1488_v34 = vpop.f32.mrb[32].mxu0 }
 0xa83   :  { %v1489_v35 = vadd.f32 %v6573_v11, %v1488_v34  ;;  %v7186_v36 = vpop.f32.mrb[33].mxu0 }
 0xa84   :  { %v1491_v37 = vpop.f32.mrb[34].mxu0 }
 0xa85   :  { %v8652_v38 = vadd.f32 %v1489_v35, %v8421_v22  ;;  %v1492_v39 = vadd.f32 %v6573_v11, %v1491_v37  ;;  %v7187_v40 = vpop.f32.mrb[35].mxu0 }
 0xa87   :  { %v8655_v42 = vadd.f32 %v1492_v39, %v8423_v25  ;;  %v1499_v31 = vsel %vm267_vm0, %v8652_v38, 0.0 }
 0xa88   :  { %1500 = vadd.xlane.f32.xlu0 %v1499_v31 }
 0xa89   :  { %v1502_v43 = vsel %vm317_vm1, %v8655_v42, 0.0 }
 0xa8a   :  { %1503 = vadd.xlane.f32.xlu1 %v1502_v43 }
 0xb15   :  { %v1501_v44 = vpop.xlane.xlu0 %1500 }
 0xb16   :  { %v1505_v45 = vmul.f32 0.015625, %v1501_v44 }
 0xb17   :  { %v1504_v41 = vpop.xlane.xlu1 %1503 }
 0xb18   :  { %v1507_v22 = vsub.f32 %v8652_v38, %v1505_v45  ;;  %v1506_v46 = vmul.f32 0.015625, %v1504_v41 }
 0xb1a   :  { %v1508_v25 = vsub.f32 %v8655_v42, %v1506_v46  ;;  %v1509_v47 = vmul.f32 %v1507_v22, %v1507_v22 }
 0xb1c   :  { %v1511_v48 = vsel %vm267_vm0, %v1509_v47, 0.0  ;;  %v1510_v49 = vmul.f32 %v1508_v25, %v1508_v25 }
 0xb1d   :  { %1512 = vadd.xlane.f32.xlu0 %v1511_v48 }
 0xb1e   :  { %v1514_v50 = vsel %vm317_vm1, %v1510_v49, 0.0 }
 0xb21   :  { %1515 = vadd.xlane.f32.xlu0 %v1514_v50 }
 0xbaa   :  { %v1513_v54 = vpop.xlane.xlu0 %1512 }
 0xbab   :  { %v1517_v55 = vmul.f32 0.015625, %v1513_v54 }
 0xbad   :  { %v1519_v56 = vadd.f32 1e-12, %v1517_v55 }
 0xbae   :  { %v1516_v57 = vpop.xlane.xlu0 %1515 }
 0xbaf   :  { %7952 = vrsqrt.f32 %v1519_v56  ;;  %v1518_v58 = vmul.f32 0.015625, %v1516_v57 }
 0xbb1   :  { %v1520_v59 = vadd.f32 1e-12, %v1518_v58 }
 0xbb3   :  { %7954 = vrsqrt.f32 %v1520_v59 }
 0xbb9   :  { %v7953_v60 = vpop.eup %7952 }
 0xbba   :  { %v1523_v61 = vmul.f32 %v7953_v60, %v1507_v22 }
 0xbbc   :  { %v1531_v5 = vmul.f32 %v6579_v62, %v1523_v61 }
 0xbbd   :  { %v7955_v63 = vpop.eup %7954 }
 0xbbe   :  { %v1524_v7 = vmul.f32 %v7955_v63, %v1508_v25  ;;  %v1539_v10 = vadd.f32 %v6580_v8, %v1531_v5 }
 0xbc0   :  { %v1532_v9 = vmul.f32 %v6579_v62, %v1524_v7 }
 0xbc2   :  { %v1540_v12 = vadd.f32 %v6580_v8, %v1532_v9 }
 0xbc4   :  { %v1549_v13 = vpack.c.bf16 %v1540_v12, %v1539_v10  ;;  %v7822_v12 = vld [vmem:[%s8217_s25 + $0x44] ss:$8 sps:$4 sm:$0xff]  }
 0xbc5   :  { %1883 = vmatprep.subr.bf16.mxu1 %v7822_v12 }
 0xbc6   :  { %7197 = vmatmul.mubr.msk.bf16.vlgmr.msra.gmra.mrb[40].mxu1 %vm267_vm0, %v1549_v13  ;;  %v7820_v13 = vld [vmem:[%s8217_s25 + $0x40] ss:$8 sps:$4 sm:$0xff]   ;;  %s9616_s25 = sld [smem:[#allocation7_spill]] }
 0xbc7   :  { %1915 = vmatprep.mubr.bf16.mxu1 %v8169_v1  ;;  %1884 = vmatpush1.bf16.msra.mxu1 %v7820_v13 }
 0xbc8   :  { %1885 = vmatprep.subr.bf16.mxu1 %v7825_v15 }
 0xbcb   :  { %1886 = vmatpush1.bf16.msra.mxu1 %v7823_v16 }
 0xbcc   :  { %1887 = vmatprep.subr.bf16.mxu1 %v7828_v17 }
 0xbcf   :  { %1888 = vmatpush1.bf16.msra.mxu1 %v7826_v18 }
 0xbd0   :  { %1889 = vmatprep.subr.bf16.mxu1 %v7831_v14 }
 0xbd3   :  { %1890 = vmatpush1.bf16.msra.mxu1 %v7829_v20 }
 0xbd4   :  { %7220 = vmatprep.subr.bf16.mxu1 %v8170_v3 }
 0xc99   :  { %v1618_v26 = vpop.f32.mrb[40].mxu1 }
 0xc9a   :  { %v1619_v27 = vadd.f32 %v6581_v24, %v1618_v26  ;;  %v7198_v28 = vpop.f32.mrb[41].mxu1 }
 0xc9b   :  { %v1621_v29 = vpop.f32.mrb[42].mxu1 }
 0xc9c   :  { %v1625_v30 = vmul.f32 %v1619_v27, %v1619_v27  ;;  %v1622_v33 = vadd.f32 %v6581_v24, %v1621_v29  ;;  %v7199_v11 = vpop.f32.mrb[43].mxu1 }
 0xc9e   :  { %v1627_v34 = vmul.f32 %v1625_v30, %v1619_v27  ;;  %v1626_v35 = vmul.f32 %v1622_v33, %v1622_v33  ;;  %v6598_v30 = vld [vmem:[%s8207_s17 + $0x1] ss:$0 sm:$0xff]  ;;  %s9614_s17 = sld [smem:[#allocation8_spill]] }
 0xca0   :  { %v1629_v36 = vmul.f32 0.044715, %v1627_v34  ;;  %v1628_v37 = vmul.f32 %v1626_v35, %v1622_v33 }
 0xca2   :  { %v1631_v39 = vadd.f32 %v1629_v36, %v1619_v27  ;;  %v1630_v40 = vmul.f32 0.044715, %v1628_v37  ;;  %v6599_v36 = vld [vmem:[%s8212_s21 + $0x1] ss:$0 sm:$0xff]  ;;  %s9615_s21 = sld [smem:[#allocation6_spill]] }
 0xca4   :  { %v1633_v31 = vmul.f32 0.7978846, %v1631_v39  ;;  %v1632_v43 = vadd.f32 %v1630_v40, %v1622_v33 }
 0xca6   :  { %7956 = vtanh.f32 %v1633_v31  ;;  %v1634_v44 = vmul.f32 0.7978846, %v1632_v43  ;;  %v6608_v43 = vld [vmem:[%s8222_s29 + $0x2] sm:$0x3]  ;;  %s9617_s29 = sld [smem:[#allocation10_spill]] }
 0xca8   :  { %7958 = vtanh.f32 %v1634_v44  ;;  %v1833_v44 = vrot.slane %v6608_v43, %v8450_v4 }
 0xcb0   :  { %v7957_v45 = vpop.eup %7956 }
 0xcb1   :  { %v1637_v41 = vadd.f32 1.0, %v7957_v45 }
 0xcb2   :  { %v7959_v22 = vpop.eup %7958 }
 0xcb3   :  { %v1639_v46 = vmul.f32 0.5, %v1637_v41  ;;  %v1638_v25 = vadd.f32 1.0, %v7959_v22  ;;  %v1837_v41 = vrot.slane %v6608_v43, %v8454_v6 }
 0xcb5   :  { %v1640_v47 = vmul.f32 0.5, %v1638_v25  ;;  %v1641_v48 = vmul.f32 %v1639_v46, %v1619_v27 }
 0xcb7   :  { %v1642_v49 = vmul.f32 %v1640_v47, %v1622_v33 }
 0xcb9   :  { %v1659_v50 = vpack.c.bf16 %v1642_v49, %v1641_v48 }
 0xcbb   :  { %7217 = vmatmul.mubr.bf16.vlgmr.msra.gmra.mrb[36].mxu0 %v1659_v50 }
 0xcbc   :  { %7234 = vmatprep.mubr.msk.bf16.mxu0 %vm8171_vm2, %v8170_v3 }
 0xd8e   :  { %v1742_v51 = vpop.f32.mrb[36].mxu0 }
 0xd8f   :  { %v1749_v53 = vadd.f32 %v1742_v51, %v8652_v38  ;;  %v7218_v19 = vpop.f32.mrb[37].mxu0 }
 0xd90   :  { %v1745_v54 = vpop.f32.mrb[38].mxu0 }
 0xd91   :  { %v8697_v55 = vadd.f32 %v6595_v52, %v1749_v53  ;;  %v1750_v56 = vadd.f32 %v1745_v54, %v8655_v42  ;;  %v7219_v57 = vpop.f32.mrb[39].mxu0 }
 0xd93   :  { %v8700_v58 = vadd.f32 %v6595_v52, %v1750_v56  ;;  %v1764_v59 = vsel %vm267_vm0, %v8697_v55, 0.0 }
 0xd94   :  { %1765 = vadd.xlane.f32.xlu0 %v1764_v59 }
 0xd95   :  { %v1767_v60 = vsel %vm317_vm1, %v8700_v58, 0.0 }
 0xd96   :  { %1768 = vadd.xlane.f32.xlu1 %v1767_v60 }
 0xe21   :  { %v1766_v38 = vpop.xlane.xlu0 %1765 }
 0xe22   :  { %v1770_v61 = vmul.f32 0.015625, %v1766_v38 }
 0xe23   :  { %v1769_v62 = vpop.xlane.xlu1 %1768 }
 0xe24   :  { %v1772_v42 = vsub.f32 %v8697_v55, %v1770_v61  ;;  %v1771_v63 = vmul.f32 0.015625, %v1769_v62 }
 0xe26   :  { %v1773_v5 = vsub.f32 %v8700_v58, %v1771_v63  ;;  %v1774_v7 = vmul.f32 %v1772_v42, %v1772_v42 }
 0xe28   :  { %v1776_v8 = vsel %vm267_vm0, %v1774_v7, 0.0  ;;  %v1775_v9 = vmul.f32 %v1773_v5, %v1773_v5 }
 0xe29   :  { %1777 = vadd.xlane.f32.xlu0 %v1776_v8 }
 0xe2a   :  { %v1779_v10 = vsel %vm317_vm1, %v1775_v9, 0.0 }
 0xe2b   :  { %1780 = vadd.xlane.f32.xlu1 %v1779_v10 }
 0xeb6   :  { %v1778_v21 = vpop.xlane.xlu0 %1777 }
 0xeb7   :  { %v1782_v23 = vmul.f32 0.015625, %v1778_v21 }
 0xeb8   :  { %v1781_v24 = vpop.xlane.xlu1 %1780 }
 0xeb9   :  { %v1784_v26 = vadd.f32 1e-12, %v1782_v23  ;;  %v1783_v27 = vmul.f32 0.015625, %v1781_v24 }
 0xebb   :  { %7960 = vrsqrt.f32 %v1784_v26  ;;  %v1785_v28 = vadd.f32 1e-12, %v1783_v27 }
 0xebd   :  { %7962 = vrsqrt.f32 %v1785_v28 }
 0xec5   :  { %v7961_v29 = vpop.eup %7960 }
 0xec6   :  { %v1788_v33 = vmul.f32 %v7961_v29, %v1772_v42 }
 0xec7   :  { %v7963_v11 = vpop.eup %7962 }
 0xec8   :  { %v1796_v34 = vmul.f32 %v6598_v30, %v1788_v33  ;;  %v1789_v35 = vmul.f32 %v7963_v11, %v1773_v5 }
 0xeca   :  { %v1797_v37 = vmul.f32 %v6598_v30, %v1789_v35  ;;  %v1804_v39 = vadd.f32 %v6599_v36, %v1796_v34 }
 0xecc   :  { %v1805_v40 = vadd.f32 %v6599_v36, %v1797_v37 }
 0xece   :  { %v1828_v31 = vpack.c.bf16 %v1805_v40, %v1804_v39 }
 0xed0   :  { %6626 = vmatmul.mubr.msk.bf16.vlgmr.msra.gmra.mrb[44].mxu1 %vm267_vm0, %v1828_v31 }
 0xed1   :  { %7222 = vmatprep.mubr.msk.bf16.mxu1 %vm8171_vm2, %v8170_v3 }
 0xfa3   :  { %v1917_v45 = vpop.f32.mrb[44].mxu1 }
 0xfa4   :  { %v1918_v22 = vadd.f32 %v1917_v45, %v1833_v44  ;;  %v1919_v46 = vpop.f32.mrb[45].mxu1 }
 0xfa5   :  { %v1921_v25 = vpop.f32.mrb[46].mxu1  ;;  %v1920_v50 = vadd.f32 %v1919_v46, %v1837_v41 }
 0xfa6   :  { %v1926_v47 = vpack.c.bf16 %v1918_v22, %v1918_v22  ;;  %v1922_v48 = vadd.f32 %v1921_v25, %v1833_v44  ;;  %v1923_v49 = vpop.f32.mrb[47].mxu1 }
 0xfa7   :  { %v1924_v51 = vadd.f32 %v1923_v49, %v1837_v41  ;;  %v8747_v42 = vpack.c.bf16 %v1920_v50, %v1920_v50 }
 0xfa8   :  { %v2385_v52 = vpack.c.bf16 %v1922_v48, %v1918_v22  ;;  %2038 = vrot.lane.b32.xlu1 %v1926_v47, %s8176_s22  ;;  %1928 = vrot.lane.b32.xlu0 %v1926_v47, %s8172_s0 }
 0xfa9   :  { %v8729_v53 = vpack.c.bf16 %v1924_v51, %v1920_v50  ;;  %v1994_v7 = vand.u32 %v8747_v42, %v8481_v32 }
 0xfaa   :  { %v2387_v19 = vshrl.u32 %v2385_v52, 16  ;;  %v2390_v54 = vshll.u32 %v2385_v52, 16 }
 0xfac   :  { %2036 = vrot.lane.b32.xlu1 %v1926_v47, %s8173_s5  ;;  %2148 = vrot.lane.b32.xlu0 %v1926_v47, %s8174_s9  ;;  %v2389_v56 = vrot.slane %v2387_v19, 2  ;;  %v2392_v57 = vrot.slane %v2390_v54, 3 }
 0xfae   :  { %v2393_v59 = vor.u32 %v2392_v57, %v2389_v56 }
 0xfb0   :  { %2150 = vrot.lane.b32.xlu1 %v1926_v47, %s8177_s23  ;;  %2259 = vrot.lane.b32.xlu0 %v1926_v47, %s8175_s13 }
 0xfb4   :  { %2261 = vrot.lane.b32.xlu1 %v1926_v47, %s8178_s26  ;;  %2512 = vrot.lane.b32.xlu0 %v2393_v59, %s8176_s22 }
 0xfb8   :  { %2394 = vrot.lane.b32.xlu1 %v2393_v59, %s8172_s0  ;;  %2623 = vrot.lane.b32.xlu0 %v2393_v59, %s8177_s23 }
 0xfbc   :  { %2510 = vrot.lane.b32.xlu1 %v2393_v59, %s8173_s5  ;;  %2734 = vrot.lane.b32.xlu0 %v2393_v59, %s8178_s26 }
 0xfc0   :  { %2621 = vrot.lane.b32.xlu1 %v2393_v59, %s8174_s9 }
 0xfc4   :  { %2732 = vrot.lane.b32.xlu1 %v2393_v59, %s8175_s13 }
0x101a   :  { %v2039_v60 = vpop.permute.xlu1 %2038  ;;  %v1929_v38 = vpop.permute.xlu0 %1928 }
0x101b   :  { %v2044_v61 = vsel %vm478_vm3, %v2039_v60, 0  ;;  %v1934_v62 = vsel %vm478_vm3, %v1929_v38, 0 }
0x101c   :  { %7221 = vmatpush3.bf16.xpose.msra.mxu1 %v1934_v62  ;;  %7233 = vmatpush3.bf16.xpose.msra.mxu0 %v2044_v61 }
0x101d   :  { %7226 = vmatprep.subr.bf16.mxu1 %v8170_v3  ;;  %7244 = vmatprep.subr.bf16.mxu0 %v8170_v3 }
0x101e   :  { %v2037_v63 = vpop.permute.xlu1 %2036  ;;  %v2149_v10 = vpop.permute.xlu0 %2148 }
0x1022   :  { %v2151_v5 = vpop.permute.xlu1 %2150  ;;  %v2260_v15 = vpop.permute.xlu0 %2259 }
0x1023   :  { %v2156_v8 = vsel %vm478_vm3, %v2151_v5, 0  ;;  %7223 = vmatmul.mubr.msk.bf16.vlgmr.msra.gmra.mrb[48].mxu1 %vm478_vm3, %v1926_v47  ;;  %7235 = vmatmul.mubr.msk.bf16.vlgmr.msra.gmra.mrb[40].mxu0 %vm478_vm3, %v2037_v63 }
0x1024   :  { %7227 = vmatpush3.bf16.msra.mxu1 %v1994_v7  ;;  %7245 = vmatpush3.bf16.xpose.msra.mxu0 %v2156_v8 }
0x1025   :  { %7246 = vmatprep.mubr.msk.bf16.mxu0 %vm8171_vm2, %v8170_v3  ;;  %7256 = vmatprep.subr.bf16.mxu0 %v8170_v3 }
0x1026   :  { %7228 = vmatprep.mubr.msk.bf16.mxu1 %vm8171_vm2, %v8170_v3  ;;  %7238 = vmatprep.subr.bf16.mxu1 %v8170_v3  ;;  %v2262_v9 = vpop.permute.xlu1 %2261  ;;  %v2513_v17 = vpop.permute.xlu0 %2512 }
0x1027   :  { %v2267_v12 = vsel %vm478_vm3, %v2262_v9, 0  ;;  %v2518_v18 = vsel %vm478_vm3, %v2513_v17, 0 }
0x102a   :  { %v2395_v13 = vpop.permute.xlu1 %2394  ;;  %v2624_v20 = vpop.permute.xlu0 %2623 }
0x102b   :  { %7247 = vmatmul.mubr.msk.bf16.vlgmr.msra.gmra.mrb[44].mxu0 %vm478_vm3, %v2149_v10  ;;  %v2400_v16 = vsel %vm478_vm3, %v2395_v13, 0  ;;  %v2629_v21 = vsel %vm478_vm3, %v2624_v20, 0 }
0x102c   :  { %7257 = vmatpush3.bf16.xpose.msra.mxu0 %v2267_v12  ;;  %7258 = vmatprep.mubr.msk.bf16.mxu0 %vm8171_vm2, %v8170_v3 }
0x102d   :  { %7268 = vmatprep.subr.bf16.mxu0 %v8170_v3 }
0x102e   :  { %v2511_v14 = vpop.permute.xlu1 %2510  ;;  %v2735_v23 = vpop.permute.xlu0 %2734 }
0x102f   :  { %v2740_v26 = vsel %vm478_vm3, %v2735_v23, 0 }
0x1032   :  { %v2622_v24 = vpop.permute.xlu1 %2621 }
0x1033   :  { %7259 = vmatmul.mubr.msk.bf16.vlgmr.msra.gmra.mrb[48].mxu0 %vm478_vm3, %v2260_v15 }
0x1034   :  { %7269 = vmatpush3.bf16.xpose.msra.mxu0 %v2400_v16  ;;  %7270 = vmatprep.mubr.msk.bf16.mxu0 %vm8171_vm2, %v8170_v3 }
0x1035   :  { %7280 = vmatprep.subr.bf16.mxu0 %v8170_v3 }
0x1036   :  { %v2733_v27 = vpop.permute.xlu1 %2732 }
0x103b   :  { %7271 = vmatmul.mubr.msk.bf16.vlgmr.msra.gmra.mrb[52].mxu0 %vm478_vm3, %v2393_v59 }
0x103c   :  { %7281 = vmatpush3.bf16.xpose.msra.mxu0 %v2518_v18  ;;  %7282 = vmatprep.mubr.msk.bf16.mxu0 %vm8171_vm2, %v8170_v3 }
0x103d   :  { %7292 = vmatprep.subr.bf16.mxu0 %v8170_v3 }
0x1043   :  { %7283 = vmatmul.mubr.msk.bf16.vlgmr.msra.gmra.mrb[56].mxu0 %vm478_vm3, %v2511_v14 }
0x1044   :  { %7293 = vmatpush3.bf16.xpose.msra.mxu0 %v2629_v21  ;;  %7294 = vmatprep.mubr.msk.bf16.mxu0 %vm8171_vm2, %v8170_v3 }
0x1045   :  { %7304 = vmatprep.subr.bf16.mxu0 %v8170_v3 }
0x104b   :  { %7295 = vmatmul.mubr.msk.bf16.vlgmr.msra.gmra.mrb[60].mxu0 %vm478_vm3, %v2622_v24 }
0x104c   :  { %7305 = vmatpush3.bf16.xpose.msra.mxu0 %v2740_v26  ;;  %7306 = vmatprep.mubr.msk.bf16.mxu0 %vm8171_vm2, %v8170_v3 }
0x104d   :  { %7316 = vmatprep.subr.bf16.mxu0 %v8170_v3 }
0x1053   :  { %7307 = vmatmul.mubr.msk.bf16.vlgmr.msra.gmra.mrb[64].mxu0 %vm478_vm3, %v2733_v27 }
0x1054   :  { %7324 = vmatprep.mubr.msk.bf16.mxu0 %vm8171_vm2, %v8170_v3 }
0x10f6   :  { %v1970_v28 = vpop.f32.mrb[48].mxu1  ;;  %v2080_v29 = vpop.f32.mrb[40].mxu0 }
0x10f7   :  { %v1976_v30 = vmul.f32 0.25, %v1970_v28  ;;  %v2086_v33 = vmul.f32 0.25, %v2080_v29  ;;  %v7224_v11 = vpop.f32.mrb[49].mxu1  ;;  %v7236_v34 = vpop.f32.mrb[41].mxu0 }
0x10f8   :  { %v1973_v35 = vpop.f32.mrb[50].mxu1  ;;  %v2083_v36 = vpop.f32.mrb[42].mxu0 }
0x10f9   :  { %v7225_v37 = vpop.f32.mrb[51].mxu1  ;;  %v7237_v39 = vpop.f32.mrb[43].mxu0  ;;  %v2087_v40 = vsel %vm526_vm6, %v2086_v33, -inf  ;;  %v1977_v31 = vsel %vm526_vm6, %v1976_v30, -inf }
0x10fa   :  { %2088 = vmax.xlane.f32.xlu1 %v2087_v40  ;;  %1978 = vmax.xlane.f32.xlu0 %v1977_v31 }
0x10fe   :  { %v2192_v43 = vpop.f32.mrb[44].mxu0 }
0x10ff   :  { %v2198_v44 = vmul.f32 0.25, %v2192_v43  ;;  %v7248_v45 = vpop.f32.mrb[45].mxu0 }
0x1100   :  { %v2195_v41 = vpop.f32.mrb[46].mxu0 }
0x1101   :  { %v7249_v22 = vpop.f32.mrb[47].mxu0  ;;  %v2199_v46 = vsel %vm526_vm6, %v2198_v44, -inf }
0x1102   :  { %2200 = vmax.xlane.f32.xlu0 %v2199_v46 }
0x1106   :  { %v2303_v25 = vpop.f32.mrb[48].mxu0 }
0x1107   :  { %v2309_v47 = vmul.f32 0.25, %v2303_v25  ;;  %v7260_v48 = vpop.f32.mrb[49].mxu0 }
0x1108   :  { %v2306_v49 = vpop.f32.mrb[50].mxu0 }
0x1109   :  { %v7261_v50 = vpop.f32.mrb[51].mxu0  ;;  %v2310_v51 = vsel %vm526_vm6, %v2309_v47, -inf }
0x110a   :  { %2311 = vmax.xlane.f32.xlu0 %v2310_v51 }
0x110e   :  { %v2436_v52 = vpop.f32.mrb[52].mxu0 }
0x110f   :  { %v2442_v19 = vmul.f32 0.25, %v2436_v52  ;;  %v7272_v54 = vpop.f32.mrb[53].mxu0 }
0x1110   :  { %v2439_v56 = vpop.f32.mrb[54].mxu0 }
0x1111   :  { %v7273_v57 = vpop.f32.mrb[55].mxu0  ;;  %v2443_v59 = vsel %vm526_vm6, %v2442_v19, -inf }
0x1112   :  { %2444 = vmax.xlane.f32.xlu0 %v2443_v59 }
0x1116   :  { %v2554_v60 = vpop.f32.mrb[56].mxu0 }
0x1117   :  { %v2560_v38 = vmul.f32 0.25, %v2554_v60  ;;  %v7284_v61 = vpop.f32.mrb[57].mxu0 }
0x1118   :  { %v2557_v62 = vpop.f32.mrb[58].mxu0 }
0x1119   :  { %v7285_v63 = vpop.f32.mrb[59].mxu0  ;;  %v2561_v5 = vsel %vm526_vm6, %v2560_v38, -inf }
0x111a   :  { %2562 = vmax.xlane.f32.xlu1 %v2561_v5  ;;  %v2457_v63 = vshrl.u32 %v8729_v53, 16  ;;  %v2460_v5 = vshll.u32 %v8729_v53, 16 }
0x111e   :  { %v2665_v7 = vpop.f32.mrb[60].mxu0 }
0x111f   :  { %v2671_v8 = vmul.f32 0.25, %v2665_v7  ;;  %v7296_v9 = vpop.f32.mrb[61].mxu0  ;;  %v2459_v7 = vrot.slane %v2457_v63, 2 }
0x1120   :  { %v2668_v10 = vpop.f32.mrb[62].mxu0 }
0x1121   :  { %v7297_v12 = vpop.f32.mrb[63].mxu0  ;;  %v2672_v13 = vsel %vm526_vm6, %v2671_v8, -inf }
0x1122   :  { %2673 = vmax.xlane.f32.xlu0 %v2672_v13 }
0x1126   :  { %v2776_v15 = vpop.f32.mrb[64].mxu0 }
0x1127   :  { %v2782_v16 = vmul.f32 0.25, %v2776_v15  ;;  %v7308_v17 = vpop.f32.mrb[65].mxu0 }
0x1128   :  { %v2779_v18 = vpop.f32.mrb[66].mxu0 }
0x1129   :  { %v7309_v20 = vpop.f32.mrb[67].mxu0  ;;  %v2783_v14 = vsel %vm526_vm6, %v2782_v16, -inf }
0x112a   :  { %2784 = vmax.xlane.f32.xlu1 %v2783_v14 }
0x1138   :  { %2100 = vrot.lane.b32.xlu0 %v8747_v42, %s8173_s5 }
0x1187   :  { %v2089_v21 = vpop.xlane.xlu1 %2088  ;;  %v1979_v23 = vpop.xlane.xlu0 %1978 }
0x1188   :  { %v2090_v24 = vsub.f32 %v2086_v33, %v2089_v21  ;;  %v1980_v26 = vsub.f32 %v1976_v30, %v1979_v23 }
0x118a   :  { %v2091_v27 = vmul.f32 1.442695, %v2090_v24  ;;  %v1981_v28 = vmul.f32 1.442695, %v1980_v26 }
0x118c   :  { %7964 = vpow2.f32 %v2091_v27 }
0x118d   :  { %7966 = vpow2.f32 %v1981_v28 }
0x118f   :  { %v2201_v29 = vpop.xlane.xlu0 %2200 }
0x1190   :  { %v2202_v11 = vsub.f32 %v2198_v44, %v2201_v29 }
0x1192   :  { %v2203_v34 = vmul.f32 1.442695, %v2202_v11 }
0x1194   :  { %7968 = vpow2.f32 %v2203_v34 }
0x1196   :  { %v8798_v35 = vpop.eup %7964 }
0x1197   :  { %v7967_v36 = vpop.eup %7966  ;;  %v2093_v37 = vsel %vm526_vm6, %v8798_v35, 0.0  ;;  %v2312_v40 = vpop.xlane.xlu0 %2311 }
0x1198   :  { %2094 = vadd.xlane.f32.xlu1 %v2093_v37  ;;  %v1983_v39 = vsel %vm526_vm6, %v7967_v36, 0.0  ;;  %v2313_v31 = vsub.f32 %v2309_v47, %v2312_v40 }
0x1199   :  { %1984 = vadd.xlane.f32.xlu0 %v1983_v39 }
0x119a   :  { %v2314_v44 = vmul.f32 1.442695, %v2313_v31 }
0x119c   :  { %7970 = vpow2.f32 %v2314_v44 }
0x119e   :  { %v8803_v33 = vpop.eup %7968 }
0x119f   :  { %v2205_v30 = vsel %vm526_vm6, %v8803_v33, 0.0  ;;  %v2445_v43 = vpop.xlane.xlu0 %2444 }
0x11a0   :  { %2206 = vadd.xlane.f32.xlu0 %v2205_v30  ;;  %v2446_v45 = vsub.f32 %v2442_v19, %v2445_v43 }
0x11a2   :  { %v2447_v25 = vmul.f32 1.442695, %v2446_v45 }
0x11a4   :  { %7972 = vpow2.f32 %v2447_v25 }
0x11a6   :  { %v8811_v56 = vpop.eup %7970 }
0x11a7   :  { %v2563_v41 = vpop.xlane.xlu1 %2562 }
0x11a8   :  { %v2564_v46 = vsub.f32 %v2560_v38, %v2563_v41 }
0x11a9   :  { %2211 = vrot.lane.b32.xlu1 %v8747_v42, %s8174_s9 }
0x11aa   :  { %v2565_v50 = vmul.f32 1.442695, %v2564_v46 }
0x11ac   :  { %7974 = vpow2.f32 %v2565_v50 }
0x11ae   :  { %v8815_v47 = vpop.eup %7972 }
0x11af   :  { %v2674_v22 = vpop.xlane.xlu0 %2673  ;;  %v2449_v57 = vsel %vm526_vm6, %v8815_v47, 0.0 }
0x11b0   :  { %v2675_v48 = vsub.f32 %v2671_v8, %v2674_v22  ;;  %v2462_v8 = vrot.slane %v2460_v5, 3 }
0x11b2   :  { %v2676_v51 = vmul.f32 1.442695, %v2675_v48  ;;  %v2463_v9 = vor.u32 %v2462_v8, %v2459_v7 }
0x11b3   :  { %v2101_v10 = vpop.permute.xlu0 %2100 }
0x11b4   :  { %7976 = vpow2.f32 %v2676_v51  ;;  %v2106_v20 = vand.u32 %v2101_v10, %v8481_v32  ;;  %v2468_v40 = vand.u32 %v2463_v9, %v8481_v32 }
0x11b6   :  { %2322 = vrot.lane.b32.xlu0 %v8747_v42, %s8175_s13  ;;  %v2316_v42 = vsel %vm526_vm6, %v8811_v56, 0.0  ;;  %v8817_v19 = vpop.eup %7974 }
0x11b7   :  { %v2785_v49 = vpop.xlane.xlu1 %2784  ;;  %v2567_v60 = vsel %vm526_vm6, %v8817_v19, 0.0 }
0x11b8   :  { %v2786_v52 = vsub.f32 %v2782_v16, %v2785_v49 }
0x11ba   :  { %v2787_v54 = vmul.f32 1.442695, %v2786_v52 }
0x11bc   :  { %7978 = vpow2.f32 %v2787_v54 }
0x11be   :  { %v8821_v59 = vpop.eup %7976 }
0x11bf   :  { %v2678_v38 = vsel %vm526_vm6, %v8821_v59, 0.0 }
0x11c6   :  { %v8827_v61 = vpop.eup %7978 }
0x11c7   :  { %v2789_v62 = vsel %vm526_vm6, %v8827_v61, 0.0 }
0x11cd   :  { %2317 = vadd.xlane.f32.xlu1 %v2316_v42 }
0x11d1   :  { %2450 = vadd.xlane.f32.xlu1 %v2449_v57 }
0x11d5   :  { %2568 = vadd.xlane.f32.xlu1 %v2567_v60  ;;  %2679 = vadd.xlane.f32.xlu0 %v2678_v38 }
0x11d9   :  { %2790 = vadd.xlane.f32.xlu0 %v2789_v62 }
0x11e6   :  { %2573 = vrot.lane.b32.xlu1 %v2463_v9, %s8173_s5 }
0x11ea   :  { %2795 = vrot.lane.b32.xlu1 %v2463_v9, %s8175_s13 }
0x11ef   :  { %2684 = vrot.lane.b32.xlu0 %v2463_v9, %s8174_s9 }
0x1225   :  { %v2095_v13 = vpop.xlane.xlu1 %2094 }
0x1226   :  { %v1985_v12 = vpop.xlane.xlu0 %1984 }
0x1227   :  { %7980 = vrcp.f32 %v1985_v12 }
0x1228   :  { %7982 = vrcp.f32 %v2095_v13 }
0x1229   :  { %v2212_v21 = vpop.permute.xlu1 %2211 }
0x122a   :  { %v2217_v26 = vand.u32 %v2212_v21, %v8481_v32  ;;  %v7833_v21 = vld [vmem:[%s8227_s3 + $0x28] sm:$0xff]  }
0x122d   :  { %v2207_v15 = vpop.xlane.xlu0 %2206 }
0x122e   :  { %7984 = vrcp.f32 %v2207_v15 }
0x1231   :  { %v7981_v16 = vpop.eup %7980  ;;  %v2323_v28 = vpop.permute.xlu0 %2322 }
0x1232   :  { %v1987_v17 = vmul.f32 %v7981_v16, %v7967_v36  ;;  %v7983_v53 = vpop.eup %7982  ;;  %v2328_v11 = vand.u32 %v2323_v28, %v8481_v32  ;;  %v7834_v28 = vld [vmem:[%s8227_s3 + $0x30] sm:$0xff]  }
0x1233   :  { %v2097_v14 = vmul.f32 %v7983_v53, %v8798_v35 }
0x1234   :  { %v1988_v18 = vpack.c.bf16 %v1987_v17, %v1987_v17  ;;  %v7832_v17 = vld [vmem:[%s8227_s3 + $0x20] sm:$0xff]  }
0x1235   :  { %v2098_v23 = vpack.c.bf16 %v2097_v14, %v2097_v14  ;;  %7317 = vmatpush3.bf16.msra.mxu0 %v7832_v17 }
0x1236   :  { %7229 = vmatmul.mubr.msk.bf16.vlgmr.msra.gmra.mrb[52].mxu1 %vm540_vm7, %v1988_v18  ;;  %7318 = vmatprep.subr.bf16.mxu0 %v8170_v3 }
0x1237   :  { %7239 = vmatpush3.bf16.msra.mxu1 %v2106_v20  ;;  %7240 = vmatprep.mubr.msk.bf16.mxu1 %vm8171_vm2, %v8170_v3 }
0x1238   :  { %7250 = vmatprep.subr.bf16.mxu1 %v8170_v3  ;;  %v7985_v24 = vpop.eup %7984 }
0x1239   :  { %v2209_v27 = vmul.f32 %v7985_v24, %v8803_v33  ;;  %7319 = vmatpush3.bf16.msra.mxu0 %v7833_v21  ;;  %v7839_v21 = vld [vmem:[%s8247_s24 + $0x38] sm:$0xff]  }
0x123a   :  { %7320 = vmatprep.subr.bf16.mxu0 %v8170_v3 }
0x123b   :  { %v2210_v29 = vpack.c.bf16 %v2209_v27, %v2209_v27 }
0x123d   :  { %7321 = vmatpush3.bf16.msra.mxu0 %v7834_v28 }
0x123e   :  { %7241 = vmatmul.mubr.msk.bf16.vlgmr.msra.gmra.mrb[56].mxu1 %vm540_vm7, %v2098_v23  ;;  %7322 = vmatprep.subr.bf16.mxu0 %v8170_v3 }
0x123f   :  { %7251 = vmatpush3.bf16.msra.mxu1 %v2217_v26  ;;  %7252 = vmatprep.mubr.msk.bf16.mxu1 %vm8171_vm2, %v8170_v3 }
0x1240   :  { %7262 = vmatprep.subr.bf16.mxu1 %v8170_v3 }
0x1246   :  { %7253 = vmatmul.mubr.msk.bf16.vlgmr.msra.gmra.mrb[60].mxu1 %vm540_vm7, %v2210_v29 }
0x1247   :  { %7263 = vmatpush3.bf16.msra.mxu1 %v2328_v11  ;;  %7264 = vmatprep.mubr.msk.bf16.mxu1 %vm8171_vm2, %v8170_v3  ;;  %v7835_v11 = vld [vmem:[%s8227_s3 + $0x38] sm:$0xff]   ;;  %s9618_s3 = sld [smem:[#allocation9_spill]] }
0x1248   :  { %7274 = vmatprep.subr.bf16.mxu1 %v8170_v3  ;;  %7323 = vmatpush3.bf16.msra.mxu0 %v7835_v11 }
0x1249   :  { %7340 = vmatprep.subr.bf16.mxu0 %v8170_v3 }
0x125a   :  { %v2318_v34 = vpop.xlane.xlu1 %2317 }
0x125b   :  { %7986 = vrcp.f32 %v2318_v34 }
0x125e   :  { %v2451_v35 = vpop.xlane.xlu1 %2450 }
0x125f   :  { %7988 = vrcp.f32 %v2451_v35 }
0x1262   :  { %v2569_v36 = vpop.xlane.xlu1 %2568  ;;  %v2680_v31 = vpop.xlane.xlu0 %2679 }
0x1263   :  { %7990 = vrcp.f32 %v2569_v36 }
0x1264   :  { %7992 = vrcp.f32 %v2680_v31 }
0x1265   :  { %v7987_v37 = vpop.eup %7986 }
0x1266   :  { %v2320_v39 = vmul.f32 %v7987_v37, %v8811_v56  ;;  %v2574_v44 = vpop.permute.xlu1 %2573  ;;  %v2791_v45 = vpop.xlane.xlu0 %2790 }
0x1267   :  { %v2579_v46 = vand.u32 %v2574_v44, %v8481_v32  ;;  %7994 = vrcp.f32 %v2791_v45 }
0x1268   :  { %v2321_v33 = vpack.c.bf16 %v2320_v39, %v2320_v39 }
0x1269   :  { %v7989_v30 = vpop.eup %7988 }
0x126a   :  { %7265 = vmatmul.mubr.msk.bf16.vlgmr.msra.gmra.mrb[64].mxu1 %vm540_vm7, %v2321_v33  ;;  %v2453_v43 = vmul.f32 %v7989_v30, %v8815_v47  ;;  %v2685_v48 = vpop.permute.xlu0 %2684  ;;  %v2796_v54 = vpop.permute.xlu1 %2795 }
0x126b   :  { %7275 = vmatpush3.bf16.msra.mxu1 %v2468_v40  ;;  %7276 = vmatprep.mubr.msk.bf16.mxu1 %vm8171_vm2, %v8170_v3  ;;  %v2690_v51 = vand.u32 %v2685_v48, %v8481_v32  ;;  %v2801_v47 = vand.u32 %v2796_v54, %v8481_v32 }
0x126c   :  { %7286 = vmatprep.subr.bf16.mxu1 %v8170_v3  ;;  %v2454_v41 = vpack.c.bf16 %v2453_v43, %v2453_v43 }
0x126d   :  { %v7991_v22 = vpop.eup %7990 }
0x126e   :  { %v2571_v25 = vmul.f32 %v7991_v22, %v8817_v19  ;;  %v7993_v50 = vpop.eup %7992 }
0x126f   :  { %v2682_v52 = vmul.f32 %v7993_v50, %v8821_v59 }
0x1270   :  { %v2572_v49 = vpack.c.bf16 %v2571_v25, %v2571_v25 }
0x1271   :  { %v2683_v56 = vpack.c.bf16 %v2682_v52, %v2682_v52  ;;  %v7995_v42 = vpop.eup %7994 }
0x1272   :  { %7277 = vmatmul.mubr.msk.bf16.vlgmr.msra.gmra.mrb[68].mxu1 %vm540_vm7, %v2454_v41  ;;  %v2793_v19 = vmul.f32 %v7995_v42, %v8827_v61 }
0x1273   :  { %7287 = vmatpush3.bf16.msra.mxu1 %v2579_v46  ;;  %7288 = vmatprep.mubr.msk.bf16.mxu1 %vm8171_vm2, %v8170_v3 }
0x1274   :  { %7298 = vmatprep.subr.bf16.mxu1 %v8170_v3  ;;  %v2794_v57 = vpack.c.bf16 %v2793_v19, %v2793_v19 }
0x127a   :  { %7289 = vmatmul.mubr.msk.bf16.vlgmr.msra.gmra.mrb[72].mxu1 %vm540_vm7, %v2572_v49 }
0x127b   :  { %7299 = vmatpush3.bf16.msra.mxu1 %v2690_v51  ;;  %7300 = vmatprep.mubr.msk.bf16.mxu1 %vm8171_vm2, %v8170_v3 }
0x127c   :  { %7310 = vmatprep.subr.bf16.mxu1 %v8170_v3 }
0x1282   :  { %7301 = vmatmul.mubr.msk.bf16.vlgmr.msra.gmra.mrb[76].mxu1 %vm540_vm7, %v2683_v56 }
0x1283   :  { %7311 = vmatpush3.bf16.msra.mxu1 %v2801_v47  ;;  %7312 = vmatprep.mubr.msk.bf16.mxu1 %vm8171_vm2, %v8170_v3 }
0x1284   :  { %7328 = vmatprep.subr.bf16.mxu1 %v8170_v3 }
0x128a   :  { %7313 = vmatmul.mubr.msk.bf16.vlgmr.msra.gmra.mrb[80].mxu1 %vm540_vm7, %v2794_v57  ;;  %v6643_v57 = vld [vmem:[%s8232_s8 + $0x1] ss:$0 sm:$0xff]  ;;  %s9619_s8 = sld [smem:[#allocation11_spill]] }
0x128b   :  { %7336 = vmatprep.mubr.msk.bf16.mxu1 %vm8171_vm2, %v8170_v3 }
0x1309   :  { %v2030_v59 = vpop.f32.mrb[52].mxu1 }
0x130a   :  { %v7230_v60 = vpop.f32.mrb[53].mxu1 }
0x130b   :  { %v2033_v32 = vpop.f32.mrb[54].mxu1 }
0x130c   :  { %v7231_v38 = vpop.f32.mrb[55].mxu1 }
0x1311   :  { %v2142_v62 = vpop.f32.mrb[56].mxu1 }
0x1312   :  { %v7242_v63 = vpop.f32.mrb[57].mxu1 }
0x1313   :  { %v2145_v5 = vpop.f32.mrb[58].mxu1 }
0x1314   :  { %v7243_v7 = vpop.f32.mrb[59].mxu1 }
0x1319   :  { %v2253_v8 = vpop.f32.mrb[60].mxu1 }
0x131a   :  { %v7254_v61 = vpop.f32.mrb[61].mxu1 }
0x131b   :  { %v2256_v9 = vpop.f32.mrb[62].mxu1 }
0x131c   :  { %v7255_v10 = vpop.f32.mrb[63].mxu1 }
0x133d   :  { %v2364_v12 = vpop.f32.mrb[64].mxu1 }
0x133e   :  { %v7266_v13 = vpop.f32.mrb[65].mxu1 }
0x133f   :  { %v2367_v15 = vpop.f32.mrb[66].mxu1 }
0x1340   :  { %v7267_v16 = vpop.f32.mrb[67].mxu1 }
0x1345   :  { %v2504_v18 = vpop.f32.mrb[68].mxu1 }
0x1346   :  { %v7278_v53 = vpop.f32.mrb[69].mxu1 }
0x1347   :  { %v2507_v20 = vpop.f32.mrb[70].mxu1  ;;  %v7836_v53 = vld [vmem:[%s8247_s24 + $0x20] sm:$0xff]  }
0x1348   :  { %v7279_v14 = vpop.f32.mrb[71].mxu1  ;;  %7329 = vmatpush3.bf16.msra.mxu1 %v7836_v53  ;;  %v7837_v20 = vld [vmem:[%s8247_s24 + $0x28] sm:$0xff]  }
0x1349   :  { %7330 = vmatprep.subr.bf16.mxu1 %v8170_v3  ;;  %v7838_v14 = vld [vmem:[%s8247_s24 + $0x30] sm:$0xff]   ;;  %s9622_s24 = sld [smem:[#allocation15_spill]] }
0x134c   :  { %7331 = vmatpush3.bf16.msra.mxu1 %v7837_v20 }
0x134d   :  { %v2615_v23 = vpop.f32.mrb[72].mxu1  ;;  %7332 = vmatprep.subr.bf16.mxu1 %v8170_v3 }
0x134e   :  { %v7740_v24 = vpack.i.bf16 %v2142_v62, %v2615_v23  ;;  %v7290_v26 = vpop.f32.mrb[73].mxu1 }
0x134f   :  { %v2618_v27 = vpop.f32.mrb[74].mxu1 }
0x1350   :  { %7741 = vrot.lane.b32.xlu1 %v7740_v24, %s8178_s26  ;;  %v7291_v29 = vpop.f32.mrb[75].mxu1  ;;  %7333 = vmatpush3.bf16.msra.mxu1 %v7838_v14 }
0x1351   :  { %7334 = vmatprep.subr.bf16.mxu1 %v8170_v3 }
0x1354   :  { %7335 = vmatpush3.bf16.msra.mxu1 %v7839_v21 }
0x1355   :  { %v2726_v34 = vpop.f32.mrb[76].mxu1  ;;  %7360 = vmatprep.subr.bf16.mxu1 %v8170_v3 }
0x1356   :  { %v7745_v35 = vpack.i.bf16 %v2253_v8, %v2726_v34  ;;  %v7302_v36 = vpop.f32.mrb[77].mxu1 }
0x1357   :  { %v2729_v37 = vpop.f32.mrb[78].mxu1 }
0x1358   :  { %7746 = vrot.lane.b32.xlu1 %v7745_v35, %s8177_s23  ;;  %v7303_v39 = vpop.f32.mrb[79].mxu1  ;;  %v6651_v35 = vld [vmem:[%s8237_s14 + $0x1] ss:$0 sm:$0xff]  ;;  %s9620_s14 = sld [smem:[#allocation16_spill]] }
0x135c   :  { %2379 = vrot.lane.b32.xlu1 %v2364_v12, %s8176_s22 }
0x135d   :  { %v2837_v33 = vpop.f32.mrb[80].mxu1 }
0x135e   :  { %2852 = vrot.lane.b32.xlu0 %v2837_v33, %s8176_s22  ;;  %v7314_v30 = vpop.f32.mrb[81].mxu1  ;;  %v6652_v33 = vld [vmem:[%s8242_s19 + $0x1] ss:$0 sm:$0xff]  ;;  %s9621_s19 = sld [smem:[#allocation14_spill]] }
0x135f   :  { %v2840_v40 = vpop.f32.mrb[82].mxu1 }
0x1360   :  { %v7315_v31 = vpop.f32.mrb[83].mxu1 }
0x13c2   :  { %v7742_v43 = vpop.permute.xlu1 %7741 }
0x13c3   :  { %v7744_v45 = vunpack.i.h.bf16 %v7742_v43  ;;  %v7743_v41 = vunpack.i.l.bf16 %v7742_v43 }
0x13c5   :  { %v2382_v25 = vsel %vm478_vm3, %v2030_v59, %v7744_v45  ;;  %v2855_v48 = vsel %vm478_vm3, %v2504_v18, %v7743_v41  ;;  %v7841_v45 = vld [vmem:[%s8257_s6 + $0x48] sm:$0xff]   ;;  %v7842_v41 = vld [vmem:[%s8257_s6 + $0x50] sm:$0xff]  }
0x13ca   :  { %v7747_v44 = vpop.permute.xlu1 %7746 }
0x13cb   :  { %v7749_v22 = vunpack.i.h.bf16 %v7747_v44  ;;  %v7748_v46 = vunpack.i.l.bf16 %v7747_v44  ;;  %v7840_v44 = vld [vmem:[%s8257_s6 + $0x40] sm:$0xff]  }
0x13cd   :  { %v2383_v50 = vsel %vm938_vm8, %v2382_v25, %v7749_v22  ;;  %v2856_v51 = vsel %vm938_vm8, %v2855_v48, %v7748_v46  ;;  %v7843_v22 = vld [vmem:[%s8257_s6 + $0x58] sm:$0xff]   ;;  %v7844_v46 = vld [vmem:[%s8257_s6 + $0x60] sm:$0xff]   ;;  %v7845_v25 = vld [vmem:[%s8257_s6 + $0x68] sm:$0xff]  }
0x13ce   :  { %v2380_v49 = vpop.permute.xlu1 %2379  ;;  %v7846_v48 = vld [vmem:[%s8257_s6 + $0x70] sm:$0xff]  }
0x13cf   :  { %v2384_v42 = vsel %vm940_vm9, %v2383_v50, %v2380_v49  ;;  %v7847_v49 = vld [vmem:[%s8257_s6 + $0x78] sm:$0xff]   ;;  %v6662_v50 = vld [vmem:[%s8252_s30 + $0x1] ss:$0 sm:$0xff]  ;;  %s9623_s30 = sld [smem:[#allocation17_spill]]  ;;  %s9624_s6 = sld [smem:[#allocation12_spill]] }
0x13d0   :  { %v2853_v52 = vpop.permute.xlu0 %2852 }
0x13d1   :  { %v2857_v54 = vsel %vm940_vm9, %v2856_v51, %v2853_v52 }
0x13d2   :  { %v2859_v56 = vrot.slane %v2857_v54, 3 }
0x13d4   :  { %v2861_v47 = vsel %vm1418_vm10, %v2384_v42, %v2859_v56 }
0x13d5   :  { %v2862_v19 = vpack.c.bf16 %v2859_v56, %v2861_v47 }
0x13d7   :  { %7325 = vmatmul.mubr.msk.bf16.vlgmr.msra.gmra.mrb[68].mxu0 %vm267_vm0, %v2862_v19 }
0x13d8   :  { %7356 = vmatprep.mubr.msk.bf16.mxu0 %vm8171_vm2, %v8170_v3  ;;  %7341 = vmatpush3.bf16.msra.mxu0 %v7840_v44 }
0x13d9   :  { %7342 = vmatprep.subr.bf16.mxu0 %v8170_v3 }
0x13dc   :  { %7343 = vmatpush3.bf16.msra.mxu0 %v7841_v45 }
0x13dd   :  { %7344 = vmatprep.subr.bf16.mxu0 %v8170_v3 }
0x13e0   :  { %7345 = vmatpush3.bf16.msra.mxu0 %v7842_v41 }
0x13e1   :  { %7346 = vmatprep.subr.bf16.mxu0 %v8170_v3 }
0x13e4   :  { %7347 = vmatpush3.bf16.msra.mxu0 %v7843_v22 }
0x13e5   :  { %7348 = vmatprep.subr.bf16.mxu0 %v8170_v3 }
0x13e8   :  { %7349 = vmatpush3.bf16.msra.mxu0 %v7844_v46 }
0x13e9   :  { %7350 = vmatprep.subr.bf16.mxu0 %v8170_v3 }
0x13ec   :  { %7351 = vmatpush3.bf16.msra.mxu0 %v7845_v25  ;;  %v3322_v25 = vld [vmem:[%s9617_s29] sm:$0xff] }
0x13ed   :  { %7352 = vmatprep.subr.bf16.mxu0 %v8170_v3 }
0x13f0   :  { %7353 = vmatpush3.bf16.msra.mxu0 %v7846_v48  ;;  %v3323_v48 = vld [vmem:[%s9617_s29 + $0x8] sm:$0x3f] }
0x13f1   :  { %7354 = vmatprep.subr.bf16.mxu0 %v8170_v3 }
0x13f4   :  { %7355 = vmatpush3.bf16.msra.mxu0 %v7847_v49  ;;  %v6696_v49 = vld [vmem:[%s9618_s3] ss:$0 sm:$0xff] }
0x13f5   :  { %7372 = vmatprep.subr.bf16.mxu0 %v8170_v3 }
0x14aa   :  { %v2930_v59 = vpop.f32.mrb[68].mxu0 }
0x14ab   :  { %v2931_v60 = vadd.f32 %v6643_v57, %v2930_v59  ;;  %v7326_v32 = vpop.f32.mrb[69].mxu0 }
0x14ac   :  { %v2933_v38 = vpop.f32.mrb[70].mxu0 }
0x14ad   :  { %v8905_v62 = vadd.f32 %v2931_v60, %v8697_v55  ;;  %v2934_v63 = vadd.f32 %v6643_v57, %v2933_v38  ;;  %v7327_v5 = vpop.f32.mrb[71].mxu0 }
0x14af   :  { %v2943_v7 = vsel %vm267_vm0, %v8905_v62, 0.0  ;;  %v2938_v8 = vadd.f32 %v2934_v63, %v8700_v58 }
0x14b0   :  { %2944 = vadd.xlane.f32.xlu0 %v2943_v7 }
0x14b1   :  { %v2946_v61 = vsel %vm317_vm1, %v2938_v8, 0.0 }
0x14b2   :  { %2947 = vadd.xlane.f32.xlu1 %v2946_v61 }
0x153d   :  { %v2945_v9 = vpop.xlane.xlu0 %2944 }
0x153e   :  { %v2949_v10 = vmul.f32 0.015625, %v2945_v9 }
0x153f   :  { %v2948_v12 = vpop.xlane.xlu1 %2947 }
0x1540   :  { %v2951_v55 = vsub.f32 %v8905_v62, %v2949_v10  ;;  %v2950_v13 = vmul.f32 0.015625, %v2948_v12 }
0x1542   :  { %v2952_v15 = vsub.f32 %v2938_v8, %v2950_v13  ;;  %v2953_v16 = vmul.f32 %v2951_v55, %v2951_v55 }
0x1544   :  { %v2955_v17 = vsel %vm267_vm0, %v2953_v16, 0.0  ;;  %v2954_v18 = vmul.f32 %v2952_v15, %v2952_v15 }
0x1545   :  { %2956 = vadd.xlane.f32.xlu0 %v2955_v17 }
0x1546   :  { %v2958_v58 = vsel %vm317_vm1, %v2954_v18, 0.0 }
0x1549   :  { %2959 = vadd.xlane.f32.xlu0 %v2958_v58  ;;  %v6693_v58 = vld [vmem:[%s9613_s28 + $0x1] ss:$0 sm:$0xff] }
0x15d2   :  { %v2957_v23 = vpop.xlane.xlu0 %2956 }
0x15d3   :  { %v2961_v24 = vmul.f32 0.015625, %v2957_v23 }
0x15d5   :  { %v2963_v26 = vadd.f32 1e-12, %v2961_v24 }
0x15d6   :  { %v2960_v27 = vpop.xlane.xlu0 %2959 }
0x15d7   :  { %7996 = vrsqrt.f32 %v2963_v26  ;;  %v2962_v28 = vmul.f32 0.015625, %v2960_v27 }
0x15d9   :  { %v2964_v29 = vadd.f32 1e-12, %v2962_v28 }
0x15db   :  { %7998 = vrsqrt.f32 %v2964_v29 }
0x15e1   :  { %v7997_v11 = vpop.eup %7996 }
0x15e2   :  { %v2967_v34 = vmul.f32 %v7997_v11, %v2951_v55 }
0x15e4   :  { %v2975_v37 = vmul.f32 %v6651_v35, %v2967_v34  ;;  %v7848_v34 = vld [vmem:[%s9614_s17] sm:$0xff]  }
0x15e5   :  { %v7999_v36 = vpop.eup %7998 }
0x15e6   :  { %v2968_v39 = vmul.f32 %v7999_v36, %v2952_v15  ;;  %v2983_v40 = vadd.f32 %v6652_v33, %v2975_v37  ;;  %v7851_v36 = vld [vmem:[%s9614_s17 + $0x18] sm:$0xff]  }
0x15e8   :  { %v2976_v30 = vmul.f32 %v6651_v35, %v2968_v39  ;;  %v7850_v35 = vld [vmem:[%s9614_s17 + $0x10] sm:$0xff]  }
0x15ea   :  { %v2984_v31 = vadd.f32 %v6652_v33, %v2976_v30 }
0x15ec   :  { %v2994_v43 = vpack.c.bf16 %v2984_v31, %v2983_v40  ;;  %v6694_v40 = vld [vmem:[%s9615_s21] ss:$0 sm:$0xff] }
0x15ee   :  { %7337 = vmatmul.mubr.msk.bf16.vlgmr.msra.gmra.mrb[84].mxu1 %vm267_vm0, %v2994_v43  ;;  %v6695_v43 = vld [vmem:[%s9616_s25] ss:$0 sm:$0xff] }
0x15ef   :  { %7368 = vmatprep.mubr.msk.bf16.mxu1 %vm8171_vm2, %v8170_v3  ;;  %7361 = vmatpush3.bf16.msra.mxu1 %v7848_v34 }
0x15f0   :  { %7362 = vmatprep.subr.bf16.mxu1 %v8170_v3 }
0x16c1   :  { %v3064_v51 = vpop.f32.mrb[84].mxu1 }
0x16c2   :  { %v3065_v52 = vadd.f32 %v6662_v50, %v3064_v51  ;;  %v7338_v54 = vpop.f32.mrb[85].mxu1  ;;  %v3335_v51 = vrot.slane %v3323_v48, 6 }
0x16c3   :  { %v3067_v56 = vpop.f32.mrb[86].mxu1 }
0x16c4   :  { %v3071_v42 = vmul.f32 %v3065_v52, %v3065_v52  ;;  %v3068_v47 = vadd.f32 %v6662_v50, %v3067_v56  ;;  %v7339_v19 = vpop.f32.mrb[87].mxu1  ;;  %v3334_v50 = vrot.slane %v3322_v25, 6 }
0x16c6   :  { %v3073_v57 = vmul.f32 %v3071_v42, %v3065_v52  ;;  %v3072_v59 = vmul.f32 %v3068_v47, %v3068_v47  ;;  %v3324_v42 = vld [vmem:[%s9619_s8] sm:$0xff]  ;;  %v3336_v19 = vsel %vm544_vm4, %v3334_v50, %v3335_v51  ;;  %vm3578_vm4 = vcmask 64512  }
0x16c8   :  { %v3075_v60 = vmul.f32 0.044715, %v3073_v57  ;;  %v3074_v32 = vmul.f32 %v3072_v59, %v3068_v47 }
0x16ca   :  { %v3077_v38 = vadd.f32 %v3075_v60, %v3065_v52  ;;  %v3076_v63 = vmul.f32 0.044715, %v3074_v32 }
0x16cc   :  { %v3079_v5 = vmul.f32 0.7978846, %v3077_v38  ;;  %v3078_v7 = vadd.f32 %v3076_v63, %v3068_v47 }
0x16ce   :  { %8000 = vtanh.f32 %v3079_v5  ;;  %v3080_v8 = vmul.f32 0.7978846, %v3078_v7 }
0x16d0   :  { %8002 = vtanh.f32 %v3080_v8 }
0x16d8   :  { %v8001_v61 = vpop.eup %8000 }
0x16d9   :  { %v3083_v9 = vadd.f32 1.0, %v8001_v61 }
0x16da   :  { %v8003_v10 = vpop.eup %8002 }
0x16db   :  { %v3085_v12 = vmul.f32 0.5, %v3083_v9  ;;  %v3084_v55 = vadd.f32 1.0, %v8003_v10 }
0x16dd   :  { %v3086_v13 = vmul.f32 0.5, %v3084_v55  ;;  %v3087_v15 = vmul.f32 %v3085_v12, %v3065_v52  ;;  %v3326_v52 = vrot.slane %v3322_v25, 7 }
0x16df   :  { %v3088_v16 = vmul.f32 %v3086_v13, %v3068_v47 }
0x16e1   :  { %v3106_v17 = vpack.c.bf16 %v3088_v16, %v3087_v15 }
0x16e3   :  { %7357 = vmatmul.mubr.bf16.vlgmr.msra.gmra.mrb[72].mxu0 %v3106_v17 }
0x16e4   :  { %7374 = vmatprep.mubr.msk.bf16.mxu0 %vm8171_vm2, %v8170_v3 }
0x17b6   :  { %v3189_v18 = vpop.f32.mrb[72].mxu0 }
0x17b7   :  { %v3195_v53 = vadd.f32 %v3189_v18, %v8905_v62  ;;  %v7358_v20 = vpop.f32.mrb[73].mxu0  ;;  %v7849_v62 = vld [vmem:[%s9614_s17 + $0x8] sm:$0xff]  }
0x17b8   :  { %v3192_v14 = vpop.f32.mrb[74].mxu0  ;;  %7363 = vmatpush3.bf16.msra.mxu1 %v7849_v62  ;;  %v7857_v20 = vld [vmem:[%s9620_s14 + $0x14] ss:$8 sps:$4 sm:$0xff]  }
0x17b9   :  { %v7359_v21 = vpop.f32.mrb[75].mxu0  ;;  %v3204_v23 = vadd.f32 %v6693_v58, %v3195_v53  ;;  %7364 = vmatprep.subr.bf16.mxu1 %v8170_v3  ;;  %v7854_v58 = vld [vmem:[%s9620_s14 + $0x4] ss:$8 sps:$4 sm:$0xff]   ;;  %v7852_v53 = vld [vmem:[%s9620_s14] ss:$8 sps:$4 sm:$0xff]  }
0x17ba   :  { %v7855_v14 = vld [vmem:[%s9620_s14 + $0x10] ss:$8 sps:$4 sm:$0xff]   ;;  %v7860_v21 = vld [vmem:[%s9620_s14 + $0x24] ss:$8 sps:$4 sm:$0xff]  }
0x17bb   :  { %v3207_v24 = vsel %vm267_vm0, %v3204_v23, 0.0 }
0x17bc   :  { %3208 = vadd.xlane.f32.xlu0 %v3207_v24  ;;  %7365 = vmatpush3.bf16.msra.mxu1 %v7850_v35  ;;  %v7863_v24 = vld [vmem:[%s9620_s14 + $0x34] ss:$8 sps:$4 sm:$0xff]  }
0x17bd   :  { %7366 = vmatprep.subr.bf16.mxu1 %v8170_v3 }
0x17c0   :  { %7367 = vmatpush3.bf16.msra.mxu1 %v7851_v36  ;;  %v6703_v36 = vld [vmem:[%s9621_s19] ss:$0 sm:$0xff] }
0x17c1   :  { %3483 = vmatprep.subr.bf16.mxu1 %v7854_v58 }
0x1849   :  { %v3209_v26 = vpop.xlane.xlu0 %3208 }
0x184a   :  { %v3210_v27 = vmul.f32 0.015625, %v3209_v26  ;;  %v7861_v26 = vld [vmem:[%s9620_s14 + $0x30] ss:$8 sps:$4 sm:$0xff]  }
0x184c   :  { %v3211_v28 = vsub.f32 %v3204_v23, %v3210_v27  ;;  %v7858_v23 = vld [vmem:[%s9620_s14 + $0x20] ss:$8 sps:$4 sm:$0xff]  }
0x184e   :  { %v3212_v29 = vmul.f32 %v3211_v28, %v3211_v28 }
0x1850   :  { %v3213_v11 = vsel %vm267_vm0, %v3212_v29, 0.0 }
0x1851   :  { %3214 = vadd.xlane.f32.xlu1 %v3213_v11 }
0x18de   :  { %v3215_v37 = vpop.xlane.xlu1 %3214 }
0x18df   :  { %v3216_v39 = vmul.f32 0.015625, %v3215_v37 }
0x18e1   :  { %v3217_v33 = vadd.f32 1e-12, %v3216_v39 }
0x18e3   :  { %8004 = vrsqrt.f32 %v3217_v33 }
0x18ed   :  { %v8005_v30 = vpop.eup %8004 }
0x18ee   :  { %v3219_v31 = vmul.f32 %v8005_v30, %v3211_v28 }
0x18f0   :  { %v3226_v44 = vmul.f32 %v6694_v40, %v3219_v31  ;;  %v6704_v40 = vld [vmem:[%s9622_s24] ss:$0 sm:$0xff] }
0x18f2   :  { %v3233_v45 = vadd.f32 %v6695_v43, %v3226_v44 }
0x18f4   :  { %v3235_v41 = vrot.slane %v3233_v45, 4 }
0x18f6   :  { %v3238_v22 = vsel %vm3237_vm11, %v3233_v45, %v3235_v41  ;;  %v3418_v41 = vld [vmem:[%s9623_s30] sm:$0x3] }
0x18f7   :  { %v3247_v46 = vpack.c.bf16 %v3238_v22, %v3238_v22  ;;  %v3433_v22 = vrot.slane %v3418_v41, %v8450_v4 }
0x18f9   :  { %7369 = vmatmul.mubr.msk.bf16.vlgmr.msra.gmra.mrb[88].mxu1 %vm267_vm0, %v3247_v46  ;;  %v3437_v46 = vrot.slane %v3418_v41, %v8454_v6  ;;  %v6702_v41 = vld [vmem:[%s9624_s6 + $0x1] sm:$0x1] }
0x18fa   :  { %3515 = vmatprep.mubr.bf16.mxu1 %v8169_v1  ;;  %3484 = vmatpush1.bf16.msra.mxu1 %v7852_v53  ;;  %vm3357_vm5 = vcmp.gt.f32.partialorder %v6702_v41, 0.0 }
0x18fb   :  { %3485 = vmatprep.subr.bf16.mxu1 %v7857_v20 }
0x18fe   :  { %3486 = vmatpush1.bf16.msra.mxu1 %v7855_v14 }
0x18ff   :  { %3487 = vmatprep.subr.bf16.mxu1 %v7860_v21 }
0x1902   :  { %3488 = vmatpush1.bf16.msra.mxu1 %v7858_v23 }
0x1903   :  { %3489 = vmatprep.subr.bf16.mxu1 %v7863_v24  ;;  %v3345_v24 = vld [vmem:[%s9624_s6] sm:$0x1] }
0x1904   :  { %vm3346_vm13 = vcmp.gt.f32.partialorder %v3345_v24, 0.0 }
0x1906   :  { %3490 = vmatpush1.bf16.msra.mxu1 %v7861_v26  ;;  %v3347_v26 = vsel %vm3346_vm13, 1, %v8169_v1 }
0x1907   :  { %7378 = vmatprep.subr.bf16.mxu1 %v8170_v3 }
0x19cc   :  { %v3316_v54 = vpop.f32.mrb[88].mxu1 }
0x19cd   :  { %v3317_v56 = vadd.f32 %v6696_v49, %v3316_v54  ;;  %v7370_v47 = vpop.f32.mrb[89].mxu1 }
0x19ce   :  { %v3319_v57 = vpop.f32.mrb[90].mxu1 }
0x19cf   :  { %v3328_v59 = vsel %vm3237_vm11, %v3317_v56, %v3326_v52  ;;  %v3331_v60 = vrot.slane %v3317_v56, 1  ;;  %v7371_v32 = vpop.f32.mrb[91].mxu1 }
0x19d0   :  { %v8968_v38 = vadd.f32 %v3328_v59, %v3324_v42 }
0x19d1   :  { %v3338_v63 = vsel %vm3237_vm11, %v3331_v60, %v3336_v19 }
0x19d2   :  { %v3368_v5 = vsel %vm267_vm0, %v8968_v38, 0.0  ;;  %v8973_v7 = vadd.f32 %v3338_v63, %v3324_v42 }
0x19d3   :  { %3369 = vadd.xlane.f32.xlu0 %v3368_v5 }
0x19d4   :  { %v3371_v8 = vsel %vm267_vm0, %v8973_v7, 0.0 }
0x19d5   :  { %3372 = vadd.xlane.f32.xlu1 %v3371_v8 }
0x1a60   :  { %v3370_v61 = vpop.xlane.xlu0 %3369 }
0x1a61   :  { %v3374_v9 = vmul.f32 0.015625, %v3370_v61 }
0x1a62   :  { %v3373_v10 = vpop.xlane.xlu1 %3372 }
0x1a63   :  { %v3376_v12 = vsub.f32 %v8968_v38, %v3374_v9  ;;  %v3375_v55 = vmul.f32 0.015625, %v3373_v10 }
0x1a65   :  { %v3377_v13 = vsub.f32 %v8973_v7, %v3375_v55  ;;  %v3378_v15 = vmul.f32 %v3376_v12, %v3376_v12 }
0x1a67   :  { %v3380_v16 = vsel %vm267_vm0, %v3378_v15, 0.0  ;;  %v3379_v17 = vmul.f32 %v3377_v13, %v3377_v13 }
0x1a68   :  { %3381 = vadd.xlane.f32.xlu0 %v3380_v16 }
0x1a69   :  { %v3383_v18 = vsel %vm267_vm0, %v3379_v17, 0.0 }
0x1a6a   :  { %3384 = vadd.xlane.f32.xlu1 %v3383_v18 }
0x1af5   :  { %v3382_v27 = vpop.xlane.xlu0 %3381 }
0x1af6   :  { %v3386_v28 = vmul.f32 0.015625, %v3382_v27  ;;  %v9062_v27 = vand.u32 127, %v378_v0 }
0x1af7   :  { %v3385_v29 = vpop.xlane.xlu1 %3384 }
0x1af8   :  { %v3388_v11 = vadd.f32 1e-05, %v3386_v28  ;;  %v3387_v34 = vmul.f32 0.015625, %v3385_v29  ;;  %v3351_v28 = vrot.slane %v3347_v26, %v8450_v4  ;;  %vm3344_vm14 = vcmp.ge.s32.totalorder %v8445_v2, %v9062_v27 }
0x1af9   :  { %v8180_v29 = vmov -1e+09  }
0x1afa   :  { %8006 = vrsqrt.f32 %v3388_v11  ;;  %v3389_v62 = vadd.f32 1e-05, %v3387_v34  ;;  %vm3352_vm15 = vcmp.eq.s32.totalorder %v3351_v28, 1 }
0x1afb   :  { %vm3353_vm1 = vmand %vm3344_vm14, %vm3352_vm15 }
0x1afc   :  { %8008 = vrsqrt.f32 %v3389_v62  ;;  %v9070_v11 = vsel %vm3353_vm1, 0.0, %v8180_v29 }
0x1b04   :  { %v8007_v35 = vpop.eup %8006 }
0x1b05   :  { %v3392_v37 = vmul.f32 %v8007_v35, %v3376_v12 }
0x1b06   :  { %v8009_v39 = vpop.eup %8008 }
0x1b07   :  { %v3400_v33 = vmul.f32 %v6703_v36, %v3392_v37  ;;  %v3393_v30 = vmul.f32 %v8009_v39, %v3377_v13 }
0x1b09   :  { %v3401_v31 = vmul.f32 %v6703_v36, %v3393_v30  ;;  %v3408_v43 = vadd.f32 %v6704_v40, %v3400_v33 }
0x1b0b   :  { %v3409_v44 = vadd.f32 %v6704_v40, %v3401_v31 }
0x1b0d   :  { %v3428_v45 = vpack.c.bf16 %v3409_v44, %v3408_v43 }
0x1b0f   :  { %6713 = vmatmul.mubr.msk.bf16.vlgmr.msra.gmra.mrb[92].mxu1 %vm267_vm0, %v3428_v45 }
0x1b10   :  { %7380 = vmatprep.mubr.msk.bf16.mxu1 %vm8171_vm2, %v8170_v3 }
0x1be2   :  { %v3517_v25 = vpop.f32.mrb[92].mxu1 }
0x1be3   :  { %v3518_v48 = vadd.f32 %v3517_v25, %v3433_v22  ;;  %v3519_v49 = vpop.f32.mrb[93].mxu1 }
0x1be4   :  { %v3520_v50 = vadd.f32 %v3519_v49, %v3437_v46  ;;  %v3521_v51 = vpop.f32.mrb[94].mxu1 }
0x1be5   :  { %v3526_v52 = vpack.c.bf16 %v3518_v48, %v3518_v48  ;;  %v3523_v54 = vpop.f32.mrb[95].mxu1  ;;  %v3522_v19 = vadd.f32 %v3521_v51, %v3433_v22  ;;  %v3358_v51 = vsel %vm3357_vm5, 1, %v8169_v1 }
0x1be6   :  { %v8998_v56 = vpack.c.bf16 %v3520_v50, %v3520_v50  ;;  %v9000_v42 = vadd.f32 %v3523_v54, %v3437_v46  ;;  %v3362_v54 = vrot.slane %v3358_v51, %v8450_v4 }
0x1be7   :  { %3641 = vrot.lane.b32.xlu1 %v3526_v52, %s8176_s22  ;;  %3528 = vrot.lane.b32.xlu0 %v3526_v52, %s8172_s0  ;;  %v3991_v57 = vpack.c.bf16 %v3522_v19, %v3522_v19 }
0x1be8   :  { %v3597_v47 = vsel %vm3595_vm12, %v8998_v56, 0  ;;  %vm3363_vm6 = vcmp.eq.s32.totalorder %v3362_v54, 1 }
0x1be9   :  { %7379 = vmatpush3.bf16.msra.mxu1 %v3597_v47  ;;  %vm3364_vm7 = vmand %vm3344_vm14, %vm3363_vm6 }
0x1bea   :  { %7390 = vmatprep.subr.bf16.mxu1 %v8170_v3 }
0x1beb   :  { %3639 = vrot.lane.b32.xlu1 %v3526_v52, %s8173_s5  ;;  %3752 = vrot.lane.b32.xlu0 %v3526_v52, %s8174_s9 }
0x1bef   :  { %3754 = vrot.lane.b32.xlu1 %v3526_v52, %s8177_s23  ;;  %3864 = vrot.lane.b32.xlu0 %v3526_v52, %s8175_s13 }
0x1bf3   :  { %3866 = vrot.lane.b32.xlu1 %v3526_v52, %s8178_s26  ;;  %4104 = vrot.lane.b32.xlu0 %v3991_v57, %s8176_s22 }
0x1bf7   :  { %3993 = vrot.lane.b32.xlu1 %v3991_v57, %s8172_s0  ;;  %4217 = vrot.lane.b32.xlu0 %v3991_v57, %s8177_s23 }
0x1bfb   :  { %4102 = vrot.lane.b32.xlu1 %v3991_v57, %s8173_s5  ;;  %4329 = vrot.lane.b32.xlu0 %v3991_v57, %s8178_s26 }
0x1bff   :  { %4215 = vrot.lane.b32.xlu1 %v3991_v57, %s8174_s9 }
0x1c03   :  { %4327 = vrot.lane.b32.xlu1 %v3991_v57, %s8175_s13 }
0x1c59   :  { %v3529_v59 = vpop.permute.xlu0 %3528  ;;  %v3642_v32 = vpop.permute.xlu1 %3641 }
0x1c5a   :  { %v3534_v60 = vsel %vm478_vm3, %v3529_v59, 0  ;;  %v3647_v5 = vsel %vm478_vm3, %v3642_v32, 0 }
0x1c5b   :  { %7373 = vmatpush3.bf16.xpose.msra.mxu0 %v3534_v60 }
0x1c5c   :  { %7384 = vmatprep.subr.bf16.mxu0 %v8170_v3 }
0x1c5d   :  { %v3640_v63 = vpop.permute.xlu1 %3639  ;;  %v3753_v10 = vpop.permute.xlu0 %3752 }
0x1c61   :  { %v3755_v8 = vpop.permute.xlu1 %3754  ;;  %v3865_v13 = vpop.permute.xlu0 %3864 }
0x1c62   :  { %7375 = vmatmul.mubr.msk.bf16.vlgmr.msra.gmra.mrb[76].mxu0 %vm478_vm3, %v3526_v52  ;;  %v3760_v61 = vsel %vm478_vm3, %v3755_v8, 0 }
0x1c63   :  { %7385 = vmatpush3.bf16.xpose.msra.mxu0 %v3647_v5  ;;  %7386 = vmatprep.mubr.msk.bf16.mxu0 %vm8171_vm2, %v8170_v3  ;;  %v9095_v5 = vsel %vm3364_vm7, 0.0, %v8180_v29 }
0x1c64   :  { %7396 = vmatprep.subr.bf16.mxu0 %v8170_v3 }
0x1c65   :  { %v3867_v9 = vpop.permute.xlu1 %3866  ;;  %v4105_v16 = vpop.permute.xlu0 %4104 }
0x1c66   :  { %v3872_v12 = vsel %vm478_vm3, %v3867_v9, 0  ;;  %v4110_v17 = vsel %vm478_vm3, %v4105_v16, 0 }
0x1c69   :  { %v3994_v55 = vpop.permute.xlu1 %3993  ;;  %v4218_v18 = vpop.permute.xlu0 %4217 }
0x1c6a   :  { %7387 = vmatmul.mubr.msk.bf16.vlgmr.msra.gmra.mrb[80].mxu0 %vm478_vm3, %v3640_v63  ;;  %v3999_v15 = vsel %vm478_vm3, %v3994_v55, 0  ;;  %v4223_v53 = vsel %vm478_vm3, %v4218_v18, 0 }
0x1c6b   :  { %7397 = vmatpush3.bf16.xpose.msra.mxu0 %v3760_v61  ;;  %7398 = vmatprep.mubr.msk.bf16.mxu0 %vm8171_vm2, %v8170_v3 }
0x1c6c   :  { %7408 = vmatprep.subr.bf16.mxu0 %v8170_v3 }
0x1c6d   :  { %v4103_v58 = vpop.permute.xlu1 %4102  ;;  %v4330_v20 = vpop.permute.xlu0 %4329 }
0x1c6e   :  { %v4335_v21 = vsel %vm478_vm3, %v4330_v20, 0 }
0x1c71   :  { %v4216_v14 = vpop.permute.xlu1 %4215 }
0x1c72   :  { %7399 = vmatmul.mubr.msk.bf16.vlgmr.msra.gmra.mrb[84].mxu0 %vm478_vm3, %v3753_v10 }
0x1c73   :  { %7409 = vmatpush3.bf16.xpose.msra.mxu0 %v3872_v12  ;;  %7410 = vmatprep.mubr.msk.bf16.mxu0 %vm8171_vm2, %v8170_v3 }
0x1c74   :  { %7420 = vmatprep.subr.bf16.mxu0 %v8170_v3 }
0x1c75   :  { %v4328_v23 = vpop.permute.xlu1 %4327 }
0x1c7a   :  { %7411 = vmatmul.mubr.msk.bf16.vlgmr.msra.gmra.mrb[88].mxu0 %vm478_vm3, %v3865_v13 }
0x1c7b   :  { %7421 = vmatpush3.bf16.xpose.msra.mxu0 %v3999_v15  ;;  %7422 = vmatprep.mubr.msk.bf16.mxu0 %vm8171_vm2, %v8170_v3 }
0x1c7c   :  { %7432 = vmatprep.subr.bf16.mxu0 %v8170_v3 }
0x1c82   :  { %7423 = vmatmul.mubr.msk.bf16.vlgmr.msra.gmra.mrb[92].mxu0 %vm478_vm3, %v3991_v57 }
0x1c83   :  { %7433 = vmatpush3.bf16.xpose.msra.mxu0 %v4110_v17  ;;  %7434 = vmatprep.mubr.msk.bf16.mxu0 %vm8171_vm2, %v8170_v3 }
0x1c84   :  { %7444 = vmatprep.subr.bf16.mxu0 %v8170_v3 }
0x1c8a   :  { %7435 = vmatmul.mubr.msk.bf16.vlgmr.msra.gmra.mrb[96].mxu0 %vm478_vm3, %v4103_v58 }
0x1c8b   :  { %7445 = vmatpush3.bf16.xpose.msra.mxu0 %v4223_v53  ;;  %7446 = vmatprep.mubr.msk.bf16.mxu0 %vm8171_vm2, %v8170_v3 }
0x1c8c   :  { %7456 = vmatprep.subr.bf16.mxu0 %v8170_v3 }
0x1c92   :  { %7447 = vmatmul.mubr.msk.bf16.vlgmr.msra.gmra.mrb[100].mxu0 %vm478_vm3, %v4216_v14 }
0x1c93   :  { %7457 = vmatpush3.bf16.xpose.msra.mxu0 %v4335_v21  ;;  %7458 = vmatprep.mubr.msk.bf16.mxu0 %vm8171_vm2, %v8170_v3 }
0x1c94   :  { %7468 = vmatprep.subr.bf16.mxu0 %v8170_v3 }
0x1c9a   :  { %7459 = vmatmul.mubr.msk.bf16.vlgmr.msra.gmra.mrb[104].mxu0 %vm478_vm3, %v4328_v23 }
0x1c9b   :  { %7476 = vmatprep.mubr.msk.bf16.mxu0 %vm8171_vm2, %v8170_v3 }
0x1d35   :  { %v3570_v34 = vpop.f32.mrb[76].mxu0 }
0x1d36   :  { %v3576_v62 = vmul.f32 0.25, %v3570_v34  ;;  %v7376_v35 = vpop.f32.mrb[77].mxu0 }
0x1d37   :  { %v3573_v36 = vpop.f32.mrb[78].mxu0 }
0x1d38   :  { %v9073_v0 = vadd.f32 %v3576_v62, %v9070_v11  ;;  %v7377_v37 = vpop.f32.mrb[79].mxu0 }
0x1d3a   :  { %v3579_v39 = vsel %vm3578_vm4, %v9073_v0, -inf }
0x1d3b   :  { %3580 = vmax.xlane.f32.xlu0 %v3579_v39 }
0x1d3d   :  { %v3683_v33 = vpop.f32.mrb[80].mxu0 }
0x1d3e   :  { %v3689_v30 = vmul.f32 0.25, %v3683_v33  ;;  %v7388_v40 = vpop.f32.mrb[81].mxu0 }
0x1d3f   :  { %v3686_v31 = vpop.f32.mrb[82].mxu0 }
0x1d40   :  { %v9078_v43 = vadd.f32 %v3689_v30, %v9070_v11  ;;  %v7389_v44 = vpop.f32.mrb[83].mxu0 }
0x1d42   :  { %v3691_v45 = vsel %vm3578_vm4, %v9078_v43, -inf }
0x1d43   :  { %3692 = vmax.xlane.f32.xlu1 %v3691_v45 }
0x1d45   :  { %v3796_v22 = vpop.f32.mrb[84].mxu0 }
0x1d46   :  { %v3802_v46 = vmul.f32 0.25, %v3796_v22  ;;  %v7400_v25 = vpop.f32.mrb[85].mxu0 }
0x1d47   :  { %v3799_v48 = vpop.f32.mrb[86].mxu0 }
0x1d48   :  { %v9084_v49 = vadd.f32 %v3802_v46, %v9070_v11  ;;  %v7401_v50 = vpop.f32.mrb[87].mxu0 }
0x1d4a   :  { %v3804_v52 = vsel %vm3578_vm4, %v9084_v49, -inf }
0x1d4b   :  { %3805 = vmax.xlane.f32.xlu0 %v3804_v52 }
0x1d4d   :  { %v3908_v47 = vpop.f32.mrb[88].mxu0 }
0x1d4e   :  { %v3914_v19 = vmul.f32 0.25, %v3908_v47  ;;  %v7412_v57 = vpop.f32.mrb[89].mxu0 }
0x1d4f   :  { %v3911_v59 = vpop.f32.mrb[90].mxu0 }
0x1d50   :  { %v3915_v60 = vadd.f32 %v3914_v19, %v9070_v11  ;;  %v7413_v32 = vpop.f32.mrb[91].mxu0 }
0x1d52   :  { %v3916_v63 = vsel %vm3578_vm4, %v3915_v60, -inf }
0x1d53   :  { %3917 = vmax.xlane.f32.xlu0 %v3916_v63 }
0x1d55   :  { %v4035_v8 = vpop.f32.mrb[92].mxu0 }
0x1d56   :  { %v4041_v61 = vmul.f32 0.25, %v4035_v8  ;;  %v7424_v9 = vpop.f32.mrb[93].mxu0  ;;  %v9134_v8 = vpack.c.bf16 %v9000_v42, %v9000_v42 }
0x1d57   :  { %v4038_v10 = vpop.f32.mrb[94].mxu0 }
0x1d58   :  { %v4042_v12 = vadd.f32 %v4041_v61, %v9095_v5  ;;  %v7425_v55 = vpop.f32.mrb[95].mxu0 }
0x1d5a   :  { %v4043_v13 = vsel %vm3578_vm4, %v4042_v12, -inf }
0x1d5b   :  { %4044 = vmax.xlane.f32.xlu0 %v4043_v13 }
0x1d5d   :  { %v4146_v15 = vpop.f32.mrb[96].mxu0 }
0x1d5e   :  { %v4152_v16 = vmul.f32 0.25, %v4146_v15  ;;  %v7436_v17 = vpop.f32.mrb[97].mxu0 }
0x1d5f   :  { %v4149_v18 = vpop.f32.mrb[98].mxu0 }
0x1d60   :  { %v9100_v2 = vadd.f32 %v4152_v16, %v9095_v5  ;;  %v7437_v58 = vpop.f32.mrb[99].mxu0 }
0x1d62   :  { %v4154_v53 = vsel %vm3578_vm4, %v9100_v2, -inf }
0x1d63   :  { %4155 = vmax.xlane.f32.xlu1 %v4154_v53 }
0x1d65   :  { %v4259_v20 = vpop.f32.mrb[100].mxu0 }
0x1d66   :  { %v4265_v14 = vmul.f32 0.25, %v4259_v20  ;;  %v7448_v21 = vpop.f32.mrb[101].mxu0 }
0x1d67   :  { %v4262_v23 = vpop.f32.mrb[102].mxu0 }
0x1d68   :  { %v4266_v24 = vadd.f32 %v4265_v14, %v9095_v5  ;;  %v7449_v26 = vpop.f32.mrb[103].mxu0 }
0x1d6a   :  { %v4267_v28 = vsel %vm3578_vm4, %v4266_v24, -inf }
0x1d6b   :  { %4268 = vmax.xlane.f32.xlu0 %v4267_v28 }
0x1d6d   :  { %v4371_v29 = vpop.f32.mrb[104].mxu0 }
0x1d6e   :  { %v4377_v34 = vmul.f32 0.25, %v4371_v29  ;;  %v7460_v62 = vpop.f32.mrb[105].mxu0 }
0x1d6f   :  { %v4374_v35 = vpop.f32.mrb[106].mxu0 }
0x1d70   :  { %v4378_v36 = vadd.f32 %v4377_v34, %v9095_v5  ;;  %v7461_v37 = vpop.f32.mrb[107].mxu0 }
0x1d72   :  { %v4379_v39 = vsel %vm3578_vm4, %v4378_v36, -inf }
0x1d73   :  { %4380 = vmax.xlane.f32.xlu1 %v4379_v39 }
0x1d81   :  { %3816 = vrot.lane.b32.xlu0 %v8998_v56, %s8174_s9 }
0x1d84   :  { %3704 = vrot.lane.b32.xlu1 %v8998_v56, %s8173_s5 }
0x1dc8   :  { %v3581_v33 = vpop.xlane.xlu0 %3580 }
0x1dc9   :  { %v3582_v30 = vsub.f32 %v9073_v0, %v3581_v33 }
0x1dcb   :  { %v3583_v40 = vmul.f32 1.442695, %v3582_v30 }
0x1dcd   :  { %8010 = vpow2.f32 %v3583_v40 }
0x1dd0   :  { %v3693_v31 = vpop.xlane.xlu1 %3692 }
0x1dd1   :  { %v3694_v44 = vsub.f32 %v9078_v43, %v3693_v31 }
0x1dd3   :  { %v3695_v45 = vmul.f32 1.442695, %v3694_v44 }
0x1dd5   :  { %8012 = vpow2.f32 %v3695_v45 }
0x1dd7   :  { %v8011_v41 = vpop.eup %8010 }
0x1dd8   :  { %v3806_v22 = vpop.xlane.xlu0 %3805  ;;  %v3585_v46 = vsel %vm3578_vm4, %v8011_v41, 0.0 }
0x1dd9   :  { %v3807_v25 = vsub.f32 %v9084_v49, %v3806_v22  ;;  %3586 = vadd.xlane.f32.xlu0 %v3585_v46 }
0x1ddb   :  { %v3808_v48 = vmul.f32 1.442695, %v3807_v25  ;;  %v4060_v25 = vsel %vm3595_vm12, %v9134_v8, 0 }
0x1ddd   :  { %8014 = vpow2.f32 %v3808_v48 }
0x1ddf   :  { %v9116_v50 = vpop.eup %8012 }
0x1de0   :  { %v3918_v51 = vpop.xlane.xlu0 %3917  ;;  %v3697_v0 = vsel %vm3578_vm4, %v9116_v50, 0.0 }
0x1de1   :  { %v3919_v52 = vsub.f32 %v3915_v60, %v3918_v51  ;;  %3698 = vadd.xlane.f32.xlu1 %v3697_v0 }
0x1de3   :  { %v3920_v43 = vmul.f32 1.442695, %v3919_v52 }
0x1de5   :  { %8016 = vpow2.f32 %v3920_v43 }
0x1de7   :  { %v9120_v54 = vpop.eup %8014 }
0x1de8   :  { %v4045_v47 = vpop.xlane.xlu0 %4044  ;;  %v3810_v19 = vsel %vm3578_vm4, %v9120_v54, 0.0 }
0x1de9   :  { %v4046_v49 = vsub.f32 %v4042_v12, %v4045_v47  ;;  %3811 = vadd.xlane.f32.xlu0 %v3810_v19 }
0x1deb   :  { %v4047_v57 = vmul.f32 1.442695, %v4046_v49 }
0x1ded   :  { %8018 = vpow2.f32 %v4047_v57 }
0x1def   :  { %v9124_v59 = vpop.eup %8016 }
0x1df0   :  { %v3922_v32 = vsel %vm3578_vm4, %v9124_v59, 0.0  ;;  %v4156_v12 = vpop.xlane.xlu1 %4155 }
0x1df1   :  { %3923 = vadd.xlane.f32.xlu1 %v3922_v32  ;;  %v4157_v55 = vsub.f32 %v9100_v2, %v4156_v12 }
0x1df3   :  { %v4158_v15 = vmul.f32 1.442695, %v4157_v55 }
0x1df7   :  { %v9128_v60 = vpop.eup %8018 }
0x1df8   :  { %v4049_v63 = vsel %vm3578_vm4, %v9128_v60, 0.0  ;;  %v4269_v61 = vpop.xlane.xlu0 %4268 }
0x1df9   :  { %4050 = vadd.xlane.f32.xlu0 %v4049_v63  ;;  %v4270_v9 = vsub.f32 %v4266_v24, %v4269_v61 }
0x1dfb   :  { %v4271_v10 = vmul.f32 1.442695, %v4270_v9 }
0x1dfc   :  { %v3817_v20 = vpop.permute.xlu0 %3816 }
0x1dfd   :  { %8020 = vpow2.f32 %v4271_v10  ;;  %v3822_v37 = vsel %vm3595_vm12, %v3817_v20, 0 }
0x1dfe   :  { %8022 = vpow2.f32 %v4158_v15 }
0x1e00   :  { %v4381_v13 = vpop.xlane.xlu1 %4380 }
0x1e01   :  { %v4382_v16 = vsub.f32 %v4378_v36, %v4381_v13 }
0x1e02   :  { %4167 = vrot.lane.b32.xlu1 %v9134_v8, %s8173_s5 }
0x1e03   :  { %v4383_v17 = vmul.f32 1.442695, %v4382_v16 }
0x1e04   :  { %v3705_v21 = vpop.permute.xlu1 %3704 }
0x1e05   :  { %8024 = vpow2.f32 %v4383_v17  ;;  %v3710_v29 = vsel %vm3595_vm12, %v3705_v21, 0 }
0x1e07   :  { %v9141_v42 = vpop.eup %8020 }
0x1e08   :  { %v4273_v18 = vsel %vm3578_vm4, %v9141_v42, 0.0  ;;  %v9145_v58 = vpop.eup %8022 }
0x1e0f   :  { %3928 = vrot.lane.b32.xlu0 %v8998_v56, %s8175_s13  ;;  %v4160_v56 = vsel %vm3578_vm4, %v9145_v58, 0.0  ;;  %v9149_v53 = vpop.eup %8024 }
0x1e10   :  { %v4385_v2 = vsel %vm3578_vm4, %v9149_v53, 0.0 }
0x1e26   :  { %4274 = vadd.xlane.f32.xlu1 %v4273_v18 }
0x1e2e   :  { %4161 = vadd.xlane.f32.xlu0 %v4160_v56 }
0x1e32   :  { %4386 = vadd.xlane.f32.xlu0 %v4385_v2 }
0x1e37   :  { %4391 = vrot.lane.b32.xlu1 %v9134_v8, %s8175_s13 }
0x1e48   :  { %4279 = vrot.lane.b32.xlu0 %v9134_v8, %s8174_s9 }
0x1e66   :  { %v3587_v14 = vpop.xlane.xlu0 %3586 }
0x1e67   :  { %8026 = vrcp.f32 %v3587_v14 }
0x1e6e   :  { %v3699_v23 = vpop.xlane.xlu1 %3698 }
0x1e6f   :  { %8028 = vrcp.f32 %v3699_v23 }
0x1e71   :  { %v8027_v24 = vpop.eup %8026 }
0x1e72   :  { %v3589_v26 = vmul.f32 %v8027_v24, %v8011_v41 }
0x1e74   :  { %v3590_v28 = vpack.c.bf16 %v3589_v26, %v3589_v26 }
0x1e76   :  { %7381 = vmatmul.mubr.msk.bf16.vlgmr.msra.gmra.mrb[96].mxu1 %vm3578_vm4, %v3590_v28  ;;  %v3812_v34 = vpop.xlane.xlu0 %3811 }
0x1e77   :  { %7391 = vmatpush3.bf16.msra.mxu1 %v3710_v29  ;;  %8030 = vrcp.f32 %v3812_v34  ;;  %7392 = vmatprep.mubr.msk.bf16.mxu1 %vm8171_vm2, %v8170_v3 }
0x1e78   :  { %7402 = vmatprep.subr.bf16.mxu1 %v8170_v3 }
0x1e79   :  { %v8029_v62 = vpop.eup %8028 }
0x1e7a   :  { %v3701_v35 = vmul.f32 %v8029_v62, %v9116_v50 }
0x1e7c   :  { %v3702_v36 = vpack.c.bf16 %v3701_v35, %v3701_v35  ;;  %v7864_v35 = vld [vmem:[%s9625_s1] sm:$0xff]  }
0x1e7d   :  { %7469 = vmatpush3.bf16.msra.mxu0 %v7864_v35  ;;  %v7869_v35 = vld [vmem:[%s9627_s7 + $0x8] sm:$0xff]  }
0x1e7e   :  { %v3924_v39 = vpop.xlane.xlu1 %3923  ;;  %7393 = vmatmul.mubr.msk.bf16.vlgmr.msra.gmra.mrb[100].mxu1 %vm3578_vm4, %v3702_v36  ;;  %7470 = vmatprep.subr.bf16.mxu0 %v8170_v3 }
0x1e7f   :  { %8032 = vrcp.f32 %v3924_v39  ;;  %7403 = vmatpush3.bf16.msra.mxu1 %v3822_v37  ;;  %7404 = vmatprep.mubr.msk.bf16.mxu1 %vm8171_vm2, %v8170_v3  ;;  %v7865_v37 = vld [vmem:[%s9625_s1 + $0x8] sm:$0xff]  }
0x1e80   :  { %7414 = vmatprep.subr.bf16.mxu1 %v8170_v3 }
0x1e81   :  { %v8031_v33 = vpop.eup %8030  ;;  %7471 = vmatpush3.bf16.msra.mxu0 %v7865_v37  ;;  %v7871_v37 = vld [vmem:[%s9627_s7 + $0x18] sm:$0xff]  }
0x1e82   :  { %v3814_v30 = vmul.f32 %v8031_v33, %v9120_v54  ;;  %v4168_v51 = vpop.permute.xlu1 %4167  ;;  %7472 = vmatprep.subr.bf16.mxu0 %v8170_v3 }
0x1e83   :  { %v4173_v52 = vsel %vm3595_vm12, %v4168_v51, 0 }
0x1e84   :  { %v3815_v40 = vpack.c.bf16 %v3814_v30, %v3814_v30 }
0x1e86   :  { %7405 = vmatmul.mubr.msk.bf16.vlgmr.msra.gmra.mrb[104].mxu1 %vm3578_vm4, %v3815_v40  ;;  %v4051_v31 = vpop.xlane.xlu0 %4050  ;;  %v7866_v40 = vld [vmem:[%s9625_s1 + $0x10] sm:$0xff]  }
0x1e87   :  { %8034 = vrcp.f32 %v4051_v31  ;;  %7416 = vmatprep.mubr.msk.bf16.mxu1 %vm8171_vm2, %v8170_v3  ;;  %7473 = vmatpush3.bf16.msra.mxu0 %v7866_v40 }
0x1e88   :  { %7474 = vmatprep.subr.bf16.mxu0 %v8170_v3 }
0x1e89   :  { %v8033_v44 = vpop.eup %8032 }
0x1e8a   :  { %v3926_v45 = vmul.f32 %v8033_v44, %v9124_v59  ;;  %v3929_v41 = vpop.permute.xlu0 %3928 }
0x1e8b   :  { %v3934_v22 = vsel %vm3595_vm12, %v3929_v41, 0 }
0x1e8c   :  { %7415 = vmatpush3.bf16.msra.mxu1 %v3934_v22  ;;  %v3927_v46 = vpack.c.bf16 %v3926_v45, %v3926_v45  ;;  %v7867_v45 = vld [vmem:[%s9625_s1 + $0x18] sm:$0xff]  }
0x1e8d   :  { %7426 = vmatprep.subr.bf16.mxu1 %v8170_v3  ;;  %7475 = vmatpush3.bf16.msra.mxu0 %v7867_v45 }
0x1e8e   :  { %7492 = vmatprep.subr.bf16.mxu0 %v8170_v3 }
0x1e8f   :  { %7417 = vmatmul.mubr.msk.bf16.vlgmr.msra.gmra.mrb[108].mxu1 %vm3578_vm4, %v3927_v46 }
0x1e90   :  { %7427 = vmatpush3.bf16.msra.mxu1 %v4060_v25  ;;  %7428 = vmatprep.mubr.msk.bf16.mxu1 %vm8171_vm2, %v8170_v3 }
0x1e91   :  { %v8035_v48 = vpop.eup %8034  ;;  %7438 = vmatprep.subr.bf16.mxu1 %v8170_v3 }
0x1e92   :  { %v4053_v50 = vmul.f32 %v8035_v48, %v9128_v60 }
0x1e94   :  { %v4054_v0 = vpack.c.bf16 %v4053_v50, %v4053_v50 }
0x1e97   :  { %7429 = vmatmul.mubr.msk.bf16.vlgmr.msra.gmra.mrb[112].mxu1 %vm3578_vm4, %v4054_v0 }
0x1e98   :  { %7439 = vmatpush3.bf16.msra.mxu1 %v4173_v52  ;;  %7440 = vmatprep.mubr.msk.bf16.mxu1 %vm8171_vm2, %v8170_v3 }
0x1e99   :  { %7450 = vmatprep.subr.bf16.mxu1 %v8170_v3 }
0x1eb3   :  { %v4275_v54 = vpop.xlane.xlu1 %4274 }
0x1eb7   :  { %v4392_v8 = vpop.permute.xlu1 %4391 }
0x1eb8   :  { %v4397_v10 = vsel %vm3595_vm12, %v4392_v8, 0 }
0x1ebb   :  { %v4162_v43 = vpop.xlane.xlu0 %4161 }
0x1ebc   :  { %8036 = vrcp.f32 %v4162_v43 }
0x1ebd   :  { %8038 = vrcp.f32 %v4275_v54 }
0x1ebf   :  { %v4387_v47 = vpop.xlane.xlu0 %4386 }
0x1ec0   :  { %8040 = vrcp.f32 %v4387_v47 }
0x1ec3   :  { %v4280_v57 = vpop.permute.xlu0 %4279 }
0x1ec4   :  { %v4285_v60 = vsel %vm3595_vm12, %v4280_v57, 0 }
0x1ec6   :  { %v8037_v19 = vpop.eup %8036 }
0x1ec7   :  { %v4164_v49 = vmul.f32 %v8037_v19, %v9145_v58  ;;  %v8039_v32 = vpop.eup %8038 }
0x1ec8   :  { %v4277_v63 = vmul.f32 %v8039_v32, %v9141_v42 }
0x1ec9   :  { %v4165_v59 = vpack.c.bf16 %v4164_v49, %v4164_v49 }
0x1eca   :  { %v4278_v61 = vpack.c.bf16 %v4277_v63, %v4277_v63  ;;  %v8041_v9 = vpop.eup %8040 }
0x1ecb   :  { %7441 = vmatmul.mubr.msk.bf16.vlgmr.msra.gmra.mrb[116].mxu1 %vm3578_vm4, %v4165_v59  ;;  %v4389_v12 = vmul.f32 %v8041_v9, %v9149_v53 }
0x1ecc   :  { %7451 = vmatpush3.bf16.msra.mxu1 %v4285_v60  ;;  %7452 = vmatprep.mubr.msk.bf16.mxu1 %vm8171_vm2, %v8170_v3 }
0x1ecd   :  { %7462 = vmatprep.subr.bf16.mxu1 %v8170_v3  ;;  %v4390_v55 = vpack.c.bf16 %v4389_v12, %v4389_v12 }
0x1ed3   :  { %7453 = vmatmul.mubr.msk.bf16.vlgmr.msra.gmra.mrb[120].mxu1 %vm3578_vm4, %v4278_v61 }
0x1ed4   :  { %7463 = vmatpush3.bf16.msra.mxu1 %v4397_v10  ;;  %7464 = vmatprep.mubr.msk.bf16.mxu1 %vm8171_vm2, %v8170_v3 }
0x1ed5   :  { %7480 = vmatprep.subr.bf16.mxu1 %v8170_v3 }
0x1edb   :  { %7465 = vmatmul.mubr.msk.bf16.vlgmr.msra.gmra.mrb[124].mxu1 %vm3578_vm4, %v4390_v55 }
0x1edc   :  { %7488 = vmatprep.mubr.msk.bf16.mxu1 %vm8171_vm2, %v8170_v3 }
0x1f49   :  { %v3633_v13 = vpop.f32.mrb[96].mxu1 }
0x1f4a   :  { %v7382_v15 = vpop.f32.mrb[97].mxu1 }
0x1f4b   :  { %v3636_v16 = vpop.f32.mrb[98].mxu1  ;;  %v6730_v15 = vld [vmem:[%s9626_s2] ss:$0 sm:$0xff] }
0x1f4c   :  { %v7383_v17 = vpop.f32.mrb[99].mxu1 }
0x1f51   :  { %v3746_v42 = vpop.f32.mrb[100].mxu1 }
0x1f52   :  { %v7394_v18 = vpop.f32.mrb[101].mxu1 }
0x1f53   :  { %v3749_v58 = vpop.f32.mrb[102].mxu1 }
0x1f54   :  { %v7395_v56 = vpop.f32.mrb[103].mxu1 }
0x1f59   :  { %v3858_v2 = vpop.f32.mrb[104].mxu1 }
0x1f5a   :  { %v7406_v53 = vpop.f32.mrb[105].mxu1 }
0x1f5b   :  { %v3861_v20 = vpop.f32.mrb[106].mxu1 }
0x1f5c   :  { %v7407_v14 = vpop.f32.mrb[107].mxu1 }
0x1f62   :  { %v3970_v21 = vpop.f32.mrb[108].mxu1 }
0x1f63   :  { %v7418_v23 = vpop.f32.mrb[109].mxu1 }
0x1f64   :  { %v3973_v24 = vpop.f32.mrb[110].mxu1 }
0x1f65   :  { %v7419_v26 = vpop.f32.mrb[111].mxu1 }
0x1f6a   :  { %v4096_v28 = vpop.f32.mrb[112].mxu1 }
0x1f6b   :  { %v7430_v29 = vpop.f32.mrb[113].mxu1 }
0x1f6c   :  { %v4099_v34 = vpop.f32.mrb[114].mxu1 }
0x1f6d   :  { %v7431_v62 = vpop.f32.mrb[115].mxu1 }
0x1f6e   :  { %v7868_v62 = vld [vmem:[%s9627_s7] sm:$0xff]  }
0x1f6f   :  { %7481 = vmatpush3.bf16.msra.mxu1 %v7868_v62  ;;  %v6752_v62 = vld [vmem:[%s9632_s18] ss:$0 sm:$0xff] }
0x1f70   :  { %7482 = vmatprep.subr.bf16.mxu1 %v8170_v3 }
0x1f73   :  { %7483 = vmatpush3.bf16.msra.mxu1 %v7869_v35 }
0x1f74   :  { %7484 = vmatprep.subr.bf16.mxu1 %v8170_v3 }
0x1f9e   :  { %v4209_v36 = vpop.f32.mrb[116].mxu1 }
0x1f9f   :  { %v7750_v39 = vpack.i.bf16 %v4209_v36, %v3746_v42  ;;  %v7442_v33 = vpop.f32.mrb[117].mxu1  ;;  %v7870_v36 = vld [vmem:[%s9627_s7 + $0x10] sm:$0xff]  }
0x1fa0   :  { %v4212_v30 = vpop.f32.mrb[118].mxu1  ;;  %7485 = vmatpush3.bf16.msra.mxu1 %v7870_v36 }
0x1fa1   :  { %7751 = vrot.lane.b32.xlu1 %v7750_v39, %s8178_s26  ;;  %v7443_v31 = vpop.f32.mrb[119].mxu1  ;;  %7486 = vmatprep.subr.bf16.mxu1 %v8170_v3 }
0x1fa4   :  { %7487 = vmatpush3.bf16.msra.mxu1 %v7871_v37 }
0x1fa6   :  { %v4321_v44 = vpop.f32.mrb[120].mxu1 }
0x1fa7   :  { %v7755_v41 = vpack.i.bf16 %v4321_v44, %v3858_v2  ;;  %v7454_v22 = vpop.f32.mrb[121].mxu1 }
0x1fa8   :  { %v4324_v46 = vpop.f32.mrb[122].mxu1  ;;  %v6736_v22 = vld [vmem:[%s9628_s10] ss:$0 sm:$0xff] }
0x1fa9   :  { %7756 = vrot.lane.b32.xlu1 %v7755_v41, %s8177_s23  ;;  %v7455_v25 = vpop.f32.mrb[123].mxu1 }
0x1fae   :  { %v4433_v48 = vpop.f32.mrb[124].mxu1 }
0x1faf   :  { %v7760_v50 = vpack.i.bf16 %v4433_v48, %v3970_v21  ;;  %v7466_v51 = vpop.f32.mrb[125].mxu1 }
0x1fb0   :  { %v4436_v0 = vpop.f32.mrb[126].mxu1 }
0x1fb1   :  { %7761 = vrot.lane.b32.xlu1 %v7760_v50, %s8176_s22  ;;  %v7467_v52 = vpop.f32.mrb[127].mxu1  ;;  %v6737_v50 = vld [vmem:[%s9629_s11] ss:$0 sm:$0xff] }
0x2013   :  { %v7752_v43 = vpop.permute.xlu1 %7751 }
0x2014   :  { %v7754_v47 = vunpack.i.h.bf16 %v7752_v43  ;;  %v7753_v19 = vunpack.i.l.bf16 %v7752_v43 }
0x2016   :  { %v4451_v32 = vsel %vm478_vm3, %v4096_v28, %v7754_v47  ;;  %v3988_v60 = vsel %vm478_vm3, %v3633_v13, %v7753_v19  ;;  %v7873_v47 = vld [vmem:[%s9630_s15 + $0x8] sm:$0xff]   ;;  %v7874_v19 = vld [vmem:[%s9630_s15 + $0x10] sm:$0xff]  }
0x201b   :  { %v7757_v54 = vpop.permute.xlu1 %7756 }
0x201c   :  { %v7759_v49 = vunpack.i.h.bf16 %v7757_v54  ;;  %v7758_v57 = vunpack.i.l.bf16 %v7757_v54  ;;  %v7872_v54 = vld [vmem:[%s9630_s15] sm:$0xff]  }
0x201e   :  { %v4452_v61 = vsel %vm938_vm8, %v4451_v32, %v7759_v49  ;;  %v3989_v9 = vsel %vm938_vm8, %v3988_v60, %v7758_v57  ;;  %v7875_v49 = vld [vmem:[%s9630_s15 + $0x18] sm:$0xff]   ;;  %v7877_v57 = vld [vmem:[%s9630_s15 + $0x28] sm:$0xff]   ;;  %v6738_v60 = vld [vmem:[%s9631_s16] ss:$0 sm:$0xff] }
0x201f   :  { %v7879_v32 = vld [vmem:[%s9630_s15 + $0x38] sm:$0xff]  }
0x2023   :  { %v7762_v59 = vpop.permute.xlu1 %7761 }
0x2024   :  { %v7764_v63 = vunpack.i.h.bf16 %v7762_v59  ;;  %v7763_v8 = vunpack.i.l.bf16 %v7762_v59  ;;  %v7878_v59 = vld [vmem:[%s9630_s15 + $0x30] sm:$0xff]  }
0x2026   :  { %v4453_v10 = vsel %vm940_vm9, %v4452_v61, %v7764_v63  ;;  %v3990_v12 = vsel %vm940_vm9, %v3989_v9, %v7763_v8 }
0x2027   :  { %v4454_v55 = vpack.c.bf16 %v4453_v10, %v3990_v12 }
0x2029   :  { %7477 = vmatmul.mubr.msk.bf16.vlgmr.msra.gmra.mrb[108].mxu0 %vm267_vm0, %v4454_v55 }
0x202a   :  { %7508 = vmatprep.mubr.msk.bf16.mxu0 %vm8171_vm2, %v8170_v3  ;;  %7493 = vmatpush3.bf16.msra.mxu0 %v7872_v54  ;;  %v7883_v54 = vld [vmem:[%s9620_s14 + $0x50] ss:$8 sps:$4 sm:$0xff]  }
0x202b   :  { %7494 = vmatprep.subr.bf16.mxu0 %v8170_v3 }
0x202e   :  { %7495 = vmatpush3.bf16.msra.mxu0 %v7873_v47  ;;  %v7888_v47 = vld [vmem:[%s9620_s14 + $0x64] ss:$8 sps:$4 sm:$0xff]  }
0x202f   :  { %7496 = vmatprep.subr.bf16.mxu0 %v8170_v3 }
0x2032   :  { %7497 = vmatpush3.bf16.msra.mxu0 %v7874_v19  ;;  %v7886_v19 = vld [vmem:[%s9620_s14 + $0x60] ss:$8 sps:$4 sm:$0xff]  }
0x2033   :  { %7498 = vmatprep.subr.bf16.mxu0 %v8170_v3 }
0x2036   :  { %7499 = vmatpush3.bf16.msra.mxu0 %v7875_v49  ;;  %v7891_v49 = vld [vmem:[%s9620_s14 + $0x74] ss:$8 sps:$4 sm:$0xff]  }
0x2037   :  { %7500 = vmatprep.subr.bf16.mxu0 %v8170_v3 }
0x20fc   :  { %v4522_v16 = vpop.f32.mrb[108].mxu0 }
0x20fd   :  { %v4523_v17 = vadd.f32 %v6730_v15, %v4522_v16  ;;  %v7478_v13 = vpop.f32.mrb[109].mxu0 }
0x20fe   :  { %v4525_v42 = vpop.f32.mrb[110].mxu0 }
0x20ff   :  { %v9225_v18 = vadd.f32 %v4523_v17, %v8968_v38  ;;  %v4526_v58 = vadd.f32 %v6730_v15, %v4525_v42  ;;  %v7479_v56 = vpop.f32.mrb[111].mxu0 }
0x2101   :  { %v9228_v2 = vadd.f32 %v4526_v58, %v8973_v7  ;;  %v4533_v53 = vsel %vm267_vm0, %v9225_v18, 0.0 }
0x2102   :  { %4534 = vadd.xlane.f32.xlu1 %v4533_v53 }
0x2103   :  { %v4536_v20 = vsel %vm267_vm0, %v9228_v2, 0.0 }
0x2104   :  { %4537 = vadd.xlane.f32.xlu0 %v4536_v20 }
0x218f   :  { %v4535_v14 = vpop.xlane.xlu1 %4534 }
0x2190   :  { %v4539_v21 = vmul.f32 0.015625, %v4535_v14 }
0x2191   :  { %v4538_v23 = vpop.xlane.xlu0 %4537 }
0x2192   :  { %v4541_v38 = vsub.f32 %v9225_v18, %v4539_v21  ;;  %v4540_v24 = vmul.f32 0.015625, %v4538_v23 }
0x2194   :  { %v4542_v7 = vsub.f32 %v9228_v2, %v4540_v24  ;;  %v4543_v26 = vmul.f32 %v4541_v38, %v4541_v38 }
0x2196   :  { %v4545_v28 = vsel %vm267_vm0, %v4543_v26, 0.0  ;;  %v4544_v29 = vmul.f32 %v4542_v7, %v4542_v7 }
0x2197   :  { %4546 = vadd.xlane.f32.xlu0 %v4545_v28 }
0x2198   :  { %v4548_v34 = vsel %vm267_vm0, %v4544_v29, 0.0 }
0x219b   :  { %4549 = vadd.xlane.f32.xlu0 %v4548_v34 }
0x2224   :  { %v4547_v39 = vpop.xlane.xlu0 %4546 }
0x2225   :  { %v4551_v33 = vmul.f32 0.015625, %v4547_v39 }
0x2227   :  { %v4553_v30 = vadd.f32 1e-05, %v4551_v33 }
0x2228   :  { %v4550_v40 = vpop.xlane.xlu0 %4549 }
0x2229   :  { %8042 = vrsqrt.f32 %v4553_v30  ;;  %v4552_v31 = vmul.f32 0.015625, %v4550_v40 }
0x222b   :  { %v4554_v44 = vadd.f32 1e-05, %v4552_v31 }
0x222d   :  { %8044 = vrsqrt.f32 %v4554_v44 }
0x2233   :  { %v8043_v45 = vpop.eup %8042 }
0x2234   :  { %v4557_v41 = vmul.f32 %v8043_v45, %v4541_v38 }
0x2236   :  { %v4565_v25 = vmul.f32 %v6736_v22, %v4557_v41 }
0x2237   :  { %v8045_v46 = vpop.eup %8044 }
0x2238   :  { %v4558_v48 = vmul.f32 %v8045_v46, %v4542_v7  ;;  %v4573_v0 = vadd.f32 %v6737_v50, %v4565_v25 }
0x223a   :  { %v4566_v51 = vmul.f32 %v6736_v22, %v4558_v48 }
0x223c   :  { %v4574_v52 = vadd.f32 %v6737_v50, %v4566_v51 }
0x223e   :  { %v4583_v43 = vpack.c.bf16 %v4574_v52, %v4573_v0  ;;  %v7882_v0 = vld [vmem:[%s9620_s14 + $0x44] ss:$8 sps:$4 sm:$0xff]   ;;  %v7880_v52 = vld [vmem:[%s9620_s14 + $0x40] ss:$8 sps:$4 sm:$0xff]  }
0x223f   :  { %4917 = vmatprep.subr.bf16.mxu1 %v7882_v0 }
0x2240   :  { %7489 = vmatmul.mubr.msk.bf16.vlgmr.msra.gmra.mrb[128].mxu1 %vm267_vm0, %v4583_v43  ;;  %v7885_v43 = vld [vmem:[%s9620_s14 + $0x54] ss:$8 sps:$4 sm:$0xff]  }
0x2241   :  { %4949 = vmatprep.mubr.bf16.mxu1 %v8169_v1  ;;  %v7876_v1 = vld [vmem:[%s9630_s15 + $0x20] sm:$0xff]   ;;  %4918 = vmatpush1.bf16.msra.mxu1 %v7880_v52 }
0x2242   :  { %7501 = vmatpush3.bf16.msra.mxu0 %v7876_v1  ;;  %4919 = vmatprep.subr.bf16.mxu1 %v7885_v43  ;;  %v7889_v1 = vld [vmem:[%s9620_s14 + $0x70] ss:$8 sps:$4 sm:$0xff]  }
0x2243   :  { %7502 = vmatprep.subr.bf16.mxu0 %v8170_v3 }
0x2245   :  { %4920 = vmatpush1.bf16.msra.mxu1 %v7883_v54 }
0x2246   :  { %7503 = vmatpush3.bf16.msra.mxu0 %v7877_v57  ;;  %4921 = vmatprep.subr.bf16.mxu1 %v7888_v47 }
0x2247   :  { %7504 = vmatprep.subr.bf16.mxu0 %v8170_v3 }
0x2249   :  { %4922 = vmatpush1.bf16.msra.mxu1 %v7886_v19 }
0x224a   :  { %7505 = vmatpush3.bf16.msra.mxu0 %v7878_v59  ;;  %4923 = vmatprep.subr.bf16.mxu1 %v7891_v49 }
0x224b   :  { %7506 = vmatprep.subr.bf16.mxu0 %v8170_v3 }
0x224d   :  { %4924 = vmatpush1.bf16.msra.mxu1 %v7889_v1 }
0x224e   :  { %7507 = vmatpush3.bf16.msra.mxu0 %v7879_v32  ;;  %7512 = vmatprep.subr.bf16.mxu1 %v8170_v3 }
0x224f   :  { %7524 = vmatprep.subr.bf16.mxu0 %v8170_v3 }
0x2313   :  { %v4652_v63 = vpop.f32.mrb[128].mxu1 }
0x2314   :  { %v4653_v8 = vadd.f32 %v6738_v60, %v4652_v63  ;;  %v7490_v61 = vpop.f32.mrb[129].mxu1 }
0x2315   :  { %v4655_v9 = vpop.f32.mrb[130].mxu1 }
0x2316   :  { %v4659_v10 = vmul.f32 %v4653_v8, %v4653_v8  ;;  %v4656_v12 = vadd.f32 %v6738_v60, %v4655_v9  ;;  %v7491_v55 = vpop.f32.mrb[131].mxu1  ;;  %v6755_v9 = vld [vmem:[%s9621_s19 + $0x1] ss:$0 sm:$0xff] }
0x2318   :  { %v4661_v15 = vmul.f32 %v4659_v10, %v4653_v8  ;;  %v4660_v16 = vmul.f32 %v4656_v12, %v4656_v12 }
0x231a   :  { %v4663_v17 = vmul.f32 0.044715, %v4661_v15  ;;  %v4662_v13 = vmul.f32 %v4660_v16, %v4656_v12  ;;  %v6756_v16 = vld [vmem:[%s9622_s24 + $0x1] ss:$0 sm:$0xff] }
0x231c   :  { %v4665_v42 = vadd.f32 %v4663_v17, %v4653_v8  ;;  %v4664_v58 = vmul.f32 0.044715, %v4662_v13 }
0x231e   :  { %v4667_v56 = vmul.f32 0.7978846, %v4665_v42  ;;  %v4666_v53 = vadd.f32 %v4664_v58, %v4656_v12 }
0x2320   :  { %8046 = vtanh.f32 %v4667_v56  ;;  %v4668_v20 = vmul.f32 0.7978846, %v4666_v53  ;;  %v6765_v56 = vld [vmem:[%s9623_s30 + $0x2] sm:$0x3] }
0x2321   :  { %v4867_v53 = vrot.slane %v6765_v56, %v8450_v4 }
0x2322   :  { %8048 = vtanh.f32 %v4668_v20 }
0x232a   :  { %v8047_v14 = vpop.eup %8046 }
0x232b   :  { %v4671_v21 = vadd.f32 1.0, %v8047_v14 }
0x232c   :  { %v8049_v23 = vpop.eup %8048 }
0x232d   :  { %v4673_v38 = vmul.f32 0.5, %v4671_v21  ;;  %v4672_v24 = vadd.f32 1.0, %v8049_v23  ;;  %v4871_v23 = vrot.slane %v6765_v56, %v8454_v6 }
0x232f   :  { %v4674_v7 = vmul.f32 0.5, %v4672_v24  ;;  %v4675_v26 = vmul.f32 %v4673_v38, %v4653_v8 }
0x2331   :  { %v4676_v28 = vmul.f32 %v4674_v7, %v4656_v12 }
0x2333   :  { %v4693_v29 = vpack.c.bf16 %v4676_v28, %v4675_v26 }
0x2335   :  { %7509 = vmatmul.mubr.bf16.vlgmr.msra.gmra.mrb[112].mxu0 %v4693_v29 }
0x2336   :  { %7526 = vmatprep.mubr.msk.bf16.mxu0 %vm8171_vm2, %v8170_v3 }
0x2408   :  { %v4776_v34 = vpop.f32.mrb[112].mxu0 }
0x2409   :  { %v4783_v35 = vadd.f32 %v4776_v34, %v9225_v18  ;;  %v7510_v36 = vpop.f32.mrb[113].mxu0 }
0x240a   :  { %v4779_v37 = vpop.f32.mrb[114].mxu0 }
0x240b   :  { %v9270_v39 = vadd.f32 %v6752_v62, %v4783_v35  ;;  %v4784_v33 = vadd.f32 %v4779_v37, %v9228_v2  ;;  %v7511_v30 = vpop.f32.mrb[115].mxu0 }
0x240d   :  { %v9273_v40 = vadd.f32 %v6752_v62, %v4784_v33  ;;  %v4798_v31 = vsel %vm267_vm0, %v9270_v39, 0.0 }
0x240e   :  { %4799 = vadd.xlane.f32.xlu1 %v4798_v31 }
0x240f   :  { %v4801_v44 = vsel %vm267_vm0, %v9273_v40, 0.0 }
0x2410   :  { %4802 = vadd.xlane.f32.xlu0 %v4801_v44 }
0x249b   :  { %v4800_v18 = vpop.xlane.xlu1 %4799 }
0x249c   :  { %v4804_v45 = vmul.f32 0.015625, %v4800_v18 }
0x249d   :  { %v4803_v41 = vpop.xlane.xlu0 %4802 }
0x249e   :  { %v4806_v2 = vsub.f32 %v9270_v39, %v4804_v45  ;;  %v4805_v22 = vmul.f32 0.015625, %v4803_v41 }
0x24a0   :  { %v4807_v46 = vsub.f32 %v9273_v40, %v4805_v22  ;;  %v4808_v25 = vmul.f32 %v4806_v2, %v4806_v2 }
0x24a2   :  { %v4810_v48 = vsel %vm267_vm0, %v4808_v25, 0.0  ;;  %v4809_v50 = vmul.f32 %v4807_v46, %v4807_v46 }
0x24a3   :  { %4811 = vadd.xlane.f32.xlu1 %v4810_v48 }
0x24a4   :  { %v4813_v51 = vsel %vm267_vm0, %v4809_v50, 0.0 }
0x24a5   :  { %4814 = vadd.xlane.f32.xlu0 %v4813_v51 }
0x2530   :  { %v4812_v57 = vpop.xlane.xlu1 %4811 }
0x2531   :  { %v4816_v59 = vmul.f32 0.015625, %v4812_v57 }
0x2532   :  { %v4815_v32 = vpop.xlane.xlu0 %4814 }
0x2533   :  { %v4818_v60 = vadd.f32 1e-05, %v4816_v59  ;;  %v4817_v63 = vmul.f32 0.015625, %v4815_v32 }
0x2535   :  { %8050 = vrsqrt.f32 %v4818_v60  ;;  %v4819_v8 = vadd.f32 1e-05, %v4817_v63 }
0x2537   :  { %8052 = vrsqrt.f32 %v4819_v8 }
0x253f   :  { %v8051_v61 = vpop.eup %8050 }
0x2540   :  { %v4822_v10 = vmul.f32 %v8051_v61, %v4806_v2 }
0x2541   :  { %v8053_v12 = vpop.eup %8052 }
0x2542   :  { %v4830_v55 = vmul.f32 %v6755_v9, %v4822_v10  ;;  %v4823_v15 = vmul.f32 %v8053_v12, %v4807_v46 }
0x2544   :  { %v4831_v17 = vmul.f32 %v6755_v9, %v4823_v15  ;;  %v4838_v13 = vadd.f32 %v6756_v16, %v4830_v55 }
0x2546   :  { %v4839_v42 = vadd.f32 %v6756_v16, %v4831_v17 }
0x2548   :  { %v4862_v58 = vpack.c.bf16 %v4839_v42, %v4838_v13 }
0x254a   :  { %6783 = vmatmul.mubr.msk.bf16.vlgmr.msra.gmra.mrb[132].mxu1 %vm267_vm0, %v4862_v58 }
0x254b   :  { %7514 = vmatprep.mubr.msk.bf16.mxu1 %vm8171_vm2, %v8170_v3 }
0x261d   :  { %v4951_v20 = vpop.f32.mrb[132].mxu1 }
0x261e   :  { %v4952_v14 = vadd.f32 %v4951_v20, %v4867_v53  ;;  %v4953_v21 = vpop.f32.mrb[133].mxu1 }
0x261f   :  { %v4955_v38 = vpop.f32.mrb[134].mxu1  ;;  %v4954_v34 = vadd.f32 %v4953_v21, %v4871_v23 }
0x2620   :  { %v4960_v24 = vpack.c.bf16 %v4952_v14, %v4952_v14  ;;  %v4957_v7 = vpop.f32.mrb[135].mxu1  ;;  %v4956_v28 = vadd.f32 %v4955_v38, %v4867_v53 }
0x2621   :  { %v9300_v26 = vadd.f32 %v4957_v7, %v4871_v23  ;;  %v9320_v37 = vpack.c.bf16 %v4954_v34, %v4954_v34 }
0x2622   :  { %5073 = vrot.lane.b32.xlu0 %v4960_v24, %s8176_s22  ;;  %4962 = vrot.lane.b32.xlu1 %v4960_v24, %s8172_s0  ;;  %v5423_v4 = vpack.c.bf16 %v4956_v28, %v4956_v28 }
0x2623   :  { %v5029_v31 = vsel %vm3595_vm12, %v9320_v37, 0 }
0x2626   :  { %5298 = vrot.lane.b32.xlu0 %v4960_v24, %s8178_s26  ;;  %5071 = vrot.lane.b32.xlu1 %v4960_v24, %s8173_s5 }
0x262a   :  { %5425 = vrot.lane.b32.xlu0 %v5423_v4, %s8172_s0  ;;  %5186 = vrot.lane.b32.xlu1 %v4960_v24, %s8177_s23  ;;  %s9633_s0 = sld [smem:[#allocation26_spill]] }
0x262e   :  { %5534 = vrot.lane.b32.xlu0 %v5423_v4, %s8173_s5  ;;  %5184 = vrot.lane.b32.xlu1 %v4960_v24, %s8174_s9 }
0x2632   :  { %5647 = vrot.lane.b32.xlu0 %v5423_v4, %s8174_s9  ;;  %5296 = vrot.lane.b32.xlu1 %v4960_v24, %s8175_s13 }
0x2636   :  { %5759 = vrot.lane.b32.xlu0 %v5423_v4, %s8175_s13  ;;  %5536 = vrot.lane.b32.xlu1 %v5423_v4, %s8176_s22 }
0x263a   :  { %5649 = vrot.lane.b32.xlu1 %v5423_v4, %s8177_s23 }
0x263e   :  { %5761 = vrot.lane.b32.xlu1 %v5423_v4, %s8178_s26 }
0x2694   :  { %v5074_v6 = vpop.permute.xlu0 %5073  ;;  %v4963_v29 = vpop.permute.xlu1 %4962 }
0x2695   :  { %v5079_v62 = vsel %vm478_vm3, %v5074_v6, 0  ;;  %v4968_v35 = vsel %vm478_vm3, %v4963_v29, 0 }
0x2696   :  { %7513 = vmatpush3.bf16.xpose.msra.mxu1 %v4968_v35  ;;  %7525 = vmatpush3.bf16.xpose.msra.mxu0 %v5079_v62 }
0x2697   :  { %7518 = vmatprep.subr.bf16.mxu1 %v8170_v3  ;;  %7536 = vmatprep.subr.bf16.mxu0 %v8170_v3 }
0x2698   :  { %v5072_v36 = vpop.permute.xlu1 %5071  ;;  %v5299_v44 = vpop.permute.xlu0 %5298 }
0x2699   :  { %v5304_v45 = vsel %vm478_vm3, %v5299_v44, 0 }
0x269c   :  { %v5187_v33 = vpop.permute.xlu1 %5186  ;;  %v5426_v41 = vpop.permute.xlu0 %5425 }
0x269d   :  { %v5192_v30 = vsel %vm478_vm3, %v5187_v33, 0  ;;  %7515 = vmatmul.mubr.msk.bf16.vlgmr.msra.gmra.mrb[136].mxu1 %vm478_vm3, %v4960_v24  ;;  %7527 = vmatmul.mubr.msk.bf16.vlgmr.msra.gmra.mrb[116].mxu0 %vm478_vm3, %v5072_v36  ;;  %v5431_v22 = vsel %vm478_vm3, %v5426_v41, 0 }
0x269e   :  { %7519 = vmatpush3.bf16.msra.mxu1 %v5029_v31  ;;  %7537 = vmatpush3.bf16.xpose.msra.mxu0 %v5192_v30 }
0x269f   :  { %7538 = vmatprep.mubr.msk.bf16.mxu0 %vm8171_vm2, %v8170_v3  ;;  %7548 = vmatprep.subr.bf16.mxu0 %v8170_v3 }
0x26a0   :  { %7520 = vmatprep.mubr.msk.bf16.mxu1 %vm8171_vm2, %v8170_v3  ;;  %7530 = vmatprep.subr.bf16.mxu1 %v8170_v3  ;;  %v5185_v18 = vpop.permute.xlu1 %5184  ;;  %v5535_v50 = vpop.permute.xlu0 %5534 }
0x26a4   :  { %v5297_v2 = vpop.permute.xlu1 %5296  ;;  %v5648_v52 = vpop.permute.xlu0 %5647 }
0x26a5   :  { %7539 = vmatmul.mubr.msk.bf16.vlgmr.msra.gmra.mrb[120].mxu0 %vm478_vm3, %v5185_v18 }
0x26a6   :  { %7549 = vmatpush3.bf16.xpose.msra.mxu0 %v5304_v45  ;;  %7550 = vmatprep.mubr.msk.bf16.mxu0 %vm8171_vm2, %v8170_v3 }
0x26a7   :  { %7560 = vmatprep.subr.bf16.mxu0 %v8170_v3 }
0x26a8   :  { %v5537_v46 = vpop.permute.xlu1 %5536  ;;  %v5760_v54 = vpop.permute.xlu0 %5759 }
0x26a9   :  { %v5542_v25 = vsel %vm478_vm3, %v5537_v46, 0 }
0x26ac   :  { %v5650_v48 = vpop.permute.xlu1 %5649 }
0x26ad   :  { %7551 = vmatmul.mubr.msk.bf16.vlgmr.msra.gmra.mrb[124].mxu0 %vm478_vm3, %v5297_v2  ;;  %v5655_v51 = vsel %vm478_vm3, %v5650_v48, 0 }
0x26ae   :  { %7561 = vmatpush3.bf16.xpose.msra.mxu0 %v5431_v22  ;;  %7562 = vmatprep.mubr.msk.bf16.mxu0 %vm8171_vm2, %v8170_v3 }
0x26af   :  { %7572 = vmatprep.subr.bf16.mxu0 %v8170_v3 }
0x26b0   :  { %v5762_v0 = vpop.permute.xlu1 %5761 }
0x26b1   :  { %v5767_v43 = vsel %vm478_vm3, %v5762_v0, 0 }
0x26b5   :  { %7563 = vmatmul.mubr.msk.bf16.vlgmr.msra.gmra.mrb[128].mxu0 %vm478_vm3, %v5423_v4 }
0x26b6   :  { %7573 = vmatpush3.bf16.xpose.msra.mxu0 %v5542_v25  ;;  %7574 = vmatprep.mubr.msk.bf16.mxu0 %vm8171_vm2, %v8170_v3 }
0x26b7   :  { %7584 = vmatprep.subr.bf16.mxu0 %v8170_v3 }
0x26bd   :  { %7575 = vmatmul.mubr.msk.bf16.vlgmr.msra.gmra.mrb[132].mxu0 %vm478_vm3, %v5535_v50 }
0x26be   :  { %7585 = vmatpush3.bf16.xpose.msra.mxu0 %v5655_v51  ;;  %7586 = vmatprep.mubr.msk.bf16.mxu0 %vm8171_vm2, %v8170_v3 }
0x26bf   :  { %7596 = vmatprep.subr.bf16.mxu0 %v8170_v3 }
0x26c5   :  { %7587 = vmatmul.mubr.msk.bf16.vlgmr.msra.gmra.mrb[136].mxu0 %vm478_vm3, %v5648_v52 }
0x26c6   :  { %7597 = vmatpush3.bf16.xpose.msra.mxu0 %v5767_v43  ;;  %7598 = vmatprep.mubr.msk.bf16.mxu0 %vm8171_vm2, %v8170_v3 }
0x26c7   :  { %7608 = vmatprep.subr.bf16.mxu0 %v8170_v3 }
0x26cd   :  { %7599 = vmatmul.mubr.msk.bf16.vlgmr.msra.gmra.mrb[140].mxu0 %vm478_vm3, %v5760_v54 }
0x26ce   :  { %7616 = vmatprep.mubr.msk.bf16.mxu0 %vm8171_vm2, %v8170_v3 }
0x2770   :  { %v5004_v47 = vpop.f32.mrb[136].mxu1  ;;  %v5115_v19 = vpop.f32.mrb[116].mxu0 }
0x2771   :  { %v5010_v49 = vmul.f32 0.25, %v5004_v47  ;;  %v5121_v1 = vmul.f32 0.25, %v5115_v19  ;;  %v7516_v57 = vpop.f32.mrb[137].mxu1  ;;  %v7528_v59 = vpop.f32.mrb[117].mxu0 }
0x2772   :  { %v5007_v32 = vpop.f32.mrb[138].mxu1  ;;  %v5118_v60 = vpop.f32.mrb[118].mxu0 }
0x2773   :  { %v5011_v63 = vadd.f32 %v5010_v49, %v9070_v11  ;;  %v5122_v8 = vadd.f32 %v5121_v1, %v9070_v11  ;;  %v7517_v61 = vpop.f32.mrb[139].mxu1  ;;  %v7529_v9 = vpop.f32.mrb[119].mxu0 }
0x2775   :  { %v5012_v10 = vsel %vm3578_vm4, %v5011_v63, -inf  ;;  %v5123_v12 = vsel %vm3578_vm4, %v5122_v8, -inf }
0x2776   :  { %5013 = vmax.xlane.f32.xlu1 %v5012_v10  ;;  %5124 = vmax.xlane.f32.xlu0 %v5123_v12 }
0x2778   :  { %v5228_v55 = vpop.f32.mrb[120].mxu0 }
0x2779   :  { %v5234_v15 = vmul.f32 0.25, %v5228_v55  ;;  %v7540_v16 = vpop.f32.mrb[121].mxu0 }
0x277a   :  { %v5231_v17 = vpop.f32.mrb[122].mxu0 }
0x277b   :  { %v5235_v13 = vadd.f32 %v5234_v15, %v9070_v11  ;;  %v7541_v42 = vpop.f32.mrb[123].mxu0 }
0x277d   :  { %v5236_v58 = vsel %vm3578_vm4, %v5235_v13, -inf }
0x277e   :  { %5237 = vmax.xlane.f32.xlu0 %v5236_v58 }
0x2780   :  { %v5340_v56 = vpop.f32.mrb[124].mxu0 }
0x2781   :  { %v5346_v53 = vmul.f32 0.25, %v5340_v56  ;;  %v7552_v20 = vpop.f32.mrb[125].mxu0 }
0x2782   :  { %v5343_v14 = vpop.f32.mrb[126].mxu0 }
0x2783   :  { %v5347_v21 = vadd.f32 %v5346_v53, %v9070_v11  ;;  %v7553_v23 = vpop.f32.mrb[127].mxu0 }
0x2785   :  { %v5348_v38 = vsel %vm3578_vm4, %v5347_v21, -inf }
0x2786   :  { %5349 = vmax.xlane.f32.xlu0 %v5348_v38 }
0x2788   :  { %v5467_v24 = vpop.f32.mrb[128].mxu0 }
0x2789   :  { %v5473_v7 = vmul.f32 0.25, %v5467_v24  ;;  %v7564_v28 = vpop.f32.mrb[129].mxu0 }
0x278a   :  { %v5470_v4 = vpop.f32.mrb[130].mxu0 }
0x278b   :  { %v5474_v6 = vadd.f32 %v5473_v7, %v9095_v5  ;;  %v7565_v29 = vpop.f32.mrb[131].mxu0 }
0x278d   :  { %v5475_v34 = vsel %vm3578_vm4, %v5474_v6, -inf }
0x278e   :  { %5476 = vmax.xlane.f32.xlu1 %v5475_v34 }
0x2790   :  { %v5578_v62 = vpop.f32.mrb[132].mxu0 }
0x2791   :  { %v5584_v35 = vmul.f32 0.25, %v5578_v62  ;;  %v7576_v36 = vpop.f32.mrb[133].mxu0 }
0x2792   :  { %v5581_v33 = vpop.f32.mrb[134].mxu0  ;;  %v5487_v36 = vpack.c.bf16 %v9300_v26, %v9300_v26 }
0x2793   :  { %v5585_v11 = vadd.f32 %v5584_v35, %v9095_v5  ;;  %v7577_v30 = vpop.f32.mrb[135].mxu0 }
0x2795   :  { %v5586_v31 = vsel %vm3578_vm4, %v5585_v11, -inf }
0x2796   :  { %5587 = vmax.xlane.f32.xlu0 %v5586_v31 }
0x2798   :  { %v5691_v44 = vpop.f32.mrb[136].mxu0 }
0x2799   :  { %v5697_v18 = vmul.f32 0.25, %v5691_v44  ;;  %v7588_v45 = vpop.f32.mrb[137].mxu0 }
0x279a   :  { %v5694_v41 = vpop.f32.mrb[138].mxu0 }
0x279b   :  { %v5698_v2 = vadd.f32 %v5697_v18, %v9095_v5  ;;  %v7589_v22 = vpop.f32.mrb[139].mxu0 }
0x279d   :  { %v5699_v46 = vsel %vm3578_vm4, %v5698_v2, -inf }
0x279e   :  { %5700 = vmax.xlane.f32.xlu1 %v5699_v46 }
0x27a0   :  { %v5803_v25 = vpop.f32.mrb[140].mxu0 }
0x27a1   :  { %v5809_v48 = vmul.f32 0.25, %v5803_v25  ;;  %v7600_v50 = vpop.f32.mrb[141].mxu0 }
0x27a2   :  { %v5806_v51 = vpop.f32.mrb[142].mxu0 }
0x27a3   :  { %v5810_v0 = vadd.f32 %v5809_v48, %v9095_v5  ;;  %v7601_v52 = vpop.f32.mrb[143].mxu0 }
0x27a5   :  { %v5811_v43 = vsel %vm3578_vm4, %v5810_v0, -inf }
0x27a6   :  { %5812 = vmax.xlane.f32.xlu0 %v5811_v43 }
0x27bc   :  { %5136 = vrot.lane.b32.xlu0 %v9320_v37, %s8173_s5 }
0x2803   :  { %v5125_v54 = vpop.xlane.xlu0 %5124  ;;  %v5014_v47 = vpop.xlane.xlu1 %5013 }
0x2804   :  { %v5126_v19 = vsub.f32 %v5122_v8, %v5125_v54  ;;  %v5015_v49 = vsub.f32 %v5011_v63, %v5014_v47 }
0x2806   :  { %v5127_v1 = vmul.f32 1.442695, %v5126_v19  ;;  %v5016_v57 = vmul.f32 1.442695, %v5015_v49  ;;  %v5492_v49 = vsel %vm3595_vm12, %v5487_v36, 0 }
0x2808   :  { %8054 = vpow2.f32 %v5127_v1 }
0x2809   :  { %8056 = vpow2.f32 %v5016_v57 }
0x280b   :  { %v5238_v59 = vpop.xlane.xlu0 %5237 }
0x280c   :  { %v5239_v32 = vsub.f32 %v5235_v13, %v5238_v59 }
0x280e   :  { %v5240_v60 = vmul.f32 1.442695, %v5239_v32 }
0x2810   :  { %8058 = vpow2.f32 %v5240_v60 }
0x2812   :  { %v9379_v5 = vpop.eup %8054 }
0x2813   :  { %v8057_v61 = vpop.eup %8056  ;;  %v5350_v9 = vpop.xlane.xlu0 %5349  ;;  %v5129_v10 = vsel %vm3578_vm4, %v9379_v5, 0.0 }
0x2814   :  { %v5351_v12 = vsub.f32 %v5347_v21, %v5350_v9  ;;  %5130 = vadd.xlane.f32.xlu0 %v5129_v10  ;;  %v5018_v8 = vsel %vm3578_vm4, %v8057_v61, 0.0 }
0x2815   :  { %5019 = vadd.xlane.f32.xlu1 %v5018_v8 }
0x2816   :  { %v5352_v63 = vmul.f32 1.442695, %v5351_v12 }
0x2818   :  { %8060 = vpow2.f32 %v5352_v63 }
0x281a   :  { %v9384_v55 = vpop.eup %8058 }
0x281b   :  { %v5242_v15 = vsel %vm3578_vm4, %v9384_v55, 0.0  ;;  %v5477_v13 = vpop.xlane.xlu1 %5476 }
0x281c   :  { %5243 = vadd.xlane.f32.xlu1 %v5242_v15  ;;  %v5478_v42 = vsub.f32 %v5474_v6, %v5477_v13 }
0x281e   :  { %v5479_v56 = vmul.f32 1.442695, %v5478_v42 }
0x2820   :  { %8062 = vpow2.f32 %v5479_v56 }
0x2822   :  { %v9388_v16 = vpop.eup %8060 }
0x2823   :  { %v5354_v17 = vsel %vm3578_vm4, %v9388_v16, 0.0  ;;  %v5588_v58 = vpop.xlane.xlu0 %5587 }
0x2824   :  { %5355 = vadd.xlane.f32.xlu0 %v5354_v17  ;;  %v5589_v53 = vsub.f32 %v5585_v11, %v5588_v58 }
0x2826   :  { %v5590_v23 = vmul.f32 1.442695, %v5589_v53 }
0x2828   :  { %8064 = vpow2.f32 %v5590_v23 }
0x282a   :  { %v9396_v28 = vpop.eup %8062 }
0x282b   :  { %v5701_v20 = vpop.xlane.xlu1 %5700 }
0x282c   :  { %v5702_v21 = vsub.f32 %v5698_v2, %v5701_v20 }
0x282d   :  { %5248 = vrot.lane.b32.xlu1 %v9320_v37, %s8174_s9 }
0x282e   :  { %v5703_v24 = vmul.f32 1.442695, %v5702_v21 }
0x2830   :  { %8066 = vpow2.f32 %v5703_v24 }
0x2832   :  { %v9400_v4 = vpop.eup %8064 }
0x2833   :  { %v5813_v14 = vpop.xlane.xlu0 %5812  ;;  %v5592_v29 = vsel %vm3578_vm4, %v9400_v4, 0.0 }
0x2834   :  { %v5814_v38 = vsub.f32 %v5810_v0, %v5813_v14 }
0x2836   :  { %v5815_v7 = vmul.f32 1.442695, %v5814_v38 }
0x2837   :  { %v5137_v33 = vpop.permute.xlu0 %5136 }
0x2838   :  { %8068 = vpow2.f32 %v5815_v7  ;;  %v5142_v2 = vsel %vm3595_vm12, %v5137_v33, 0 }
0x283a   :  { %5360 = vrot.lane.b32.xlu0 %v9320_v37, %s8175_s13  ;;  %v5481_v37 = vsel %vm3578_vm4, %v9396_v28, 0.0  ;;  %v9402_v6 = vpop.eup %8066 }
0x283b   :  { %v5705_v35 = vsel %vm3578_vm4, %v9402_v6, 0.0 }
0x2842   :  { %v9406_v34 = vpop.eup %8068 }
0x2843   :  { %v5817_v62 = vsel %vm3578_vm4, %v9406_v34, 0.0 }
0x2851   :  { %5482 = vadd.xlane.f32.xlu1 %v5481_v37 }
0x2855   :  { %5593 = vadd.xlane.f32.xlu1 %v5592_v29 }
0x2859   :  { %5818 = vadd.xlane.f32.xlu0 %v5817_v62  ;;  %5706 = vadd.xlane.f32.xlu1 %v5705_v35 }
0x286a   :  { %5711 = vrot.lane.b32.xlu1 %v5487_v36, %s8174_s9 }
0x286e   :  { %5823 = vrot.lane.b32.xlu1 %v5487_v36, %s8175_s13 }
0x286f   :  { %5599 = vrot.lane.b32.xlu0 %v5487_v36, %s8173_s5 }
0x28a1   :  { %v5131_v30 = vpop.xlane.xlu0 %5130 }
0x28a2   :  { %v5020_v11 = vpop.xlane.xlu1 %5019 }
0x28a3   :  { %8070 = vrcp.f32 %v5020_v11 }
0x28a4   :  { %8072 = vrcp.f32 %v5131_v30  ;;  %v7892_v30 = vld [vmem:[%s9625_s1 + $0x20] sm:$0xff]  }
0x28a5   :  { %7609 = vmatpush3.bf16.msra.mxu0 %v7892_v30  ;;  %v7899_v30 = vld [vmem:[%s9627_s7 + $0x38] sm:$0xff]  }
0x28a6   :  { %7610 = vmatprep.subr.bf16.mxu0 %v8170_v3 }
0x28a9   :  { %v5244_v31 = vpop.xlane.xlu1 %5243 }
0x28aa   :  { %8074 = vrcp.f32 %v5244_v31 }
0x28ad   :  { %v8071_v44 = vpop.eup %8070  ;;  %v5249_v46 = vpop.permute.xlu1 %5248 }
0x28ae   :  { %v5022_v18 = vmul.f32 %v8071_v44, %v8057_v61  ;;  %v8073_v41 = vpop.eup %8072  ;;  %v5254_v50 = vsel %vm3595_vm12, %v5249_v46, 0  ;;  %v7894_v46 = vld [vmem:[%s9625_s1 + $0x30] sm:$0xff]  }
0x28af   :  { %v5133_v26 = vmul.f32 %v8073_v41, %v9379_v5  ;;  %v7893_v41 = vld [vmem:[%s9625_s1 + $0x28] sm:$0xff]  }
0x28b0   :  { %v5023_v45 = vpack.c.bf16 %v5022_v18, %v5022_v18  ;;  %7611 = vmatpush3.bf16.msra.mxu0 %v7893_v41 }
0x28b1   :  { %v5356_v22 = vpop.xlane.xlu0 %5355  ;;  %v5134_v25 = vpack.c.bf16 %v5133_v26, %v5133_v26  ;;  %7612 = vmatprep.subr.bf16.mxu0 %v8170_v3 }
0x28b2   :  { %7521 = vmatmul.mubr.msk.bf16.vlgmr.msra.gmra.mrb[140].mxu1 %vm3578_vm4, %v5023_v45  ;;  %8076 = vrcp.f32 %v5356_v22 }
0x28b3   :  { %7531 = vmatpush3.bf16.msra.mxu1 %v5142_v2  ;;  %7532 = vmatprep.mubr.msk.bf16.mxu1 %vm8171_vm2, %v8170_v3 }
0x28b4   :  { %7542 = vmatprep.subr.bf16.mxu1 %v8170_v3  ;;  %v8075_v48 = vpop.eup %8074  ;;  %7613 = vmatpush3.bf16.msra.mxu0 %v7894_v46  ;;  %v6808_v46 = vld [vmem:[%s9628_s10 + $0x1] ss:$0 sm:$0xff] }
0x28b5   :  { %v5246_v51 = vmul.f32 %v8075_v48, %v9384_v55  ;;  %v5361_v0 = vpop.permute.xlu0 %5360  ;;  %7614 = vmatprep.subr.bf16.mxu0 %v8170_v3 }
0x28b6   :  { %v5366_v54 = vsel %vm3595_vm12, %v5361_v0, 0 }
0x28b7   :  { %v5247_v52 = vpack.c.bf16 %v5246_v51, %v5246_v51 }
0x28ba   :  { %7533 = vmatmul.mubr.msk.bf16.vlgmr.msra.gmra.mrb[144].mxu1 %vm3578_vm4, %v5134_v25 }
0x28bb   :  { %7543 = vmatpush3.bf16.msra.mxu1 %v5254_v50  ;;  %7544 = vmatprep.mubr.msk.bf16.mxu1 %vm8171_vm2, %v8170_v3  ;;  %v7895_v50 = vld [vmem:[%s9625_s1 + $0x38] sm:$0xff]  }
0x28bc   :  { %7554 = vmatprep.subr.bf16.mxu1 %v8170_v3  ;;  %v8077_v43 = vpop.eup %8076  ;;  %7615 = vmatpush3.bf16.msra.mxu0 %v7895_v50 }
0x28bd   :  { %v5358_v47 = vmul.f32 %v8077_v43, %v9388_v16  ;;  %7632 = vmatprep.subr.bf16.mxu0 %v8170_v3 }
0x28bf   :  { %v5359_v19 = vpack.c.bf16 %v5358_v47, %v5358_v47 }
0x28c2   :  { %7545 = vmatmul.mubr.msk.bf16.vlgmr.msra.gmra.mrb[148].mxu1 %vm3578_vm4, %v5247_v52 }
0x28c3   :  { %7555 = vmatpush3.bf16.msra.mxu1 %v5366_v54  ;;  %7556 = vmatprep.mubr.msk.bf16.mxu1 %vm8171_vm2, %v8170_v3 }
0x28c4   :  { %7566 = vmatprep.subr.bf16.mxu1 %v8170_v3 }
0x28ca   :  { %7557 = vmatmul.mubr.msk.bf16.vlgmr.msra.gmra.mrb[152].mxu1 %vm3578_vm4, %v5359_v19 }
0x28cb   :  { %7567 = vmatpush3.bf16.msra.mxu1 %v5492_v49  ;;  %7568 = vmatprep.mubr.msk.bf16.mxu1 %vm8171_vm2, %v8170_v3 }
0x28cc   :  { %7578 = vmatprep.subr.bf16.mxu1 %v8170_v3 }
0x28de   :  { %v5483_v1 = vpop.xlane.xlu1 %5482 }
0x28df   :  { %8078 = vrcp.f32 %v5483_v1 }
0x28e2   :  { %v5594_v57 = vpop.xlane.xlu1 %5593 }
0x28e3   :  { %8080 = vrcp.f32 %v5594_v57 }
0x28e6   :  { %v5819_v59 = vpop.xlane.xlu0 %5818  ;;  %v5707_v32 = vpop.xlane.xlu1 %5706 }
0x28e7   :  { %8082 = vrcp.f32 %v5707_v32 }
0x28e8   :  { %8084 = vrcp.f32 %v5819_v59 }
0x28e9   :  { %v8079_v60 = vpop.eup %8078 }
0x28ea   :  { %v5485_v5 = vmul.f32 %v8079_v60, %v9396_v28  ;;  %v5600_v61 = vpop.permute.xlu0 %5599  ;;  %v5712_v63 = vpop.permute.xlu1 %5711 }
0x28eb   :  { %v5605_v12 = vsel %vm3595_vm12, %v5600_v61, 0  ;;  %v5717_v16 = vsel %vm3595_vm12, %v5712_v63, 0 }
0x28ec   :  { %v5486_v9 = vpack.c.bf16 %v5485_v5, %v5485_v5 }
0x28ed   :  { %v8081_v10 = vpop.eup %8080 }
0x28ee   :  { %7569 = vmatmul.mubr.msk.bf16.vlgmr.msra.gmra.mrb[156].mxu1 %vm3578_vm4, %v5486_v9  ;;  %v5596_v8 = vmul.f32 %v8081_v10, %v9400_v4  ;;  %v5824_v13 = vpop.permute.xlu1 %5823 }
0x28ef   :  { %7579 = vmatpush3.bf16.msra.mxu1 %v5605_v12  ;;  %7580 = vmatprep.mubr.msk.bf16.mxu1 %vm8171_vm2, %v8170_v3  ;;  %v5829_v56 = vsel %vm3595_vm12, %v5824_v13, 0 }
0x28f0   :  { %7590 = vmatprep.subr.bf16.mxu1 %v8170_v3  ;;  %v5597_v55 = vpack.c.bf16 %v5596_v8, %v5596_v8 }
0x28f1   :  { %v8083_v15 = vpop.eup %8082 }
0x28f2   :  { %v5709_v17 = vmul.f32 %v8083_v15, %v9402_v6  ;;  %v8085_v58 = vpop.eup %8084 }
0x28f3   :  { %v5821_v53 = vmul.f32 %v8085_v58, %v9406_v34 }
0x28f4   :  { %v5710_v42 = vpack.c.bf16 %v5709_v17, %v5709_v17 }
0x28f5   :  { %v5822_v20 = vpack.c.bf16 %v5821_v53, %v5821_v53 }
0x28f6   :  { %7581 = vmatmul.mubr.msk.bf16.vlgmr.msra.gmra.mrb[160].mxu1 %vm3578_vm4, %v5597_v55 }
0x28f7   :  { %7591 = vmatpush3.bf16.msra.mxu1 %v5717_v16  ;;  %7592 = vmatprep.mubr.msk.bf16.mxu1 %vm8171_vm2, %v8170_v3 }
0x28f8   :  { %7602 = vmatprep.subr.bf16.mxu1 %v8170_v3 }
0x28fe   :  { %7593 = vmatmul.mubr.msk.bf16.vlgmr.msra.gmra.mrb[164].mxu1 %vm3578_vm4, %v5710_v42  ;;  %v6800_v42 = vld [vmem:[%s9626_s2 + $0x1] ss:$0 sm:$0xff] }
0x28ff   :  { %7603 = vmatpush3.bf16.msra.mxu1 %v5829_v56  ;;  %7604 = vmatprep.mubr.msk.bf16.mxu1 %vm8171_vm2, %v8170_v3 }
0x2900   :  { %7620 = vmatprep.subr.bf16.mxu1 %v8170_v3 }
0x2906   :  { %7605 = vmatmul.mubr.msk.bf16.vlgmr.msra.gmra.mrb[168].mxu1 %vm3578_vm4, %v5822_v20 }
0x2907   :  { %7628 = vmatprep.mubr.msk.bf16.mxu1 %vm8171_vm2, %v8170_v3 }
0x2985   :  { %v5065_v14 = vpop.f32.mrb[140].mxu1 }
0x2986   :  { %v7522_v21 = vpop.f32.mrb[141].mxu1 }
0x2987   :  { %v5068_v23 = vpop.f32.mrb[142].mxu1 }
0x2988   :  { %v7523_v38 = vpop.f32.mrb[143].mxu1 }
0x298d   :  { %v5178_v24 = vpop.f32.mrb[144].mxu1 }
0x298e   :  { %v7534_v7 = vpop.f32.mrb[145].mxu1 }
0x298f   :  { %v5181_v28 = vpop.f32.mrb[146].mxu1 }
0x2990   :  { %v7535_v37 = vpop.f32.mrb[147].mxu1 }
0x2995   :  { %v5290_v4 = vpop.f32.mrb[148].mxu1 }
0x2996   :  { %v7546_v6 = vpop.f32.mrb[149].mxu1 }
0x2997   :  { %v5293_v29 = vpop.f32.mrb[150].mxu1 }
0x2998   :  { %v7547_v34 = vpop.f32.mrb[151].mxu1 }
0x299d   :  { %v5402_v62 = vpop.f32.mrb[152].mxu1 }
0x299e   :  { %v7558_v35 = vpop.f32.mrb[153].mxu1 }
0x299f   :  { %v5405_v36 = vpop.f32.mrb[154].mxu1 }
0x29a0   :  { %v7559_v33 = vpop.f32.mrb[155].mxu1  ;;  %v7896_v36 = vld [vmem:[%s9627_s7 + $0x20] sm:$0xff]  }
0x29a1   :  { %7621 = vmatpush3.bf16.msra.mxu1 %v7896_v36  ;;  %v7897_v33 = vld [vmem:[%s9627_s7 + $0x28] sm:$0xff]  }
0x29a2   :  { %7622 = vmatprep.subr.bf16.mxu1 %v8170_v3 }
0x29a5   :  { %7623 = vmatpush3.bf16.msra.mxu1 %v7897_v33 }
0x29a6   :  { %7624 = vmatprep.subr.bf16.mxu1 %v8170_v3 }
0x29c1   :  { %v5528_v11 = vpop.f32.mrb[156].mxu1 }
0x29c2   :  { %v7570_v31 = vpop.f32.mrb[157].mxu1 }
0x29c3   :  { %v5531_v44 = vpop.f32.mrb[158].mxu1 }
0x29c4   :  { %v7571_v18 = vpop.f32.mrb[159].mxu1 }
0x29c9   :  { %v5641_v45 = vpop.f32.mrb[160].mxu1 }
0x29ca   :  { %v7765_v2 = vpack.i.bf16 %v5641_v45, %v5178_v24  ;;  %v7582_v26 = vpop.f32.mrb[161].mxu1 }
0x29cb   :  { %v5644_v22 = vpop.f32.mrb[162].mxu1 }
0x29cc   :  { %7766 = vrot.lane.b32.xlu1 %v7765_v2, %s8178_s26  ;;  %v7583_v25 = vpop.f32.mrb[163].mxu1 }
0x29d1   :  { %v5753_v48 = vpop.f32.mrb[164].mxu1 }
0x29d2   :  { %v7770_v51 = vpack.i.bf16 %v5753_v48, %v5290_v4  ;;  %v7594_v0 = vpop.f32.mrb[165].mxu1 }
0x29d3   :  { %v5756_v52 = vpop.f32.mrb[166].mxu1 }
0x29d4   :  { %7771 = vrot.lane.b32.xlu0 %v7770_v51, %s8177_s23  ;;  %v7595_v43 = vpop.f32.mrb[167].mxu1  ;;  %v6809_v51 = vld [vmem:[%s9629_s11 + $0x1] ss:$0 sm:$0xff] }
0x29d9   :  { %v5865_v54 = vpop.f32.mrb[168].mxu1 }
0x29da   :  { %v7775_v47 = vpack.i.bf16 %v5865_v54, %v5402_v62  ;;  %v7606_v19 = vpop.f32.mrb[169].mxu1 }
0x29db   :  { %v5868_v49 = vpop.f32.mrb[170].mxu1  ;;  %v7901_v19 = vld [vmem:[%s9630_s15 + $0x48] sm:$0xff]  }
0x29dc   :  { %7776 = vrot.lane.b32.xlu1 %v7775_v47, %s8176_s22  ;;  %v7607_v1 = vpop.f32.mrb[171].mxu1  ;;  %v7900_v47 = vld [vmem:[%s9630_s15 + $0x40] sm:$0xff]   ;;  %v7902_v49 = vld [vmem:[%s9630_s15 + $0x50] sm:$0xff]  }
0x29dd   :  { %v7903_v1 = vld [vmem:[%s9630_s15 + $0x58] sm:$0xff]  }
0x2a3e   :  { %v7767_v57 = vpop.permute.xlu1 %7766 }
0x2a3f   :  { %v7769_v32 = vunpack.i.h.bf16 %v7767_v57  ;;  %v7768_v60 = vunpack.i.l.bf16 %v7767_v57  ;;  %v7904_v57 = vld [vmem:[%s9630_s15 + $0x60] sm:$0xff]  }
0x2a41   :  { %v5883_v10 = vsel %vm478_vm3, %v5528_v11, %v7769_v32  ;;  %v5420_v12 = vsel %vm478_vm3, %v5065_v14, %v7768_v60  ;;  %v7898_v11 = vld [vmem:[%s9627_s7 + $0x30] sm:$0xff]   ;;  %v7907_v60 = vld [vmem:[%s9630_s15 + $0x78] sm:$0xff]  }
0x2a42   :  { %7625 = vmatpush3.bf16.msra.mxu1 %v7898_v11  ;;  %v7906_v32 = vld [vmem:[%s9630_s15 + $0x70] sm:$0xff]  }
0x2a43   :  { %7626 = vmatprep.subr.bf16.mxu1 %v8170_v3 }
0x2a46   :  { %v7772_v59 = vpop.permute.xlu0 %7771  ;;  %7627 = vmatpush3.bf16.msra.mxu1 %v7899_v30 }
0x2a47   :  { %v7774_v5 = vunpack.i.h.bf16 %v7772_v59  ;;  %v7773_v61 = vunpack.i.l.bf16 %v7772_v59  ;;  %7652 = vmatprep.subr.bf16.mxu1 %v8170_v3  ;;  %v7905_v59 = vld [vmem:[%s9630_s15 + $0x68] sm:$0xff]  }
0x2a49   :  { %v5421_v55 = vsel %vm938_vm8, %v5420_v12, %v7773_v61  ;;  %v5884_v15 = vsel %vm938_vm8, %v5883_v10, %v7774_v5  ;;  %v6819_v5 = vld [vmem:[%s9631_s16 + $0x1] ss:$0 sm:$0xff] }
0x2a4e   :  { %v7777_v9 = vpop.permute.xlu1 %7776 }
0x2a4f   :  { %v7779_v8 = vunpack.i.h.bf16 %v7777_v9  ;;  %v7778_v63 = vunpack.i.l.bf16 %v7777_v9 }
0x2a51   :  { %v5422_v16 = vsel %vm940_vm9, %v5421_v55, %v7778_v63  ;;  %v5885_v17 = vsel %vm940_vm9, %v5884_v15, %v7779_v8 }
0x2a52   :  { %v5886_v13 = vpack.c.bf16 %v5885_v17, %v5422_v16 }
0x2a54   :  { %7617 = vmatmul.mubr.msk.bf16.vlgmr.msra.gmra.mrb[144].mxu0 %vm267_vm0, %v5886_v13 }
0x2a55   :  { %7648 = vmatprep.mubr.msk.bf16.mxu0 %vm8171_vm2, %v8170_v3  ;;  %7633 = vmatpush3.bf16.msra.mxu0 %v7900_v47 }
0x2a56   :  { %7634 = vmatprep.subr.bf16.mxu0 %v8170_v3 }
0x2a59   :  { %7635 = vmatpush3.bf16.msra.mxu0 %v7901_v19 }
0x2a5a   :  { %7636 = vmatprep.subr.bf16.mxu0 %v8170_v3 }
0x2a5d   :  { %7637 = vmatpush3.bf16.msra.mxu0 %v7902_v49 }
0x2a5e   :  { %7638 = vmatprep.subr.bf16.mxu0 %v8170_v3 }
0x2a61   :  { %7639 = vmatpush3.bf16.msra.mxu0 %v7903_v1  ;;  %v7913_v1 = vld [vmem:[%s8377_s4 + $0x28] sm:$0xff]  }
0x2a62   :  { %7640 = vmatprep.subr.bf16.mxu0 %v8170_v3 }
0x2a65   :  { %7641 = vmatpush3.bf16.msra.mxu0 %v7904_v57  ;;  %v6352_v57 = vsel %vm267_vm0, %v7913_v1, 0 }
0x2a66   :  { %7642 = vmatprep.subr.bf16.mxu0 %v8170_v3 }
0x2a69   :  { %7643 = vmatpush3.bf16.msra.mxu0 %v7905_v59  ;;  %v7914_v59 = vld [vmem:[%s8377_s4 + $0x30] sm:$0xff]  }
0x2a6a   :  { %7644 = vmatprep.subr.bf16.mxu0 %v8170_v3 }
0x2a6d   :  { %7645 = vmatpush3.bf16.msra.mxu0 %v7906_v32  ;;  %v6355_v32 = vsel %vm267_vm0, %v7914_v59, 0 }
0x2a6e   :  { %7646 = vmatprep.subr.bf16.mxu0 %v8170_v3 }
0x2a71   :  { %7647 = vmatpush3.bf16.msra.mxu0 %v7907_v60  ;;  %v7915_v60 = vld [vmem:[%s8377_s4 + $0x38] sm:$0xff]  }
0x2b27   :  { %v5954_v58 = vpop.f32.mrb[144].mxu0 }
0x2b28   :  { %v5955_v56 = vadd.f32 %v6800_v42, %v5954_v58  ;;  %v7618_v53 = vpop.f32.mrb[145].mxu0 }
0x2b29   :  { %v5957_v20 = vpop.f32.mrb[146].mxu0 }
0x2b2a   :  { %v9484_v14 = vadd.f32 %v5955_v56, %v9270_v39  ;;  %v5958_v21 = vadd.f32 %v6800_v42, %v5957_v20  ;;  %v7619_v23 = vpop.f32.mrb[147].mxu0 }
0x2b2c   :  { %v9487_v38 = vadd.f32 %v5958_v21, %v9273_v40  ;;  %v5967_v24 = vsel %vm267_vm0, %v9484_v14, 0.0 }
0x2b2d   :  { %5968 = vadd.xlane.f32.xlu0 %v5967_v24 }
0x2b2e   :  { %v5970_v7 = vsel %vm267_vm0, %v9487_v38, 0.0 }
0x2b2f   :  { %5971 = vadd.xlane.f32.xlu1 %v5970_v7 }
0x2bba   :  { %v5969_v28 = vpop.xlane.xlu0 %5968 }
0x2bbb   :  { %v5973_v37 = vmul.f32 0.015625, %v5969_v28 }
0x2bbc   :  { %v5972_v4 = vpop.xlane.xlu1 %5971 }
0x2bbd   :  { %v5975_v39 = vsub.f32 %v9484_v14, %v5973_v37  ;;  %v5974_v6 = vmul.f32 0.015625, %v5972_v4 }
0x2bbf   :  { %v5976_v40 = vsub.f32 %v9487_v38, %v5974_v6  ;;  %v5977_v29 = vmul.f32 %v5975_v39, %v5975_v39 }
0x2bc1   :  { %v5979_v34 = vsel %vm267_vm0, %v5977_v29, 0.0  ;;  %v5978_v62 = vmul.f32 %v5976_v40, %v5976_v40  ;;  %v6850_v29 = vld [vmem:[%s9632_s18 + $0x1] ss:$0 sm:$0xff] }
0x2bc2   :  { %5980 = vadd.xlane.f32.xlu0 %v5979_v34 }
0x2bc3   :  { %v5982_v35 = vsel %vm267_vm0, %v5978_v62, 0.0 }
0x2bc6   :  { %5983 = vadd.xlane.f32.xlu0 %v5982_v35 }
0x2c4f   :  { %v5981_v31 = vpop.xlane.xlu0 %5980 }
0x2c50   :  { %v5985_v44 = vmul.f32 0.015625, %v5981_v31 }
0x2c52   :  { %v5987_v18 = vadd.f32 1e-05, %v5985_v44 }
0x2c53   :  { %v5984_v45 = vpop.xlane.xlu0 %5983 }
0x2c54   :  { %8086 = vrsqrt.f32 %v5987_v18  ;;  %v5986_v41 = vmul.f32 0.015625, %v5984_v45  ;;  %v7908_v18 = vld [vmem:[%s8377_s4] sm:$0xff]  }
0x2c55   :  { %v6337_v45 = vsel %vm267_vm0, %v7908_v18, 0 }
0x2c56   :  { %v5988_v2 = vadd.f32 1e-05, %v5986_v41 }
0x2c58   :  { %8088 = vrsqrt.f32 %v5988_v2 }
0x2c5e   :  { %v8087_v26 = vpop.eup %8086 }
0x2c5f   :  { %v5991_v22 = vmul.f32 %v8087_v26, %v5975_v39  ;;  %v7911_v26 = vld [vmem:[%s8377_s4 + $0x18] sm:$0xff]  }
0x2c61   :  { %v5999_v48 = vmul.f32 %v6808_v46, %v5991_v22  ;;  %v6346_v22 = vsel %vm267_vm0, %v7911_v26, 0 }
0x2c62   :  { %v8089_v25 = vpop.eup %8088 }
0x2c63   :  { %v5992_v50 = vmul.f32 %v8089_v25, %v5976_v40  ;;  %v6007_v52 = vadd.f32 %v6809_v51, %v5999_v48 }
0x2c65   :  { %v6000_v0 = vmul.f32 %v6808_v46, %v5992_v50  ;;  %v7912_v46 = vld [vmem:[%s8377_s4 + $0x20] sm:$0xff]  }
0x2c66   :  { %v6349_v25 = vsel %vm267_vm0, %v7912_v46, 0 }
0x2c67   :  { %v6008_v43 = vadd.f32 %v6809_v51, %v6000_v0 }
0x2c69   :  { %v6018_v54 = vpack.c.bf16 %v6008_v43, %v6007_v52 }
0x2c6b   :  { %7629 = vmatmul.mubr.msk.bf16.vlgmr.msra.gmra.mrb[172].mxu1 %vm267_vm0, %v6018_v54 }
0x2c6c   :  { %7668 = vmatprep.mubr.msk.bf16.mxu1 %vm8171_vm2, %v8170_v3  ;;  %7653 = vmatpush3.bf16.xpose.msra.mxu1 %v6337_v45  ;;  %vm6403_vm2 = vcmp.lt.s32.totalorder %v9062_v27, 96 }
0x2c6d   :  { %7654 = vmatprep.subr.bf16.mxu1 %v8170_v3 }
0x2d3e   :  { %v6088_v61 = vpop.f32.mrb[172].mxu1 }
0x2d3f   :  { %v6089_v9 = vadd.f32 %v6819_v5, %v6088_v61  ;;  %v7630_v10 = vpop.f32.mrb[173].mxu1 }
0x2d40   :  { %v6091_v12 = vpop.f32.mrb[174].mxu1 }
0x2d41   :  { %v6095_v8 = vmul.f32 %v6089_v9, %v6089_v9  ;;  %v6092_v63 = vadd.f32 %v6819_v5, %v6091_v12  ;;  %v7631_v55 = vpop.f32.mrb[175].mxu1  ;;  %v6358_v5 = vsel %vm267_vm0, %v7915_v60, 0 }
0x2d43   :  { %v6097_v15 = vmul.f32 %v6095_v8, %v6089_v9  ;;  %v6096_v16 = vmul.f32 %v6092_v63, %v6092_v63 }
0x2d45   :  { %v6099_v17 = vmul.f32 0.044715, %v6097_v15  ;;  %v6098_v13 = vmul.f32 %v6096_v16, %v6092_v63  ;;  %v6851_v15 = vld [vmem:[%s9633_s0] ss:$0 sm:$0xff] }
0x2d47   :  { %v6101_v42 = vadd.f32 %v6099_v17, %v6089_v9  ;;  %v6100_v58 = vmul.f32 0.044715, %v6098_v13 }
0x2d49   :  { %v6103_v56 = vmul.f32 0.7978846, %v6101_v42  ;;  %v6102_v53 = vadd.f32 %v6100_v58, %v6092_v63 }
0x2d4b   :  { %8090 = vtanh.f32 %v6103_v56  ;;  %v6104_v20 = vmul.f32 0.7978846, %v6102_v53 }
0x2d4d   :  { %8092 = vtanh.f32 %v6104_v20 }
0x2d55   :  { %v8091_v21 = vpop.eup %8090 }
0x2d56   :  { %v6107_v23 = vadd.f32 1.0, %v8091_v21 }
0x2d57   :  { %v8093_v24 = vpop.eup %8092 }
0x2d58   :  { %v6109_v7 = vmul.f32 0.5, %v6107_v23  ;;  %v6108_v28 = vadd.f32 1.0, %v8093_v24 }
0x2d5a   :  { %v6110_v37 = vmul.f32 0.5, %v6108_v28  ;;  %v6111_v4 = vmul.f32 %v6109_v7, %v6089_v9 }
0x2d5c   :  { %v6112_v39 = vmul.f32 %v6110_v37, %v6092_v63 }
0x2d5e   :  { %v6130_v6 = vpack.c.bf16 %v6112_v39, %v6111_v4 }
0x2d60   :  { %7649 = vmatmul.mubr.bf16.vlgmr.msra.gmra.mrb[148].mxu0 %v6130_v6 }
0x2e33   :  { %v6213_v40 = vpop.f32.mrb[148].mxu0 }
0x2e34   :  { %v6220_v34 = vadd.f32 %v6213_v40, %v9484_v14  ;;  %v7650_v62 = vpop.f32.mrb[149].mxu0  ;;  %v7909_v14 = vld [vmem:[%s8377_s4 + $0x8] sm:$0xff]  }
0x2e35   :  { %v6216_v35 = vpop.f32.mrb[150].mxu0  ;;  %v6340_v41 = vsel %vm267_vm0, %v7909_v14, 0 }
0x2e36   :  { %v6230_v36 = vadd.f32 %v6850_v29, %v6220_v34  ;;  %v6221_v33 = vadd.f32 %v6216_v35, %v9487_v38  ;;  %v7651_v11 = vpop.f32.mrb[151].mxu0  ;;  %7655 = vmatpush3.bf16.xpose.msra.mxu1 %v6340_v41  ;;  %v7910_v38 = vld [vmem:[%s8377_s4 + $0x10] sm:$0xff]   ;;  %s9634_s4 = sld [smem:[#allocation13_spill]] }
0x2e37   :  { %7656 = vmatprep.subr.bf16.mxu1 %v8170_v3  ;;  %v6343_v2 = vsel %vm267_vm0, %v7910_v38, 0 }
0x2e38   :  { %v6231_v30 = vadd.f32 %v6850_v29, %v6221_v33  ;;  %v6234_v31 = vsel %vm267_vm0, %v6230_v36, 0.0 }
0x2e39   :  { %6235 = vadd.xlane.f32.xlu0 %v6234_v31 }
0x2e3a   :  { %v6237_v44 = vsel %vm267_vm0, %v6231_v30, 0.0 }
0x2e3b   :  { %6238 = vadd.xlane.f32.xlu1 %v6237_v44 }
0x2e3c   :  { %v6426_v35 = vld [vmem:[%s9634_s4] sm:$0xff]  ;;  %v6427_v33 = vld [vmem:[%s9634_s4 + $0x8] sm:$0xff] }
0x2e3e   :  { %7657 = vmatpush3.bf16.xpose.msra.mxu1 %v6343_v2 }
0x2e3f   :  { %7658 = vmatprep.subr.bf16.mxu1 %v8170_v3 }
0x2e46   :  { %7659 = vmatpush3.bf16.xpose.msra.mxu1 %v6346_v22 }
0x2e47   :  { %7660 = vmatprep.subr.bf16.mxu1 %v8170_v3 }
0x2e4e   :  { %7661 = vmatpush3.bf16.xpose.msra.mxu1 %v6349_v25 }
0x2e4f   :  { %7662 = vmatprep.subr.bf16.mxu1 %v8170_v3 }
0x2e56   :  { %7663 = vmatpush3.bf16.xpose.msra.mxu1 %v6352_v57 }
0x2e57   :  { %7664 = vmatprep.subr.bf16.mxu1 %v8170_v3 }
0x2e5e   :  { %7665 = vmatpush3.bf16.xpose.msra.mxu1 %v6355_v32 }
0x2e5f   :  { %7666 = vmatprep.subr.bf16.mxu1 %v8170_v3  ;;  %v6852_v3 = vld [vmem:[%s8372_s27] ss:$0 sm:$0xff]  ;;  %s8181_s27 = smov [#allocation2]  }
0x2e60   :  { %s6479_s5 = sshll.u32 %s8181_s27, 4  ;;  %s6480_s5 = int_to_ptr.vmem [resolvable:$true] %s6479_s5 }
0x2e61   :  { %s8106_s9 = scalar_lea.vmem %s6480_s5, 256  ;;  %p8111_p1 = scmp.lt.s32.totalorder %s6480_s5, %s6480_s5 }
0x2e62   :  { %p8107_p0 = scmp.ne.s32.totalorder %s6480_s5, %s8106_s9  ;;  %p8112_p2 = scmp.lt.s32.totalorder %s8106_s9, %s8106_s9 }
0x2e64   :  { %p8113_p3 = por %p8112_p2, %p8111_p1 }
0x2e66   :  { %7667 = vmatpush3.bf16.xpose.msra.mxu1 %v6358_v5  ;;  %p8114_p4 = pnand %p8113_p3, %p8107_p0 }
0x2ec6   :  { %v6236_v48 = vpop.xlane.xlu0 %6235 }
0x2ec7   :  { %v6240_v50 = vmul.f32 0.015625, %v6236_v48 }
0x2ec8   :  { %v6239_v51 = vpop.xlane.xlu1 %6238 }
0x2ec9   :  { %v6242_v0 = vsub.f32 %v6230_v36, %v6240_v50  ;;  %v6241_v52 = vmul.f32 0.015625, %v6239_v51 }
0x2ecb   :  { %v6243_v43 = vsub.f32 %v6231_v30, %v6241_v52  ;;  %v6244_v54 = vmul.f32 %v6242_v0, %v6242_v0 }
0x2ecd   :  { %v6246_v47 = vsel %vm267_vm0, %v6244_v54, 0.0  ;;  %v6245_v19 = vmul.f32 %v6243_v43, %v6243_v43 }
0x2ece   :  { %6247 = vadd.xlane.f32.xlu0 %v6246_v47 }
0x2ecf   :  { %v6249_v49 = vsel %vm267_vm0, %v6245_v19, 0.0 }
0x2ed0   :  { %6250 = vadd.xlane.f32.xlu1 %v6249_v49 }
0x2f5b   :  { %v6248_v61 = vpop.xlane.xlu0 %6247 }
0x2f5c   :  { %v6252_v9 = vmul.f32 0.015625, %v6248_v61 }
0x2f5d   :  { %v6251_v10 = vpop.xlane.xlu1 %6250 }
0x2f5e   :  { %v6254_v12 = vadd.f32 1e-05, %v6252_v9  ;;  %v6253_v8 = vmul.f32 0.015625, %v6251_v10 }
0x2f60   :  { %8094 = vrsqrt.f32 %v6254_v12  ;;  %v6255_v63 = vadd.f32 1e-05, %v6253_v8 }
0x2f62   :  { %8096 = vrsqrt.f32 %v6255_v63 }
0x2f6a   :  { %v8095_v55 = vpop.eup %8094 }
0x2f6b   :  { %v6258_v16 = vmul.f32 %v8095_v55, %v6242_v0 }
0x2f6c   :  { %v8097_v17 = vpop.eup %8096 }
0x2f6d   :  { %v6266_v13 = vmul.f32 %v6851_v15, %v6258_v16  ;;  %v6259_v42 = vmul.f32 %v8097_v17, %v6243_v43 }
0x2f6f   :  { %v6267_v58 = vmul.f32 %v6851_v15, %v6259_v42  ;;  %v6274_v56 = vadd.f32 %v6852_v3, %v6266_v13 }
0x2f71   :  { %v6275_v53 = vadd.f32 %v6852_v3, %v6267_v58 }
0x2f73   :  { %v6292_v20 = vpack.c.bf16 %v6275_v53, %v6274_v56 }
0x2f75   :  { %7669 = vmatmul.mubr.msk.bf16.vlgmr.msra.gmra.mrb[176].mxu1 %vm267_vm0, %v6292_v20  ;;  %vm6442_vm0 = vcmask 7168  }
0x3048   :  { %v6394_v21 = vpop.f32.mrb[176].mxu1 }
0x3049   :  { %6401 = vst [vmem:[#allocation2] sm:$0xff] %v6394_v21  ;;  %v7670_v23 = vpop.f32.mrb[177].mxu1  ;;  %v6404_v24 = vsel %vm6403_vm2, %v6394_v21, -1e+09  ;;  %v6428_v11 = vmul.f32 %v6426_v35, %v6394_v21 }
0x304a   :  { %6406 = vmax.xlane.f32.xlu0 %v6404_v24  ;;  %v6397_v7 = vpop.f32.mrb[178].mxu1 }
0x304b   :  { %6402 = vst [vmem:[#allocation2 + $0x8] sm:$0xff] %v6397_v7  ;;  %v7671_v28 = vpop.f32.mrb[179].mxu1  ;;  %v6405_v37 = vsel %vm6403_vm2, %v6397_v7, -1e+09  ;;  %v6429_v30 = vmul.f32 %v6427_v33, %v6397_v7 }
0x304c   :  { %6408 = vmax.xlane.f32.xlu1 %v6405_v37 }
0x30d7   :  { %v6407_v4 = vpop.xlane.xlu0 %6406 }
0x30d8   :  { %v6410_v39 = vsub.f32 %v6404_v24, %v6407_v4 }
0x30d9   :  { %v6409_v6 = vpop.xlane.xlu1 %6408 }
0x30da   :  { %v6412_v40 = vmul.f32 1.442695, %v6410_v39  ;;  %v6411_v29 = vsub.f32 %v6405_v37, %v6409_v6 }
0x30dc   :  { %8098 = vpow2.f32 %v6412_v40  ;;  %v6414_v34 = vmul.f32 1.442695, %v6411_v29 }
0x30de   :  { %8100 = vpow2.f32 %v6414_v34 }
0x30e6   :  { %v8099_v62 = vpop.eup %8098 }
0x30e7   :  { %6416 = vadd.xlane.f32.xlu0 %v8099_v62 }
0x30e8   :  { %v8101_v36 = vpop.eup %8100 }
0x30e9   :  { %6418 = vadd.xlane.f32.xlu1 %v8101_v36 }
0x30eb   :  { %6430 = vadd.xlane.f32.xlu0 %v6428_v11 }
0x30ed   :  { %6432 = vadd.xlane.f32.xlu1 %v6429_v30 }
0x30ef   :  { %6434 = vadd.xlane.f32.xlu0 %v6426_v35 }
0x30f1   :  { %6436 = vadd.xlane.f32.xlu1 %v6427_v33 }
0x3174   :  { %v6417_v31 = vpop.xlane.xlu0 %6416 }
0x3175   :  { %8102 = vlog2.f32 %v6417_v31 }
0x3176   :  { %v6419_v44 = vpop.xlane.xlu1 %6418 }
0x3177   :  { %8104 = vlog2.f32 %v6419_v44 }
0x3178   :  { %v6431_v18 = vpop.xlane.xlu0 %6430 }
0x317a   :  { %v6433_v45 = vpop.xlane.xlu1 %6432 }
0x317c   :  { %v6435_v14 = vpop.xlane.xlu0 %6434 }
0x317d   :  { %v6455_v41 = vsel %vm6442_vm0, %v6435_v14, 0.0 }
0x317e   :  { %v6437_v38 = vpop.xlane.xlu1 %6436 }
0x317f   :  { %v8103_v2 = vpop.eup %8102  ;;  %v6456_v26 = vsel %vm6442_vm0, %v6437_v38, 0.0 }
0x3180   :  { %v6421_v22 = vmul.f32 0.6931472, %v8103_v2  ;;  %v6457_v46 = vadd.f32 %v6456_v26, %v6455_v41 }
0x3181   :  { %v8105_v25 = vpop.eup %8104 }
0x3182   :  { %v6423_v48 = vmul.f32 0.6931472, %v8105_v25  ;;  %v6424_v50 = vadd.f32 %v6421_v22, %v6407_v4  ;;  %6458 = vadd.xlane.f32.xlu1 %v6457_v46 }
0x3184   :  { %v6438_v51 = vsub.f32 %v6424_v50, %v6431_v18  ;;  %v6425_v0 = vadd.f32 %v6423_v48, %v6409_v6 }
0x3186   :  { %v6439_v52 = vsub.f32 %v6425_v0, %v6433_v45  ;;  %v6440_v43 = vmul.f32 %v6438_v51, %v6435_v14 }
0x3188   :  { %v6441_v54 = vmul.f32 %v6439_v52, %v6437_v38  ;;  %v6443_v47 = vsel %vm6442_vm0, %v6440_v43, 0.0 }
0x318a   :  { %v6444_v19 = vsel %vm6442_vm0, %v6441_v54, 0.0 }
0x318b   :  { %v6445_v49 = vadd.f32 %v6444_v19, %v6443_v47 }
0x318d   :  { %6446 = vadd.xlane.f32.xlu0 %v6445_v49 }
0x318e   :  { %8117 = shalt.err (!%p8114_p4)
}
0x318f   :  { %s8118_s13 = scalar_lea.hbm %s8382_s12, 256 }
0x3190   :  { %p8119_p5 = scmp.ne.s32.totalorder %s8382_s12, %s8118_s13  ;;  %p8122_p6 = scmp.lt.u32.totalorder %s8118_s13, %s8382_s12 }
0x3192   :  { %p8124_p7 = pnand %p8122_p6, %p8119_p5 }
0x3194   :  { %8127 = shalt.err (!%p8124_p7)
}
0x3195   :  { %s8182_s22 = smov 128   ;;  %s8183_s23 = smov 8   ;;  %vm6468_vm3 = vcmp.eq.s32.totalorder %v9062_v27, 1  ;;  %vm6467_vm8 = vcmp.eq.s32.totalorder %v9062_v27, 0 }
0x3196   :  { %6485 = dma.vmem_to_hbm [thread:$0]  %s6480_s5, 256, %s8382_s12, [#allocation3], %s8182_s22, %s8182_s22, %s8183_s23  }
0x320f   :  { %v6459_v1 = vpop.xlane.xlu1 %6458 }
0x3210   :  { %v6460_v57 = vrot.slane %v6459_v1, 4 }
0x3212   :  { %v6461_v59 = vadd.f32 %v6460_v57, %v6459_v1 }
0x3214   :  { %v6462_v32 = vrot.slane %v6461_v59, 2 }
0x3216   :  { %v6463_v9 = vadd.f32 %v6462_v32, %v6461_v59 }
0x3218   :  { %v6464_v8 = vrot.slane %v6463_v9, 1 }
0x321a   :  { %v6447_v60 = vpop.xlane.xlu0 %6446  ;;  %v6465_v15 = vadd.f32 %v6464_v8, %v6463_v9 }
0x321b   :  { %v6448_v5 = vrot.slane %v6447_v60, 4 }
0x321d   :  { %v6449_v61 = vadd.f32 %v6448_v5, %v6447_v60 }
0x321f   :  { %v6450_v10 = vrot.slane %v6449_v61, 2 }
0x3221   :  { %v6451_v12 = vadd.f32 %v6450_v10, %v6449_v61 }
0x3223   :  { %v6452_v63 = vrot.slane %v6451_v12, 1 }
0x3225   :  { %v6453_v55 = vadd.f32 %v6452_v63, %v6451_v12 }
0x3227   :  { %7672 = vpush %v6453_v55 }
0x3228   :  { %7674 = vpush %v6465_v15 }
0x3258   :  { %s7673_s26 = spop %7672 }
0x3259   :  { %v6471_v16 = vstv %s7673_s26  ;;  %s7675_s12 = spop %7674 }
0x325a   :  { %v6469_v17 = vstv %s7675_s12 }
0x325b   :  { %v6470_v13 = vsel %vm6468_vm3, %v6469_v17, 0.0 }
0x325c   :  { %v6472_v42 = vsel %vm6467_vm8, %v6471_v16, %v6470_v13 }
0x325d   :  { %6473 = vst [vmem:[%s8387_s20] sm:$0x1] %v6472_v42 }
0x325e   :  { %8128 = dma.done.wait [#allocation3], 256  }
0x325f   :  { %8129 = vsyncadd [#allocation3], 4294967040 }
0x3260   :  { %6493 = vsyncpa [#allocation3], 1 }

</bundles_post_ra>
